<compile_context>
chip_gen: v5e
topology: v5e:2x2
jax: 0.10.0
libtpu: 0.0.40
codegen_flags: <defaults>
</compile_context>

<pallas_src>
import functools
from typing import NamedTuple

import jax
import jax.numpy as jnp
from jax.experimental import pallas as pl
from jax.experimental.pallas import tpu as pltpu

PAD_INDEX = 0
MAX_SRC_LENGTH = 8   # max_oovs


def _round_up(n, m):
    return ((n + m - 1) // m) * m


class CopyNetConfig(NamedTuple):
    V: int
    E: int
    H: int
    max_oovs: int
    VX: int
    E_P: int
    H_P: int
    H2_P: int
    G3: int
    P: int
    mxu_dtype: type


# ---------------------------------------------------------------------------
# Pallas kernel: whole teacher-forced decode for one batch tile
# ---------------------------------------------------------------------------
def copynet_kernel(
    embed_ref,              # (T, Bt, E_P)   embedded target tokens (f32)
    enc_ref,                # (Bt, S_P, H2_P) encoder outputs (mxu_dtype)
    idx_ref,                # (Bt, S_P) int32 encoder token indices
    bridge_w_ref,           # (H2_P, H_P)
    wo_w_ref, wo_b_ref,     # (H2_P, H_P), (1, H_P)   Wo  (copy scores)
    wa_w_ref, wa_b_ref,     # (H2_P, H_P), (1, H_P)   Wa  (attention scores)
    w_ie3_ref,              # (E_P, 3*H_P)   GRU input weights (embed part) [r|z|n]
    w_ic3_ref,              # (H2_P, 3*H_P)  GRU input weights (context part) [r|z|n]
    w_h3_ref,               # (H_P, 3*H_P)   GRU hidden weights [r|z|n]
    b_i3_ref,               # (1, 3*H_P)
    b_h3_ref,               # (1, 3*H_P)
    wg_w_ref,               # (H_P, P)
    wg_b_ref,               # (1, P)  cols >= V carry -1e9 (gen-vocab mask)
    out_ref,                # (T, Bt, P)
    s_all_ref,              # VMEM scratch (T, Bt, H_P) f32  -- decoder states
    *, V, VX, S_REAL, mxu_dtype,
):
    f32 = jnp.float32
    T, Bt, _ = embed_ref.shape
    S_P = idx_ref.shape[1]
    H_P = bridge_w_ref.shape[1]
    H2_P = enc_ref.shape[2]
    G3 = w_h3_ref.shape[1]
    P = wg_w_ref.shape[1]

    def cast(a):
        # cast MXU operands only; accumulation + master state stay f32
        return a if a.dtype == mxu_dtype else a.astype(mxu_dtype)

    def mm(a, w):   # MXU matmul, f32 accumulation
        return jnp.dot(cast(a), cast(w), preferred_element_type=f32)

    def recip(x):   # EUP approx reciprocal + one Newton step (~f32 exact)
        r = pl.reciprocal(x, approx=True)
        return r * (2.0 - x * r)

    # ---- weights loaded once, reused by every unrolled step ----
    bridge_w = bridge_w_ref[...]
    wo_w, wo_b = wo_w_ref[...], wo_b_ref[...].astype(f32)
    wa_w, wa_b = wa_w_ref[...], wa_b_ref[...].astype(f32)
    w_ie3, w_ic3, w_h3 = w_ie3_ref[...], w_ic3_ref[...], w_h3_ref[...]
    b_i3, b_h3 = b_i3_ref[...].astype(f32), b_h3_ref[...].astype(f32)
    wg_w, wg_b = wg_w_ref[...], wg_b_ref[...].astype(f32)

    # ---- loop-invariant precompute (hoisted out of the recurrence) ----
    enc = enc_ref[...]                                        # (Bt, S_P, H2_P)
    idx = idx_ref[...]                                        # (Bt, S_P)
    enc_flat = enc.reshape(Bt * S_P, H2_P)                    # free (S_P % 8 == 0)
    enc_scores = jnp.tanh(mm(enc_flat, wo_w) + wo_b).reshape(Bt, S_P, H_P)
    attn_scores = jnp.tanh(mm(enc_flat, wa_w) + wa_b).reshape(Bt, S_P, H_P)
    # eliminate ctx: precompute enc @ W_ic3 once, contract with attention weights
    enc_ic3 = mm(enc_flat, w_ic3).reshape(Bt, S_P, G3)
    # hoist casts (avoid re-casting inside the unrolled loops)
    enc_scores_c = cast(enc_scores)
    attn_scores_c = cast(attn_scores)
    enc_ic3_c = cast(enc_ic3)

    pad_mask = jnp.where(idx == PAD_INDEX, -1000.0, 0.0).astype(f32)   # (Bt, S_P)
    col = jax.lax.broadcasted_iota(jnp.int32, (1, P), 1)
    oov_fill = jnp.where((col >= V) & (col < VX), 1e-4, 0.0).astype(f32)
    # one-hot of source indices built in-kernel (no dense OHE DMA from HBM)
    ohe_c = cast((idx[:, :, None] ==
                  jax.lax.broadcasted_iota(jnp.int32, (Bt, S_P, P), 2)).astype(f32))

    # ---- serial recurrence: ONLY the state chain (GRU + attention context) ----
    s = mm(enc[:, S_REAL - 1, :], bridge_w)                   # bridge(enc[:, -1, :])
    ctx3 = jnp.zeros((Bt, G3), f32)                           # context contribution
    for t in range(T):
        x = embed_ref[t]                                      # (Bt, E_P) f32
        gi = mm(x, w_ie3) + ctx3 + b_i3                       # (Bt, 3*H_P)
        gh = mm(s, w_h3) + b_h3                               # (Bt, 3*H_P)
        r = jax.nn.sigmoid(gi[:, :H_P] + gh[:, :H_P])
        z = jax.nn.sigmoid(gi[:, H_P:2 * H_P] + gh[:, H_P:2 * H_P])
        n = jnp.tanh(gi[:, 2 * H_P:] + r * gh[:, 2 * H_P:])
        s = (1.0 - z) * n + z * s                             # (Bt, H_P) f32
        s_all_ref[t] = s
        if t + 1 < T:
            # update_global_attention -> context contribution for the next step
            psi_a = jnp.einsum('bqh,bkh->bqk', cast(s[:, None, :]), attn_scores_c,
                               preferred_element_type=f32)[:, 0, :] + pad_mask
            ea = jnp.exp(psi_a - jnp.max(psi_a, axis=-1, keepdims=True))
            pa = ea * recip(jnp.sum(ea, axis=-1, keepdims=True))
            ctx3 = jnp.einsum('bqs,bsk->bqk', cast(pa[:, None, :]), enc_ic3_c,
                              preferred_element_type=f32)[:, 0, :]   # (Bt, G3)

    # ---- deferred vocab-side work (off the serial chain) ----
    s_all = s_all_ref[...]                                    # (T, Bt, H_P)
    # ONE big MXU matmul with M = T*Bt rows for the generation logits
    psi_g_all = (mm(s_all.reshape(T * Bt, H_P), wg_w) + wg_b).reshape(T, Bt, P)
    for t in range(T):
        s_t = s_all[t]                                        # (Bt, H_P)
        psi_c = jnp.einsum('bqh,bkh->bqk', cast(s_t[:, None, :]), enc_scores_c,
                           preferred_element_type=f32)[:, 0, :] + pad_mask
        psi_g = psi_g_all[t]                                  # (Bt, P)
        m = jnp.maximum(jnp.max(psi_g, axis=-1, keepdims=True),
                        jnp.max(psi_c, axis=-1, keepdims=True))
        eg = jnp.exp(psi_g - m)
        ec = jnp.exp(psi_c - m)
        inv = recip(jnp.sum(eg, axis=-1, keepdims=True)
                    + jnp.sum(ec, axis=-1, keepdims=True))
        prob_g = eg * inv                                     # 0 for cols >= V
        prob_c = ec * inv                                     # (Bt, S_P)
        copy = jnp.einsum('bqs,bsv->bqv', cast(prob_c[:, None, :]), ohe_c,
                          preferred_element_type=f32)[:, 0, :]
        out_ref[t] = (prob_g + oov_fill + copy).astype(out_ref.dtype)


# ---------------------------------------------------------------------------
# One-time parameter preparation (packing / padding / dtype conversion)
# ---------------------------------------------------------------------------
def prepare_params(params, *, mxu_dtype=jnp.bfloat16, max_oovs=MAX_SRC_LENGTH):
    V, E = params['embedding'].shape
    H = params['bridge_w'].shape[1]
    VX = V + max_oovs
    E_P = _round_up(E, 128)
    H_P = _round_up(H, 128)
    H2_P = 2 * H_P
    G3 = 3 * H_P
    P = _round_up(VX, 128)
    f32 = jnp.float32

    def pad2(x, rows, cols, dtype):
        return jnp.zeros((rows, cols), dtype).at[:x.shape[0], :x.shape[1]].set(
            x.astype(dtype))

    def pack_gates(wr, wz, wn, rows, dtype):
        w = jnp.zeros((rows, G3), dtype)
        w = w.at[:wr.shape[0], 0:wr.shape[1]].set(wr.astype(dtype))
        w = w.at[:wz.shape[0], H_P:H_P + wz.shape[1]].set(wz.astype(dtype))
        w = w.at[:wn.shape[0], 2 * H_P:2 * H_P + wn.shape[1]].set(wn.astype(dtype))
        return w

    weights = dict(
        embedding=pad2(params['embedding'], V, E_P, f32),
        bridge_w=pad2(params['bridge_w'], H2_P, H_P, mxu_dtype),
        wo_w=pad2(params['wo_w'], H2_P, H_P, mxu_dtype),
        wo_b=pad2(params['wo_b'], 1, H_P, f32),
        wa_w=pad2(params['wa_w'], H2_P, H_P, mxu_dtype),
        wa_b=pad2(params['wa_b'], 1, H_P, f32),
        w_ie3=pack_gates(params['w_ir_e'], params['w_iz_e'], params['w_in_e'],
                         E_P, mxu_dtype),
        w_ic3=pack_gates(params['w_ir_c'], params['w_iz_c'], params['w_in_c'],
                         H2_P, mxu_dtype),
        w_h3=pack_gates(params['w_hr'], params['w_hz'], params['w_hn'],
                        H_P, mxu_dtype),
        b_i3=pack_gates(params['b_ir'], params['b_iz'], params['b_in'], 1, f32),
        b_h3=pack_gates(params['b_hr'], params['b_hz'], params['b_hn'], 1, f32),
        wg_w=pad2(params['wg_w'], H_P, P, mxu_dtype),
        # fold the "generation vocab has only V columns" mask into the padded bias
        wg_b=jnp.full((1, P), -1e9, f32).at[:, :V].set(params['wg_b'].astype(f32)),
    )
    cfg = CopyNetConfig(V=V, E=E, H=H, max_oovs=max_oovs, VX=VX, E_P=E_P,
                        H_P=H_P, H2_P=H2_P, G3=G3, P=P, mxu_dtype=mxu_dtype)
    return weights, cfg


def _vmem_limit_bytes(T, B_TILE, S_P, cfg):
    wb = jnp.dtype(cfg.mxu_dtype).itemsize
    f = 4
    blocks = (T * B_TILE * cfg.E_P * f + B_TILE * S_P * cfg.H2_P * wb
              + B_TILE * S_P * 4 + T * B_TILE * cfg.P * f)
    wsum = ((3 * cfg.H2_P * cfg.H_P + cfg.E_P * cfg.G3 + cfg.H2_P * cfg.G3
             + cfg.H_P * cfg.G3 + cfg.H_P * cfg.P) * wb
            + (2 * cfg.H_P + 2 * cfg.G3 + 2 * cfg.P) * f)
    inter = (B_TILE * S_P * (2 * cfg.H_P + cfg.G3 + cfg.P) * (f + wb)
             + T * B_TILE * (cfg.H_P + 2 * cfg.P) * f)
    est = 2 * blocks + 2 * wsum + 2 * inter
    return int(min(64 * 1024 * 1024, max(32 * 1024 * 1024, est)))


# ---------------------------------------------------------------------------
# Forward wrapper
# ---------------------------------------------------------------------------
def copynet_decoder_forward(weights, inputs, encoded, encoded_idx, *, config):
    """inputs: [bs, max_len] int32; encoded: [bs, S, 2H] f32;
       encoded_idx: [bs, S] int32 -> [bs, max_len, V + max_oovs] f32."""
    cfg = config
    f32 = jnp.float32
    bs, T = inputs.shape
    S = encoded.shape[1]
    S_P = _round_up(S, 8)           # sublane-aligned -> free enc reshape in-kernel

    # batch tiling: large tiles for MXU M-dim; >=2 tiles when the batch allows
    # it so both v7x TensorCores get work.
    B8 = _round_up(bs, 8)
    if B8 <= 8:
        B_TILE = 8
    elif B8 <= 256:
        B_TILE = min(128, _round_up((B8 + 1) // 2, 8))
    else:
        B_TILE = 128
    B_P = _round_up(B8, B_TILE)

    # --- data: embedding gather (XLA) + padding ---
    emb = weights['embedding'][inputs]                             # (bs, T, E_P)
    embed_p = jnp.zeros((T, B_P, cfg.E_P), f32).at[:, :bs, :].set(
        jnp.transpose(emb, (1, 0, 2)))
    encoded_p = jnp.zeros((B_P, S_P, cfg.H2_P), cfg.mxu_dtype).at[
        :bs, :S, :2 * cfg.H].set(encoded.astype(cfg.mxu_dtype))
    encidx_p = jnp.full((B_P, S_P), PAD_INDEX, jnp.int32).at[:bs, :S].set(
        encoded_idx.astype(jnp.int32))

    kernel = functools.partial(copynet_kernel, V=cfg.V, VX=cfg.VX,
                               S_REAL=S, mxu_dtype=cfg.mxu_dtype)

    full2 = lambda shape: pl.BlockSpec(shape, lambda b: (0, 0))
    grid_spec = pltpu.PrefetchScalarGridSpec(
        num_scalar_prefetch=0,
        grid=(B_P // B_TILE,),       # independent batch tiles -> "parallel"
        in_specs=[
            pl.BlockSpec((T, B_TILE, cfg.E_P), lambda b: (0, b, 0)),
            pl.BlockSpec((B_TILE, S_P, cfg.H2_P), lambda b: (b, 0, 0)),
            pl.BlockSpec((B_TILE, S_P), lambda b: (b, 0)),
            full2((cfg.H2_P, cfg.H_P)),                          # bridge
            full2((cfg.H2_P, cfg.H_P)), full2((1, cfg.H_P)),     # Wo
            full2((cfg.H2_P, cfg.H_P)), full2((1, cfg.H_P)),     # Wa
            full2((cfg.E_P, cfg.G3)), full2((cfg.H2_P, cfg.G3)),
            full2((cfg.H_P, cfg.G3)),
            full2((1, cfg.G3)), full2((1, cfg.G3)),
            full2((cfg.H_P, cfg.P)), full2((1, cfg.P)),          # Wg
        ],
        out_specs=pl.BlockSpec((T, B_TILE, cfg.P), lambda b: (0, b, 0)),
        scratch_shapes=[pltpu.VMEM((T, B_TILE, cfg.H_P), jnp.float32)],
    )

    out = pl.pallas_call(
        kernel,
        out_shape=jax.ShapeDtypeStruct((T, B_P, cfg.P), f32),
        grid_spec=grid_spec,
        compiler_params=pltpu.CompilerParams(
            dimension_semantics=("parallel",),
            vmem_limit_bytes=_vmem_limit_bytes(T, B_TILE, S_P, cfg)),
    )(embed_p, encoded_p, encidx_p,
      weights['bridge_w'], weights['wo_w'], weights['wo_b'],
      weights['wa_w'], weights['wa_b'],
      weights['w_ie3'], weights['w_ic3'], weights['w_h3'],
      weights['b_i3'], weights['b_h3'], weights['wg_w'], weights['wg_b'])

    return jnp.transpose(out[:, :bs, :cfg.VX], (1, 0, 2))   # (bs, T, V+X)


# ---------------------------------------------------------------------------
# Pure-JAX reference (mirrors the PyTorch forward) for verification
# ---------------------------------------------------------------------------
def ref_forward(params, inputs, encoded, encoded_idx, V, X):
    bs, max_len = inputs.shape
    H = params['bridge_w'].shape[1]
    ohe = jax.nn.one_hot(encoded_idx, V + X, dtype=jnp.float32)
    enc_scores = jnp.tanh(encoded @ params['wo_w'] + params['wo_b'])
    attn_scores = jnp.tanh(encoded @ params['wa_w'] + params['wa_b'])
    pad_mask = -1000.0 * (encoded_idx == PAD_INDEX).astype(jnp.float32)
    s_t = encoded[:, -1, :] @ params['bridge_w']
    ctx = jnp.zeros((bs, 2 * H), jnp.float32)
    outs = []
    for i in range(max_len):
        x = params['embedding'][inputs[:, i]]
        r = jax.nn.sigmoid(x @ params['w_ir_e'] + ctx @ params['w_ir_c']
                           + params['b_ir'] + s_t @ params['w_hr'] + params['b_hr'])
        z = jax.nn.sigmoid(x @ params['w_iz_e'] + ctx @ params['w_iz_c']
                           + params['b_iz'] + s_t @ params['w_hz'] + params['b_hz'])
        n = jnp.tanh(x @ params['w_in_e'] + ctx @ params['w_in_c'] + params['b_in']
                     + r * (s_t @ params['w_hn'] + params['b_hn']))
        s_t = (1.0 - z) * n + z * s_t
        psi_g = s_t @ params['wg_w'] + params['wg_b']
        psi_c = jnp.einsum('bsh,bh->bs', enc_scores, s_t) + pad_mask
        p = jax.nn.softmax(jnp.concatenate([psi_g, psi_c], axis=1), axis=1)
        prob_g, prob_c = p[:, :V], p[:, V:]
        prob_g = jnp.concatenate(
            [prob_g, jnp.full((bs, X), 1e-4, jnp.float32)], axis=1)
        outs.append(prob_g + jnp.einsum('bs,bsv->bv', prob_c, ohe))
        psi_a = jnp.einsum('bsh,bh->bs', attn_scores, s_t) + pad_mask
        prob_a = jax.nn.softmax(psi_a, axis=1)
        ctx = jnp.einsum('bs,bsk->bk', prob_a, encoded)
    return jnp.stack(outs, axis=1)


def init_params(key, V, E, H):
    names_shapes = [
        ('embedding', (V, E)), ('bridge_w', (2 * H, H)),
        ('wo_w', (2 * H, H)), ('wo_b', (1, H)),
        ('wa_w', (2 * H, H)), ('wa_b', (1, H)),
        ('w_ir_e', (E, H)), ('w_iz_e', (E, H)), ('w_in_e', (E, H)),
        ('w_ir_c', (2 * H, H)), ('w_iz_c', (2 * H, H)), ('w_in_c', (2 * H, H)),
        ('w_hr', (H, H)), ('w_hz', (H, H)), ('w_hn', (H, H)),
        ('b_ir', (1, H)), ('b_iz', (1, H)), ('b_in', (1, H)),
        ('b_hr', (1, H)), ('b_hz', (1, H)), ('b_hn', (1, H)),
        ('wg_w', (H, V)), ('wg_b', (1, V)),
    ]
    ks = jax.random.split(key, len(names_shapes))
    return {name: 0.1 * jax.random.normal(k, shape, dtype=jnp.float32)
            for k, (name, shape) in zip(ks, names_shapes)}


if __name__ == "__main__":
    V, E, H = 16, 12, 16
    bs, S, max_len = 4, 10, 6    # S=10 exercises the S->16 sublane padding path
    X = MAX_SRC_LENGTH

    key = jax.random.PRNGKey(0)
    kp, k1, k2, k3 = jax.random.split(key, 4)
    params = init_params(kp, V, E, H)
    inputs = jax.random.randint(k1, (bs, max_len), 0, V, dtype=jnp.int32)
    encoded = 0.5 * jax.random.normal(k2, (bs, S, 2 * H), dtype=jnp.float32)
    encoded_idx = jax.random.randint(k3, (bs, S), 1, V, dtype=jnp.int32)
    encoded_idx = encoded_idx.at[:, -2:].set(PAD_INDEX)   # padding at the end

    ref = ref_forward(params, inputs, encoded, encoded_idx, V, X)

    # --- exact-path check: f32 MXU operands, tight tolerance ---
    w32, c32 = prepare_params(params, mxu_dtype=jnp.float32)
    fwd32 = jax.jit(functools.partial(copynet_decoder_forward, config=c32))
    out32 = jax.block_until_ready(fwd32(w32, inputs, encoded, encoded_idx))
    assert out32.shape == (bs, max_len, V + X)
    if not jnp.allclose(out32, ref, atol=1e-3, rtol=1e-3):
        raise AssertionError(
            f"f32 kernel/reference mismatch, max abs diff "
            f"{float(jnp.max(jnp.abs(out32 - ref)))}")

    # --- default fast path: bf16 MXU operands (v5e/v6e/v7x), looser tolerance ---
    wbf, cbf = prepare_params(params)   # mxu_dtype=jnp.bfloat16 by default
    fwdbf = jax.jit(functools.partial(copynet_decoder_forward, config=cbf))
    outbf = jax.block_until_ready(fwdbf(wbf, inputs, encoded, encoded_idx))
    if not jnp.allclose(outbf, ref, atol=5e-2, rtol=5e-2):
        raise AssertionError(
            f"bf16 kernel/reference mismatch, max abs diff "
            f"{float(jnp.max(jnp.abs(outbf - ref)))}")

    print("KERNEL_OK")
</pallas_src>

<mosaic_0001>
module attributes {stable_mosaic.version = 11 : i64} {
  func.func @copynet_kernel(%arg0: i32, %arg1: memref<6x8x128xf32, #tpu.memory_space<vmem>>, %arg2: memref<8x16x256xf32, #tpu.memory_space<vmem>>, %arg3: memref<8x16xi32, #tpu.memory_space<vmem>>, %arg4: memref<256x128xf32, #tpu.memory_space<vmem>>, %arg5: memref<256x128xf32, #tpu.memory_space<vmem>>, %arg6: memref<1x128xf32, #tpu.memory_space<vmem>>, %arg7: memref<256x128xf32, #tpu.memory_space<vmem>>, %arg8: memref<1x128xf32, #tpu.memory_space<vmem>>, %arg9: memref<128x384xf32, #tpu.memory_space<vmem>>, %arg10: memref<256x384xf32, #tpu.memory_space<vmem>>, %arg11: memref<128x384xf32, #tpu.memory_space<vmem>>, %arg12: memref<1x384xf32, #tpu.memory_space<vmem>>, %arg13: memref<1x384xf32, #tpu.memory_space<vmem>>, %arg14: memref<128x128xf32, #tpu.memory_space<vmem>>, %arg15: memref<1x128xf32, #tpu.memory_space<vmem>>, %arg16: memref<6x8x128xf32, #tpu.memory_space<vmem>>, %arg17: memref<6x8x128xf32, #tpu.memory_space<vmem>>) attributes {dimension_semantics = [#tpu.dimension_semantics<parallel>], iteration_bounds = array<i64: 1>, scalar_prefetch = 0 : i64, scratch_operands = 1 : i64, tpu.core_type = #tpu.core_type<tc>, window_params = [{transform_indices = @transform_0, window_bounds = array<i64: 6, 8, 128>}, {transform_indices = @transform_1, window_bounds = array<i64: 8, 16, 256>}, {transform_indices = @transform_2, window_bounds = array<i64: 8, 16>}, {pipeline_mode = #tpu.pipeline_mode<synchronous>, transform_indices = @transform_3, window_bounds = array<i64: 256, 128>}, {pipeline_mode = #tpu.pipeline_mode<synchronous>, transform_indices = @transform_4, window_bounds = array<i64: 256, 128>}, {pipeline_mode = #tpu.pipeline_mode<synchronous>, transform_indices = @transform_5, window_bounds = array<i64: 1, 128>}, {pipeline_mode = #tpu.pipeline_mode<synchronous>, transform_indices = @transform_6, window_bounds = array<i64: 256, 128>}, {pipeline_mode = #tpu.pipeline_mode<synchronous>, transform_indices = @transform_7, window_bounds = array<i64: 1, 128>}, {pipeline_mode = #tpu.pipeline_mode<synchronous>, transform_indices = @transform_8, window_bounds = array<i64: 128, 384>}, {pipeline_mode = #tpu.pipeline_mode<synchronous>, transform_indices = @transform_9, window_bounds = array<i64: 256, 384>}, {pipeline_mode = #tpu.pipeline_mode<synchronous>, transform_indices = @transform_10, window_bounds = array<i64: 128, 384>}, {pipeline_mode = #tpu.pipeline_mode<synchronous>, transform_indices = @transform_11, window_bounds = array<i64: 1, 384>}, {pipeline_mode = #tpu.pipeline_mode<synchronous>, transform_indices = @transform_12, window_bounds = array<i64: 1, 384>}, {pipeline_mode = #tpu.pipeline_mode<synchronous>, transform_indices = @transform_13, window_bounds = array<i64: 128, 128>}, {pipeline_mode = #tpu.pipeline_mode<synchronous>, transform_indices = @transform_14, window_bounds = array<i64: 1, 128>}, {transform_indices = @transform_15, window_bounds = array<i64: 6, 8, 128>}]} {
    %c0 = arith.constant 0 : index
    %c0_0 = arith.constant 0 : index
    %0 = vector.load %arg4[%c0, %c0_0] : memref<256x128xf32, #tpu.memory_space<vmem>>, vector<256x128xf32>
    %c0_1 = arith.constant 0 : index
    %c0_2 = arith.constant 0 : index
    %1 = vector.load %arg5[%c0_1, %c0_2] : memref<256x128xf32, #tpu.memory_space<vmem>>, vector<256x128xf32>
    %c0_3 = arith.constant 0 : index
    %c0_4 = arith.constant 0 : index
    %2 = vector.load %arg6[%c0_3, %c0_4] : memref<1x128xf32, #tpu.memory_space<vmem>>, vector<1x128xf32>
    %c0_5 = arith.constant 0 : index
    %c0_6 = arith.constant 0 : index
    %3 = vector.load %arg7[%c0_5, %c0_6] : memref<256x128xf32, #tpu.memory_space<vmem>>, vector<256x128xf32>
    %c0_7 = arith.constant 0 : index
    %c0_8 = arith.constant 0 : index
    %4 = vector.load %arg8[%c0_7, %c0_8] : memref<1x128xf32, #tpu.memory_space<vmem>>, vector<1x128xf32>
    %c0_9 = arith.constant 0 : index
    %c0_10 = arith.constant 0 : index
    %5 = vector.load %arg9[%c0_9, %c0_10] : memref<128x384xf32, #tpu.memory_space<vmem>>, vector<128x384xf32>
    %c0_11 = arith.constant 0 : index
    %c0_12 = arith.constant 0 : index
    %6 = vector.load %arg10[%c0_11, %c0_12] : memref<256x384xf32, #tpu.memory_space<vmem>>, vector<256x384xf32>
    %c0_13 = arith.constant 0 : index
    %c0_14 = arith.constant 0 : index
    %7 = vector.load %arg11[%c0_13, %c0_14] : memref<128x384xf32, #tpu.memory_space<vmem>>, vector<128x384xf32>
    %c0_15 = arith.constant 0 : index
    %c0_16 = arith.constant 0 : index
    %8 = vector.load %arg12[%c0_15, %c0_16] : memref<1x384xf32, #tpu.memory_space<vmem>>, vector<1x384xf32>
    %c0_17 = arith.constant 0 : index
    %c0_18 = arith.constant 0 : index
    %9 = vector.load %arg13[%c0_17, %c0_18] : memref<1x384xf32, #tpu.memory_space<vmem>>, vector<1x384xf32>
    %c0_19 = arith.constant 0 : index
    %c0_20 = arith.constant 0 : index
    %10 = vector.load %arg14[%c0_19, %c0_20] : memref<128x128xf32, #tpu.memory_space<vmem>>, vector<128x128xf32>
    %c0_21 = arith.constant 0 : index
    %c0_22 = arith.constant 0 : index
    %11 = vector.load %arg15[%c0_21, %c0_22] : memref<1x128xf32, #tpu.memory_space<vmem>>, vector<1x128xf32>
    %c0_23 = arith.constant 0 : index
    %c0_24 = arith.constant 0 : index
    %c0_25 = arith.constant 0 : index
    %12 = vector.load %arg2[%c0_23, %c0_24, %c0_25] : memref<8x16x256xf32, #tpu.memory_space<vmem>>, vector<8x16x256xf32>
    %c0_26 = arith.constant 0 : index
    %c0_27 = arith.constant 0 : index
    %13 = vector.load %arg3[%c0_26, %c0_27] : memref<8x16xi32, #tpu.memory_space<vmem>>, vector<8x16xi32>
    %14 = vector.shape_cast %12 : vector<8x16x256xf32> to vector<128x256xf32>
    %cst = arith.constant dense<0.000000e+00> : vector<128x128xf32>
    %15 = tpu.matmul %14, %1, %cst {dimension_numbers = #tpu.dot_dimension_numbers<[1], [0], [0], [1], [0, 0, 1, 1], [], []>} : vector<128x256xf32>, vector<256x128xf32>, vector<128x128xf32> -> vector<128x128xf32>
    %16 = vector.broadcast %2 : vector<1x128xf32> to vector<128x128xf32>
    %17 = arith.addf %15, %16 : vector<128x128xf32>
    %18 = math.tanh %17 : vector<128x128xf32>
    %19 = vector.shape_cast %18 : vector<128x128xf32> to vector<8x16x128xf32>
    %cst_28 = arith.constant dense<0.000000e+00> : vector<128x128xf32>
    %20 = tpu.matmul %14, %3, %cst_28 {dimension_numbers = #tpu.dot_dimension_numbers<[1], [0], [0], [1], [0, 0, 1, 1], [], []>} : vector<128x256xf32>, vector<256x128xf32>, vector<128x128xf32> -> vector<128x128xf32>
    %21 = vector.broadcast %4 : vector<1x128xf32> to vector<128x128xf32>
    %22 = arith.addf %20, %21 : vector<128x128xf32>
    %23 = math.tanh %22 : vector<128x128xf32>
    %24 = vector.shape_cast %23 : vector<128x128xf32> to vector<8x16x128xf32>
    %cst_29 = arith.constant dense<0.000000e+00> : vector<128x384xf32>
    %25 = tpu.matmul %14, %6, %cst_29 {dimension_numbers = #tpu.dot_dimension_numbers<[1], [0], [0], [1], [0, 0, 1, 1], [], []>} : vector<128x256xf32>, vector<256x384xf32>, vector<128x384xf32> -> vector<128x384xf32>
    %26 = vector.shape_cast %25 : vector<128x384xf32> to vector<8x16x384xf32>
    %c0_i32 = arith.constant 0 : i32
    %27 = vector.broadcast %c0_i32 : i32 to vector<8x16xi32>
    %28 = arith.cmpi eq, %13, %27 : vector<8x16xi32>
    %cst_30 = arith.constant -1.000000e+03 : f32
    %cst_31 = arith.constant 0.000000e+00 : f32
    %29 = vector.broadcast %cst_30 : f32 to vector<8x16xf32>
    %30 = vector.broadcast %cst_31 : f32 to vector<8x16xf32>
    %31 = arith.select %28, %29, %30 : vector<8x16xi1>, vector<8x16xf32>
    %32 = tpu.iota {dimensions = array<i32: 1>} : vector<1x128xi32>
    %c16_i32 = arith.constant 16 : i32
    %33 = vector.broadcast %c16_i32 : i32 to vector<1x128xi32>
    %34 = arith.cmpi sge, %32, %33 : vector<1x128xi32>
    %c24_i32 = arith.constant 24 : i32
    %35 = vector.broadcast %c24_i32 : i32 to vector<1x128xi32>
    %36 = arith.cmpi slt, %32, %35 : vector<1x128xi32>
    %37 = arith.andi %34, %36 : vector<1x128xi1>
    %cst_32 = arith.constant 9.99999974E-5 : f32
    %cst_33 = arith.constant 0.000000e+00 : f32
    %38 = vector.broadcast %cst_32 : f32 to vector<1x128xf32>
    %39 = vector.broadcast %cst_33 : f32 to vector<1x128xf32>
    %40 = arith.select %37, %38, %39 : vector<1x128xi1>, vector<1x128xf32>
    %41 = vector.shape_cast %13 : vector<8x16xi32> to vector<8x16x1xi32>
    %42 = tpu.iota {dimensions = array<i32: 2>} : vector<8x16x128xi32>
    %43 = vector.broadcast %41 : vector<8x16x1xi32> to vector<8x16x128xi32>
    %44 = arith.cmpi eq, %43, %42 : vector<8x16x128xi32>
    %45 = arith.extui %44 : vector<8x16x128xi1> to vector<8x16x128xi32>
    %46 = arith.sitofp %45 : vector<8x16x128xi32> to vector<8x16x128xf32>
    %47 = vector.extract_strided_slice %12 {offsets = [0, 9, 0], sizes = [8, 1, 256], strides = [1, 1, 1]} : vector<8x16x256xf32> to vector<8x1x256xf32>
    %48 = vector.shape_cast %47 : vector<8x1x256xf32> to vector<8x256xf32>
    %cst_34 = arith.constant dense<0.000000e+00> : vector<8x128xf32>
    %49 = tpu.matmul %48, %0, %cst_34 {dimension_numbers = #tpu.dot_dimension_numbers<[1], [0], [0], [1], [0, 0, 1, 1], [], []>} : vector<8x256xf32>, vector<256x128xf32>, vector<8x128xf32> -> vector<8x128xf32>
    %cst_35 = arith.constant 0.000000e+00 : f32
    %50 = vector.broadcast %cst_35 : f32 to vector<8x384xf32>
    %c0_36 = arith.constant 0 : index
    %c0_37 = arith.constant 0 : index
    %c0_38 = arith.constant 0 : index
    %51 = vector.load %arg1[%c0_36, %c0_37, %c0_38] : memref<6x8x128xf32, #tpu.memory_space<vmem>>, vector<1x8x128xf32>
    %52 = vector.shape_cast %51 : vector<1x8x128xf32> to vector<8x128xf32>
    %cst_39 = arith.constant dense<0.000000e+00> : vector<8x384xf32>
    %53 = tpu.matmul %52, %5, %cst_39 {dimension_numbers = #tpu.dot_dimension_numbers<[1], [0], [0], [1], [0, 0, 1, 1], [], []>} : vector<8x128xf32>, vector<128x384xf32>, vector<8x384xf32> -> vector<8x384xf32>
    %54 = arith.addf %53, %50 : vector<8x384xf32>
    %55 = vector.broadcast %8 : vector<1x384xf32> to vector<8x384xf32>
    %56 = arith.addf %54, %55 : vector<8x384xf32>
    %cst_40 = arith.constant dense<0.000000e+00> : vector<8x384xf32>
    %57 = tpu.matmul %49, %7, %cst_40 {dimension_numbers = #tpu.dot_dimension_numbers<[1], [0], [0], [1], [0, 0, 1, 1], [], []>} : vector<8x128xf32>, vector<128x384xf32>, vector<8x384xf32> -> vector<8x384xf32>
    %58 = vector.broadcast %9 : vector<1x384xf32> to vector<8x384xf32>
    %59 = arith.addf %57, %58 : vector<8x384xf32>
    %60 = vector.extract_strided_slice %56 {offsets = [0, 0], sizes = [8, 128], strides = [1, 1]} : vector<8x384xf32> to vector<8x128xf32>
    %61 = vector.extract_strided_slice %59 {offsets = [0, 0], sizes = [8, 128], strides = [1, 1]} : vector<8x384xf32> to vector<8x128xf32>
    %62 = arith.addf %60, %61 : vector<8x128xf32>
    %63 = arith.negf %62 : vector<8x128xf32>
    %64 = math.exp %63 : vector<8x128xf32>
    %cst_41 = arith.constant 1.000000e+00 : f32
    %65 = vector.broadcast %cst_41 : f32 to vector<8x128xf32>
    %66 = arith.addf %65, %64 : vector<8x128xf32>
    %67 = arith.divf %65, %66 : vector<8x128xf32>
    %68 = vector.extract_strided_slice %56 {offsets = [0, 128], sizes = [8, 128], strides = [1, 1]} : vector<8x384xf32> to vector<8x128xf32>
    %69 = vector.extract_strided_slice %59 {offsets = [0, 128], sizes = [8, 128], strides = [1, 1]} : vector<8x384xf32> to vector<8x128xf32>
    %70 = arith.addf %68, %69 : vector<8x128xf32>
    %71 = arith.negf %70 : vector<8x128xf32>
    %72 = math.exp %71 : vector<8x128xf32>
    %cst_42 = arith.constant 1.000000e+00 : f32
    %73 = vector.broadcast %cst_42 : f32 to vector<8x128xf32>
    %74 = arith.addf %73, %72 : vector<8x128xf32>
    %75 = arith.divf %73, %74 : vector<8x128xf32>
    %76 = vector.extract_strided_slice %56 {offsets = [0, 256], sizes = [8, 128], strides = [1, 1]} : vector<8x384xf32> to vector<8x128xf32>
    %77 = vector.extract_strided_slice %59 {offsets = [0, 256], sizes = [8, 128], strides = [1, 1]} : vector<8x384xf32> to vector<8x128xf32>
    %78 = arith.mulf %67, %77 : vector<8x128xf32>
    %79 = arith.addf %76, %78 : vector<8x128xf32>
    %80 = math.tanh %79 : vector<8x128xf32>
    %cst_43 = arith.constant 1.000000e+00 : f32
    %81 = vector.broadcast %cst_43 : f32 to vector<8x128xf32>
    %82 = arith.subf %81, %75 : vector<8x128xf32>
    %83 = arith.mulf %82, %80 : vector<8x128xf32>
    %84 = arith.mulf %75, %49 : vector<8x128xf32>
    %85 = arith.addf %83, %84 : vector<8x128xf32>
    %c0_44 = arith.constant 0 : index
    %c0_45 = arith.constant 0 : index
    %c0_46 = arith.constant 0 : index
    %86 = vector.load %arg17[%c0_44, %c0_45, %c0_46] : memref<6x8x128xf32, #tpu.memory_space<vmem>>, vector<1x8x128xf32>
    %87 = vector.shape_cast %86 : vector<1x8x128xf32> to vector<8x128xf32>
    %88 = vector.shape_cast %85 : vector<8x128xf32> to vector<1x8x128xf32>
    tpu.vector_store %arg17[%c0_44, %c0_45, %c0_46], %88 {strides = array<i32>} : memref<6x8x128xf32, #tpu.memory_space<vmem>>, vector<1x8x128xf32>,
    %89 = vector.shape_cast %85 : vector<8x128xf32> to vector<8x1x128xf32>
    "tpu.trace_start"() <{level = 10 : i32, message = "bqh,bkh->bqk"}> : () -> ()
    %cst_47 = arith.constant dense<0.000000e+00> : vector<8x1x16xf32>
    %90 = tpu.matmul %89, %24, %cst_47 {dimension_numbers = #tpu.dot_dimension_numbers<[2], [2], [1], [1], [0, 0, 0, 1, 1, 1], [0], [0]>} : vector<8x1x128xf32>, vector<8x16x128xf32>, vector<8x1x16xf32> -> vector<8x1x16xf32>
    "tpu.trace_stop"() : () -> ()
    %91 = vector.shape_cast %90 : vector<8x1x16xf32> to vector<8x16xf32>
    %92 = arith.addf %91, %31 : vector<8x16xf32>
    %cst_48 = arith.constant dense<0xFF800000> : vector<8xf32>
    %93 = vector.multi_reduction <maximumf>, %92, %cst_48 [1] : vector<8x16xf32> to vector<8xf32>
    %94 = vector.shape_cast %93 : vector<8xf32> to vector<8x1xf32>
    %95 = vector.broadcast %94 : vector<8x1xf32> to vector<8x16xf32>
    %96 = arith.subf %92, %95 : vector<8x16xf32>
    %97 = math.exp %96 : vector<8x16xf32>
    %cst_49 = arith.constant dense<0.000000e+00> : vector<8xf32>
    %98 = vector.multi_reduction <add>, %97, %cst_49 [1] : vector<8x16xf32> to vector<8xf32>
    %99 = vector.shape_cast %98 : vector<8xf32> to vector<8x1xf32>
    %100 = tpu.reciprocal %99 {approx = true} : vector<8x1xf32> -> vector<8x1xf32>
    %101 = arith.mulf %99, %100 : vector<8x1xf32>
    %cst_50 = arith.constant 2.000000e+00 : f32
    %102 = vector.broadcast %cst_50 : f32 to vector<8x1xf32>
    %103 = arith.subf %102, %101 : vector<8x1xf32>
    %104 = arith.mulf %100, %103 : vector<8x1xf32>
    %105 = vector.broadcast %104 : vector<8x1xf32> to vector<8x16xf32>
    %106 = arith.mulf %97, %105 : vector<8x16xf32>
    %107 = vector.shape_cast %106 : vector<8x16xf32> to vector<8x1x16xf32>
    "tpu.trace_start"() <{level = 10 : i32, message = "bqs,bsk->bqk"}> : () -> ()
    %cst_51 = arith.constant dense<0.000000e+00> : vector<8x1x384xf32>
    %108 = tpu.matmul %107, %26, %cst_51 {dimension_numbers = #tpu.dot_dimension_numbers<[2], [1], [1], [2], [0, 0, 0, 1, 1, 2], [0], [0]>} : vector<8x1x16xf32>, vector<8x16x384xf32>, vector<8x1x384xf32> -> vector<8x1x384xf32>
    "tpu.trace_stop"() : () -> ()
    %109 = vector.shape_cast %108 : vector<8x1x384xf32> to vector<8x384xf32>
    %c1 = arith.constant 1 : index
    %c0_52 = arith.constant 0 : index
    %c0_53 = arith.constant 0 : index
    %110 = vector.load %arg1[%c1, %c0_52, %c0_53] : memref<6x8x128xf32, #tpu.memory_space<vmem>>, vector<1x8x128xf32>
    %111 = vector.shape_cast %110 : vector<1x8x128xf32> to vector<8x128xf32>
    %cst_54 = arith.constant dense<0.000000e+00> : vector<8x384xf32>
    %112 = tpu.matmul %111, %5, %cst_54 {dimension_numbers = #tpu.dot_dimension_numbers<[1], [0], [0], [1], [0, 0, 1, 1], [], []>} : vector<8x128xf32>, vector<128x384xf32>, vector<8x384xf32> -> vector<8x384xf32>
    %113 = arith.addf %112, %109 : vector<8x384xf32>
    %114 = vector.broadcast %8 : vector<1x384xf32> to vector<8x384xf32>
    %115 = arith.addf %113, %114 : vector<8x384xf32>
    %cst_55 = arith.constant dense<0.000000e+00> : vector<8x384xf32>
    %116 = tpu.matmul %85, %7, %cst_55 {dimension_numbers = #tpu.dot_dimension_numbers<[1], [0], [0], [1], [0, 0, 1, 1], [], []>} : vector<8x128xf32>, vector<128x384xf32>, vector<8x384xf32> -> vector<8x384xf32>
    %117 = vector.broadcast %9 : vector<1x384xf32> to vector<8x384xf32>
    %118 = arith.addf %116, %117 : vector<8x384xf32>
    %119 = vector.extract_strided_slice %115 {offsets = [0, 0], sizes = [8, 128], strides = [1, 1]} : vector<8x384xf32> to vector<8x128xf32>
    %120 = vector.extract_strided_slice %118 {offsets = [0, 0], sizes = [8, 128], strides = [1, 1]} : vector<8x384xf32> to vector<8x128xf32>
    %121 = arith.addf %119, %120 : vector<8x128xf32>
    %122 = arith.negf %121 : vector<8x128xf32>
    %123 = math.exp %122 : vector<8x128xf32>
    %cst_56 = arith.constant 1.000000e+00 : f32
    %124 = vector.broadcast %cst_56 : f32 to vector<8x128xf32>
    %125 = arith.addf %124, %123 : vector<8x128xf32>
    %126 = arith.divf %124, %125 : vector<8x128xf32>
    %127 = vector.extract_strided_slice %115 {offsets = [0, 128], sizes = [8, 128], strides = [1, 1]} : vector<8x384xf32> to vector<8x128xf32>
    %128 = vector.extract_strided_slice %118 {offsets = [0, 128], sizes = [8, 128], strides = [1, 1]} : vector<8x384xf32> to vector<8x128xf32>
    %129 = arith.addf %127, %128 : vector<8x128xf32>
    %130 = arith.negf %129 : vector<8x128xf32>
    %131 = math.exp %130 : vector<8x128xf32>
    %cst_57 = arith.constant 1.000000e+00 : f32
    %132 = vector.broadcast %cst_57 : f32 to vector<8x128xf32>
    %133 = arith.addf %132, %131 : vector<8x128xf32>
    %134 = arith.divf %132, %133 : vector<8x128xf32>
    %135 = vector.extract_strided_slice %115 {offsets = [0, 256], sizes = [8, 128], strides = [1, 1]} : vector<8x384xf32> to vector<8x128xf32>
    %136 = vector.extract_strided_slice %118 {offsets = [0, 256], sizes = [8, 128], strides = [1, 1]} : vector<8x384xf32> to vector<8x128xf32>
    %137 = arith.mulf %126, %136 : vector<8x128xf32>
    %138 = arith.addf %135, %137 : vector<8x128xf32>
    %139 = math.tanh %138 : vector<8x128xf32>
    %cst_58 = arith.constant 1.000000e+00 : f32
    %140 = vector.broadcast %cst_58 : f32 to vector<8x128xf32>
    %141 = arith.subf %140, %134 : vector<8x128xf32>
    %142 = arith.mulf %141, %139 : vector<8x128xf32>
    %143 = arith.mulf %134, %85 : vector<8x128xf32>
    %144 = arith.addf %142, %143 : vector<8x128xf32>
    %c1_59 = arith.constant 1 : index
    %c0_60 = arith.constant 0 : index
    %c0_61 = arith.constant 0 : index
    %145 = vector.load %arg17[%c1_59, %c0_60, %c0_61] : memref<6x8x128xf32, #tpu.memory_space<vmem>>, vector<1x8x128xf32>
    %146 = vector.shape_cast %145 : vector<1x8x128xf32> to vector<8x128xf32>
    %147 = vector.shape_cast %144 : vector<8x128xf32> to vector<1x8x128xf32>
    tpu.vector_store %arg17[%c1_59, %c0_60, %c0_61], %147 {strides = array<i32>} : memref<6x8x128xf32, #tpu.memory_space<vmem>>, vector<1x8x128xf32>,
    %148 = vector.shape_cast %144 : vector<8x128xf32> to vector<8x1x128xf32>
    "tpu.trace_start"() <{level = 10 : i32, message = "bqh,bkh->bqk"}> : () -> ()
    %cst_62 = arith.constant dense<0.000000e+00> : vector<8x1x16xf32>
    %149 = tpu.matmul %148, %24, %cst_62 {dimension_numbers = #tpu.dot_dimension_numbers<[2], [2], [1], [1], [0, 0, 0, 1, 1, 1], [0], [0]>} : vector<8x1x128xf32>, vector<8x16x128xf32>, vector<8x1x16xf32> -> vector<8x1x16xf32>
    "tpu.trace_stop"() : () -> ()
    %150 = vector.shape_cast %149 : vector<8x1x16xf32> to vector<8x16xf32>
    %151 = arith.addf %150, %31 : vector<8x16xf32>
    %cst_63 = arith.constant dense<0xFF800000> : vector<8xf32>
    %152 = vector.multi_reduction <maximumf>, %151, %cst_63 [1] : vector<8x16xf32> to vector<8xf32>
    %153 = vector.shape_cast %152 : vector<8xf32> to vector<8x1xf32>
    %154 = vector.broadcast %153 : vector<8x1xf32> to vector<8x16xf32>
    %155 = arith.subf %151, %154 : vector<8x16xf32>
    %156 = math.exp %155 : vector<8x16xf32>
    %cst_64 = arith.constant dense<0.000000e+00> : vector<8xf32>
    %157 = vector.multi_reduction <add>, %156, %cst_64 [1] : vector<8x16xf32> to vector<8xf32>
    %158 = vector.shape_cast %157 : vector<8xf32> to vector<8x1xf32>
    %159 = tpu.reciprocal %158 {approx = true} : vector<8x1xf32> -> vector<8x1xf32>
    %160 = arith.mulf %158, %159 : vector<8x1xf32>
    %cst_65 = arith.constant 2.000000e+00 : f32
    %161 = vector.broadcast %cst_65 : f32 to vector<8x1xf32>
    %162 = arith.subf %161, %160 : vector<8x1xf32>
    %163 = arith.mulf %159, %162 : vector<8x1xf32>
    %164 = vector.broadcast %163 : vector<8x1xf32> to vector<8x16xf32>
    %165 = arith.mulf %156, %164 : vector<8x16xf32>
    %166 = vector.shape_cast %165 : vector<8x16xf32> to vector<8x1x16xf32>
    "tpu.trace_start"() <{level = 10 : i32, message = "bqs,bsk->bqk"}> : () -> ()
    %cst_66 = arith.constant dense<0.000000e+00> : vector<8x1x384xf32>
    %167 = tpu.matmul %166, %26, %cst_66 {dimension_numbers = #tpu.dot_dimension_numbers<[2], [1], [1], [2], [0, 0, 0, 1, 1, 2], [0], [0]>} : vector<8x1x16xf32>, vector<8x16x384xf32>, vector<8x1x384xf32> -> vector<8x1x384xf32>
    "tpu.trace_stop"() : () -> ()
    %168 = vector.shape_cast %167 : vector<8x1x384xf32> to vector<8x384xf32>
    %c2 = arith.constant 2 : index
    %c0_67 = arith.constant 0 : index
    %c0_68 = arith.constant 0 : index
    %169 = vector.load %arg1[%c2, %c0_67, %c0_68] : memref<6x8x128xf32, #tpu.memory_space<vmem>>, vector<1x8x128xf32>
    %170 = vector.shape_cast %169 : vector<1x8x128xf32> to vector<8x128xf32>
    %cst_69 = arith.constant dense<0.000000e+00> : vector<8x384xf32>
    %171 = tpu.matmul %170, %5, %cst_69 {dimension_numbers = #tpu.dot_dimension_numbers<[1], [0], [0], [1], [0, 0, 1, 1], [], []>} : vector<8x128xf32>, vector<128x384xf32>, vector<8x384xf32> -> vector<8x384xf32>
    %172 = arith.addf %171, %168 : vector<8x384xf32>
    %173 = vector.broadcast %8 : vector<1x384xf32> to vector<8x384xf32>
    %174 = arith.addf %172, %173 : vector<8x384xf32>
    %cst_70 = arith.constant dense<0.000000e+00> : vector<8x384xf32>
    %175 = tpu.matmul %144, %7, %cst_70 {dimension_numbers = #tpu.dot_dimension_numbers<[1], [0], [0], [1], [0, 0, 1, 1], [], []>} : vector<8x128xf32>, vector<128x384xf32>, vector<8x384xf32> -> vector<8x384xf32>
    %176 = vector.broadcast %9 : vector<1x384xf32> to vector<8x384xf32>
    %177 = arith.addf %175, %176 : vector<8x384xf32>
    %178 = vector.extract_strided_slice %174 {offsets = [0, 0], sizes = [8, 128], strides = [1, 1]} : vector<8x384xf32> to vector<8x128xf32>
    %179 = vector.extract_strided_slice %177 {offsets = [0, 0], sizes = [8, 128], strides = [1, 1]} : vector<8x384xf32> to vector<8x128xf32>
    %180 = arith.addf %178, %179 : vector<8x128xf32>
    %181 = arith.negf %180 : vector<8x128xf32>
    %182 = math.exp %181 : vector<8x128xf32>
    %cst_71 = arith.constant 1.000000e+00 : f32
    %183 = vector.broadcast %cst_71 : f32 to vector<8x128xf32>
    %184 = arith.addf %183, %182 : vector<8x128xf32>
    %185 = arith.divf %183, %184 : vector<8x128xf32>
    %186 = vector.extract_strided_slice %174 {offsets = [0, 128], sizes = [8, 128], strides = [1, 1]} : vector<8x384xf32> to vector<8x128xf32>
    %187 = vector.extract_strided_slice %177 {offsets = [0, 128], sizes = [8, 128], strides = [1, 1]} : vector<8x384xf32> to vector<8x128xf32>
    %188 = arith.addf %186, %187 : vector<8x128xf32>
    %189 = arith.negf %188 : vector<8x128xf32>
    %190 = math.exp %189 : vector<8x128xf32>
    %cst_72 = arith.constant 1.000000e+00 : f32
    %191 = vector.broadcast %cst_72 : f32 to vector<8x128xf32>
    %192 = arith.addf %191, %190 : vector<8x128xf32>
    %193 = arith.divf %191, %192 : vector<8x128xf32>
    %194 = vector.extract_strided_slice %174 {offsets = [0, 256], sizes = [8, 128], strides = [1, 1]} : vector<8x384xf32> to vector<8x128xf32>
    %195 = vector.extract_strided_slice %177 {offsets = [0, 256], sizes = [8, 128], strides = [1, 1]} : vector<8x384xf32> to vector<8x128xf32>
    %196 = arith.mulf %185, %195 : vector<8x128xf32>
    %197 = arith.addf %194, %196 : vector<8x128xf32>
    %198 = math.tanh %197 : vector<8x128xf32>
    %cst_73 = arith.constant 1.000000e+00 : f32
    %199 = vector.broadcast %cst_73 : f32 to vector<8x128xf32>
    %200 = arith.subf %199, %193 : vector<8x128xf32>
    %201 = arith.mulf %200, %198 : vector<8x128xf32>
    %202 = arith.mulf %193, %144 : vector<8x128xf32>
    %203 = arith.addf %201, %202 : vector<8x128xf32>
    %c2_74 = arith.constant 2 : index
    %c0_75 = arith.constant 0 : index
    %c0_76 = arith.constant 0 : index
    %204 = vector.load %arg17[%c2_74, %c0_75, %c0_76] : memref<6x8x128xf32, #tpu.memory_space<vmem>>, vector<1x8x128xf32>
    %205 = vector.shape_cast %204 : vector<1x8x128xf32> to vector<8x128xf32>
    %206 = vector.shape_cast %203 : vector<8x128xf32> to vector<1x8x128xf32>
    tpu.vector_store %arg17[%c2_74, %c0_75, %c0_76], %206 {strides = array<i32>} : memref<6x8x128xf32, #tpu.memory_space<vmem>>, vector<1x8x128xf32>,
    %207 = vector.shape_cast %203 : vector<8x128xf32> to vector<8x1x128xf32>
    "tpu.trace_start"() <{level = 10 : i32, message = "bqh,bkh->bqk"}> : () -> ()
    %cst_77 = arith.constant dense<0.000000e+00> : vector<8x1x16xf32>
    %208 = tpu.matmul %207, %24, %cst_77 {dimension_numbers = #tpu.dot_dimension_numbers<[2], [2], [1], [1], [0, 0, 0, 1, 1, 1], [0], [0]>} : vector<8x1x128xf32>, vector<8x16x128xf32>, vector<8x1x16xf32> -> vector<8x1x16xf32>
    "tpu.trace_stop"() : () -> ()
    %209 = vector.shape_cast %208 : vector<8x1x16xf32> to vector<8x16xf32>
    %210 = arith.addf %209, %31 : vector<8x16xf32>
    %cst_78 = arith.constant dense<0xFF800000> : vector<8xf32>
    %211 = vector.multi_reduction <maximumf>, %210, %cst_78 [1] : vector<8x16xf32> to vector<8xf32>
    %212 = vector.shape_cast %211 : vector<8xf32> to vector<8x1xf32>
    %213 = vector.broadcast %212 : vector<8x1xf32> to vector<8x16xf32>
    %214 = arith.subf %210, %213 : vector<8x16xf32>
    %215 = math.exp %214 : vector<8x16xf32>
    %cst_79 = arith.constant dense<0.000000e+00> : vector<8xf32>
    %216 = vector.multi_reduction <add>, %215, %cst_79 [1] : vector<8x16xf32> to vector<8xf32>
    %217 = vector.shape_cast %216 : vector<8xf32> to vector<8x1xf32>
    %218 = tpu.reciprocal %217 {approx = true} : vector<8x1xf32> -> vector<8x1xf32>
    %219 = arith.mulf %217, %218 : vector<8x1xf32>
    %cst_80 = arith.constant 2.000000e+00 : f32
    %220 = vector.broadcast %cst_80 : f32 to vector<8x1xf32>
    %221 = arith.subf %220, %219 : vector<8x1xf32>
    %222 = arith.mulf %218, %221 : vector<8x1xf32>
    %223 = vector.broadcast %222 : vector<8x1xf32> to vector<8x16xf32>
    %224 = arith.mulf %215, %223 : vector<8x16xf32>
    %225 = vector.shape_cast %224 : vector<8x16xf32> to vector<8x1x16xf32>
    "tpu.trace_start"() <{level = 10 : i32, message = "bqs,bsk->bqk"}> : () -> ()
    %cst_81 = arith.constant dense<0.000000e+00> : vector<8x1x384xf32>
    %226 = tpu.matmul %225, %26, %cst_81 {dimension_numbers = #tpu.dot_dimension_numbers<[2], [1], [1], [2], [0, 0, 0, 1, 1, 2], [0], [0]>} : vector<8x1x16xf32>, vector<8x16x384xf32>, vector<8x1x384xf32> -> vector<8x1x384xf32>
    "tpu.trace_stop"() : () -> ()
    %227 = vector.shape_cast %226 : vector<8x1x384xf32> to vector<8x384xf32>
    %c3 = arith.constant 3 : index
    %c0_82 = arith.constant 0 : index
    %c0_83 = arith.constant 0 : index
    %228 = vector.load %arg1[%c3, %c0_82, %c0_83] : memref<6x8x128xf32, #tpu.memory_space<vmem>>, vector<1x8x128xf32>
    %229 = vector.shape_cast %228 : vector<1x8x128xf32> to vector<8x128xf32>
    %cst_84 = arith.constant dense<0.000000e+00> : vector<8x384xf32>
    %230 = tpu.matmul %229, %5, %cst_84 {dimension_numbers = #tpu.dot_dimension_numbers<[1], [0], [0], [1], [0, 0, 1, 1], [], []>} : vector<8x128xf32>, vector<128x384xf32>, vector<8x384xf32> -> vector<8x384xf32>
    %231 = arith.addf %230, %227 : vector<8x384xf32>
    %232 = vector.broadcast %8 : vector<1x384xf32> to vector<8x384xf32>
    %233 = arith.addf %231, %232 : vector<8x384xf32>
    %cst_85 = arith.constant dense<0.000000e+00> : vector<8x384xf32>
    %234 = tpu.matmul %203, %7, %cst_85 {dimension_numbers = #tpu.dot_dimension_numbers<[1], [0], [0], [1], [0, 0, 1, 1], [], []>} : vector<8x128xf32>, vector<128x384xf32>, vector<8x384xf32> -> vector<8x384xf32>
    %235 = vector.broadcast %9 : vector<1x384xf32> to vector<8x384xf32>
    %236 = arith.addf %234, %235 : vector<8x384xf32>
    %237 = vector.extract_strided_slice %233 {offsets = [0, 0], sizes = [8, 128], strides = [1, 1]} : vector<8x384xf32> to vector<8x128xf32>
    %238 = vector.extract_strided_slice %236 {offsets = [0, 0], sizes = [8, 128], strides = [1, 1]} : vector<8x384xf32> to vector<8x128xf32>
    %239 = arith.addf %237, %238 : vector<8x128xf32>
    %240 = arith.negf %239 : vector<8x128xf32>
    %241 = math.exp %240 : vector<8x128xf32>
    %cst_86 = arith.constant 1.000000e+00 : f32
    %242 = vector.broadcast %cst_86 : f32 to vector<8x128xf32>
    %243 = arith.addf %242, %241 : vector<8x128xf32>
    %244 = arith.divf %242, %243 : vector<8x128xf32>
    %245 = vector.extract_strided_slice %233 {offsets = [0, 128], sizes = [8, 128], strides = [1, 1]} : vector<8x384xf32> to vector<8x128xf32>
    %246 = vector.extract_strided_slice %236 {offsets = [0, 128], sizes = [8, 128], strides = [1, 1]} : vector<8x384xf32> to vector<8x128xf32>
    %247 = arith.addf %245, %246 : vector<8x128xf32>
    %248 = arith.negf %247 : vector<8x128xf32>
    %249 = math.exp %248 : vector<8x128xf32>
    %cst_87 = arith.constant 1.000000e+00 : f32
    %250 = vector.broadcast %cst_87 : f32 to vector<8x128xf32>
    %251 = arith.addf %250, %249 : vector<8x128xf32>
    %252 = arith.divf %250, %251 : vector<8x128xf32>
    %253 = vector.extract_strided_slice %233 {offsets = [0, 256], sizes = [8, 128], strides = [1, 1]} : vector<8x384xf32> to vector<8x128xf32>
    %254 = vector.extract_strided_slice %236 {offsets = [0, 256], sizes = [8, 128], strides = [1, 1]} : vector<8x384xf32> to vector<8x128xf32>
    %255 = arith.mulf %244, %254 : vector<8x128xf32>
    %256 = arith.addf %253, %255 : vector<8x128xf32>
    %257 = math.tanh %256 : vector<8x128xf32>
    %cst_88 = arith.constant 1.000000e+00 : f32
    %258 = vector.broadcast %cst_88 : f32 to vector<8x128xf32>
    %259 = arith.subf %258, %252 : vector<8x128xf32>
    %260 = arith.mulf %259, %257 : vector<8x128xf32>
    %261 = arith.mulf %252, %203 : vector<8x128xf32>
    %262 = arith.addf %260, %261 : vector<8x128xf32>
    %c3_89 = arith.constant 3 : index
    %c0_90 = arith.constant 0 : index
    %c0_91 = arith.constant 0 : index
    %263 = vector.load %arg17[%c3_89, %c0_90, %c0_91] : memref<6x8x128xf32, #tpu.memory_space<vmem>>, vector<1x8x128xf32>
    %264 = vector.shape_cast %263 : vector<1x8x128xf32> to vector<8x128xf32>
    %265 = vector.shape_cast %262 : vector<8x128xf32> to vector<1x8x128xf32>
    tpu.vector_store %arg17[%c3_89, %c0_90, %c0_91], %265 {strides = array<i32>} : memref<6x8x128xf32, #tpu.memory_space<vmem>>, vector<1x8x128xf32>,
    %266 = vector.shape_cast %262 : vector<8x128xf32> to vector<8x1x128xf32>
    "tpu.trace_start"() <{level = 10 : i32, message = "bqh,bkh->bqk"}> : () -> ()
    %cst_92 = arith.constant dense<0.000000e+00> : vector<8x1x16xf32>
    %267 = tpu.matmul %266, %24, %cst_92 {dimension_numbers = #tpu.dot_dimension_numbers<[2], [2], [1], [1], [0, 0, 0, 1, 1, 1], [0], [0]>} : vector<8x1x128xf32>, vector<8x16x128xf32>, vector<8x1x16xf32> -> vector<8x1x16xf32>
    "tpu.trace_stop"() : () -> ()
    %268 = vector.shape_cast %267 : vector<8x1x16xf32> to vector<8x16xf32>
    %269 = arith.addf %268, %31 : vector<8x16xf32>
    %cst_93 = arith.constant dense<0xFF800000> : vector<8xf32>
    %270 = vector.multi_reduction <maximumf>, %269, %cst_93 [1] : vector<8x16xf32> to vector<8xf32>
    %271 = vector.shape_cast %270 : vector<8xf32> to vector<8x1xf32>
    %272 = vector.broadcast %271 : vector<8x1xf32> to vector<8x16xf32>
    %273 = arith.subf %269, %272 : vector<8x16xf32>
    %274 = math.exp %273 : vector<8x16xf32>
    %cst_94 = arith.constant dense<0.000000e+00> : vector<8xf32>
    %275 = vector.multi_reduction <add>, %274, %cst_94 [1] : vector<8x16xf32> to vector<8xf32>
    %276 = vector.shape_cast %275 : vector<8xf32> to vector<8x1xf32>
    %277 = tpu.reciprocal %276 {approx = true} : vector<8x1xf32> -> vector<8x1xf32>
    %278 = arith.mulf %276, %277 : vector<8x1xf32>
    %cst_95 = arith.constant 2.000000e+00 : f32
    %279 = vector.broadcast %cst_95 : f32 to vector<8x1xf32>
    %280 = arith.subf %279, %278 : vector<8x1xf32>
    %281 = arith.mulf %277, %280 : vector<8x1xf32>
    %282 = vector.broadcast %281 : vector<8x1xf32> to vector<8x16xf32>
    %283 = arith.mulf %274, %282 : vector<8x16xf32>
    %284 = vector.shape_cast %283 : vector<8x16xf32> to vector<8x1x16xf32>
    "tpu.trace_start"() <{level = 10 : i32, message = "bqs,bsk->bqk"}> : () -> ()
    %cst_96 = arith.constant dense<0.000000e+00> : vector<8x1x384xf32>
    %285 = tpu.matmul %284, %26, %cst_96 {dimension_numbers = #tpu.dot_dimension_numbers<[2], [1], [1], [2], [0, 0, 0, 1, 1, 2], [0], [0]>} : vector<8x1x16xf32>, vector<8x16x384xf32>, vector<8x1x384xf32> -> vector<8x1x384xf32>
    "tpu.trace_stop"() : () -> ()
    %286 = vector.shape_cast %285 : vector<8x1x384xf32> to vector<8x384xf32>
    %c4 = arith.constant 4 : index
    %c0_97 = arith.constant 0 : index
    %c0_98 = arith.constant 0 : index
    %287 = vector.load %arg1[%c4, %c0_97, %c0_98] : memref<6x8x128xf32, #tpu.memory_space<vmem>>, vector<1x8x128xf32>
    %288 = vector.shape_cast %287 : vector<1x8x128xf32> to vector<8x128xf32>
    %cst_99 = arith.constant dense<0.000000e+00> : vector<8x384xf32>
    %289 = tpu.matmul %288, %5, %cst_99 {dimension_numbers = #tpu.dot_dimension_numbers<[1], [0], [0], [1], [0, 0, 1, 1], [], []>} : vector<8x128xf32>, vector<128x384xf32>, vector<8x384xf32> -> vector<8x384xf32>
    %290 = arith.addf %289, %286 : vector<8x384xf32>
    %291 = vector.broadcast %8 : vector<1x384xf32> to vector<8x384xf32>
    %292 = arith.addf %290, %291 : vector<8x384xf32>
    %cst_100 = arith.constant dense<0.000000e+00> : vector<8x384xf32>
    %293 = tpu.matmul %262, %7, %cst_100 {dimension_numbers = #tpu.dot_dimension_numbers<[1], [0], [0], [1], [0, 0, 1, 1], [], []>} : vector<8x128xf32>, vector<128x384xf32>, vector<8x384xf32> -> vector<8x384xf32>
    %294 = vector.broadcast %9 : vector<1x384xf32> to vector<8x384xf32>
    %295 = arith.addf %293, %294 : vector<8x384xf32>
    %296 = vector.extract_strided_slice %292 {offsets = [0, 0], sizes = [8, 128], strides = [1, 1]} : vector<8x384xf32> to vector<8x128xf32>
    %297 = vector.extract_strided_slice %295 {offsets = [0, 0], sizes = [8, 128], strides = [1, 1]} : vector<8x384xf32> to vector<8x128xf32>
    %298 = arith.addf %296, %297 : vector<8x128xf32>
    %299 = arith.negf %298 : vector<8x128xf32>
    %300 = math.exp %299 : vector<8x128xf32>
    %cst_101 = arith.constant 1.000000e+00 : f32
    %301 = vector.broadcast %cst_101 : f32 to vector<8x128xf32>
    %302 = arith.addf %301, %300 : vector<8x128xf32>
    %303 = arith.divf %301, %302 : vector<8x128xf32>
    %304 = vector.extract_strided_slice %292 {offsets = [0, 128], sizes = [8, 128], strides = [1, 1]} : vector<8x384xf32> to vector<8x128xf32>
    %305 = vector.extract_strided_slice %295 {offsets = [0, 128], sizes = [8, 128], strides = [1, 1]} : vector<8x384xf32> to vector<8x128xf32>
    %306 = arith.addf %304, %305 : vector<8x128xf32>
    %307 = arith.negf %306 : vector<8x128xf32>
    %308 = math.exp %307 : vector<8x128xf32>
    %cst_102 = arith.constant 1.000000e+00 : f32
    %309 = vector.broadcast %cst_102 : f32 to vector<8x128xf32>
    %310 = arith.addf %309, %308 : vector<8x128xf32>
    %311 = arith.divf %309, %310 : vector<8x128xf32>
    %312 = vector.extract_strided_slice %292 {offsets = [0, 256], sizes = [8, 128], strides = [1, 1]} : vector<8x384xf32> to vector<8x128xf32>
    %313 = vector.extract_strided_slice %295 {offsets = [0, 256], sizes = [8, 128], strides = [1, 1]} : vector<8x384xf32> to vector<8x128xf32>
    %314 = arith.mulf %303, %313 : vector<8x128xf32>
    %315 = arith.addf %312, %314 : vector<8x128xf32>
    %316 = math.tanh %315 : vector<8x128xf32>
    %cst_103 = arith.constant 1.000000e+00 : f32
    %317 = vector.broadcast %cst_103 : f32 to vector<8x128xf32>
    %318 = arith.subf %317, %311 : vector<8x128xf32>
    %319 = arith.mulf %318, %316 : vector<8x128xf32>
    %320 = arith.mulf %311, %262 : vector<8x128xf32>
    %321 = arith.addf %319, %320 : vector<8x128xf32>
    %c4_104 = arith.constant 4 : index
    %c0_105 = arith.constant 0 : index
    %c0_106 = arith.constant 0 : index
    %322 = vector.load %arg17[%c4_104, %c0_105, %c0_106] : memref<6x8x128xf32, #tpu.memory_space<vmem>>, vector<1x8x128xf32>
    %323 = vector.shape_cast %322 : vector<1x8x128xf32> to vector<8x128xf32>
    %324 = vector.shape_cast %321 : vector<8x128xf32> to vector<1x8x128xf32>
    tpu.vector_store %arg17[%c4_104, %c0_105, %c0_106], %324 {strides = array<i32>} : memref<6x8x128xf32, #tpu.memory_space<vmem>>, vector<1x8x128xf32>,
    %325 = vector.shape_cast %321 : vector<8x128xf32> to vector<8x1x128xf32>
    "tpu.trace_start"() <{level = 10 : i32, message = "bqh,bkh->bqk"}> : () -> ()
    %cst_107 = arith.constant dense<0.000000e+00> : vector<8x1x16xf32>
    %326 = tpu.matmul %325, %24, %cst_107 {dimension_numbers = #tpu.dot_dimension_numbers<[2], [2], [1], [1], [0, 0, 0, 1, 1, 1], [0], [0]>} : vector<8x1x128xf32>, vector<8x16x128xf32>, vector<8x1x16xf32> -> vector<8x1x16xf32>
    "tpu.trace_stop"() : () -> ()
    %327 = vector.shape_cast %326 : vector<8x1x16xf32> to vector<8x16xf32>
    %328 = arith.addf %327, %31 : vector<8x16xf32>
    %cst_108 = arith.constant dense<0xFF800000> : vector<8xf32>
    %329 = vector.multi_reduction <maximumf>, %328, %cst_108 [1] : vector<8x16xf32> to vector<8xf32>
    %330 = vector.shape_cast %329 : vector<8xf32> to vector<8x1xf32>
    %331 = vector.broadcast %330 : vector<8x1xf32> to vector<8x16xf32>
    %332 = arith.subf %328, %331 : vector<8x16xf32>
    %333 = math.exp %332 : vector<8x16xf32>
    %cst_109 = arith.constant dense<0.000000e+00> : vector<8xf32>
    %334 = vector.multi_reduction <add>, %333, %cst_109 [1] : vector<8x16xf32> to vector<8xf32>
    %335 = vector.shape_cast %334 : vector<8xf32> to vector<8x1xf32>
    %336 = tpu.reciprocal %335 {approx = true} : vector<8x1xf32> -> vector<8x1xf32>
    %337 = arith.mulf %335, %336 : vector<8x1xf32>
    %cst_110 = arith.constant 2.000000e+00 : f32
    %338 = vector.broadcast %cst_110 : f32 to vector<8x1xf32>
    %339 = arith.subf %338, %337 : vector<8x1xf32>
    %340 = arith.mulf %336, %339 : vector<8x1xf32>
    %341 = vector.broadcast %340 : vector<8x1xf32> to vector<8x16xf32>
    %342 = arith.mulf %333, %341 : vector<8x16xf32>
    %343 = vector.shape_cast %342 : vector<8x16xf32> to vector<8x1x16xf32>
    "tpu.trace_start"() <{level = 10 : i32, message = "bqs,bsk->bqk"}> : () -> ()
    %cst_111 = arith.constant dense<0.000000e+00> : vector<8x1x384xf32>
    %344 = tpu.matmul %343, %26, %cst_111 {dimension_numbers = #tpu.dot_dimension_numbers<[2], [1], [1], [2], [0, 0, 0, 1, 1, 2], [0], [0]>} : vector<8x1x16xf32>, vector<8x16x384xf32>, vector<8x1x384xf32> -> vector<8x1x384xf32>
    "tpu.trace_stop"() : () -> ()
    %345 = vector.shape_cast %344 : vector<8x1x384xf32> to vector<8x384xf32>
    %c5 = arith.constant 5 : index
    %c0_112 = arith.constant 0 : index
    %c0_113 = arith.constant 0 : index
    %346 = vector.load %arg1[%c5, %c0_112, %c0_113] : memref<6x8x128xf32, #tpu.memory_space<vmem>>, vector<1x8x128xf32>
    %347 = vector.shape_cast %346 : vector<1x8x128xf32> to vector<8x128xf32>
    %cst_114 = arith.constant dense<0.000000e+00> : vector<8x384xf32>
    %348 = tpu.matmul %347, %5, %cst_114 {dimension_numbers = #tpu.dot_dimension_numbers<[1], [0], [0], [1], [0, 0, 1, 1], [], []>} : vector<8x128xf32>, vector<128x384xf32>, vector<8x384xf32> -> vector<8x384xf32>
    %349 = arith.addf %348, %345 : vector<8x384xf32>
    %350 = vector.broadcast %8 : vector<1x384xf32> to vector<8x384xf32>
    %351 = arith.addf %349, %350 : vector<8x384xf32>
    %cst_115 = arith.constant dense<0.000000e+00> : vector<8x384xf32>
    %352 = tpu.matmul %321, %7, %cst_115 {dimension_numbers = #tpu.dot_dimension_numbers<[1], [0], [0], [1], [0, 0, 1, 1], [], []>} : vector<8x128xf32>, vector<128x384xf32>, vector<8x384xf32> -> vector<8x384xf32>
    %353 = vector.broadcast %9 : vector<1x384xf32> to vector<8x384xf32>
    %354 = arith.addf %352, %353 : vector<8x384xf32>
    %355 = vector.extract_strided_slice %351 {offsets = [0, 0], sizes = [8, 128], strides = [1, 1]} : vector<8x384xf32> to vector<8x128xf32>
    %356 = vector.extract_strided_slice %354 {offsets = [0, 0], sizes = [8, 128], strides = [1, 1]} : vector<8x384xf32> to vector<8x128xf32>
    %357 = arith.addf %355, %356 : vector<8x128xf32>
    %358 = arith.negf %357 : vector<8x128xf32>
    %359 = math.exp %358 : vector<8x128xf32>
    %cst_116 = arith.constant 1.000000e+00 : f32
    %360 = vector.broadcast %cst_116 : f32 to vector<8x128xf32>
    %361 = arith.addf %360, %359 : vector<8x128xf32>
    %362 = arith.divf %360, %361 : vector<8x128xf32>
    %363 = vector.extract_strided_slice %351 {offsets = [0, 128], sizes = [8, 128], strides = [1, 1]} : vector<8x384xf32> to vector<8x128xf32>
    %364 = vector.extract_strided_slice %354 {offsets = [0, 128], sizes = [8, 128], strides = [1, 1]} : vector<8x384xf32> to vector<8x128xf32>
    %365 = arith.addf %363, %364 : vector<8x128xf32>
    %366 = arith.negf %365 : vector<8x128xf32>
    %367 = math.exp %366 : vector<8x128xf32>
    %cst_117 = arith.constant 1.000000e+00 : f32
    %368 = vector.broadcast %cst_117 : f32 to vector<8x128xf32>
    %369 = arith.addf %368, %367 : vector<8x128xf32>
    %370 = arith.divf %368, %369 : vector<8x128xf32>
    %371 = vector.extract_strided_slice %351 {offsets = [0, 256], sizes = [8, 128], strides = [1, 1]} : vector<8x384xf32> to vector<8x128xf32>
    %372 = vector.extract_strided_slice %354 {offsets = [0, 256], sizes = [8, 128], strides = [1, 1]} : vector<8x384xf32> to vector<8x128xf32>
    %373 = arith.mulf %362, %372 : vector<8x128xf32>
    %374 = arith.addf %371, %373 : vector<8x128xf32>
    %375 = math.tanh %374 : vector<8x128xf32>
    %cst_118 = arith.constant 1.000000e+00 : f32
    %376 = vector.broadcast %cst_118 : f32 to vector<8x128xf32>
    %377 = arith.subf %376, %370 : vector<8x128xf32>
    %378 = arith.mulf %377, %375 : vector<8x128xf32>
    %379 = arith.mulf %370, %321 : vector<8x128xf32>
    %380 = arith.addf %378, %379 : vector<8x128xf32>
    %c5_119 = arith.constant 5 : index
    %c0_120 = arith.constant 0 : index
    %c0_121 = arith.constant 0 : index
    %381 = vector.load %arg17[%c5_119, %c0_120, %c0_121] : memref<6x8x128xf32, #tpu.memory_space<vmem>>, vector<1x8x128xf32>
    %382 = vector.shape_cast %381 : vector<1x8x128xf32> to vector<8x128xf32>
    %383 = vector.shape_cast %380 : vector<8x128xf32> to vector<1x8x128xf32>
    tpu.vector_store %arg17[%c5_119, %c0_120, %c0_121], %383 {strides = array<i32>} : memref<6x8x128xf32, #tpu.memory_space<vmem>>, vector<1x8x128xf32>,
    %c0_122 = arith.constant 0 : index
    %c0_123 = arith.constant 0 : index
    %c0_124 = arith.constant 0 : index
    %384 = vector.load %arg17[%c0_122, %c0_123, %c0_124] : memref<6x8x128xf32, #tpu.memory_space<vmem>>, vector<6x8x128xf32>
    %385 = vector.shape_cast %384 : vector<6x8x128xf32> to vector<48x128xf32>
    %cst_125 = arith.constant dense<0.000000e+00> : vector<48x128xf32>
    %386 = tpu.matmul %385, %10, %cst_125 {dimension_numbers = #tpu.dot_dimension_numbers<[1], [0], [0], [1], [0, 0, 1, 1], [], []>} : vector<48x128xf32>, vector<128x128xf32>, vector<48x128xf32> -> vector<48x128xf32>
    %387 = vector.broadcast %11 : vector<1x128xf32> to vector<48x128xf32>
    %388 = arith.addf %386, %387 : vector<48x128xf32>
    %389 = vector.shape_cast %388 : vector<48x128xf32> to vector<6x8x128xf32>
    %390 = vector.extract_strided_slice %384 {offsets = [0, 0, 0], sizes = [1, 8, 128], strides = [1, 1, 1]} : vector<6x8x128xf32> to vector<1x8x128xf32>
    %391 = vector.shape_cast %390 : vector<1x8x128xf32> to vector<8x128xf32>
    %392 = vector.shape_cast %391 : vector<8x128xf32> to vector<8x1x128xf32>
    "tpu.trace_start"() <{level = 10 : i32, message = "bqh,bkh->bqk"}> : () -> ()
    %cst_126 = arith.constant dense<0.000000e+00> : vector<8x1x16xf32>
    %393 = tpu.matmul %392, %19, %cst_126 {dimension_numbers = #tpu.dot_dimension_numbers<[2], [2], [1], [1], [0, 0, 0, 1, 1, 1], [0], [0]>} : vector<8x1x128xf32>, vector<8x16x128xf32>, vector<8x1x16xf32> -> vector<8x1x16xf32>
    "tpu.trace_stop"() : () -> ()
    %394 = vector.shape_cast %393 : vector<8x1x16xf32> to vector<8x16xf32>
    %395 = arith.addf %394, %31 : vector<8x16xf32>
    %396 = vector.extract_strided_slice %389 {offsets = [0, 0, 0], sizes = [1, 8, 128], strides = [1, 1, 1]} : vector<6x8x128xf32> to vector<1x8x128xf32>
    %397 = vector.shape_cast %396 : vector<1x8x128xf32> to vector<8x128xf32>
    %cst_127 = arith.constant dense<0xFF800000> : vector<8xf32>
    %398 = vector.multi_reduction <maximumf>, %397, %cst_127 [1] : vector<8x128xf32> to vector<8xf32>
    %399 = vector.shape_cast %398 : vector<8xf32> to vector<8x1xf32>
    %cst_128 = arith.constant dense<0xFF800000> : vector<8xf32>
    %400 = vector.multi_reduction <maximumf>, %395, %cst_128 [1] : vector<8x16xf32> to vector<8xf32>
    %401 = vector.shape_cast %400 : vector<8xf32> to vector<8x1xf32>
    %402 = arith.maximumf %399, %401 : vector<8x1xf32>
    %403 = vector.broadcast %402 : vector<8x1xf32> to vector<8x128xf32>
    %404 = arith.subf %397, %403 : vector<8x128xf32>
    %405 = math.exp %404 : vector<8x128xf32>
    %406 = vector.broadcast %402 : vector<8x1xf32> to vector<8x16xf32>
    %407 = arith.subf %395, %406 : vector<8x16xf32>
    %408 = math.exp %407 : vector<8x16xf32>
    %cst_129 = arith.constant dense<0.000000e+00> : vector<8xf32>
    %409 = vector.multi_reduction <add>, %405, %cst_129 [1] : vector<8x128xf32> to vector<8xf32>
    %410 = vector.shape_cast %409 : vector<8xf32> to vector<8x1xf32>
    %cst_130 = arith.constant dense<0.000000e+00> : vector<8xf32>
    %411 = vector.multi_reduction <add>, %408, %cst_130 [1] : vector<8x16xf32> to vector<8xf32>
    %412 = vector.shape_cast %411 : vector<8xf32> to vector<8x1xf32>
    %413 = arith.addf %410, %412 : vector<8x1xf32>
    %414 = tpu.reciprocal %413 {approx = true} : vector<8x1xf32> -> vector<8x1xf32>
    %415 = arith.mulf %413, %414 : vector<8x1xf32>
    %cst_131 = arith.constant 2.000000e+00 : f32
    %416 = vector.broadcast %cst_131 : f32 to vector<8x1xf32>
    %417 = arith.subf %416, %415 : vector<8x1xf32>
    %418 = arith.mulf %414, %417 : vector<8x1xf32>
    %419 = vector.broadcast %418 : vector<8x1xf32> to vector<8x128xf32>
    %420 = arith.mulf %405, %419 : vector<8x128xf32>
    %421 = vector.broadcast %418 : vector<8x1xf32> to vector<8x16xf32>
    %422 = arith.mulf %408, %421 : vector<8x16xf32>
    %423 = vector.shape_cast %422 : vector<8x16xf32> to vector<8x1x16xf32>
    "tpu.trace_start"() <{level = 10 : i32, message = "bqs,bsv->bqv"}> : () -> ()
    %cst_132 = arith.constant dense<0.000000e+00> : vector<8x1x128xf32>
    %424 = tpu.matmul %423, %46, %cst_132 {dimension_numbers = #tpu.dot_dimension_numbers<[2], [1], [1], [2], [0, 0, 0, 1, 1, 2], [0], [0]>} : vector<8x1x16xf32>, vector<8x16x128xf32>, vector<8x1x128xf32> -> vector<8x1x128xf32>
    "tpu.trace_stop"() : () -> ()
    %425 = vector.shape_cast %424 : vector<8x1x128xf32> to vector<8x128xf32>
    %426 = vector.broadcast %40 : vector<1x128xf32> to vector<8x128xf32>
    %427 = arith.addf %420, %426 : vector<8x128xf32>
    %428 = arith.addf %427, %425 : vector<8x128xf32>
    %c0_133 = arith.constant 0 : index
    %c0_134 = arith.constant 0 : index
    %c0_135 = arith.constant 0 : index
    %429 = vector.load %arg16[%c0_133, %c0_134, %c0_135] : memref<6x8x128xf32, #tpu.memory_space<vmem>>, vector<1x8x128xf32>
    %430 = vector.shape_cast %429 : vector<1x8x128xf32> to vector<8x128xf32>
    %431 = vector.shape_cast %428 : vector<8x128xf32> to vector<1x8x128xf32>
    tpu.vector_store %arg16[%c0_133, %c0_134, %c0_135], %431 {strides = array<i32>} : memref<6x8x128xf32, #tpu.memory_space<vmem>>, vector<1x8x128xf32>,
    %432 = vector.extract_strided_slice %384 {offsets = [1, 0, 0], sizes = [1, 8, 128], strides = [1, 1, 1]} : vector<6x8x128xf32> to vector<1x8x128xf32>
    %433 = vector.shape_cast %432 : vector<1x8x128xf32> to vector<8x128xf32>
    %434 = vector.shape_cast %433 : vector<8x128xf32> to vector<8x1x128xf32>
    "tpu.trace_start"() <{level = 10 : i32, message = "bqh,bkh->bqk"}> : () -> ()
    %cst_136 = arith.constant dense<0.000000e+00> : vector<8x1x16xf32>
    %435 = tpu.matmul %434, %19, %cst_136 {dimension_numbers = #tpu.dot_dimension_numbers<[2], [2], [1], [1], [0, 0, 0, 1, 1, 1], [0], [0]>} : vector<8x1x128xf32>, vector<8x16x128xf32>, vector<8x1x16xf32> -> vector<8x1x16xf32>
    "tpu.trace_stop"() : () -> ()
    %436 = vector.shape_cast %435 : vector<8x1x16xf32> to vector<8x16xf32>
    %437 = arith.addf %436, %31 : vector<8x16xf32>
    %438 = vector.extract_strided_slice %389 {offsets = [1, 0, 0], sizes = [1, 8, 128], strides = [1, 1, 1]} : vector<6x8x128xf32> to vector<1x8x128xf32>
    %439 = vector.shape_cast %438 : vector<1x8x128xf32> to vector<8x128xf32>
    %cst_137 = arith.constant dense<0xFF800000> : vector<8xf32>
    %440 = vector.multi_reduction <maximumf>, %439, %cst_137 [1] : vector<8x128xf32> to vector<8xf32>
    %441 = vector.shape_cast %440 : vector<8xf32> to vector<8x1xf32>
    %cst_138 = arith.constant dense<0xFF800000> : vector<8xf32>
    %442 = vector.multi_reduction <maximumf>, %437, %cst_138 [1] : vector<8x16xf32> to vector<8xf32>
    %443 = vector.shape_cast %442 : vector<8xf32> to vector<8x1xf32>
    %444 = arith.maximumf %441, %443 : vector<8x1xf32>
    %445 = vector.broadcast %444 : vector<8x1xf32> to vector<8x128xf32>
    %446 = arith.subf %439, %445 : vector<8x128xf32>
    %447 = math.exp %446 : vector<8x128xf32>
    %448 = vector.broadcast %444 : vector<8x1xf32> to vector<8x16xf32>
    %449 = arith.subf %437, %448 : vector<8x16xf32>
    %450 = math.exp %449 : vector<8x16xf32>
    %cst_139 = arith.constant dense<0.000000e+00> : vector<8xf32>
    %451 = vector.multi_reduction <add>, %447, %cst_139 [1] : vector<8x128xf32> to vector<8xf32>
    %452 = vector.shape_cast %451 : vector<8xf32> to vector<8x1xf32>
    %cst_140 = arith.constant dense<0.000000e+00> : vector<8xf32>
    %453 = vector.multi_reduction <add>, %450, %cst_140 [1] : vector<8x16xf32> to vector<8xf32>
    %454 = vector.shape_cast %453 : vector<8xf32> to vector<8x1xf32>
    %455 = arith.addf %452, %454 : vector<8x1xf32>
    %456 = tpu.reciprocal %455 {approx = true} : vector<8x1xf32> -> vector<8x1xf32>
    %457 = arith.mulf %455, %456 : vector<8x1xf32>
    %cst_141 = arith.constant 2.000000e+00 : f32
    %458 = vector.broadcast %cst_141 : f32 to vector<8x1xf32>
    %459 = arith.subf %458, %457 : vector<8x1xf32>
    %460 = arith.mulf %456, %459 : vector<8x1xf32>
    %461 = vector.broadcast %460 : vector<8x1xf32> to vector<8x128xf32>
    %462 = arith.mulf %447, %461 : vector<8x128xf32>
    %463 = vector.broadcast %460 : vector<8x1xf32> to vector<8x16xf32>
    %464 = arith.mulf %450, %463 : vector<8x16xf32>
    %465 = vector.shape_cast %464 : vector<8x16xf32> to vector<8x1x16xf32>
    "tpu.trace_start"() <{level = 10 : i32, message = "bqs,bsv->bqv"}> : () -> ()
    %cst_142 = arith.constant dense<0.000000e+00> : vector<8x1x128xf32>
    %466 = tpu.matmul %465, %46, %cst_142 {dimension_numbers = #tpu.dot_dimension_numbers<[2], [1], [1], [2], [0, 0, 0, 1, 1, 2], [0], [0]>} : vector<8x1x16xf32>, vector<8x16x128xf32>, vector<8x1x128xf32> -> vector<8x1x128xf32>
    "tpu.trace_stop"() : () -> ()
    %467 = vector.shape_cast %466 : vector<8x1x128xf32> to vector<8x128xf32>
    %468 = vector.broadcast %40 : vector<1x128xf32> to vector<8x128xf32>
    %469 = arith.addf %462, %468 : vector<8x128xf32>
    %470 = arith.addf %469, %467 : vector<8x128xf32>
    %c1_143 = arith.constant 1 : index
    %c0_144 = arith.constant 0 : index
    %c0_145 = arith.constant 0 : index
    %471 = vector.load %arg16[%c1_143, %c0_144, %c0_145] : memref<6x8x128xf32, #tpu.memory_space<vmem>>, vector<1x8x128xf32>
    %472 = vector.shape_cast %471 : vector<1x8x128xf32> to vector<8x128xf32>
    %473 = vector.shape_cast %470 : vector<8x128xf32> to vector<1x8x128xf32>
    tpu.vector_store %arg16[%c1_143, %c0_144, %c0_145], %473 {strides = array<i32>} : memref<6x8x128xf32, #tpu.memory_space<vmem>>, vector<1x8x128xf32>,
    %474 = vector.extract_strided_slice %384 {offsets = [2, 0, 0], sizes = [1, 8, 128], strides = [1, 1, 1]} : vector<6x8x128xf32> to vector<1x8x128xf32>
    %475 = vector.shape_cast %474 : vector<1x8x128xf32> to vector<8x128xf32>
    %476 = vector.shape_cast %475 : vector<8x128xf32> to vector<8x1x128xf32>
    "tpu.trace_start"() <{level = 10 : i32, message = "bqh,bkh->bqk"}> : () -> ()
    %cst_146 = arith.constant dense<0.000000e+00> : vector<8x1x16xf32>
    %477 = tpu.matmul %476, %19, %cst_146 {dimension_numbers = #tpu.dot_dimension_numbers<[2], [2], [1], [1], [0, 0, 0, 1, 1, 1], [0], [0]>} : vector<8x1x128xf32>, vector<8x16x128xf32>, vector<8x1x16xf32> -> vector<8x1x16xf32>
    "tpu.trace_stop"() : () -> ()
    %478 = vector.shape_cast %477 : vector<8x1x16xf32> to vector<8x16xf32>
    %479 = arith.addf %478, %31 : vector<8x16xf32>
    %480 = vector.extract_strided_slice %389 {offsets = [2, 0, 0], sizes = [1, 8, 128], strides = [1, 1, 1]} : vector<6x8x128xf32> to vector<1x8x128xf32>
    %481 = vector.shape_cast %480 : vector<1x8x128xf32> to vector<8x128xf32>
    %cst_147 = arith.constant dense<0xFF800000> : vector<8xf32>
    %482 = vector.multi_reduction <maximumf>, %481, %cst_147 [1] : vector<8x128xf32> to vector<8xf32>
    %483 = vector.shape_cast %482 : vector<8xf32> to vector<8x1xf32>
    %cst_148 = arith.constant dense<0xFF800000> : vector<8xf32>
    %484 = vector.multi_reduction <maximumf>, %479, %cst_148 [1] : vector<8x16xf32> to vector<8xf32>
    %485 = vector.shape_cast %484 : vector<8xf32> to vector<8x1xf32>
    %486 = arith.maximumf %483, %485 : vector<8x1xf32>
    %487 = vector.broadcast %486 : vector<8x1xf32> to vector<8x128xf32>
    %488 = arith.subf %481, %487 : vector<8x128xf32>
    %489 = math.exp %488 : vector<8x128xf32>
    %490 = vector.broadcast %486 : vector<8x1xf32> to vector<8x16xf32>
    %491 = arith.subf %479, %490 : vector<8x16xf32>
    %492 = math.exp %491 : vector<8x16xf32>
    %cst_149 = arith.constant dense<0.000000e+00> : vector<8xf32>
    %493 = vector.multi_reduction <add>, %489, %cst_149 [1] : vector<8x128xf32> to vector<8xf32>
    %494 = vector.shape_cast %493 : vector<8xf32> to vector<8x1xf32>
    %cst_150 = arith.constant dense<0.000000e+00> : vector<8xf32>
    %495 = vector.multi_reduction <add>, %492, %cst_150 [1] : vector<8x16xf32> to vector<8xf32>
    %496 = vector.shape_cast %495 : vector<8xf32> to vector<8x1xf32>
    %497 = arith.addf %494, %496 : vector<8x1xf32>
    %498 = tpu.reciprocal %497 {approx = true} : vector<8x1xf32> -> vector<8x1xf32>
    %499 = arith.mulf %497, %498 : vector<8x1xf32>
    %cst_151 = arith.constant 2.000000e+00 : f32
    %500 = vector.broadcast %cst_151 : f32 to vector<8x1xf32>
    %501 = arith.subf %500, %499 : vector<8x1xf32>
    %502 = arith.mulf %498, %501 : vector<8x1xf32>
    %503 = vector.broadcast %502 : vector<8x1xf32> to vector<8x128xf32>
    %504 = arith.mulf %489, %503 : vector<8x128xf32>
    %505 = vector.broadcast %502 : vector<8x1xf32> to vector<8x16xf32>
    %506 = arith.mulf %492, %505 : vector<8x16xf32>
    %507 = vector.shape_cast %506 : vector<8x16xf32> to vector<8x1x16xf32>
    "tpu.trace_start"() <{level = 10 : i32, message = "bqs,bsv->bqv"}> : () -> ()
    %cst_152 = arith.constant dense<0.000000e+00> : vector<8x1x128xf32>
    %508 = tpu.matmul %507, %46, %cst_152 {dimension_numbers = #tpu.dot_dimension_numbers<[2], [1], [1], [2], [0, 0, 0, 1, 1, 2], [0], [0]>} : vector<8x1x16xf32>, vector<8x16x128xf32>, vector<8x1x128xf32> -> vector<8x1x128xf32>
    "tpu.trace_stop"() : () -> ()
    %509 = vector.shape_cast %508 : vector<8x1x128xf32> to vector<8x128xf32>
    %510 = vector.broadcast %40 : vector<1x128xf32> to vector<8x128xf32>
    %511 = arith.addf %504, %510 : vector<8x128xf32>
    %512 = arith.addf %511, %509 : vector<8x128xf32>
    %c2_153 = arith.constant 2 : index
    %c0_154 = arith.constant 0 : index
    %c0_155 = arith.constant 0 : index
    %513 = vector.load %arg16[%c2_153, %c0_154, %c0_155] : memref<6x8x128xf32, #tpu.memory_space<vmem>>, vector<1x8x128xf32>
    %514 = vector.shape_cast %513 : vector<1x8x128xf32> to vector<8x128xf32>
    %515 = vector.shape_cast %512 : vector<8x128xf32> to vector<1x8x128xf32>
    tpu.vector_store %arg16[%c2_153, %c0_154, %c0_155], %515 {strides = array<i32>} : memref<6x8x128xf32, #tpu.memory_space<vmem>>, vector<1x8x128xf32>,
    %516 = vector.extract_strided_slice %384 {offsets = [3, 0, 0], sizes = [1, 8, 128], strides = [1, 1, 1]} : vector<6x8x128xf32> to vector<1x8x128xf32>
    %517 = vector.shape_cast %516 : vector<1x8x128xf32> to vector<8x128xf32>
    %518 = vector.shape_cast %517 : vector<8x128xf32> to vector<8x1x128xf32>
    "tpu.trace_start"() <{level = 10 : i32, message = "bqh,bkh->bqk"}> : () -> ()
    %cst_156 = arith.constant dense<0.000000e+00> : vector<8x1x16xf32>
    %519 = tpu.matmul %518, %19, %cst_156 {dimension_numbers = #tpu.dot_dimension_numbers<[2], [2], [1], [1], [0, 0, 0, 1, 1, 1], [0], [0]>} : vector<8x1x128xf32>, vector<8x16x128xf32>, vector<8x1x16xf32> -> vector<8x1x16xf32>
    "tpu.trace_stop"() : () -> ()
    %520 = vector.shape_cast %519 : vector<8x1x16xf32> to vector<8x16xf32>
    %521 = arith.addf %520, %31 : vector<8x16xf32>
    %522 = vector.extract_strided_slice %389 {offsets = [3, 0, 0], sizes = [1, 8, 128], strides = [1, 1, 1]} : vector<6x8x128xf32> to vector<1x8x128xf32>
    %523 = vector.shape_cast %522 : vector<1x8x128xf32> to vector<8x128xf32>
    %cst_157 = arith.constant dense<0xFF800000> : vector<8xf32>
    %524 = vector.multi_reduction <maximumf>, %523, %cst_157 [1] : vector<8x128xf32> to vector<8xf32>
    %525 = vector.shape_cast %524 : vector<8xf32> to vector<8x1xf32>
    %cst_158 = arith.constant dense<0xFF800000> : vector<8xf32>
    %526 = vector.multi_reduction <maximumf>, %521, %cst_158 [1] : vector<8x16xf32> to vector<8xf32>
    %527 = vector.shape_cast %526 : vector<8xf32> to vector<8x1xf32>
    %528 = arith.maximumf %525, %527 : vector<8x1xf32>
    %529 = vector.broadcast %528 : vector<8x1xf32> to vector<8x128xf32>
    %530 = arith.subf %523, %529 : vector<8x128xf32>
    %531 = math.exp %530 : vector<8x128xf32>
    %532 = vector.broadcast %528 : vector<8x1xf32> to vector<8x16xf32>
    %533 = arith.subf %521, %532 : vector<8x16xf32>
    %534 = math.exp %533 : vector<8x16xf32>
    %cst_159 = arith.constant dense<0.000000e+00> : vector<8xf32>
    %535 = vector.multi_reduction <add>, %531, %cst_159 [1] : vector<8x128xf32> to vector<8xf32>
    %536 = vector.shape_cast %535 : vector<8xf32> to vector<8x1xf32>
    %cst_160 = arith.constant dense<0.000000e+00> : vector<8xf32>
    %537 = vector.multi_reduction <add>, %534, %cst_160 [1] : vector<8x16xf32> to vector<8xf32>
    %538 = vector.shape_cast %537 : vector<8xf32> to vector<8x1xf32>
    %539 = arith.addf %536, %538 : vector<8x1xf32>
    %540 = tpu.reciprocal %539 {approx = true} : vector<8x1xf32> -> vector<8x1xf32>
    %541 = arith.mulf %539, %540 : vector<8x1xf32>
    %cst_161 = arith.constant 2.000000e+00 : f32
    %542 = vector.broadcast %cst_161 : f32 to vector<8x1xf32>
    %543 = arith.subf %542, %541 : vector<8x1xf32>
    %544 = arith.mulf %540, %543 : vector<8x1xf32>
    %545 = vector.broadcast %544 : vector<8x1xf32> to vector<8x128xf32>
    %546 = arith.mulf %531, %545 : vector<8x128xf32>
    %547 = vector.broadcast %544 : vector<8x1xf32> to vector<8x16xf32>
    %548 = arith.mulf %534, %547 : vector<8x16xf32>
    %549 = vector.shape_cast %548 : vector<8x16xf32> to vector<8x1x16xf32>
    "tpu.trace_start"() <{level = 10 : i32, message = "bqs,bsv->bqv"}> : () -> ()
    %cst_162 = arith.constant dense<0.000000e+00> : vector<8x1x128xf32>
    %550 = tpu.matmul %549, %46, %cst_162 {dimension_numbers = #tpu.dot_dimension_numbers<[2], [1], [1], [2], [0, 0, 0, 1, 1, 2], [0], [0]>} : vector<8x1x16xf32>, vector<8x16x128xf32>, vector<8x1x128xf32> -> vector<8x1x128xf32>
    "tpu.trace_stop"() : () -> ()
    %551 = vector.shape_cast %550 : vector<8x1x128xf32> to vector<8x128xf32>
    %552 = vector.broadcast %40 : vector<1x128xf32> to vector<8x128xf32>
    %553 = arith.addf %546, %552 : vector<8x128xf32>
    %554 = arith.addf %553, %551 : vector<8x128xf32>
    %c3_163 = arith.constant 3 : index
    %c0_164 = arith.constant 0 : index
    %c0_165 = arith.constant 0 : index
    %555 = vector.load %arg16[%c3_163, %c0_164, %c0_165] : memref<6x8x128xf32, #tpu.memory_space<vmem>>, vector<1x8x128xf32>
    %556 = vector.shape_cast %555 : vector<1x8x128xf32> to vector<8x128xf32>
    %557 = vector.shape_cast %554 : vector<8x128xf32> to vector<1x8x128xf32>
    tpu.vector_store %arg16[%c3_163, %c0_164, %c0_165], %557 {strides = array<i32>} : memref<6x8x128xf32, #tpu.memory_space<vmem>>, vector<1x8x128xf32>,
    %558 = vector.extract_strided_slice %384 {offsets = [4, 0, 0], sizes = [1, 8, 128], strides = [1, 1, 1]} : vector<6x8x128xf32> to vector<1x8x128xf32>
    %559 = vector.shape_cast %558 : vector<1x8x128xf32> to vector<8x128xf32>
    %560 = vector.shape_cast %559 : vector<8x128xf32> to vector<8x1x128xf32>
    "tpu.trace_start"() <{level = 10 : i32, message = "bqh,bkh->bqk"}> : () -> ()
    %cst_166 = arith.constant dense<0.000000e+00> : vector<8x1x16xf32>
    %561 = tpu.matmul %560, %19, %cst_166 {dimension_numbers = #tpu.dot_dimension_numbers<[2], [2], [1], [1], [0, 0, 0, 1, 1, 1], [0], [0]>} : vector<8x1x128xf32>, vector<8x16x128xf32>, vector<8x1x16xf32> -> vector<8x1x16xf32>
    "tpu.trace_stop"() : () -> ()
    %562 = vector.shape_cast %561 : vector<8x1x16xf32> to vector<8x16xf32>
    %563 = arith.addf %562, %31 : vector<8x16xf32>
    %564 = vector.extract_strided_slice %389 {offsets = [4, 0, 0], sizes = [1, 8, 128], strides = [1, 1, 1]} : vector<6x8x128xf32> to vector<1x8x128xf32>
    %565 = vector.shape_cast %564 : vector<1x8x128xf32> to vector<8x128xf32>
    %cst_167 = arith.constant dense<0xFF800000> : vector<8xf32>
    %566 = vector.multi_reduction <maximumf>, %565, %cst_167 [1] : vector<8x128xf32> to vector<8xf32>
    %567 = vector.shape_cast %566 : vector<8xf32> to vector<8x1xf32>
    %cst_168 = arith.constant dense<0xFF800000> : vector<8xf32>
    %568 = vector.multi_reduction <maximumf>, %563, %cst_168 [1] : vector<8x16xf32> to vector<8xf32>
    %569 = vector.shape_cast %568 : vector<8xf32> to vector<8x1xf32>
    %570 = arith.maximumf %567, %569 : vector<8x1xf32>
    %571 = vector.broadcast %570 : vector<8x1xf32> to vector<8x128xf32>
    %572 = arith.subf %565, %571 : vector<8x128xf32>
    %573 = math.exp %572 : vector<8x128xf32>
    %574 = vector.broadcast %570 : vector<8x1xf32> to vector<8x16xf32>
    %575 = arith.subf %563, %574 : vector<8x16xf32>
    %576 = math.exp %575 : vector<8x16xf32>
    %cst_169 = arith.constant dense<0.000000e+00> : vector<8xf32>
    %577 = vector.multi_reduction <add>, %573, %cst_169 [1] : vector<8x128xf32> to vector<8xf32>
    %578 = vector.shape_cast %577 : vector<8xf32> to vector<8x1xf32>
    %cst_170 = arith.constant dense<0.000000e+00> : vector<8xf32>
    %579 = vector.multi_reduction <add>, %576, %cst_170 [1] : vector<8x16xf32> to vector<8xf32>
    %580 = vector.shape_cast %579 : vector<8xf32> to vector<8x1xf32>
    %581 = arith.addf %578, %580 : vector<8x1xf32>
    %582 = tpu.reciprocal %581 {approx = true} : vector<8x1xf32> -> vector<8x1xf32>
    %583 = arith.mulf %581, %582 : vector<8x1xf32>
    %cst_171 = arith.constant 2.000000e+00 : f32
    %584 = vector.broadcast %cst_171 : f32 to vector<8x1xf32>
    %585 = arith.subf %584, %583 : vector<8x1xf32>
    %586 = arith.mulf %582, %585 : vector<8x1xf32>
    %587 = vector.broadcast %586 : vector<8x1xf32> to vector<8x128xf32>
    %588 = arith.mulf %573, %587 : vector<8x128xf32>
    %589 = vector.broadcast %586 : vector<8x1xf32> to vector<8x16xf32>
    %590 = arith.mulf %576, %589 : vector<8x16xf32>
    %591 = vector.shape_cast %590 : vector<8x16xf32> to vector<8x1x16xf32>
    "tpu.trace_start"() <{level = 10 : i32, message = "bqs,bsv->bqv"}> : () -> ()
    %cst_172 = arith.constant dense<0.000000e+00> : vector<8x1x128xf32>
    %592 = tpu.matmul %591, %46, %cst_172 {dimension_numbers = #tpu.dot_dimension_numbers<[2], [1], [1], [2], [0, 0, 0, 1, 1, 2], [0], [0]>} : vector<8x1x16xf32>, vector<8x16x128xf32>, vector<8x1x128xf32> -> vector<8x1x128xf32>
    "tpu.trace_stop"() : () -> ()
    %593 = vector.shape_cast %592 : vector<8x1x128xf32> to vector<8x128xf32>
    %594 = vector.broadcast %40 : vector<1x128xf32> to vector<8x128xf32>
    %595 = arith.addf %588, %594 : vector<8x128xf32>
    %596 = arith.addf %595, %593 : vector<8x128xf32>
    %c4_173 = arith.constant 4 : index
    %c0_174 = arith.constant 0 : index
    %c0_175 = arith.constant 0 : index
    %597 = vector.load %arg16[%c4_173, %c0_174, %c0_175] : memref<6x8x128xf32, #tpu.memory_space<vmem>>, vector<1x8x128xf32>
    %598 = vector.shape_cast %597 : vector<1x8x128xf32> to vector<8x128xf32>
    %599 = vector.shape_cast %596 : vector<8x128xf32> to vector<1x8x128xf32>
    tpu.vector_store %arg16[%c4_173, %c0_174, %c0_175], %599 {strides = array<i32>} : memref<6x8x128xf32, #tpu.memory_space<vmem>>, vector<1x8x128xf32>,
    %600 = vector.extract_strided_slice %384 {offsets = [5, 0, 0], sizes = [1, 8, 128], strides = [1, 1, 1]} : vector<6x8x128xf32> to vector<1x8x128xf32>
    %601 = vector.shape_cast %600 : vector<1x8x128xf32> to vector<8x128xf32>
    %602 = vector.shape_cast %601 : vector<8x128xf32> to vector<8x1x128xf32>
    "tpu.trace_start"() <{level = 10 : i32, message = "bqh,bkh->bqk"}> : () -> ()
    %cst_176 = arith.constant dense<0.000000e+00> : vector<8x1x16xf32>
    %603 = tpu.matmul %602, %19, %cst_176 {dimension_numbers = #tpu.dot_dimension_numbers<[2], [2], [1], [1], [0, 0, 0, 1, 1, 1], [0], [0]>} : vector<8x1x128xf32>, vector<8x16x128xf32>, vector<8x1x16xf32> -> vector<8x1x16xf32>
    "tpu.trace_stop"() : () -> ()
    %604 = vector.shape_cast %603 : vector<8x1x16xf32> to vector<8x16xf32>
    %605 = arith.addf %604, %31 : vector<8x16xf32>
    %606 = vector.extract_strided_slice %389 {offsets = [5, 0, 0], sizes = [1, 8, 128], strides = [1, 1, 1]} : vector<6x8x128xf32> to vector<1x8x128xf32>
    %607 = vector.shape_cast %606 : vector<1x8x128xf32> to vector<8x128xf32>
    %cst_177 = arith.constant dense<0xFF800000> : vector<8xf32>
    %608 = vector.multi_reduction <maximumf>, %607, %cst_177 [1] : vector<8x128xf32> to vector<8xf32>
    %609 = vector.shape_cast %608 : vector<8xf32> to vector<8x1xf32>
    %cst_178 = arith.constant dense<0xFF800000> : vector<8xf32>
    %610 = vector.multi_reduction <maximumf>, %605, %cst_178 [1] : vector<8x16xf32> to vector<8xf32>
    %611 = vector.shape_cast %610 : vector<8xf32> to vector<8x1xf32>
    %612 = arith.maximumf %609, %611 : vector<8x1xf32>
    %613 = vector.broadcast %612 : vector<8x1xf32> to vector<8x128xf32>
    %614 = arith.subf %607, %613 : vector<8x128xf32>
    %615 = math.exp %614 : vector<8x128xf32>
    %616 = vector.broadcast %612 : vector<8x1xf32> to vector<8x16xf32>
    %617 = arith.subf %605, %616 : vector<8x16xf32>
    %618 = math.exp %617 : vector<8x16xf32>
    %cst_179 = arith.constant dense<0.000000e+00> : vector<8xf32>
    %619 = vector.multi_reduction <add>, %615, %cst_179 [1] : vector<8x128xf32> to vector<8xf32>
    %620 = vector.shape_cast %619 : vector<8xf32> to vector<8x1xf32>
    %cst_180 = arith.constant dense<0.000000e+00> : vector<8xf32>
    %621 = vector.multi_reduction <add>, %618, %cst_180 [1] : vector<8x16xf32> to vector<8xf32>
    %622 = vector.shape_cast %621 : vector<8xf32> to vector<8x1xf32>
    %623 = arith.addf %620, %622 : vector<8x1xf32>
    %624 = tpu.reciprocal %623 {approx = true} : vector<8x1xf32> -> vector<8x1xf32>
    %625 = arith.mulf %623, %624 : vector<8x1xf32>
    %cst_181 = arith.constant 2.000000e+00 : f32
    %626 = vector.broadcast %cst_181 : f32 to vector<8x1xf32>
    %627 = arith.subf %626, %625 : vector<8x1xf32>
    %628 = arith.mulf %624, %627 : vector<8x1xf32>
    %629 = vector.broadcast %628 : vector<8x1xf32> to vector<8x128xf32>
    %630 = arith.mulf %615, %629 : vector<8x128xf32>
    %631 = vector.broadcast %628 : vector<8x1xf32> to vector<8x16xf32>
    %632 = arith.mulf %618, %631 : vector<8x16xf32>
    %633 = vector.shape_cast %632 : vector<8x16xf32> to vector<8x1x16xf32>
    "tpu.trace_start"() <{level = 10 : i32, message = "bqs,bsv->bqv"}> : () -> ()
    %cst_182 = arith.constant dense<0.000000e+00> : vector<8x1x128xf32>
    %634 = tpu.matmul %633, %46, %cst_182 {dimension_numbers = #tpu.dot_dimension_numbers<[2], [1], [1], [2], [0, 0, 0, 1, 1, 2], [0], [0]>} : vector<8x1x16xf32>, vector<8x16x128xf32>, vector<8x1x128xf32> -> vector<8x1x128xf32>
    "tpu.trace_stop"() : () -> ()
    %635 = vector.shape_cast %634 : vector<8x1x128xf32> to vector<8x128xf32>
    %636 = vector.broadcast %40 : vector<1x128xf32> to vector<8x128xf32>
    %637 = arith.addf %630, %636 : vector<8x128xf32>
    %638 = arith.addf %637, %635 : vector<8x128xf32>
    %c5_183 = arith.constant 5 : index
    %c0_184 = arith.constant 0 : index
    %c0_185 = arith.constant 0 : index
    %639 = vector.load %arg16[%c5_183, %c0_184, %c0_185] : memref<6x8x128xf32, #tpu.memory_space<vmem>>, vector<1x8x128xf32>
    %640 = vector.shape_cast %639 : vector<1x8x128xf32> to vector<8x128xf32>
    %641 = vector.shape_cast %638 : vector<8x128xf32> to vector<1x8x128xf32>
    tpu.vector_store %arg16[%c5_183, %c0_184, %c0_185], %641 {strides = array<i32>} : memref<6x8x128xf32, #tpu.memory_space<vmem>>, vector<1x8x128xf32>,
    return
  }
  func.func @transform_0(%arg0: i32) -> (i32, i32, i32) {
    %c0_i32 = arith.constant 0 : i32
    %c0_i32_0 = arith.constant 0 : i32
    %c0_i32_1 = arith.constant 0 : i32
    return %c0_i32, %arg0, %c0_i32_0 : i32, i32, i32
  }
  func.func @transform_1(%arg0: i32) -> (i32, i32, i32) {
    %c0_i32 = arith.constant 0 : i32
    %c0_i32_0 = arith.constant 0 : i32
    %c0_i32_1 = arith.constant 0 : i32
    return %arg0, %c0_i32, %c0_i32_0 : i32, i32, i32
  }
  func.func @transform_2(%arg0: i32) -> (i32, i32) {
    %c0_i32 = arith.constant 0 : i32
    %c0_i32_0 = arith.constant 0 : i32
    return %arg0, %c0_i32 : i32, i32
  }
  func.func @transform_3(%arg0: i32) -> (i32, i32) {
    %c0_i32 = arith.constant 0 : i32
    %c0_i32_0 = arith.constant 0 : i32
    %c0_i32_1 = arith.constant 0 : i32
    return %c0_i32, %c0_i32_0 : i32, i32
  }
  func.func @transform_4(%arg0: i32) -> (i32, i32) {
    %c0_i32 = arith.constant 0 : i32
    %c0_i32_0 = arith.constant 0 : i32
    %c0_i32_1 = arith.constant 0 : i32
    return %c0_i32, %c0_i32_0 : i32, i32
  }
  func.func @transform_5(%arg0: i32) -> (i32, i32) {
    %c0_i32 = arith.constant 0 : i32
    %c0_i32_0 = arith.constant 0 : i32
    %c0_i32_1 = arith.constant 0 : i32
    return %c0_i32, %c0_i32_0 : i32, i32
  }
  func.func @transform_6(%arg0: i32) -> (i32, i32) {
    %c0_i32 = arith.constant 0 : i32
    %c0_i32_0 = arith.constant 0 : i32
    %c0_i32_1 = arith.constant 0 : i32
    return %c0_i32, %c0_i32_0 : i32, i32
  }
  func.func @transform_7(%arg0: i32) -> (i32, i32) {
    %c0_i32 = arith.constant 0 : i32
    %c0_i32_0 = arith.constant 0 : i32
    %c0_i32_1 = arith.constant 0 : i32
    return %c0_i32, %c0_i32_0 : i32, i32
  }
  func.func @transform_8(%arg0: i32) -> (i32, i32) {
    %c0_i32 = arith.constant 0 : i32
    %c0_i32_0 = arith.constant 0 : i32
    %c0_i32_1 = arith.constant 0 : i32
    return %c0_i32, %c0_i32_0 : i32, i32
  }
  func.func @transform_9(%arg0: i32) -> (i32, i32) {
    %c0_i32 = arith.constant 0 : i32
    %c0_i32_0 = arith.constant 0 : i32
    %c0_i32_1 = arith.constant 0 : i32
    return %c0_i32, %c0_i32_0 : i32, i32
  }
  func.func @transform_10(%arg0: i32) -> (i32, i32) {
    %c0_i32 = arith.constant 0 : i32
    %c0_i32_0 = arith.constant 0 : i32
    %c0_i32_1 = arith.constant 0 : i32
    return %c0_i32, %c0_i32_0 : i32, i32
  }
  func.func @transform_11(%arg0: i32) -> (i32, i32) {
    %c0_i32 = arith.constant 0 : i32
    %c0_i32_0 = arith.constant 0 : i32
    %c0_i32_1 = arith.constant 0 : i32
    return %c0_i32, %c0_i32_0 : i32, i32
  }
  func.func @transform_12(%arg0: i32) -> (i32, i32) {
    %c0_i32 = arith.constant 0 : i32
    %c0_i32_0 = arith.constant 0 : i32
    %c0_i32_1 = arith.constant 0 : i32
    return %c0_i32, %c0_i32_0 : i32, i32
  }
  func.func @transform_13(%arg0: i32) -> (i32, i32) {
    %c0_i32 = arith.constant 0 : i32
    %c0_i32_0 = arith.constant 0 : i32
    %c0_i32_1 = arith.constant 0 : i32
    return %c0_i32, %c0_i32_0 : i32, i32
  }
  func.func @transform_14(%arg0: i32) -> (i32, i32) {
    %c0_i32 = arith.constant 0 : i32
    %c0_i32_0 = arith.constant 0 : i32
    %c0_i32_1 = arith.constant 0 : i32
    return %c0_i32, %c0_i32_0 : i32, i32
  }
  func.func @transform_15(%arg0: i32) -> (i32, i32, i32) {
    %c0_i32 = arith.constant 0 : i32
    %c0_i32_0 = arith.constant 0 : i32
    %c0_i32_1 = arith.constant 0 : i32
    return %c0_i32, %arg0, %c0_i32_0 : i32, i32, i32
  }
}

</mosaic_0001>

<bundles_post_ra>
// kernel: copynet_decoder_forward.1
= control target key start
LH: loop header
LB: loop body
LE: loop exit
PB: predicated region body
PF: predicated region fallthrough
CT: control target
= control target key end

     0   :  { %s15646_s0 = inlined_call_operand.vmem [shape: f32[6,8,128], index: 0, kind: input, shape index: {}]   ;;  %s15647_s1 = inlined_call_operand.vmem [shape: f32[8,16,256], index: 1, kind: input, shape index: {}]   ;;  %s15648_s2 = inlined_call_operand.vmem [shape: s32[8,16], index: 2, kind: input, shape index: {}]   ;;  %s15649_s3 = inlined_call_operand.hbm [shape: f32[256,128], index: 3, kind: input, shape index: {}]   ;;  %s15650_s4 = inlined_call_operand.hbm [shape: f32[256,128], index: 4, kind: input, shape index: {}]   ;;  %s15651_s5 = inlined_call_operand.vmem [shape: f32[1,128], index: 5, kind: input, shape index: {}]   ;;  %s15652_s6 = inlined_call_operand.hbm [shape: f32[256,128], index: 6, kind: input, shape index: {}]   ;;  %s15653_s7 = inlined_call_operand.vmem [shape: f32[1,128], index: 7, kind: input, shape index: {}]   ;;  %s15654_s8 = inlined_call_operand.hbm [shape: f32[128,384], index: 8, kind: input, shape index: {}]   ;;  %s15655_s9 = inlined_call_operand.vmem [shape: f32[256,384], index: 9, kind: input, shape index: {}]   ;;  %s15656_s10 = inlined_call_operand.hbm [shape: f32[128,384], index: 10, kind: input, shape index: {}]   ;;  %s15657_s11 = inlined_call_operand.vmem [shape: f32[1,384], index: 11, kind: input, shape index: {}]   ;;  %s15658_s12 = inlined_call_operand.vmem [shape: f32[1,384], index: 12, kind: input, shape index: {}]   ;;  %s15659_s13 = inlined_call_operand.vmem [shape: f32[128,128], index: 13, kind: input, shape index: {}]   ;;  %s15660_s14 = inlined_call_operand.vmem [shape: f32[1,128], index: 14, kind: input, shape index: {}]   ;;  %s15661_s15 = inlined_call_operand.vmem [shape: f32[6,8,128], index: 15, kind: output, shape index: {}]  }
   0x1   :  { %16070 = sst [smem:[#allocation187_spill]] %s15661_s15 }
   0x2   :  { %20 = vsyncpa [#allocation4], 0 }
   0x3   :  { %21 = vsyncpa [#allocation6], 0 }
   0x4   :  { %22 = vsyncpa [#allocation9], 0  ;;  %s46_s20 = sshll.u32 %s15650_s4, 4  ;;  %s11166_s21 = smov [#allocation5]   ;;  %s47_s20 = int_to_ptr.hbm [resolvable:$true] %s46_s20 }
   0x5   :  { %s48_s22 = sshll.u32 %s11166_s21, 4  ;;  %s76_s25 = sshll.u32 %s15654_s8, 4  ;;  %s49_s22 = int_to_ptr.vmem [resolvable:$true] %s48_s22  ;;  %s77_s25 = int_to_ptr.hbm [resolvable:$true] %s76_s25 }
   0x6   :  { %s11167_s26 = smov 128   ;;  %s11168_s27 = smov 8  }
   0x7   :  { %54 = dma.hbm_to_vmem [thread:$0]  %s47_s20, 4096, %s49_s22, [#allocation6], %s11167_s26, %s11167_s26, %s11168_s27  }
   0x8   :  { %s11169_s28 = smov [#allocation8]   ;;  %s11170_s30 = smov 384  }
   0x9   :  { %s78_s29 = sshll.u32 %s11169_s28, 4  ;;  %s11171_s16 = smov 24   ;;  %s79_s29 = int_to_ptr.vmem [resolvable:$true] %s78_s29 }
   0xa   :  { %84 = dma.hbm_to_vmem [thread:$0]  %s77_s25, 6144, %s79_s29, [#allocation9], %s11170_s30, %s11170_s30, %s11171_s16  }
   0xb   :  { %s33_s18 = sshll.u32 %s15649_s3, 4  ;;  %s11172_s19 = smov [#allocation3]   ;;  %s34_s18 = int_to_ptr.hbm [resolvable:$true] %s33_s18 }
   0xc   :  { %s35_s21 = sshll.u32 %s11172_s19, 4  ;;  %s61_s24 = sshll.u32 %s15652_s6, 4  ;;  %s36_s21 = int_to_ptr.vmem [resolvable:$true] %s35_s21  ;;  %s62_s24 = int_to_ptr.hbm [resolvable:$true] %s61_s24 }
   0xd   :  { %41 = dma.hbm_to_vmem [thread:$0]  %s34_s18, 4096, %s36_s21, [#allocation4], %s11167_s26, %s11167_s26, %s11168_s27  }
   0xe   :  { %s11173_s20 = smov [#allocation7]   ;;  %s91_s25 = sshll.u32 %s15656_s10, 4  ;;  %s92_s25 = int_to_ptr.hbm [resolvable:$true] %s91_s25 }
   0xf   :  { %s63_s22 = sshll.u32 %s11173_s20, 4  ;;  %s11174_s3 = smov [#allocation10]   ;;  %s64_s22 = int_to_ptr.vmem [resolvable:$true] %s63_s22 }
  0x10   :  { %69 = dma.hbm_to_vmem [thread:$0]  %s62_s24, 4096, %s64_s22, [#allocation6], %s11167_s26, %s11167_s26, %s11168_s27  }
  0x11   :  { %s93_s29 = sshll.u32 %s11174_s3, 4  ;;  %s94_s29 = int_to_ptr.vmem [resolvable:$true] %s93_s29 }
  0x12   :  { %99 = dma.hbm_to_vmem [thread:$0]  %s92_s25, 6144, %s94_s29, [#allocation9], %s11170_s30, %s11170_s30, %s11171_s16  }
  0x13   :  { %11160 = dma.done.wait [#allocation4], 4096  }
  0x14   :  { %11161 = vsyncadd [#allocation4], 4294963200 }
  0x15   :  { %11162 = dma.done.wait [#allocation6], 8192  }
  0x16   :  { %11163 = vsyncadd [#allocation6], 4294959104 }
  0x17   :  { %11164 = dma.done.wait [#allocation9], 12288  }
  0x18   :  { %11165 = vsyncadd [#allocation9], 4294955008  ;;  %v208_v0 = vld [vmem:[#allocation7 + $0x78] sm:$0xff]  ;;  %v207_v2 = vld [vmem:[#allocation7 + $0x70] sm:$0xff]  ;;  %vm16026_vm0 = vcmask 1041409   ;;  %vm16025_vm1 = vcmask 1042434  }
  0x19   :  { %v224_v1 = vld [vmem:[#allocation7 + $0xf8] sm:$0xff]  ;;  %622 = vmatpush.msra.mxu2 %v208_v0  ;;  %v223_v3 = vld [vmem:[#allocation7 + $0xf0] sm:$0xff]  ;;  %v206_v4 = vld [vmem:[#allocation7 + $0x68] sm:$0xff]  ;;  %vm16024_vm2 = vcmask 1043459   ;;  %vm16023_vm3 = vcmask 1044484   ;;  %vm16022_vm4 = vcmask 1045509  }
  0x1a   :  { %687 = vmatpush.msra.mxu3 %v224_v1  ;;  %v222_v5 = vld [vmem:[#allocation7 + $0xe8] sm:$0xff]  ;;  %v205_v6 = vld [vmem:[#allocation7 + $0x60] sm:$0xff]  ;;  %v204_v8 = vld [vmem:[#allocation7 + $0x58] sm:$0xff]  ;;  %vm16021_vm5 = vcmask 1046534   ;;  %vm16020_vm6 = vcmask 1047559   ;;  %s16889_s27 = sld [smem:[#allocation187_spill]] }
  0x1b   :  { %623 = vmatpush.msra.mxu2 %v207_v2  ;;  %v221_v7 = vld [vmem:[#allocation7 + $0xe0] sm:$0xff]  ;;  %v220_v9 = vld [vmem:[#allocation7 + $0xd8] sm:$0xff]  ;;  %v203_v10 = vld [vmem:[#allocation7 + $0x50] sm:$0xff] }
  0x1c   :  { %688 = vmatpush.msra.mxu3 %v223_v3  ;;  %v219_v11 = vld [vmem:[#allocation7 + $0xd0] sm:$0xff]  ;;  %v202_v12 = vld [vmem:[#allocation7 + $0x48] sm:$0xff]  ;;  %v201_v14 = vld [vmem:[#allocation7 + $0x40] sm:$0xff] }
  0x1d   :  { %624 = vmatpush.msra.mxu2 %v206_v4  ;;  %v218_v13 = vld [vmem:[#allocation7 + $0xc8] sm:$0xff]  ;;  %v217_v15 = vld [vmem:[#allocation7 + $0xc0] sm:$0xff]  ;;  %v200_v16 = vld [vmem:[#allocation7 + $0x38] sm:$0xff] }
  0x1e   :  { %689 = vmatpush.msra.mxu3 %v222_v5  ;;  %v216_v17 = vld [vmem:[#allocation7 + $0xb8] sm:$0xff]  ;;  %v199_v18 = vld [vmem:[#allocation7 + $0x30] sm:$0xff]  ;;  %v198_v20 = vld [vmem:[#allocation7 + $0x28] sm:$0xff] }
  0x1f   :  { %625 = vmatpush.msra.mxu2 %v205_v6  ;;  %v215_v19 = vld [vmem:[#allocation7 + $0xb0] sm:$0xff]  ;;  %v214_v21 = vld [vmem:[#allocation7 + $0xa8] sm:$0xff]  ;;  %v197_v22 = vld [vmem:[#allocation7 + $0x20] sm:$0xff] }
  0x20   :  { %690 = vmatpush.msra.mxu3 %v221_v7  ;;  %v213_v23 = vld [vmem:[#allocation7 + $0xa0] sm:$0xff]  ;;  %v196_v24 = vld [vmem:[#allocation7 + $0x18] sm:$0xff]  ;;  %v195_v26 = vld [vmem:[#allocation7 + $0x10] sm:$0xff] }
  0x21   :  { %626 = vmatpush.msra.mxu2 %v204_v8  ;;  %v212_v25 = vld [vmem:[#allocation7 + $0x98] sm:$0xff]  ;;  %v211_v27 = vld [vmem:[#allocation7 + $0x90] sm:$0xff]  ;;  %v194_v28 = vld [vmem:[#allocation7 + $0x8] sm:$0xff] }
  0x22   :  { %691 = vmatpush.msra.mxu3 %v220_v9  ;;  %v210_v29 = vld [vmem:[#allocation7 + $0x88] sm:$0xff]  ;;  %v193_v30 = vld [vmem:[#allocation7] sm:$0xff]  ;;  %v11287_v34 = vld [vmem:[%s15647_s1 + $0x10] sm:$0xff] }
  0x23   :  { %627 = vmatpush.msra.mxu2 %v203_v10  ;;  %v209_v31 = vld [vmem:[#allocation7 + $0x80] sm:$0xff]  ;;  %v11280_v33 = vld [vmem:[%s15647_s1 + $0x8] sm:$0xff]  ;;  %v11292_v35 = vld [vmem:[%s15647_s1 + $0x18] sm:$0xff] }
  0x24   :  { %692 = vmatpush.msra.mxu3 %v219_v11  ;;  %v11275_v32 = vld [vmem:[%s15647_s1] sm:$0xff]  ;;  %v11304_v37 = vld [vmem:[%s15647_s1 + $0x28] sm:$0xff]  ;;  %v11311_v38 = vld [vmem:[%s15647_s1 + $0x30] sm:$0xff] }
  0x25   :  { %628 = vmatpush.msra.mxu2 %v202_v12  ;;  %v11299_v36 = vld [vmem:[%s15647_s1 + $0x20] sm:$0xff]  ;;  %v11316_v39 = vld [vmem:[%s15647_s1 + $0x38] sm:$0xff]  ;;  %v11328_v41 = vld [vmem:[%s15647_s1 + $0x48] sm:$0xff] }
  0x26   :  { %693 = vmatpush.msra.mxu3 %v218_v13  ;;  %v11323_v40 = vld [vmem:[%s15647_s1 + $0x40] sm:$0xff]  ;;  %v11335_v42 = vld [vmem:[%s15647_s1 + $0x50] sm:$0xff]  ;;  %v11340_v43 = vld [vmem:[%s15647_s1 + $0x58] sm:$0xff] }
  0x27   :  { %629 = vmatpush.msra.mxu2 %v201_v14  ;;  %v11347_v44 = vld [vmem:[%s15647_s1 + $0x60] sm:$0xff]  ;;  %v11352_v45 = vld [vmem:[%s15647_s1 + $0x68] sm:$0xff]  ;;  %v175_v46 = vld [vmem:[#allocation5 + $0x78] sm:$0xff] }
  0x28   :  { %694 = vmatpush.msra.mxu3 %v217_v15  ;;  %473 = vmatpush.msra.mxu0 %v175_v46  ;;  %v11359_v47 = vld [vmem:[%s15647_s1 + $0x70] sm:$0xff]  ;;  %v11364_v48 = vld [vmem:[%s15647_s1 + $0x78] sm:$0xff]  ;;  %v173_v52 = vld [vmem:[#allocation5 + $0x68] sm:$0xff] }
  0x29   :  { %630 = vmatpush.msra.mxu2 %v200_v16  ;;  %v174_v49 = vld [vmem:[#allocation5 + $0x70] sm:$0xff]  ;;  %v172_v53 = vld [vmem:[#allocation5 + $0x60] sm:$0xff]  ;;  %v171_v54 = vld [vmem:[#allocation5 + $0x58] sm:$0xff] }
  0x2a   :  { %695 = vmatpush.msra.mxu3 %v216_v17  ;;  %v320_v50 = vld [vmem:[%s15655_s9 + $0x170] sm:$0xff]  ;;  %474 = vmatpush.msra.mxu0 %v174_v49  ;;  %v11377_v55 = vld [vmem:[%s15647_s1 + $0x80] sm:$0xff]  ;;  %v11382_v56 = vld [vmem:[%s15647_s1 + $0x88] sm:$0xff] }
  0x2b   :  { %631 = vmatpush.msra.mxu2 %v199_v18  ;;  %v368_v51 = vld [vmem:[%s15655_s9 + $0x2f0] sm:$0xff]  ;;  %v317_v58 = vld [vmem:[%s15655_s9 + $0x158] sm:$0xff]  ;;  %v169_v60 = vld [vmem:[#allocation5 + $0x48] sm:$0xff] }
  0x2c   :  { %696 = vmatpush.msra.mxu3 %v215_v19  ;;  %475 = vmatpush.msra.mxu0 %v173_v52  ;;  %v170_v57 = vld [vmem:[#allocation5 + $0x50] sm:$0xff]  ;;  %v365_v59 = vld [vmem:[%s15655_s9 + $0x2d8] sm:$0xff]  ;;  %v314_v61 = vld [vmem:[%s15655_s9 + $0x140] sm:$0xff] }
  0x2d   :  { %632 = vmatpush.msra.mxu2 %v198_v20  ;;  %v362_v62 = vld [vmem:[%s15655_s9 + $0x2c0] sm:$0xff]  ;;  %v311_v0 = vld [vmem:[%s15655_s9 + $0x128] sm:$0xff]  ;;  %v191_v2 = vld [vmem:[#allocation5 + $0xf8] sm:$0xff] }
  0x2e   :  { %697 = vmatpush.msra.mxu3 %v214_v21  ;;  %476 = vmatpush.msra.mxu0 %v172_v53  ;;  %v168_v63 = vld [vmem:[#allocation5 + $0x40] sm:$0xff]  ;;  %v359_v1 = vld [vmem:[%s15655_s9 + $0x2a8] sm:$0xff]  ;;  %v167_v3 = vld [vmem:[#allocation5 + $0x38] sm:$0xff] }
  0x2f   :  { %633 = vmatpush.msra.mxu2 %v197_v22  ;;  %538 = vmatpush.msra.mxu1 %v191_v2  ;;  %v11407_v4 = vld [vmem:[%s15647_s1 + $0x90] sm:$0xff]  ;;  %v11412_v5 = vld [vmem:[%s15647_s1 + $0x98] sm:$0xff]  ;;  %v165_v12 = vld [vmem:[#allocation5 + $0x28] sm:$0xff] }
  0x30   :  { %698 = vmatpush.msra.mxu3 %v213_v23  ;;  %477 = vmatpush.msra.mxu0 %v171_v54  ;;  %v308_v6 = vld [vmem:[%s15655_s9 + $0x110] sm:$0xff]  ;;  %v305_v10 = vld [vmem:[%s15655_s9 + $0xf8] sm:$0xff]  ;;  %v189_v13 = vld [vmem:[#allocation5 + $0xe8] sm:$0xff] }
  0x31   :  { %634 = vmatpush.msra.mxu2 %v196_v24  ;;  %v356_v7 = vld [vmem:[%s15655_s9 + $0x290] sm:$0xff]  ;;  %v353_v11 = vld [vmem:[%s15655_s9 + $0x278] sm:$0xff]  ;;  %v302_v14 = vld [vmem:[%s15655_s9 + $0xe0] sm:$0xff] }
  0x32   :  { %699 = vmatpush.msra.mxu3 %v212_v25  ;;  %478 = vmatpush.msra.mxu0 %v170_v57  ;;  %v166_v8 = vld [vmem:[#allocation5 + $0x30] sm:$0xff]  ;;  %v350_v15 = vld [vmem:[%s15655_s9 + $0x260] sm:$0xff]  ;;  %v299_v18 = vld [vmem:[%s15655_s9 + $0xc8] sm:$0xff] }
  0x33   :  { %635 = vmatpush.msra.mxu2 %v195_v26  ;;  %v190_v9 = vld [vmem:[#allocation5 + $0xf0] sm:$0xff]  ;;  %v164_v16 = vld [vmem:[#allocation5 + $0x20] sm:$0xff]  ;;  %v347_v19 = vld [vmem:[%s15655_s9 + $0x248] sm:$0xff] }
  0x34   :  { %700 = vmatpush.msra.mxu3 %v211_v27  ;;  %479 = vmatpush.msra.mxu0 %v169_v60  ;;  %v188_v17 = vld [vmem:[#allocation5 + $0xe0] sm:$0xff]  ;;  %v11448_v21 = vld [vmem:[%s15647_s1 + $0xa8] sm:$0xff]  ;;  %v163_v22 = vld [vmem:[#allocation5 + $0x18] sm:$0xff] }
  0x35   :  { %636 = vmatpush.msra.mxu2 %v194_v28  ;;  %539 = vmatpush.msra.mxu1 %v190_v9  ;;  %v11443_v20 = vld [vmem:[%s15647_s1 + $0xa0] sm:$0xff]  ;;  %v187_v23 = vld [vmem:[#allocation5 + $0xd8] sm:$0xff]  ;;  %v296_v24 = vld [vmem:[%s15655_s9 + $0xb0] sm:$0xff] }
  0x36   :  { %701 = vmatpush.msra.mxu3 %v210_v29  ;;  %480 = vmatpush.msra.mxu0 %v168_v63  ;;  %v344_v25 = vld [vmem:[%s15655_s9 + $0x230] sm:$0xff]  ;;  %v293_v28 = vld [vmem:[%s15655_s9 + $0x98] sm:$0xff]  ;;  %v290_v46 = vld [vmem:[%s15655_s9 + $0x80] sm:$0xff] }
  0x37   :  { %637 = vmatpush.msra.mxu2 %v193_v30  ;;  %540 = vmatpush.msra.mxu1 %v189_v13  ;;  %v162_v26 = vld [vmem:[#allocation5 + $0x10] sm:$0xff]  ;;  %v341_v29 = vld [vmem:[%s15655_s9 + $0x218] sm:$0xff]  ;;  %v161_v30 = vld [vmem:[#allocation5 + $0x8] sm:$0xff] }
  0x38   :  { %702 = vmatpush.msra.mxu3 %v209_v31  ;;  %638 = vmatmul.f32.vlgmr.msra.gmra.mxu2 %v11275_v32  ;;  %v186_v27 = vld [vmem:[#allocation5 + $0xd0] sm:$0xff]  ;;  %v185_v31 = vld [vmem:[#allocation5 + $0xc8] sm:$0xff]  ;;  %v338_v49 = vld [vmem:[%s15655_s9 + $0x200] sm:$0xff] }
  0x39   :  { %703 = vmatmul.f32.vlgmr.msra.gmra.mxu3 %v11280_v33  ;;  %898 = vmatpush.msrb.mxu2 %v320_v50  ;;  %v160_v50 = vld [vmem:[#allocation5] sm:$0xff]  ;;  %v11473_v52 = vld [vmem:[%s15647_s1 + $0xb0] sm:$0xff]  ;;  %v11478_v53 = vld [vmem:[%s15647_s1 + $0xb8] sm:$0xff] }
  0x3a   :  { %963 = vmatpush.msrb.mxu3 %v368_v51  ;;  %481 = vmatpush.msra.mxu0 %v167_v3  ;;  %v184_v51 = vld [vmem:[#allocation5 + $0xc0] sm:$0xff]  ;;  %v287_v54 = vld [vmem:[%s15655_s9 + $0x68] sm:$0xff]  ;;  %v332_v60 = vld [vmem:[%s15655_s9 + $0x1d0] sm:$0xff] }
  0x3b   :  { %899 = vmatpush.msrb.mxu2 %v317_v58  ;;  %541 = vmatpush.msra.mxu1 %v188_v17  ;;  %v335_v57 = vld [vmem:[%s15655_s9 + $0x1e8] sm:$0xff]  ;;  %v183_v58 = vld [vmem:[#allocation5 + $0xb8] sm:$0xff]  ;;  %v11507_v2 = vld [vmem:[%s15647_s1 + $0xc0] sm:$0xff] }
  0x3c   :  { %964 = vmatpush.msrb.mxu3 %v365_v59  ;;  %482 = vmatpush.msra.mxu0 %v166_v8  ;;  %v284_v59 = vld [vmem:[%s15655_s9 + $0x50] sm:$0xff]  ;;  %v329_v63 = vld [vmem:[%s15655_s9 + $0x1b8] sm:$0xff]  ;;  %v11512_v3 = vld [vmem:[%s15647_s1 + $0xc8] sm:$0xff] }
  0x3d   :  { %900 = vmatpush.msrb.mxu2 %v314_v61  ;;  %542 = vmatpush.msra.mxu1 %v187_v23  ;;  %v182_v61 = vld [vmem:[#allocation5 + $0xb0] sm:$0xff]  ;;  %v275_v8 = vld [vmem:[%s15655_s9 + $0x8] sm:$0xff] }
  0x3e   :  { %965 = vmatpush.msrb.mxu3 %v362_v62  ;;  %483 = vmatpush.msra.mxu0 %v165_v12  ;;  %v281_v62 = vld [vmem:[%s15655_s9 + $0x38] sm:$0xff]  ;;  %v323_v9 = vld [vmem:[%s15655_s9 + $0x188] sm:$0xff]  ;;  %v11529_v13 = vld [vmem:[%s15647_s1 + $0xd0] sm:$0xff] }
  0x3f   :  { %901 = vmatpush.msrb.mxu2 %v311_v0  ;;  %543 = vmatpush.msra.mxu1 %v186_v27  ;;  %v181_v0 = vld [vmem:[#allocation5 + $0xa8] sm:$0xff] }
  0x40   :  { %641 = vmatmul.f32.gmra.mxu2 %v11287_v34  ;;  %966 = vmatpush.msrb.mxu3 %v359_v1  ;;  %v278_v1 = vld [vmem:[%s15655_s9 + $0x20] sm:$0xff]  ;;  %v177_v12 = vld [vmem:[#allocation5 + $0x88] sm:$0xff] }
  0x41   :  { %706 = vmatmul.f32.gmra.mxu3 %v11292_v35  ;;  %902 = vmatpush.msrb.mxu2 %v308_v6  ;;  %v326_v6 = vld [vmem:[%s15655_s9 + $0x1a0] sm:$0xff]  ;;  %v11548_v17 = vld [vmem:[%s15647_s1 + $0xe8] sm:$0xff] }
  0x42   :  { %967 = vmatpush.msrb.mxu3 %v356_v7  ;;  %484 = vmatpush.msra.mxu0 %v164_v16  ;;  %v180_v7 = vld [vmem:[#allocation5 + $0xa0] sm:$0xff] }
  0x43   :  { %903 = vmatpush.msrb.mxu2 %v305_v10  ;;  %544 = vmatpush.msra.mxu1 %v185_v31  ;;  %v179_v10 = vld [vmem:[#allocation5 + $0x98] sm:$0xff]  ;;  %v11543_v16 = vld [vmem:[%s15647_s1 + $0xe0] sm:$0xff] }
  0x44   :  { %968 = vmatpush.msrb.mxu3 %v353_v11  ;;  %485 = vmatpush.msra.mxu0 %v163_v22  ;;  %v178_v11 = vld [vmem:[#allocation5 + $0x90] sm:$0xff]  ;;  %v11573_v22 = vld [vmem:[%s15653_s7] ss:$0 sm:$0xff] }
  0x45   :  { %904 = vmatpush.msrb.mxu2 %v302_v14  ;;  %545 = vmatpush.msra.mxu1 %v184_v51  ;;  %v11534_v14 = vld [vmem:[%s15647_s1 + $0xd8] sm:$0xff] }
  0x46   :  { %969 = vmatpush.msrb.mxu3 %v350_v15  ;;  %486 = vmatpush.msra.mxu0 %v162_v26  ;;  %v176_v15 = vld [vmem:[#allocation5 + $0x80] sm:$0xff] }
  0x47   :  { %905 = vmatpush.msrb.mxu2 %v299_v18  ;;  %546 = vmatpush.msra.mxu1 %v183_v58  ;;  %v11557_v18 = vld [vmem:[%s15647_s1 + $0xf0] sm:$0xff] }
  0x48   :  { %644 = vmatmul.f32.gmra.mxu2 %v11299_v36  ;;  %970 = vmatpush.msrb.mxu3 %v347_v19  ;;  %v11562_v19 = vld [vmem:[%s15647_s1 + $0xf8] sm:$0xff] }
  0x49   :  { %709 = vmatmul.f32.gmra.mxu3 %v11304_v37  ;;  %906 = vmatpush.msrb.mxu2 %v296_v24 }
  0x4a   :  { %971 = vmatpush.msrb.mxu3 %v344_v25  ;;  %487 = vmatpush.msra.mxu0 %v161_v30 }
  0x4b   :  { %907 = vmatpush.msrb.mxu2 %v293_v28  ;;  %547 = vmatpush.msra.mxu1 %v182_v61  ;;  %v143_v61 = vld [vmem:[#allocation3 + $0x78] sm:$0xff] }
  0x4c   :  { %972 = vmatpush.msrb.mxu3 %v341_v29  ;;  %488 = vmatpush.msra.mxu0 %v160_v50 }
  0x4d   :  { %908 = vmatpush.msrb.mxu2 %v290_v46  ;;  %489 = vmatmul.f32.vlgmr.msra.gmra.mxu0 %v11275_v32 }
  0x4e   :  { %973 = vmatpush.msrb.mxu3 %v338_v49  ;;  %548 = vmatpush.msra.mxu1 %v181_v0 }
  0x4f   :  { %909 = vmatpush.msrb.mxu2 %v287_v54 }
  0x50   :  { %647 = vmatmul.f32.gmra.mxu2 %v11311_v38  ;;  %974 = vmatpush.msrb.mxu3 %v335_v57  ;;  %v313_v57 = vld [vmem:[%s15655_s9 + $0x138] sm:$0xff] }
  0x51   :  { %712 = vmatmul.f32.gmra.mxu3 %v11316_v39  ;;  %910 = vmatpush.msrb.mxu2 %v284_v59  ;;  %v310_v59 = vld [vmem:[%s15655_s9 + $0x120] sm:$0xff] }
  0x52   :  { %975 = vmatpush.msrb.mxu3 %v332_v60  ;;  %549 = vmatpush.msra.mxu1 %v180_v7  ;;  %v307_v60 = vld [vmem:[%s15655_s9 + $0x108] sm:$0xff] }
  0x53   :  { %911 = vmatpush.msrb.mxu2 %v281_v62  ;;  %v304_v62 = vld [vmem:[%s15655_s9 + $0xf0] sm:$0xff] }
  0x54   :  { %976 = vmatpush.msrb.mxu3 %v329_v63  ;;  %550 = vmatpush.msra.mxu1 %v179_v10  ;;  %v295_v10 = vld [vmem:[%s15655_s9 + $0xa8] sm:$0xff] }
  0x55   :  { %912 = vmatpush.msrb.mxu2 %v278_v1  ;;  %492 = vmatmul.f32.gmra.mxu0 %v11287_v34  ;;  %v301_v1 = vld [vmem:[%s15655_s9 + $0xd8] sm:$0xff] }
  0x56   :  { %977 = vmatpush.msrb.mxu3 %v326_v6  ;;  %551 = vmatpush.msra.mxu1 %v178_v11  ;;  %v141_v6 = vld [vmem:[#allocation3 + $0x68] sm:$0xff] }
  0x57   :  { %913 = vmatpush.msrb.mxu2 %v275_v8  ;;  %v298_v8 = vld [vmem:[%s15655_s9 + $0xc0] sm:$0xff]  ;;  %v367_v11 = vld [vmem:[%s15655_s9 + $0x2e8] sm:$0xff] }
  0x58   :  { %650 = vmatmul.f32.gmra.mxu2 %v11323_v40  ;;  %978 = vmatpush.msrb.mxu3 %v323_v9  ;;  %v140_v9 = vld [vmem:[#allocation3 + $0x60] sm:$0xff] }
  0x59   :  { %715 = vmatmul.f32.gmra.mxu3 %v11328_v41  ;;  %552 = vmatpush.msra.mxu1 %v177_v12  ;;  %v139_v12 = vld [vmem:[#allocation3 + $0x58] sm:$0xff] }
  0x5a   :  { %1371 = vmatpush.msra.mxu2 %v143_v61 }
  0x5b   :  { %553 = vmatpush.msra.mxu1 %v176_v15  ;;  %v292_v15 = vld [vmem:[%s15655_s9 + $0x90] sm:$0xff] }
  0x5c   :  { %554 = vmatmul.f32.vlgmr.msra.gmra.mxu1 %v11280_v33 }
  0x5d   :  { %495 = vmatmul.f32.gmra.mxu0 %v11299_v36  ;;  %833 = vmatpush.msrb.mxu1 %v367_v11  ;;  %v159_v11 = vld [vmem:[#allocation3 + $0xf8] sm:$0xff] }
  0x5e   :  { %1391 = vmatpush.msra.mxu3 %v159_v11 }
  0x60   :  { %653 = vmatmul.f32.gmra.mxu2 %v11335_v42 }
  0x61   :  { %718 = vmatmul.f32.gmra.mxu3 %v11340_v43 }
  0x64   :  { %557 = vmatmul.f32.gmra.mxu1 %v11292_v35 }
  0x65   :  { %498 = vmatmul.f32.gmra.mxu0 %v11311_v38 }
  0x68   :  { %656 = vmatmul.f32.gmra.mxu2 %v11347_v44 }
  0x69   :  { %721 = vmatmul.f32.gmra.mxu3 %v11352_v45 }
  0x6c   :  { %560 = vmatmul.f32.gmra.mxu1 %v11304_v37 }
  0x6d   :  { %501 = vmatmul.f32.gmra.mxu0 %v11323_v40 }
  0x70   :  { %659 = vmatmul.f32.gmra.mxu2 %v11359_v47 }
  0x71   :  { %724 = vmatmul.f32.gmra.mxu3 %v11364_v48 }
  0x74   :  { %563 = vmatmul.f32.gmra.mxu1 %v11316_v39 }
  0x75   :  { %504 = vmatmul.f32.gmra.mxu0 %v11335_v42 }
  0x78   :  { %662 = vmatmul.f32.gmra.mxu2 %v11377_v55 }
  0x79   :  { %727 = vmatmul.f32.gmra.mxu3 %v11382_v56 }
  0x7c   :  { %566 = vmatmul.f32.gmra.mxu1 %v11328_v41 }
  0x7d   :  { %507 = vmatmul.f32.gmra.mxu0 %v11347_v44 }
  0x80   :  { %665 = vmatmul.f32.gmra.mxu2 %v11407_v4 }
  0x81   :  { %730 = vmatmul.f32.gmra.mxu3 %v11412_v5 }
  0x84   :  { %569 = vmatmul.f32.gmra.mxu1 %v11340_v43 }
  0x85   :  { %510 = vmatmul.f32.gmra.mxu0 %v11359_v47 }
  0x88   :  { %668 = vmatmul.f32.gmra.mxu2 %v11443_v20 }
  0x89   :  { %733 = vmatmul.f32.gmra.mxu3 %v11448_v21 }
  0x8c   :  { %572 = vmatmul.f32.gmra.mxu1 %v11352_v45 }
  0x8d   :  { %513 = vmatmul.f32.gmra.mxu0 %v11377_v55 }
  0x90   :  { %671 = vmatmul.f32.gmra.mxu2 %v11473_v52 }
  0x91   :  { %736 = vmatmul.f32.gmra.mxu3 %v11478_v53 }
  0x94   :  { %575 = vmatmul.f32.gmra.mxu1 %v11364_v48 }
  0x95   :  { %516 = vmatmul.f32.gmra.mxu0 %v11407_v4 }
  0x98   :  { %674 = vmatmul.f32.gmra.mxu2 %v11507_v2 }
  0x99   :  { %739 = vmatmul.f32.gmra.mxu3 %v11512_v3 }
  0x9c   :  { %578 = vmatmul.f32.gmra.mxu1 %v11382_v56 }
  0x9d   :  { %519 = vmatmul.f32.gmra.mxu0 %v11443_v20 }
  0xa0   :  { %677 = vmatmul.f32.gmra.mxu2 %v11529_v13 }
  0xa1   :  { %742 = vmatmul.f32.gmra.mxu3 %v11534_v14 }
  0xa4   :  { %581 = vmatmul.f32.gmra.mxu1 %v11412_v5 }
  0xa5   :  { %522 = vmatmul.f32.gmra.mxu0 %v11473_v52 }
  0xa8   :  { %680 = vmatmul.f32.gmra.mxu2 %v11543_v16 }
  0xa9   :  { %745 = vmatmul.f32.gmra.mxu3 %v11548_v17 }
  0xac   :  { %584 = vmatmul.f32.gmra.mxu1 %v11448_v21 }
  0xad   :  { %525 = vmatmul.f32.gmra.mxu0 %v11507_v2 }
  0xb0   :  { %683 = vmatmul.f32.gmra.mxu2 %v11557_v18 }
  0xb1   :  { %748 = vmatmul.f32.gmra.mxu3 %v11562_v19 }
  0xb4   :  { %587 = vmatmul.f32.gmra.mxu1 %v11478_v53 }
  0xb5   :  { %528 = vmatmul.f32.gmra.mxu0 %v11529_v13 }
  0xb8   :  { %914 = vmatmul.f32.vlgmr.msrb.gmra.mxu2 %v11275_v32 }
  0xb9   :  { %979 = vmatmul.f32.vlgmr.msrb.gmra.mxu3 %v11280_v33 }
  0xbb   :  { %v639_v23 = vpop.f32.mrf.mxu2 }
  0xbc   :  { %v704_v24 = vpop.f32.mrf.mxu3  ;;  %v640_v25 = vadd.f32 %v11573_v22, %v639_v23  ;;  %v364_v23 = vld [vmem:[%s15655_s9 + $0x2d0] sm:$0xff]  ;;  %590 = vmatmul.f32.gmra.mxu1 %v11512_v3 }
  0xbd   :  { %834 = vmatpush.msrb.mxu1 %v364_v23  ;;  %v318_v23 = vld [vmem:[%s15655_s9 + $0x160] sm:$0xff]  ;;  %531 = vmatmul.f32.gmra.mxu0 %v11543_v16 }
  0xbe   :  { %v11578_v26 = vadd.f32 %v704_v24, %v640_v25 }
  0xc0   :  { %917 = vmatmul.f32.gmra.mxu2 %v11287_v34 }
  0xc1   :  { %982 = vmatmul.f32.gmra.mxu3 %v11292_v35 }
  0xc3   :  { %v642_v33 = vpop.f32.mrf.mxu2 }
  0xc4   :  { %v707_v27 = vpop.f32.mrf.mxu3  ;;  %v643_v28 = vadd.f32 %v11573_v22, %v642_v33  ;;  %v138_v33 = vld [vmem:[#allocation3 + $0x50] sm:$0xff]  ;;  %593 = vmatmul.f32.gmra.mxu1 %v11534_v14 }
  0xc5   :  { %534 = vmatmul.f32.gmra.mxu0 %v11557_v18 }
  0xc6   :  { %v11585_v29 = vadd.f32 %v707_v27, %v643_v28  ;;  %v289_v28 = vld [vmem:[%s15655_s9 + $0x78] sm:$0xff] }
  0xc8   :  { %920 = vmatmul.f32.gmra.mxu2 %v11299_v36  ;;  %v319_v36 = vld [vmem:[%s15655_s9 + $0x168] sm:$0xff] }
  0xc9   :  { %985 = vmatmul.f32.gmra.mxu3 %v11304_v37  ;;  %768 = vmatpush.msrb.mxu0 %v319_v36  ;;  %v316_v37 = vld [vmem:[%s15655_s9 + $0x150] sm:$0xff]  ;;  %v286_v36 = vld [vmem:[%s15655_s9 + $0x60] sm:$0xff] }
  0xcb   :  { %v645_v30 = vpop.f32.mrf.mxu2  ;;  %769 = vmatpush.msrb.mxu0 %v316_v37  ;;  %v358_v37 = vld [vmem:[%s15655_s9 + $0x2a0] sm:$0xff] }
  0xcc   :  { %v710_v31 = vpop.f32.mrf.mxu3  ;;  %v646_v46 = vadd.f32 %v11573_v22, %v645_v30  ;;  %v361_v30 = vld [vmem:[%s15655_s9 + $0x2b8] sm:$0xff]  ;;  %596 = vmatmul.f32.gmra.mxu1 %v11548_v17 }
  0xcd   :  { %770 = vmatpush.msrb.mxu0 %v313_v57  ;;  %835 = vmatpush.msrb.mxu1 %v361_v30  ;;  %v135_v57 = vld [vmem:[#allocation3 + $0x38] sm:$0xff]  ;;  %v130_v30 = vld [vmem:[#allocation3 + $0x10] sm:$0xff] }
  0xce   :  { %v11592_v49 = vadd.f32 %v710_v31, %v646_v46  ;;  %v137_v31 = vld [vmem:[#allocation3 + $0x48] sm:$0xff] }
  0xcf   :  { %771 = vmatpush.msrb.mxu0 %v310_v59  ;;  %836 = vmatpush.msrb.mxu1 %v358_v37  ;;  %v129_v37 = vld [vmem:[#allocation3 + $0x8] sm:$0xff] }
  0xd0   :  { %923 = vmatmul.f32.gmra.mxu2 %v11311_v38 }
  0xd1   :  { %988 = vmatmul.f32.gmra.mxu3 %v11316_v39  ;;  %772 = vmatpush.msrb.mxu0 %v307_v60  ;;  %v352_v60 = vld [vmem:[%s15655_s9 + $0x270] sm:$0xff] }
  0xd3   :  { %v648_v50 = vpop.f32.mrf.mxu2  ;;  %773 = vmatpush.msrb.mxu0 %v304_v62  ;;  %v134_v62 = vld [vmem:[#allocation3 + $0x30] sm:$0xff] }
  0xd4   :  { %v713_v51 = vpop.f32.mrf.mxu3  ;;  %v649_v54 = vadd.f32 %v11573_v22, %v648_v50  ;;  %v136_v50 = vld [vmem:[#allocation3 + $0x40] sm:$0xff]  ;;  %599 = vmatmul.f32.gmra.mxu1 %v11562_v19 }
  0xd5   :  { %774 = vmatpush.msrb.mxu0 %v301_v1  ;;  %v274_v1 = vld [vmem:[%s15655_s9] sm:$0xff] }
  0xd6   :  { %v11608_v58 = vadd.f32 %v713_v51, %v649_v54  ;;  %v283_v51 = vld [vmem:[%s15655_s9 + $0x48] sm:$0xff] }
  0xd7   :  { %775 = vmatpush.msrb.mxu0 %v298_v8  ;;  %v355_v54 = vld [vmem:[%s15655_s9 + $0x288] sm:$0xff]  ;;  %v321_v8 = vld [vmem:[%s15655_s9 + $0x178] sm:$0xff] }
  0xd8   :  { %926 = vmatmul.f32.gmra.mxu2 %v11323_v40  ;;  %v142_v40 = vld [vmem:[#allocation3 + $0x70] sm:$0xff]  ;;  %837 = vmatpush.msrb.mxu1 %v355_v54 }
  0xd9   :  { %991 = vmatmul.f32.gmra.mxu3 %v11328_v41  ;;  %1372 = vmatpush.msra.mxu2 %v142_v40  ;;  %v349_v40 = vld [vmem:[%s15655_s9 + $0x258] sm:$0xff] }
  0xda   :  { %776 = vmatpush.msrb.mxu0 %v295_v10  ;;  %838 = vmatpush.msrb.mxu1 %v352_v60  ;;  %v343_v10 = vld [vmem:[%s15655_s9 + $0x228] sm:$0xff] }
  0xdb   :  { %v651_v63 = vpop.f32.mrf.mxu2  ;;  %1373 = vmatpush.msra.mxu2 %v141_v6  ;;  %v346_v6 = vld [vmem:[%s15655_s9 + $0x240] sm:$0xff]  ;;  %v157_v60 = vld [vmem:[#allocation3 + $0xe8] sm:$0xff] }
  0xdc   :  { %v716_v0 = vpop.f32.mrf.mxu3  ;;  %v652_v41 = vadd.f32 %v11573_v22, %v651_v63  ;;  %777 = vmatpush.msrb.mxu0 %v292_v15  ;;  %v277_v63 = vld [vmem:[%s15655_s9 + $0x18] sm:$0xff]  ;;  %839 = vmatpush.msrb.mxu1 %v349_v40  ;;  %v268_v40 = vld [vmem:[#allocation8 + $0x150] sm:$0xff] }
  0xdd   :  { %1374 = vmatpush.msra.mxu2 %v140_v9  ;;  %v132_v9 = vld [vmem:[#allocation3 + $0x20] sm:$0xff] }
  0xde   :  { %v11627_v7 = vadd.f32 %v716_v0, %v652_v41  ;;  %778 = vmatpush.msrb.mxu0 %v289_v28  ;;  %v133_v41 = vld [vmem:[#allocation3 + $0x28] sm:$0xff]  ;;  %840 = vmatpush.msrb.mxu1 %v346_v6  ;;  %v265_v6 = vld [vmem:[#allocation8 + $0x138] sm:$0xff] }
  0xdf   :  { %1375 = vmatpush.msra.mxu2 %v139_v12  ;;  %v315_v28 = vld [vmem:[%s15655_s9 + $0x148] sm:$0xff] }
  0xe0   :  { %929 = vmatmul.f32.gmra.mxu2 %v11335_v42  ;;  %779 = vmatpush.msrb.mxu0 %v286_v36  ;;  %v312_v36 = vld [vmem:[%s15655_s9 + $0x130] sm:$0xff] }
  0xe1   :  { %994 = vmatmul.f32.gmra.mxu3 %v11340_v43  ;;  %1376 = vmatpush.msra.mxu2 %v138_v33  ;;  %v340_v33 = vld [vmem:[%s15655_s9 + $0x210] sm:$0xff] }
  0xe2   :  { %780 = vmatpush.msrb.mxu0 %v283_v51  ;;  %841 = vmatpush.msrb.mxu1 %v343_v10  ;;  %v334_v51 = vld [vmem:[%s15655_s9 + $0x1e0] sm:$0xff] }
  0xe3   :  { %v654_v24 = vpop.f32.mrf.mxu2  ;;  %1377 = vmatpush.msra.mxu2 %v137_v31  ;;  %v337_v31 = vld [vmem:[%s15655_s9 + $0x1f8] sm:$0xff] }
  0xe4   :  { %v719_v25 = vpop.f32.mrf.mxu3  ;;  %v655_v27 = vadd.f32 %v11573_v22, %v654_v24  ;;  %v131_v24 = vld [vmem:[#allocation3 + $0x18] sm:$0xff]  ;;  %842 = vmatpush.msrb.mxu1 %v340_v33  ;;  %v259_v33 = vld [vmem:[#allocation8 + $0x108] sm:$0xff] }
  0xe5   :  { %1378 = vmatpush.msra.mxu2 %v136_v50  ;;  %v158_v50 = vld [vmem:[#allocation3 + $0xf0] sm:$0xff] }
  0xe6   :  { %v11655_v46 = vadd.f32 %v719_v25, %v655_v27  ;;  %843 = vmatpush.msrb.mxu1 %v337_v31  ;;  %1392 = vmatpush.msra.mxu3 %v158_v50  ;;  %v154_v31 = vld [vmem:[#allocation3 + $0xd0] sm:$0xff]  ;;  %v363_v50 = vld [vmem:[%s15655_s9 + $0x2c8] sm:$0xff] }
  0xe7   :  { %1379 = vmatpush.msra.mxu2 %v135_v57  ;;  %v128_v57 = vld [vmem:[#allocation3] sm:$0xff] }
  0xe8   :  { %932 = vmatmul.f32.gmra.mxu2 %v11347_v44  ;;  %v280_v44 = vld [vmem:[%s15655_s9 + $0x30] sm:$0xff]  ;;  %844 = vmatpush.msrb.mxu1 %v334_v51  ;;  %v153_v51 = vld [vmem:[#allocation3 + $0xc8] sm:$0xff] }
  0xe9   :  { %997 = vmatmul.f32.gmra.mxu3 %v11352_v45  ;;  %781 = vmatpush.msrb.mxu0 %v280_v44 }
  0xea   :  { %1380 = vmatpush.msra.mxu2 %v134_v62  ;;  %v306_v62 = vld [vmem:[%s15655_s9 + $0x100] sm:$0xff]  ;;  %1393 = vmatpush.msra.mxu3 %v157_v60  ;;  %v151_v60 = vld [vmem:[#allocation3 + $0xb8] sm:$0xff] }
  0xeb   :  { %v657_v45 = vpop.f32.mrf.mxu2  ;;  %782 = vmatpush.msrb.mxu0 %v277_v63  ;;  %v328_v63 = vld [vmem:[%s15655_s9 + $0x1b0] sm:$0xff] }
  0xec   :  { %v722_v59 = vpop.f32.mrf.mxu3  ;;  %v658_v61 = vadd.f32 %v11573_v22, %v657_v45  ;;  %1381 = vmatpush.msra.mxu2 %v133_v41  ;;  %v331_v45 = vld [vmem:[%s15655_s9 + $0x1c8] sm:$0xff] }
  0xed   :  { %783 = vmatpush.msrb.mxu0 %v274_v1  ;;  %845 = vmatpush.msrb.mxu1 %v331_v45  ;;  %v303_v41 = vld [vmem:[%s15655_s9 + $0xe8] sm:$0xff]  ;;  %v325_v1 = vld [vmem:[%s15655_s9 + $0x198] sm:$0xff] }
  0xee   :  { %v11683_v0 = vadd.f32 %v722_v59, %v658_v61  ;;  %1382 = vmatpush.msra.mxu2 %v132_v9  ;;  %v271_v59 = vld [vmem:[#allocation8 + $0x168] sm:$0xff]  ;;  %v322_v9 = vld [vmem:[%s15655_s9 + $0x180] sm:$0xff]  ;;  %v285_v45 = vld [vmem:[%s15655_s9 + $0x58] sm:$0xff]  ;;  %784 = vmatmul.f32.vlgmr.msrb.gmra.mxu0 %v11275_v32 }
  0xef   :  { %1028 = vmatpush.msra.mxu0 %v321_v8  ;;  %846 = vmatpush.msrb.mxu1 %v328_v63  ;;  %v300_v8 = vld [vmem:[%s15655_s9 + $0xd0] sm:$0xff]  ;;  %v282_v63 = vld [vmem:[%s15655_s9 + $0x40] sm:$0xff]  ;;  %v339_v32 = vld [vmem:[%s15655_s9 + $0x208] sm:$0xff] }
  0xf0   :  { %935 = vmatmul.f32.gmra.mxu2 %v11359_v47 }
  0xf1   :  { %1000 = vmatmul.f32.gmra.mxu3 %v11364_v48  ;;  %1029 = vmatpush.msra.mxu0 %v318_v23  ;;  %v297_v23 = vld [vmem:[%s15655_s9 + $0xb8] sm:$0xff] }
  0xf2   :  { %1383 = vmatpush.msra.mxu2 %v131_v24  ;;  %847 = vmatpush.msrb.mxu1 %v325_v1  ;;  %v369_v24 = vld [vmem:[%s15655_s9 + $0x2f8] sm:$0xff]  ;;  %v244_v1 = vld [vmem:[#allocation8 + $0x90] sm:$0xff] }
  0xf3   :  { %v660_v12 = vpop.f32.mrf.mxu2  ;;  %1030 = vmatpush.msra.mxu0 %v315_v28  ;;  %v294_v28 = vld [vmem:[%s15655_s9 + $0xa0] sm:$0xff] }
  0xf4   :  { %v725_v15 = vpop.f32.mrf.mxu3  ;;  %v661_v25 = vadd.f32 %v11573_v22, %v660_v12  ;;  %1384 = vmatpush.msra.mxu2 %v130_v30  ;;  %v156_v12 = vld [vmem:[#allocation3 + $0xe0] sm:$0xff]  ;;  %848 = vmatpush.msrb.mxu1 %v322_v9  ;;  %v279_v9 = vld [vmem:[%s15655_s9 + $0x28] sm:$0xff] }
  0xf5   :  { %1031 = vmatpush.msra.mxu0 %v312_v36  ;;  %1394 = vmatpush.msra.mxu3 %v156_v12  ;;  %v366_v30 = vld [vmem:[%s15655_s9 + $0x2e0] sm:$0xff]  ;;  %v256_v36 = vld [vmem:[#allocation8 + $0xf0] sm:$0xff]  ;;  %v351_v12 = vld [vmem:[%s15655_s9 + $0x268] sm:$0xff] }
  0xf6   :  { %v11711_v27 = vadd.f32 %v725_v15, %v661_v25  ;;  %1385 = vmatpush.msra.mxu2 %v129_v37  ;;  %v262_v15 = vld [vmem:[#allocation8 + $0x120] sm:$0xff]  ;;  %v155_v25 = vld [vmem:[#allocation3 + $0xd8] sm:$0xff]  ;;  %1093 = vmatpush.msra.mxu1 %v369_v24  ;;  %v291_v37 = vld [vmem:[%s15655_s9 + $0x88] sm:$0xff] }
  0xf7   :  { %1395 = vmatpush.msra.mxu3 %v155_v25  ;;  %v276_v24 = vld [vmem:[%s15655_s9 + $0x10] sm:$0xff] }
  0xf8   :  { %938 = vmatmul.f32.gmra.mxu2 %v11377_v55  ;;  %v309_v55 = vld [vmem:[%s15655_s9 + $0x118] sm:$0xff]  ;;  %1094 = vmatpush.msra.mxu1 %v366_v30  ;;  %v348_v25 = vld [vmem:[%s15655_s9 + $0x250] sm:$0xff] }
  0xf9   :  { %1003 = vmatmul.f32.gmra.mxu3 %v11382_v56  ;;  %1032 = vmatpush.msra.mxu0 %v309_v55  ;;  %v253_v55 = vld [vmem:[#allocation8 + $0xd8] sm:$0xff] }
  0xfa   :  { %1386 = vmatpush.msra.mxu2 %v128_v57  ;;  %1396 = vmatpush.msra.mxu3 %v154_v31  ;;  %v152_v57 = vld [vmem:[#allocation3 + $0xc0] sm:$0xff]  ;;  %v345_v30 = vld [vmem:[%s15655_s9 + $0x238] sm:$0xff] }
  0xfb   :  { %v663_v56 = vpop.f32.mrf.mxu2  ;;  %1033 = vmatpush.msra.mxu0 %v306_v62  ;;  %1095 = vmatpush.msra.mxu1 %v363_v50  ;;  %v247_v62 = vld [vmem:[#allocation8 + $0xa8] sm:$0xff]  ;;  %v147_v31 = vld [vmem:[#allocation3 + $0x98] sm:$0xff] }
  0xfc   :  { %v728_v54 = vpop.f32.mrf.mxu3  ;;  %v664_v44 = vadd.f32 %v11573_v22, %v663_v56  ;;  %1419 = vmatpush.msrb.mxu2 %v271_v59  ;;  %1397 = vmatpush.msra.mxu3 %v153_v51  ;;  %v357_v59 = vld [vmem:[%s15655_s9 + $0x298] sm:$0xff]  ;;  %v232_v51 = vld [vmem:[#allocation8 + $0x30] sm:$0xff] }
  0xfd   :  { %1034 = vmatpush.msra.mxu0 %v303_v41  ;;  %v150_v41 = vld [vmem:[#allocation3 + $0xb0] sm:$0xff] }
  0xfe   :  { %v11736_v61 = vadd.f32 %v728_v54, %v664_v44  ;;  %1420 = vmatpush.msrb.mxu2 %v268_v40  ;;  %v360_v54 = vld [vmem:[%s15655_s9 + $0x2b0] sm:$0xff]  ;;  %v250_v44 = vld [vmem:[#allocation8 + $0xc0] sm:$0xff]  ;;  %1398 = vmatpush.msra.mxu3 %v152_v57  ;;  %v229_v57 = vld [vmem:[#allocation8 + $0x18] sm:$0xff] }
  0xff   :  { %1035 = vmatpush.msra.mxu0 %v300_v8  ;;  %1096 = vmatpush.msra.mxu1 %v360_v54  ;;  %v354_v40 = vld [vmem:[%s15655_s9 + $0x280] sm:$0xff]  ;;  %v1355_v54 = vrot.slane %v11292_v35, 1  ;;  %v1357_v35 = vrot.slane %v11340_v43, 7 }
 0x100   :  { %941 = vmatmul.f32.gmra.mxu2 %v11407_v4  ;;  %1399 = vmatpush.msra.mxu3 %v151_v60  ;;  %v333_v60 = vld [vmem:[%s15655_s9 + $0x1d8] sm:$0xff] }
 0x101   :  { %1006 = vmatmul.f32.gmra.mxu3 %v11412_v5  ;;  %1421 = vmatpush.msrb.mxu2 %v265_v6 }
 0x102   :  { %1036 = vmatpush.msra.mxu0 %v297_v23  ;;  %1097 = vmatpush.msra.mxu1 %v357_v59  ;;  %v241_v23 = vld [vmem:[#allocation8 + $0x78] sm:$0xff]  ;;  %v226_v59 = vld [vmem:[#allocation8] sm:$0xff] }
 0x103   :  { %v11759_v10 = vpop.f32.mrf.mxu2  ;;  %1422 = vmatpush.msrb.mxu2 %v262_v15  ;;  %v149_v15 = vld [vmem:[#allocation3 + $0xa8] sm:$0xff]  ;;  %1400 = vmatpush.msra.mxu3 %v150_v41 }
 0x104   :  { %v11761_v11 = vpop.f32.mrf.mxu3  ;;  %1037 = vmatpush.msra.mxu0 %v294_v28  ;;  %1098 = vmatpush.msra.mxu1 %v354_v40  ;;  %v238_v28 = vld [vmem:[#allocation8 + $0x60] sm:$0xff] }
 0x105   :  { %1423 = vmatpush.msrb.mxu2 %v259_v33  ;;  %1401 = vmatpush.msra.mxu3 %v149_v15  ;;  %v148_v33 = vld [vmem:[#allocation3 + $0xa0] sm:$0xff] }
 0x106   :  { %1038 = vmatpush.msra.mxu0 %v291_v37  ;;  %1099 = vmatpush.msra.mxu1 %v351_v12 }
 0x107   :  { %1424 = vmatpush.msrb.mxu2 %v256_v36  ;;  %v235_v36 = vld [vmem:[#allocation8 + $0x48] sm:$0xff]  ;;  %1402 = vmatpush.msra.mxu3 %v148_v33  ;;  %v324_v33 = vld [vmem:[%s15655_s9 + $0x190] sm:$0xff] }
 0x108   :  { %944 = vmatmul.f32.gmra.mxu2 %v11443_v20  ;;  %1100 = vmatpush.msra.mxu1 %v348_v25 }
 0x109   :  { %1009 = vmatmul.f32.gmra.mxu3 %v11448_v21  ;;  %v288_v21 = vld [vmem:[%s15655_s9 + $0x70] sm:$0xff]  ;;  %1425 = vmatpush.msrb.mxu2 %v253_v55  ;;  %v145_v55 = vld [vmem:[#allocation3 + $0x88] sm:$0xff] }
 0x10a   :  { %1039 = vmatpush.msra.mxu0 %v288_v21  ;;  %1101 = vmatpush.msra.mxu1 %v345_v30  ;;  %v1334_v21 = vrot.slane %v11287_v34, 1  ;;  %v1337_v34 = vrot.slane %v11335_v42, 7 }
 0x10b   :  { %v11784_v56 = vpop.f32.mrf.mxu2  ;;  %1426 = vmatpush.msrb.mxu2 %v250_v44  ;;  %1403 = vmatpush.msra.mxu3 %v147_v31  ;;  %v336_v44 = vld [vmem:[%s15655_s9 + $0x1f0] sm:$0xff]  ;;  %v1363_v31 = vrot.slane %v11478_v53, 4 }
 0x10c   :  { %v11786_v20 = vpop.f32.mrf.mxu3  ;;  %1040 = vmatpush.msra.mxu0 %v285_v45  ;;  %v144_v45 = vld [vmem:[#allocation3 + $0x80] sm:$0xff] }
 0x10d   :  { %1427 = vmatpush.msrb.mxu2 %v247_v62  ;;  %v1336_v62 = vsel %vm16026_vm0, %v11311_v38, %v1334_v21  ;;  %v11864_v38 = vld [vmem:[%s15647_s1 + $0x10] sm:$0xff] }
 0x10e   :  { %1041 = vmatpush.msra.mxu0 %v282_v63  ;;  %v1356_v63 = vsel %vm16026_vm0, %v11316_v39, %v1355_v54  ;;  %v1340_v39 = vrot.slane %v11359_v47, 6  ;;  %v1339_v15 = vsel %vm16025_vm1, %v1337_v34, %v1336_v62  ;;  %v1343_v47 = vrot.slane %v11407_v4, 5  ;;  %v11917_v54 = vld [vmem:[%s15647_s1 + $0x18] sm:$0xff] }
 0x10f   :  { %1428 = vmatpush.msrb.mxu2 %v244_v1  ;;  %v330_v1 = vld [vmem:[%s15655_s9 + $0x1c0] sm:$0xff]  ;;  %787 = vmatmul.f32.gmra.mxu0 %v11864_v38 }
 0x110   :  { %947 = vmatmul.f32.gmra.mxu2 %v11473_v52  ;;  %1042 = vmatpush.msra.mxu0 %v279_v9  ;;  %v1359_v9 = vrot.slane %v11364_v48, 6  ;;  %v1361_v48 = vrot.slane %v11412_v5, 5  ;;  %v1346_v5 = vrot.slane %v11473_v52, 4  ;;  %v1349_v52 = vrot.slane %v11529_v13, 3 }
 0x111   :  { %1012 = vmatmul.f32.gmra.mxu3 %v11478_v53  ;;  %1429 = vmatpush.msrb.mxu2 %v241_v23  ;;  %v1358_v23 = vsel %vm16025_vm1, %v1357_v35, %v1356_v63  ;;  %v1365_v53 = vrot.slane %v11534_v14, 3  ;;  %v270_v63 = vld [vmem:[#allocation8 + $0x160] sm:$0xff] }
 0x112   :  { %1043 = vmatpush.msra.mxu0 %v276_v24  ;;  %v327_v24 = vld [vmem:[%s15655_s9 + $0x1a8] sm:$0xff]  ;;  %v1360_v30 = vsel %vm16024_vm2, %v1359_v9, %v1358_v23  ;;  %v272_v23 = vld [vmem:[#allocation8 + $0x170] sm:$0xff] }
 0x113   :  { %v11810_v6 = vpop.f32.mrf.mxu2  ;;  %1430 = vmatpush.msrb.mxu2 %v238_v28  ;;  %v1342_v28 = vsel %vm16024_vm2, %v1340_v39, %v1339_v15  ;;  %v11950_v39 = vld [vmem:[%s15646_s0] sm:$0xff] }
 0x114   :  { %v11812_v8 = vpop.f32.mrf.mxu3  ;;  %v258_v15 = vld [vmem:[#allocation8 + $0x100] sm:$0xff] }
 0x115   :  { %1431 = vmatpush.msrb.mxu2 %v235_v36  ;;  %v1345_v36 = vsel %vm16023_vm3, %v1343_v47, %v1342_v28  ;;  %v11961_v47 = vld [vmem:[%s15647_s1 + $0x38] sm:$0xff] }
 0x116   :  { %v269_v28 = vld [vmem:[#allocation8 + $0x158] sm:$0xff] }
 0x117   :  { %1432 = vmatpush.msrb.mxu2 %v232_v51 }
 0x118   :  { %950 = vmatmul.f32.gmra.mxu2 %v11507_v2  ;;  %v342_v2 = vld [vmem:[%s15655_s9 + $0x220] sm:$0xff] }
 0x119   :  { %1015 = vmatmul.f32.gmra.mxu3 %v11512_v3  ;;  %v146_v3 = vld [vmem:[#allocation3 + $0x90] sm:$0xff]  ;;  %1102 = vmatpush.msra.mxu1 %v342_v2 }
 0x11a   :  { %1404 = vmatpush.msra.mxu3 %v146_v3  ;;  %1433 = vmatpush.msrb.mxu2 %v229_v57  ;;  %v1348_v3 = vsel %vm16022_vm4, %v1346_v5, %v1345_v36  ;;  %v555_v5 = vpop.f32.mrf.mxu1  ;;  %v11977_v36 = vld [vmem:[%s15647_s1 + $0x50] sm:$0xff] }
 0x11b   :  { %v675_v37 = vpop.f32.mrf.mxu2  ;;  %1103 = vmatpush.msra.mxu1 %v339_v32  ;;  %v1352_v32 = vrot.slane %v11557_v18, 2 }
 0x11c   :  { %v740_v50 = vpop.f32.mrf.mxu3  ;;  %1405 = vmatpush.msra.mxu3 %v145_v55  ;;  %v676_v42 = vadd.f32 %v11573_v22, %v675_v37  ;;  %1434 = vmatpush.msrb.mxu2 %v226_v59  ;;  %v1362_v37 = vsel %vm16023_vm3, %v1361_v48, %v1360_v30  ;;  %v1367_v55 = vrot.slane %v11562_v19, 2  ;;  %v252_v30 = vld [vmem:[#allocation8 + $0xd0] sm:$0xff] }
 0x11d   :  { %1104 = vmatpush.msra.mxu1 %v336_v44  ;;  %v1364_v51 = vsel %vm16022_vm4, %v1363_v31, %v1362_v37  ;;  %v266_v31 = vld [vmem:[#allocation8 + $0x140] sm:$0xff]  ;;  %v249_v37 = vld [vmem:[#allocation8 + $0xb8] sm:$0xff] }
 0x11e   :  { %1406 = vmatpush.msra.mxu3 %v144_v45  ;;  %v741_v25 = vadd.f32 %v740_v50, %v676_v42  ;;  %v11896_v50 = vld [vmem:[%s15647_s1 + $0x20] sm:$0xff]  ;;  %v11926_v45 = vld [vmem:[%s15647_s1 + $0x30] sm:$0xff] }
 0x11f   :  { %1105 = vmatpush.msra.mxu1 %v333_v60  ;;  %790 = vmatmul.f32.gmra.mxu0 %v11896_v50  ;;  %v273_v60 = vld [vmem:[#allocation8 + $0x178] sm:$0xff] }
 0x120   :  { %953 = vmatmul.f32.gmra.mxu2 %v11529_v13  ;;  %v1351_v13 = vsel %vm16021_vm5, %v1349_v52, %v1348_v3  ;;  %1439 = vmatpush.msrb.mxu3 %v272_v23  ;;  %v246_v3 = vld [vmem:[#allocation8 + $0xa0] sm:$0xff]  ;;  %v12005_v23 = vld [vmem:[%s15647_s1 + $0x58] sm:$0xff] }
 0x121   :  { %1018 = vmatmul.f32.gmra.mxu3 %v11534_v14  ;;  %1106 = vmatpush.msra.mxu1 %v330_v1  ;;  %v1366_v14 = vsel %vm16021_vm5, %v1365_v53, %v1364_v51  ;;  %v1354_v59 = vsel %vm16020_vm6, %v1352_v32, %v1351_v13  ;;  %v11944_v1 = vld [vmem:[%s15647_s1 + $0x40] sm:$0xff]  ;;  %v263_v53 = vld [vmem:[#allocation8 + $0x128] sm:$0xff]  ;;  %v260_v32 = vld [vmem:[#allocation8 + $0x110] sm:$0xff] }
 0x122   :  { %v1368_v34 = vsel %vm16020_vm6, %v1367_v55, %v1366_v14  ;;  %1440 = vmatpush.msrb.mxu3 %v269_v28  ;;  %v243_v55 = vld [vmem:[#allocation8 + $0x88] sm:$0xff] }
 0x123   :  { %v678_v40 = vpop.f32.mrf.mxu2  ;;  %1107 = vmatpush.msra.mxu1 %v327_v24  ;;  %v11986_v13 = vld [vmem:[%s15647_s1 + $0x48] sm:$0xff] }
 0x124   :  { %v743_v41 = vpop.f32.mrf.mxu3  ;;  %v679_v43 = vadd.f32 %v11573_v22, %v678_v40  ;;  %v11934_v40 = vld [vmem:[%s15647_s1 + $0x28] sm:$0xff]  ;;  %1441 = vmatpush.msrb.mxu3 %v266_v31 }
 0x125   :  { %1108 = vmatpush.msra.mxu1 %v324_v33 }
 0x126   :  { %v744_v12 = vadd.f32 %v743_v41, %v679_v43  ;;  %v264_v43 = vld [vmem:[#allocation8 + $0x130] sm:$0xff]  ;;  %1442 = vmatpush.msrb.mxu3 %v263_v53 }
 0x127   :  { %793 = vmatmul.f32.gmra.mxu0 %v11926_v45  ;;  %v416_v53 = vld [vmem:[#allocation10 + $0x170] sm:$0xff] }
 0x128   :  { %10383 = vtanh.f32 %v744_v12  ;;  %956 = vmatmul.f32.gmra.mxu2 %v11543_v16  ;;  %v11886_v16 = vld [vmem:[%s15647_s1 + $0x8] sm:$0xff]  ;;  %v261_v12 = vld [vmem:[#allocation8 + $0x118] sm:$0xff]  ;;  %1443 = vmatpush.msrb.mxu3 %v260_v32 }
 0x129   :  { %1021 = vmatmul.f32.gmra.mxu3 %v11548_v17  ;;  %849 = vmatmul.f32.vlgmr.msrb.gmra.mxu1 %v11886_v16  ;;  %10385 = vtanh.f32 %v741_v25  ;;  %v255_v25 = vld [vmem:[#allocation8 + $0xe8] sm:$0xff]  ;;  %v413_v32 = vld [vmem:[#allocation10 + $0x158] sm:$0xff] }
 0x12b   :  { %v681_v4 = vpop.f32.mrf.mxu2 }
 0x12c   :  { %v746_v17 = vpop.f32.mrf.mxu3 }
 0x12e   :  { %v11899_v2 = vpop.eup %10383 }
 0x12f   :  { %16071 = vst [vmem:[#allocation14_spill] sm:$0xff] %v11899_v2  ;;  %1743 = vmatpush.xpose.msrb.mxu0 %v11899_v2  ;;  %v11910_v21 = vpop.eup %10385 }
 0x130   :  { %959 = vmatmul.f32.gmra.mxu2 %v11557_v18  ;;  %16072 = vst [vmem:[#allocation15_spill] sm:$0xff] %v11910_v21  ;;  %v682_v18 = vadd.f32 %v11573_v22, %v681_v4  ;;  %796 = vmatmul.f32.gmra.mxu0 %v11944_v1  ;;  %v11972_v4 = vld [vmem:[%s15651_s5] ss:$0 sm:$0xff] }
 0x131   :  { %1024 = vmatmul.f32.gmra.mxu3 %v11562_v19  ;;  %852 = vmatmul.f32.gmra.mxu1 %v11917_v54 }
 0x132   :  { %v747_v62 = vadd.f32 %v746_v17, %v682_v18  ;;  %v490_v17 = vpop.f32.mrf.mxu0  ;;  %v240_v18 = vld [vmem:[#allocation8 + $0x70] sm:$0xff] }
 0x133   :  { %v684_v57 = vpop.f32.mrf.mxu2  ;;  %1744 = vmatpush.xpose.msrb.mxu0 %v11910_v21  ;;  %v491_v52 = vadd.f32 %v11972_v4, %v490_v17  ;;  %v228_v17 = vld [vmem:[#allocation8 + $0x10] sm:$0xff]  ;;  %v371_v21 = vld [vmem:[#allocation10 + $0x8] sm:$0xff] }
 0x134   :  { %v749_v44 = vpop.f32.mrf.mxu3  ;;  %v685_v19 = vadd.f32 %v11573_v22, %v684_v57  ;;  %v267_v22 = vld [vmem:[#allocation8 + $0x148] sm:$0xff] }
 0x135   :  { %v11981_v51 = vadd.f32 %v555_v5, %v491_v52  ;;  %v12015_v52 = vld [vmem:[%s15647_s1 + $0x70] sm:$0xff] }
 0x136   :  { %v750_v35 = vadd.f32 %v749_v44, %v685_v19  ;;  %v257_v44 = vld [vmem:[#allocation8 + $0xf8] sm:$0xff] }
 0x137   :  { %16075 = vst [vmem:[#allocation18_spill] sm:$0xff] %v11981_v51  ;;  %1444 = vmatpush.msrb.mxu3 %v257_v44  ;;  %v239_v44 = vld [vmem:[#allocation8 + $0x68] sm:$0xff]  ;;  %v377_v51 = vld [vmem:[#allocation10 + $0x38] sm:$0xff] }
 0x138   :  { %10387 = vtanh.f32 %v750_v35  ;;  %1387 = vmatmul.f32.vlgmr.msra.gmra.mxu2 %v1354_v59  ;;  %799 = vmatmul.f32.gmra.mxu0 %v11977_v36  ;;  %v558_v59 = vpop.f32.mrf.mxu1  ;;  %v11996_v35 = vld [vmem:[%s15647_s1 + $0x60] sm:$0xff] }
 0x139   :  { %1407 = vmatmul.f32.vlgmr.msra.gmra.mxu3 %v1368_v34  ;;  %1459 = vmatpush.msra.mxu2 %v273_v60  ;;  %10389 = vtanh.f32 %v747_v62  ;;  %v254_v34 = vld [vmem:[#allocation8 + $0xe0] sm:$0xff]  ;;  %v237_v62 = vld [vmem:[#allocation8 + $0x58] sm:$0xff] }
 0x13a   :  { %855 = vmatmul.f32.gmra.mxu1 %v11934_v40  ;;  %v493_v19 = vpop.f32.mrf.mxu0  ;;  %1445 = vmatpush.msrb.mxu3 %v254_v34  ;;  %10391 = vtanh.f32 %v11585_v29  ;;  %v385_v29 = vld [vmem:[#allocation10 + $0x78] sm:$0xff] }
 0x13b   :  { %1460 = vmatpush.msra.mxu2 %v270_v63  ;;  %v11937_v41 = vpop.f32.mrf.mxu2  ;;  %v494_v60 = vadd.f32 %v11972_v4, %v493_v19  ;;  %v251_v63 = vld [vmem:[#allocation8 + $0xc8] sm:$0xff]  ;;  %v410_v19 = vld [vmem:[#allocation10 + $0x140] sm:$0xff]  ;;  %10393 = vtanh.f32 %v11578_v26 }
 0x13c   :  { %v11939_v42 = vpop.f32.mrf.mxu3  ;;  %1446 = vmatpush.msrb.mxu3 %v251_v63  ;;  %v12029_v63 = vld [vmem:[%s15647_s1 + $0x68] sm:$0xff]  ;;  %10395 = vtanh.f32 %v11608_v58 }
 0x13d   :  { %1461 = vmatpush.msra.mxu2 %v267_v22  ;;  %v12000_v22 = vadd.f32 %v558_v59, %v494_v60  ;;  %v407_v60 = vld [vmem:[#allocation10 + $0x128] sm:$0xff]  ;;  %10397 = vtanh.f32 %v11655_v46 }
 0x13e   :  { %v11952_v9 = vpop.eup %10387  ;;  %10399 = vtanh.f32 %v11592_v49 }
 0x13f   :  { %16073 = vst [vmem:[#allocation16_spill] sm:$0xff] %v11952_v9  ;;  %1462 = vmatpush.msra.mxu2 %v264_v43  ;;  %1763 = vmatpush.xpose.msrb.mxu1 %v11952_v9  ;;  %v11956_v24 = vpop.eup %10389  ;;  %v234_v43 = vld [vmem:[#allocation8 + $0x40] sm:$0xff]  ;;  %v373_v9 = vld [vmem:[#allocation10 + $0x18] sm:$0xff]  ;;  %10401 = vtanh.f32 %v11627_v7 }
 0x140   :  { %1435 = vmatmul.f32.vlgmr.msrb.gmra.mxu2 %v11950_v39  ;;  %16074 = vst [vmem:[#allocation17_spill] sm:$0xff] %v11956_v24  ;;  %802 = vmatmul.f32.gmra.mxu0 %v11996_v35  ;;  %v561_v31 = vpop.f32.mrf.mxu1  ;;  %10403 = vtanh.f32 %v11711_v27 }
 0x141   :  { %1463 = vmatpush.msra.mxu2 %v261_v12  ;;  %16078 = vst [vmem:[#allocation21_spill] sm:$0xff] %v12000_v22  ;;  %v248_v12 = vld [vmem:[#allocation8 + $0xb0] sm:$0xff]  ;;  %10405 = vtanh.f32 %v11683_v0 }
 0x142   :  { %858 = vmatmul.f32.gmra.mxu1 %v11961_v47  ;;  %1447 = vmatpush.msrb.mxu3 %v248_v12  ;;  %v496_v5 = vpop.f32.mrf.mxu0 }
 0x143   :  { %1464 = vmatpush.msra.mxu2 %v258_v15  ;;  %v11964_v48 = vpop.f32.mrf.mxu2  ;;  %1764 = vmatpush.xpose.msrb.mxu1 %v11956_v24  ;;  %v231_v15 = vld [vmem:[#allocation8 + $0x28] sm:$0xff] }
 0x144   :  { %v11966_v33 = vpop.f32.mrf.mxu3 }
 0x145   :  { %1465 = vmatpush.msra.mxu2 %v255_v25 }
 0x147   :  { %1466 = vmatpush.msra.mxu2 %v252_v30  ;;  %v245_v30 = vld [vmem:[#allocation8 + $0x98] sm:$0xff] }
 0x148   :  { %1448 = vmatpush.msrb.mxu3 %v245_v30  ;;  %805 = vmatmul.f32.gmra.mxu0 %v12015_v52  ;;  %v564_v12 = vpop.f32.mrf.mxu1  ;;  %v404_v30 = vld [vmem:[#allocation10 + $0x110] sm:$0xff] }
 0x149   :  { %1467 = vmatpush.msra.mxu2 %v249_v37  ;;  %v242_v37 = vld [vmem:[#allocation8 + $0x80] sm:$0xff] }
 0x14a   :  { %861 = vmatmul.f32.gmra.mxu1 %v11986_v13  ;;  %1449 = vmatpush.msrb.mxu3 %v242_v37  ;;  %v415_v37 = vld [vmem:[#allocation10 + $0x168] sm:$0xff] }
 0x14b   :  { %1468 = vmatpush.msra.mxu2 %v246_v3  ;;  %v11989_v14 = vpop.f32.mrf.mxu2  ;;  %v497_v3 = vadd.f32 %v11972_v4, %v496_v5  ;;  %v227_v5 = vld [vmem:[#allocation8 + $0x8] sm:$0xff] }
 0x14c   :  { %16076 = vst [vmem:[#allocation19_spill] sm:$0xff] %v11989_v14  ;;  %v11991_v57 = vpop.f32.mrf.mxu3  ;;  %1450 = vmatpush.msrb.mxu3 %v239_v44  ;;  %v398_v44 = vld [vmem:[#allocation10 + $0xe0] sm:$0xff]  ;;  %v12171_v14 = vld [vmem:[%s15647_s1 + $0xd8] sm:$0xff] }
 0x14d   :  { %16077 = vst [vmem:[#allocation20_spill] sm:$0xff] %v11991_v57  ;;  %1469 = vmatpush.msra.mxu2 %v243_v55  ;;  %v12019_v55 = vadd.f32 %v561_v31, %v497_v3  ;;  %v12036_v31 = vld [vmem:[%s15647_s1 + $0x80] sm:$0xff]  ;;  %v384_v57 = vld [vmem:[#allocation10 + $0x70] sm:$0xff] }
 0x14f   :  { %1470 = vmatpush.msra.mxu2 %v240_v18  ;;  %16081 = vst [vmem:[#allocation24_spill] sm:$0xff] %v12019_v55  ;;  %v236_v18 = vld [vmem:[#allocation8 + $0x50] sm:$0xff]  ;;  %v386_v55 = vld [vmem:[#allocation10 + $0x80] sm:$0xff] }
 0x150   :  { %1451 = vmatpush.msrb.mxu3 %v236_v18  ;;  %808 = vmatmul.f32.gmra.mxu0 %v12036_v31 }
 0x151   :  { %1471 = vmatpush.msra.mxu2 %v237_v62  ;;  %v233_v62 = vld [vmem:[#allocation8 + $0x38] sm:$0xff] }
 0x152   :  { %864 = vmatmul.f32.gmra.mxu1 %v12005_v23  ;;  %1452 = vmatpush.msrb.mxu3 %v233_v62  ;;  %v395_v62 = vld [vmem:[#allocation10 + $0xc8] sm:$0xff] }
 0x153   :  { %1472 = vmatpush.msra.mxu2 %v234_v43  ;;  %v12008_v25 = vpop.f32.mrf.mxu2  ;;  %v499_v43 = vpop.f32.mrf.mxu0 }
 0x154   :  { %16079 = vst [vmem:[#allocation22_spill] sm:$0xff] %v12008_v25  ;;  %v12010_v28 = vpop.f32.mrf.mxu3  ;;  %v12190_v25 = vld [vmem:[%s15647_s1 + $0xe8] sm:$0xff] }
 0x155   :  { %16080 = vst [vmem:[#allocation23_spill] sm:$0xff] %v12010_v28  ;;  %1473 = vmatpush.msra.mxu2 %v231_v15  ;;  %v230_v15 = vld [vmem:[#allocation8 + $0x20] sm:$0xff]  ;;  %v372_v28 = vld [vmem:[#allocation10 + $0x10] sm:$0xff] }
 0x156   :  { %1453 = vmatpush.msrb.mxu3 %v230_v15  ;;  %v567_v15 = vpop.f32.mrf.mxu1 }
 0x157   :  { %1474 = vmatpush.msra.mxu2 %v228_v17  ;;  %v500_v17 = vadd.f32 %v11972_v4, %v499_v43  ;;  %v409_v43 = vld [vmem:[#allocation10 + $0x138] sm:$0xff] }
 0x158   :  { %1475 = vmatmul.f32.vlgmr.msra.gmra.mxu2 %v11950_v39  ;;  %1454 = vmatpush.msrb.mxu3 %v227_v5  ;;  %v12056_v5 = vld [vmem:[%s15647_s1 + $0x90] sm:$0xff] }
 0x159   :  { %1506 = vmatpush.msrb.mxu2 %v416_v53  ;;  %v401_v53 = vld [vmem:[#allocation10 + $0xf8] sm:$0xff]  ;;  %v12039_v3 = vadd.f32 %v564_v12, %v500_v17  ;;  %1455 = vmatmul.f32.vlgmr.msrb.gmra.mxu3 %v11950_v39  ;;  %v392_v17 = vld [vmem:[#allocation10 + $0xb0] sm:$0xff] }
 0x15a   :  { %867 = vmatmul.f32.gmra.mxu1 %v12029_v63  ;;  %1486 = vmatpush.msra.mxu3 %v415_v37  ;;  %v403_v37 = vld [vmem:[#allocation10 + $0x108] sm:$0xff] }
 0x15b   :  { %1507 = vmatpush.msrb.mxu2 %v413_v32  ;;  %v12022_v59 = vpop.f32.mrf.mxu2  ;;  %16082 = vst [vmem:[#allocation25_spill] sm:$0xff] %v12039_v3  ;;  %v412_v32 = vld [vmem:[#allocation10 + $0x150] sm:$0xff]  ;;  %v502_v12 = vpop.f32.mrf.mxu0  ;;  %811 = vmatmul.f32.gmra.mxu0 %v12056_v5  ;;  %v383_v3 = vld [vmem:[#allocation10 + $0x68] sm:$0xff] }
 0x15c   :  { %v12024_v34 = vpop.f32.mrf.mxu3  ;;  %1487 = vmatpush.msra.mxu3 %v412_v32  ;;  %v503_v39 = vadd.f32 %v11972_v4, %v502_v12 }
 0x15d   :  { %1508 = vmatpush.msrb.mxu2 %v410_v19 }
 0x15e   :  { %1488 = vmatpush.msra.mxu3 %v409_v43  ;;  %v12059_v32 = vadd.f32 %v567_v15, %v503_v39  ;;  %v397_v15 = vld [vmem:[#allocation10 + $0xd8] sm:$0xff]  ;;  %v394_v39 = vld [vmem:[#allocation10 + $0xc0] sm:$0xff] }
 0x15f   :  { %1509 = vmatpush.msrb.mxu2 %v407_v60  ;;  %v12049_v60 = vld [vmem:[%s15647_s1 + $0x78] sm:$0xff] }
 0x160   :  { %16083 = vst [vmem:[#allocation26_spill] sm:$0xff] %v12059_v32  ;;  %v391_v32 = vld [vmem:[#allocation10 + $0xa8] sm:$0xff] }
 0x161   :  { %1510 = vmatpush.msrb.mxu2 %v404_v30  ;;  %v406_v30 = vld [vmem:[#allocation10 + $0x120] sm:$0xff] }
 0x162   :  { %870 = vmatmul.f32.gmra.mxu1 %v12049_v60  ;;  %1489 = vmatpush.msra.mxu3 %v406_v30 }
 0x163   :  { %1511 = vmatpush.msrb.mxu2 %v401_v53  ;;  %v12042_v18 = vpop.f32.mrf.mxu2  ;;  %v389_v53 = vld [vmem:[#allocation10 + $0x98] sm:$0xff]  ;;  %v505_v30 = vpop.f32.mrf.mxu0 }
 0x164   :  { %v12044_v19 = vpop.f32.mrf.mxu3  ;;  %1490 = vmatpush.msra.mxu3 %v403_v37  ;;  %v380_v37 = vld [vmem:[#allocation10 + $0x50] sm:$0xff] }
 0x165   :  { %1512 = vmatpush.msrb.mxu2 %v398_v44  ;;  %v400_v44 = vld [vmem:[#allocation10 + $0xf0] sm:$0xff] }
 0x166   :  { %1491 = vmatpush.msra.mxu3 %v400_v44  ;;  %v12075_v44 = vld [vmem:[%s15647_s1 + $0xa0] sm:$0xff] }
 0x167   :  { %1513 = vmatpush.msrb.mxu2 %v395_v62  ;;  %v12068_v62 = vld [vmem:[%s15647_s1 + $0x88] sm:$0xff]  ;;  %814 = vmatmul.f32.gmra.mxu0 %v12075_v44 }
 0x168   :  { %1492 = vmatpush.msra.mxu3 %v397_v15  ;;  %v374_v15 = vld [vmem:[#allocation10 + $0x20] sm:$0xff] }
 0x169   :  { %1514 = vmatpush.msrb.mxu2 %v392_v17  ;;  %v570_v17 = vpop.f32.mrf.mxu1 }
 0x16a   :  { %873 = vmatmul.f32.gmra.mxu1 %v12068_v62  ;;  %1493 = vmatpush.msra.mxu3 %v394_v39 }
 0x16b   :  { %1515 = vmatpush.msrb.mxu2 %v389_v53  ;;  %v12061_v43 = vpop.f32.mrf.mxu2  ;;  %v506_v53 = vadd.f32 %v11972_v4, %v505_v30 }
 0x16c   :  { %16084 = vst [vmem:[#allocation27_spill] sm:$0xff] %v12061_v43  ;;  %v12063_v12 = vpop.f32.mrf.mxu3  ;;  %1494 = vmatpush.msra.mxu3 %v391_v32  ;;  %v12133_v43 = vld [vmem:[%s15647_s1 + $0xb8] sm:$0xff] }
 0x16d   :  { %16085 = vst [vmem:[#allocation28_spill] sm:$0xff] %v12063_v12  ;;  %1516 = vmatpush.msrb.mxu2 %v386_v55  ;;  %v12078_v22 = vadd.f32 %v570_v17, %v506_v53  ;;  %v388_v55 = vld [vmem:[#allocation10 + $0x90] sm:$0xff]  ;;  %v508_v17 = vpop.f32.mrf.mxu0  ;;  %v12099_v53 = vpop.eup %10391  ;;  %v370_v12 = vld [vmem:[#allocation10] sm:$0xff] }
 0x16e   :  { %1495 = vmatpush.msra.mxu3 %v388_v55  ;;  %v509_v39 = vadd.f32 %v11972_v4, %v508_v17  ;;  %16089 = vst [vmem:[#allocation32_spill] sm:$0xff] %v12099_v53  ;;  %v379_v55 = vld [vmem:[#allocation10 + $0x48] sm:$0xff] }
 0x16f   :  { %1517 = vmatpush.msrb.mxu2 %v383_v3  ;;  %16086 = vst [vmem:[#allocation29_spill] sm:$0xff] %v12078_v22  ;;  %v12088_v3 = vld [vmem:[%s15647_s1 + $0x98] sm:$0xff] }
 0x170   :  { %1496 = vmatpush.msra.mxu3 %v385_v29  ;;  %v12104_v29 = vpop.eup %10393 }
 0x171   :  { %1518 = vmatpush.msrb.mxu2 %v380_v37  ;;  %v573_v32 = vpop.f32.mrf.mxu1  ;;  %v12096_v37 = vld [vmem:[%s15647_s1 + $0xb0] sm:$0xff]  ;;  %16091 = vst [vmem:[#allocation34_spill] sm:$0xff] %v12104_v29 }
 0x172   :  { %876 = vmatmul.f32.gmra.mxu1 %v12088_v3  ;;  %817 = vmatmul.f32.gmra.mxu0 %v12096_v37  ;;  %v12102_v26 = vadd.f32 %v573_v32, %v509_v39  ;;  %v12114_v32 = vld [vmem:[%s15647_s1 + $0xa8] sm:$0xff]  ;;  %v417_v39 = vld [vmem:[#allocation10 + $0x178] sm:$0xff] }
 0x173   :  { %1519 = vmatpush.msrb.mxu2 %v377_v51  ;;  %v12081_v30 = vpop.f32.mrf.mxu2  ;;  %v382_v51 = vld [vmem:[#allocation10 + $0x60] sm:$0xff] }
 0x174   :  { %16087 = vst [vmem:[#allocation30_spill] sm:$0xff] %v12081_v30  ;;  %v12083_v24 = vpop.f32.mrf.mxu3  ;;  %1497 = vmatpush.msra.mxu3 %v382_v51  ;;  %v12152_v30 = vld [vmem:[%s15647_s1 + $0xc8] sm:$0xff] }
 0x175   :  { %16088 = vst [vmem:[#allocation31_spill] sm:$0xff] %v12083_v24  ;;  %1520 = vmatpush.msrb.mxu2 %v374_v15  ;;  %v376_v15 = vld [vmem:[#allocation10 + $0x30] sm:$0xff]  ;;  %v511_v2 = vpop.f32.mrf.mxu0 }
 0x176   :  { %16090 = vst [vmem:[#allocation33_spill] sm:$0xff] %v12102_v26  ;;  %1498 = vmatpush.msra.mxu3 %v379_v55  ;;  %v512_v51 = vadd.f32 %v11972_v4, %v511_v2  ;;  %v12121_v55 = vld [vmem:[%s15647_s1 + $0xc0] sm:$0xff]  ;;  %v396_v24 = vld [vmem:[#allocation10 + $0xd0] sm:$0xff] }
 0x177   :  { %1521 = vmatpush.msrb.mxu2 %v371_v21  ;;  %v414_v26 = vld [vmem:[#allocation10 + $0x160] sm:$0xff] }
 0x178   :  { %1499 = vmatpush.msra.mxu3 %v376_v15 }
 0x179   :  { %1623 = vmatpush.xpose.msra.mxu2 %v12099_v53  ;;  %v576_v21 = vpop.f32.mrf.mxu1 }
 0x17a   :  { %879 = vmatmul.f32.gmra.mxu1 %v12114_v32  ;;  %1500 = vmatpush.msra.mxu3 %v373_v9  ;;  %v12124_v15 = vadd.f32 %v576_v21, %v512_v51  ;;  %v411_v9 = vld [vmem:[#allocation10 + $0x148] sm:$0xff]  ;;  %v405_v21 = vld [vmem:[#allocation10 + $0x118] sm:$0xff] }
 0x17b   :  { %v12107_v17 = vpop.f32.mrf.mxu2  ;;  %820 = vmatmul.f32.gmra.mxu0 %v12121_v55 }
 0x17c   :  { %16092 = vst [vmem:[#allocation35_spill] sm:$0xff] %v12107_v17  ;;  %v12109_v22 = vpop.f32.mrf.mxu3  ;;  %1501 = vmatpush.msra.mxu3 %v370_v12  ;;  %v408_v17 = vld [vmem:[#allocation10 + $0x130] sm:$0xff] }
 0x17d   :  { %1624 = vmatpush.xpose.msra.mxu2 %v12104_v29  ;;  %16093 = vst [vmem:[#allocation36_spill] sm:$0xff] %v12109_v22  ;;  %v514_v2 = vpop.f32.mrf.mxu0 }
 0x17e   :  { %16094 = vst [vmem:[#allocation37_spill] sm:$0xff] %v12124_v15  ;;  %1526 = vmatpush.msrb.mxu3 %v417_v39  ;;  %v515_v12 = vadd.f32 %v11972_v4, %v514_v2  ;;  %v402_v39 = vld [vmem:[#allocation10 + $0x100] sm:$0xff] }
 0x180   :  { %1527 = vmatpush.msrb.mxu3 %v414_v26  ;;  %v12140_v26 = vld [vmem:[%s15647_s1 + $0xd0] sm:$0xff] }
 0x181   :  { %v579_v22 = vpop.f32.mrf.mxu1 }
 0x182   :  { %1528 = vmatpush.msrb.mxu3 %v411_v9  ;;  %882 = vmatmul.f32.gmra.mxu1 %v12133_v43  ;;  %v12143_v51 = vadd.f32 %v579_v22, %v515_v12  ;;  %v12159_v12 = vld [vmem:[%s15647_s1 + $0xe0] sm:$0xff] }
 0x183   :  { %v12126_v29 = vpop.f32.mrf.mxu2  ;;  %823 = vmatmul.f32.gmra.mxu0 %v12140_v26 }
 0x184   :  { %16095 = vst [vmem:[#allocation38_spill] sm:$0xff] %v12126_v29  ;;  %v12128_v53 = vpop.f32.mrf.mxu3  ;;  %1529 = vmatpush.msrb.mxu3 %v408_v17  ;;  %v393_v17 = vld [vmem:[#allocation10 + $0xb8] sm:$0xff] }
 0x185   :  { %16096 = vst [vmem:[#allocation39_spill] sm:$0xff] %v12128_v53  ;;  %v399_v53 = vld [vmem:[#allocation10 + $0xe8] sm:$0xff]  ;;  %v517_v2 = vpop.f32.mrf.mxu0 }
 0x186   :  { %16097 = vst [vmem:[#allocation40_spill] sm:$0xff] %v12143_v51  ;;  %1530 = vmatpush.msrb.mxu3 %v405_v21  ;;  %v518_v22 = vadd.f32 %v11972_v4, %v517_v2  ;;  %v390_v21 = vld [vmem:[#allocation10 + $0xa0] sm:$0xff] }
 0x188   :  { %1531 = vmatpush.msrb.mxu3 %v402_v39 }
 0x189   :  { %v582_v29 = vpop.f32.mrf.mxu1 }
 0x18a   :  { %1532 = vmatpush.msrb.mxu3 %v399_v53  ;;  %885 = vmatmul.f32.gmra.mxu1 %v12152_v30  ;;  %v12162_v53 = vadd.f32 %v582_v29, %v518_v22  ;;  %v381_v29 = vld [vmem:[#allocation10 + $0x58] sm:$0xff]  ;;  %v12178_v22 = vld [vmem:[%s15647_s1 + $0xf0] sm:$0xff] }
 0x18b   :  { %v12145_v9 = vpop.f32.mrf.mxu2  ;;  %826 = vmatmul.f32.gmra.mxu0 %v12159_v12 }
 0x18c   :  { %16098 = vst [vmem:[#allocation41_spill] sm:$0xff] %v12145_v9  ;;  %v12147_v15 = vpop.f32.mrf.mxu3  ;;  %1533 = vmatpush.msrb.mxu3 %v396_v24 }
 0x18d   :  { %16099 = vst [vmem:[#allocation42_spill] sm:$0xff] %v12147_v15  ;;  %v387_v15 = vld [vmem:[#allocation10 + $0x88] sm:$0xff]  ;;  %v520_v2 = vpop.f32.mrf.mxu0 }
 0x18e   :  { %16100 = vst [vmem:[#allocation43_spill] sm:$0xff] %v12162_v53  ;;  %1534 = vmatpush.msrb.mxu3 %v393_v17  ;;  %v521_v24 = vadd.f32 %v11972_v4, %v520_v2  ;;  %v378_v17 = vld [vmem:[#allocation10 + $0x40] sm:$0xff] }
 0x190   :  { %1535 = vmatpush.msrb.mxu3 %v390_v21 }
 0x191   :  { %v585_v9 = vpop.f32.mrf.mxu1 }
 0x192   :  { %1536 = vmatpush.msrb.mxu3 %v387_v15  ;;  %888 = vmatmul.f32.gmra.mxu1 %v12171_v14  ;;  %v12181_v15 = vadd.f32 %v585_v9, %v521_v24  ;;  %v10747_v9 = vld [vmem:[%s15647_s1] sm:$0xff] }
 0x193   :  { %v12164_v39 = vpop.f32.mrf.mxu2  ;;  %829 = vmatmul.f32.gmra.mxu0 %v12178_v22 }
 0x194   :  { %16101 = vst [vmem:[#allocation44_spill] sm:$0xff] %v12164_v39  ;;  %v12166_v51 = vpop.f32.mrf.mxu3  ;;  %1537 = vmatpush.msrb.mxu3 %v384_v57 }
 0x195   :  { %16102 = vst [vmem:[#allocation45_spill] sm:$0xff] %v12166_v51  ;;  %v375_v51 = vld [vmem:[#allocation10 + $0x28] sm:$0xff]  ;;  %v523_v2 = vpop.f32.mrf.mxu0 }
 0x196   :  { %16103 = vst [vmem:[#allocation46_spill] sm:$0xff] %v12181_v15  ;;  %1538 = vmatpush.msrb.mxu3 %v381_v29  ;;  %v524_v57 = vadd.f32 %v11972_v4, %v523_v2 }
 0x198   :  { %1539 = vmatpush.msrb.mxu3 %v378_v17 }
 0x199   :  { %v588_v39 = vpop.f32.mrf.mxu1 }
 0x19a   :  { %1540 = vmatpush.msrb.mxu3 %v375_v51  ;;  %891 = vmatmul.f32.gmra.mxu1 %v12190_v25  ;;  %v12197_v24 = vadd.f32 %v588_v39, %v524_v57 }
 0x19b   :  { %v12183_v21 = vpop.f32.mrf.mxu2  ;;  %1044 = vmatmul.f32.vlgmr.msra.gmra.mxu0 %v10747_v9 }
 0x19c   :  { %16104 = vst [vmem:[#allocation47_spill] sm:$0xff] %v12183_v21  ;;  %v12185_v53 = vpop.f32.mrf.mxu3  ;;  %1541 = vmatpush.msrb.mxu3 %v372_v28 }
 0x19d   :  { %16105 = vst [vmem:[#allocation48_spill] sm:$0xff] %v12185_v53  ;;  %v526_v17 = vpop.f32.mrf.mxu0  ;;  %v12206_v53 = vld [vmem:[%s15647_s1 + $0xf8] sm:$0xff] }
 0x19e   :  { %16106 = vst [vmem:[#allocation49_spill] sm:$0xff] %v12197_v24  ;;  %v527_v2 = vadd.f32 %v11972_v4, %v526_v17 }
 0x1a1   :  { %v591_v15 = vpop.f32.mrf.mxu1 }
 0x1a2   :  { %894 = vmatmul.f32.gmra.mxu1 %v12206_v53  ;;  %v12211_v28 = vadd.f32 %v591_v15, %v527_v2 }
 0x1a3   :  { %v12199_v51 = vpop.f32.mrf.mxu2  ;;  %1047 = vmatmul.f32.gmra.mxu0 %v11864_v38 }
 0x1a4   :  { %16107 = vst [vmem:[#allocation50_spill] sm:$0xff] %v12199_v51  ;;  %v12201_v29 = vpop.f32.mrf.mxu3 }
 0x1a5   :  { %16108 = vst [vmem:[#allocation51_spill] sm:$0xff] %v12201_v29  ;;  %v529_v9 = vpop.f32.mrf.mxu0 }
 0x1a6   :  { %16109 = vst [vmem:[#allocation52_spill] sm:$0xff] %v12211_v28  ;;  %v530_v21 = vadd.f32 %v11972_v4, %v529_v9 }
 0x1a9   :  { %v594_v24 = vpop.f32.mrf.mxu1 }
 0x1aa   :  { %1109 = vmatmul.f32.vlgmr.msra.gmra.mxu1 %v11886_v16  ;;  %v12220_v29 = vadd.f32 %v594_v24, %v530_v21 }
 0x1ab   :  { %v12213_v39 = vpop.f32.mrf.mxu2  ;;  %1050 = vmatmul.f32.gmra.mxu0 %v11896_v50 }
 0x1ac   :  { %16110 = vst [vmem:[#allocation53_spill] sm:$0xff] %v12213_v39  ;;  %v12215_v57 = vpop.f32.mrf.mxu3 }
 0x1ad   :  { %16111 = vst [vmem:[#allocation54_spill] sm:$0xff] %v12215_v57  ;;  %v532_v38 = vpop.f32.mrf.mxu0 }
 0x1ae   :  { %16112 = vst [vmem:[#allocation55_spill] sm:$0xff] %v12220_v29  ;;  %v533_v2 = vadd.f32 %v11972_v4, %v532_v38  ;;  %v12238_v38 = vpop.eup %10395 }
 0x1af   :  { %16115 = vst [vmem:[#allocation58_spill] sm:$0xff] %v12238_v38 }
 0x1b1   :  { %v597_v15 = vpop.f32.mrf.mxu1 }
 0x1b2   :  { %1112 = vmatmul.f32.gmra.mxu1 %v11917_v54  ;;  %v12230_v16 = vadd.f32 %v597_v15, %v533_v2 }
 0x1b3   :  { %v12222_v51 = vpop.f32.mrf.mxu2  ;;  %1053 = vmatmul.f32.gmra.mxu0 %v11926_v45  ;;  %v12242_v45 = vpop.eup %10397 }
 0x1b4   :  { %v12224_v17 = vpop.f32.mrf.mxu3  ;;  %16114 = vst [vmem:[#allocation57_spill] sm:$0xff] %v12230_v16  ;;  %v12251_v7 = vpop.eup %10399 }
 0x1b5   :  { %16113 = vst [vmem:[#allocation56_spill] sm:$0xff] %v12224_v17  ;;  %v535_v9 = vpop.f32.mrf.mxu0  ;;  %v12253_v46 = vpop.eup %10401 }
 0x1b6   :  { %v536_v58 = vadd.f32 %v11972_v4, %v535_v9  ;;  %16116 = vst [vmem:[#allocation59_spill] sm:$0xff] %v12242_v45  ;;  %v12262_v15 = vpop.eup %10403 }
 0x1b7   :  { %16118 = vst [vmem:[#allocation61_spill] sm:$0xff] %v12251_v7  ;;  %v12266_v27 = vpop.eup %10405 }
 0x1b8   :  { %16119 = vst [vmem:[#allocation62_spill] sm:$0xff] %v12253_v46 }
 0x1b9   :  { %v600_v54 = vpop.f32.mrf.mxu1  ;;  %16121 = vst [vmem:[#allocation64_spill] sm:$0xff] %v12262_v15 }
 0x1ba   :  { %1115 = vmatmul.f32.gmra.mxu1 %v11934_v40  ;;  %v12248_v49 = vadd.f32 %v600_v54, %v536_v58  ;;  %16122 = vst [vmem:[#allocation65_spill] sm:$0xff] %v12266_v27 }
 0x1bb   :  { %v1388_v50 = vpop.f32.mrf.mxu2  ;;  %1056 = vmatmul.f32.gmra.mxu0 %v11944_v1 }
 0x1bc   :  { %v1408_v21 = vpop.f32.mrf.mxu3  ;;  %16117 = vst [vmem:[#allocation60_spill] sm:$0xff] %v12248_v49 }
 0x1bd   :  { %v12235_v24 = vadd.f32 %v1408_v21, %v1388_v50  ;;  %v785_v40 = vpop.f32.mrf.mxu0 }
 0x1bf   :  { %1502 = vmatmul.f32.vlgmr.msra.gmra.mxu3 %v12235_v24  ;;  %1522 = vmatmul.f32.vlgmr.msrb.gmra.mxu2 %v12235_v24 }
 0x1c0   :  { %1643 = vmatpush.xpose.msra.mxu3 %v12238_v38  ;;  %1663 = vmatpush.xpose.msrb.mxu2 %v12242_v45 }
 0x1c1   :  { %v850_v1 = vpop.f32.mrf.mxu1 }
 0x1c2   :  { %1118 = vmatmul.f32.gmra.mxu1 %v11961_v47  ;;  %v12259_v4 = vadd.f32 %v850_v1, %v785_v40 }
 0x1c3   :  { %1059 = vmatmul.f32.gmra.mxu0 %v11977_v36 }
 0x1c4   :  { %1644 = vmatpush.xpose.msra.mxu3 %v12251_v7  ;;  %1664 = vmatpush.xpose.msrb.mxu2 %v12253_v46  ;;  %16120 = vst [vmem:[#allocation63_spill] sm:$0xff] %v12259_v4 }
 0x1c5   :  { %v788_v2 = vpop.f32.mrf.mxu0 }
 0x1c7   :  { %1542 = vmatmul.f32.vlgmr.msrb.gmra.mxu3 %v12235_v24 }
 0x1c8   :  { %1683 = vmatpush.xpose.msrb.mxu3 %v12262_v15 }
 0x1c9   :  { %v853_v0 = vpop.f32.mrf.mxu1 }
 0x1ca   :  { %1121 = vmatmul.f32.gmra.mxu1 %v11986_v13  ;;  %v12270_v50 = vadd.f32 %v853_v0, %v788_v2 }
 0x1cb   :  { %1062 = vmatmul.f32.gmra.mxu0 %v11996_v35 }
 0x1cc   :  { %1684 = vmatpush.xpose.msrb.mxu3 %v12266_v27  ;;  %16123 = vst [vmem:[#allocation66_spill] sm:$0xff] %v12270_v50 }
 0x1cd   :  { %v791_v47 = vpop.f32.mrf.mxu0 }
 0x1d1   :  { %v856_v36 = vpop.f32.mrf.mxu1 }
 0x1d2   :  { %1124 = vmatmul.f32.gmra.mxu1 %v12005_v23  ;;  %v12276_v54 = vadd.f32 %v856_v36, %v791_v47 }
 0x1d3   :  { %1065 = vmatmul.f32.gmra.mxu0 %v12015_v52 }
 0x1d4   :  { %16124 = vst [vmem:[#allocation67_spill] sm:$0xff] %v12276_v54 }
 0x1d5   :  { %v794_v21 = vpop.f32.mrf.mxu0 }
 0x1d9   :  { %v859_v9 = vpop.f32.mrf.mxu1 }
 0x1da   :  { %1127 = vmatmul.f32.gmra.mxu1 %v12029_v63  ;;  %v12278_v58 = vadd.f32 %v859_v9, %v794_v21  ;;  %v1436_v21 = vpop.f32.mrf.mxu2 }
 0x1db   :  { %1068 = vmatmul.f32.gmra.mxu0 %v12036_v31 }
 0x1dc   :  { %16125 = vst [vmem:[#allocation68_spill] sm:$0xff] %v12278_v58  ;;  %1994 = vmatpush.msra.mxu1 %v12278_v58  ;;  %v1456_v9 = vpop.f32.mrf.mxu3 }
 0x1dd   :  { %v797_v13 = vpop.f32.mrf.mxu0 }
 0x1de   :  { %1995 = vmatpush.msra.mxu1 %v12276_v54 }
 0x1e1   :  { %v862_v35 = vpop.f32.mrf.mxu1 }
 0x1e2   :  { %1130 = vmatmul.f32.gmra.mxu1 %v12049_v60  ;;  %v12284_v23 = vadd.f32 %v862_v35, %v797_v13  ;;  %v1476_v13 = vpop.f32.mrf.mxu2 }
 0x1e3   :  { %1071 = vmatmul.f32.gmra.mxu0 %v12056_v5 }
 0x1e4   :  { %16126 = vst [vmem:[#allocation69_spill] sm:$0xff] %v12284_v23 }
 0x1e5   :  { %v800_v52 = vpop.f32.mrf.mxu0 }
 0x1e9   :  { %v865_v63 = vpop.f32.mrf.mxu1 }
 0x1ea   :  { %1133 = vmatmul.f32.gmra.mxu1 %v12068_v62  ;;  %v12288_v40 = vadd.f32 %v865_v63, %v800_v52 }
 0x1eb   :  { %1074 = vmatmul.f32.gmra.mxu0 %v12075_v44 }
 0x1ec   :  { %16127 = vst [vmem:[#allocation70_spill] sm:$0xff] %v12288_v40 }
 0x1ed   :  { %v803_v31 = vpop.f32.mrf.mxu0 }
 0x1f1   :  { %v868_v1 = vpop.f32.mrf.mxu1 }
 0x1f2   :  { %1136 = vmatmul.f32.gmra.mxu1 %v12088_v3  ;;  %v12292_v2 = vadd.f32 %v868_v1, %v803_v31 }
 0x1f3   :  { %1077 = vmatmul.f32.gmra.mxu0 %v12096_v37 }
 0x1f5   :  { %v806_v60 = vpop.f32.mrf.mxu0 }
 0x1f9   :  { %v871_v0 = vpop.f32.mrf.mxu1 }
 0x1fa   :  { %1139 = vmatmul.f32.gmra.mxu1 %v12114_v32  ;;  %v12296_v5 = vadd.f32 %v871_v0, %v806_v60 }
 0x1fb   :  { %1080 = vmatmul.f32.gmra.mxu0 %v12121_v55 }
 0x1fd   :  { %v12299_v62 = vpop.f32.mrf.mxu0 }
 0x201   :  { %v12301_v47 = vpop.f32.mrf.mxu1 }
 0x202   :  { %1142 = vmatmul.f32.gmra.mxu1 %v12133_v43 }
 0x203   :  { %1083 = vmatmul.f32.gmra.mxu0 %v12140_v26 }
 0x205   :  { %v12305_v44 = vpop.f32.mrf.mxu0 }
 0x209   :  { %v12307_v3 = vpop.f32.mrf.mxu1 }
 0x20a   :  { %1145 = vmatmul.f32.gmra.mxu1 %v12152_v30 }
 0x20b   :  { %1086 = vmatmul.f32.gmra.mxu0 %v12159_v12 }
 0x20d   :  { %v12311_v37 = vpop.f32.mrf.mxu0 }
 0x211   :  { %v12313_v32 = vpop.f32.mrf.mxu1 }
 0x212   :  { %1148 = vmatmul.f32.gmra.mxu1 %v12171_v14 }
 0x213   :  { %1089 = vmatmul.f32.gmra.mxu0 %v12178_v22 }
 0x215   :  { %v12317_v55 = vpop.f32.mrf.mxu0 }
 0x219   :  { %v12319_v43 = vpop.f32.mrf.mxu1 }
 0x21a   :  { %1151 = vmatmul.f32.gmra.mxu1 %v12190_v25  ;;  %v418_v25 = vld [vmem:[%s15657_s11] sm:$0x7] }
 0x21b   :  { %v12341_v35 = vperm.slane %v418_v25, 0  ;;  %v12343_v52 = vperm.slane %v418_v25, 1 }
 0x21d   :  { %v12323_v26 = vpop.f32.mrf.mxu0  ;;  %16130 = vst [vmem:[#allocation73_spill] sm:$0xff] %v12341_v35  ;;  %v1437_v49 = vadd.f32 %v1436_v21, %v12341_v35  ;;  %v1457_v28 = vadd.f32 %v1456_v9, %v12343_v52 }
 0x21e   :  { %16131 = vst [vmem:[#allocation74_spill] sm:$0xff] %v12343_v52 }
 0x221   :  { %v12325_v30 = vpop.f32.mrf.mxu1 }
 0x222   :  { %1154 = vmatmul.f32.gmra.mxu1 %v12206_v53  ;;  %v419_v53 = vld [vmem:[%s15658_s12] sm:$0x7] }
 0x223   :  { %v12345_v63 = vperm.slane %v419_v53, 0  ;;  %v12347_v31 = vperm.slane %v419_v53, 1 }
 0x225   :  { %v12327_v12 = vpop.f32.mrf.mxu0  ;;  %16132 = vst [vmem:[#allocation75_spill] sm:$0xff] %v12345_v63 }
 0x226   :  { %16133 = vst [vmem:[#allocation76_spill] sm:$0xff] %v12347_v31 }
 0x229   :  { %v12329_v36 = vpop.f32.mrf.mxu1 }
 0x22d   :  { %v12331_v14 = vpop.f32.mrf.mxu0 }
 0x22e   :  { %16128 = vst [vmem:[#allocation71_spill] sm:$0xff] %v12331_v14 }
 0x231   :  { %v12333_v22 = vpop.f32.mrf.mxu1 }
 0x232   :  { %16129 = vst [vmem:[#allocation72_spill] sm:$0xff] %v12333_v22 }
 0x235   :  { %v12349_v1 = vpop.f32.mrf.mxu0 }
 0x236   :  { %16134 = vst [vmem:[#allocation77_spill] sm:$0xff] %v12349_v1 }
 0x239   :  { %v12351_v60 = vpop.f32.mrf.mxu1 }
 0x23a   :  { %16135 = vst [vmem:[#allocation78_spill] sm:$0xff] %v12351_v60 }
 0x23d   :  { %v1045_v7 = vpop.f32.mrf.mxu0 }
 0x241   :  { %v1110_v45 = vpop.f32.mrf.mxu1 }
 0x242   :  { %v1503_v0 = vpop.f32.mrf.mxu3  ;;  %v1523_v16 = vpop.f32.mrf.mxu2  ;;  %v12357_v35 = vadd.f32 %v1110_v45, %v1045_v7 }
 0x243   :  { %v1504_v29 = vadd.f32 %v1503_v0, %v12345_v63  ;;  %v1524_v54 = vadd.f32 %v1523_v16, %v12347_v31 }
 0x244   :  { %16136 = vst [vmem:[#allocation79_spill] sm:$0xff] %v12357_v35 }
 0x245   :  { %v1546_v58 = vadd.f32 %v1504_v29, %v1437_v49  ;;  %v1566_v27 = vadd.f32 %v1524_v54, %v1457_v28  ;;  %v1048_v22 = vpop.f32.mrf.mxu0  ;;  %v12363_v54 = vperm.slane %v419_v53, 2 }
 0x247   :  { %v10071_v46 = vmul.f32 -1.442695, %v1546_v58  ;;  %v10072_v15 = vmul.f32 -1.442695, %v1566_v27  ;;  %16138 = vst [vmem:[#allocation81_spill] sm:$0xff] %v12363_v54  ;;  %v12365_v58 = vperm.slane %v418_v25, 2 }
 0x248   :  { %v10749_v25 = vld [vmem:[%s15653_s7] ss:$0 sm:$0xff] }
 0x249   :  { %10407 = vpow2.f32 %v10071_v46  ;;  %v1113_v14 = vpop.f32.mrf.mxu1  ;;  %16139 = vst [vmem:[#allocation82_spill] sm:$0xff] %v12365_v58  ;;  %v1477_v53 = vadd.f32 %v1476_v13, %v12365_v58 }
 0x24a   :  { %10409 = vpow2.f32 %v10072_v15  ;;  %v12359_v9 = vadd.f32 %v1113_v14, %v1048_v22  ;;  %v1543_v7 = vpop.f32.mrf.mxu3 }
 0x24b   :  { %v1544_v0 = vadd.f32 %v1543_v7, %v12363_v54 }
 0x24c   :  { %16137 = vst [vmem:[#allocation80_spill] sm:$0xff] %v12359_v9  ;;  %1971 = vmatpush.msra.mxu0 %v12359_v9 }
 0x24e   :  { %1972 = vmatpush.msra.mxu0 %v12357_v35 }
 0x24f   :  { %v10408_v38 = vpop.eup %10407 }
 0x250   :  { %v10410_v57 = vpop.eup %10409  ;;  %v1550_v39 = vadd.f32 1.0, %v10408_v38 }
 0x251   :  { %v1570_v21 = vadd.f32 1.0, %v10410_v57 }
 0x252   :  { %10411 = vrcp.f32 %v1550_v39  ;;  %v1562_v27 = vand.u32 2147483648, %v1550_v39  ;;  %v1560_v38 = vand.u32 2147483647, %v1550_v39  ;;  %vm1556_vm8 = vweird.f32 %v1550_v39 }
 0x253   :  { %10413 = vrcp.f32 %v1570_v21  ;;  %vm1576_vm12 = vweird.f32 %v1570_v21 }
 0x254   :  { %v1563_v22 = vor.u32 1.1754944e-38, %v1562_v27  ;;  %vm1561_vm10 = vcmp.eq.f32.partialorder %v1560_v38, 8.507059e+37 }
 0x258   :  { %v10412_v29 = vpop.eup %10411 }
 0x259   :  { %v10414_v28 = vpop.eup %10413  ;;  %v1552_v16 = vmul.f32 %v10412_v29, %v1550_v39  ;;  %vm1557_vm7 = vweird.f32 %v10412_v29  ;;  %v1580_v39 = vand.u32 2147483647, %v1570_v21 }
 0x25a   :  { %v1572_v49 = vmul.f32 %v10414_v28, %v1570_v21  ;;  %vm1558_vm9 = vmor %vm1556_vm8, %vm1557_vm7  ;;  %vm1577_vm11 = vweird.f32 %v10414_v28  ;;  %vm16027_vm7 = vcmask 130048  }
 0x25b   :  { %v1553_v46 = vsub.f32 1.0, %v1552_v16  ;;  %vm1578_vm13 = vmor %vm1576_vm12, %vm1577_vm11  ;;  %vm1581_vm14 = vcmp.eq.f32.partialorder %v1580_v39, 8.507059e+37 }
 0x25c   :  { %v1573_v15 = vsub.f32 1.0, %v1572_v49 }
 0x25d   :  { %v1554_v57 = vmul.f32 %v10412_v29, %v1553_v46  ;;  %v1582_v46 = vand.u32 2147483648, %v1570_v21 }
 0x25e   :  { %v1574_v45 = vmul.f32 %v10414_v28, %v1573_v15  ;;  %v667_v15 = vadd.f32 %v10749_v25, %v11759_v10 }
 0x25f   :  { %v1555_v14 = vadd.f32 %v10412_v29, %v1554_v57  ;;  %v1583_v38 = vor.u32 1.1754944e-38, %v1582_v46 }
 0x260   :  { %v1575_v49 = vadd.f32 %v10414_v28, %v1574_v45  ;;  %v670_v45 = vadd.f32 %v10749_v25, %v11784_v56 }
 0x261   :  { %v1559_v35 = vsel %vm1558_vm9, %v10412_v29, %v1555_v14  ;;  %v673_v29 = vadd.f32 %v10749_v25, %v11810_v6 }
 0x262   :  { %v1564_v16 = vsel %vm1561_vm10, %v1563_v22, %v1559_v35  ;;  %v1579_v57 = vsel %vm1578_vm13, %v10414_v28, %v1575_v49  ;;  %v732_v35 = vadd.f32 %v11761_v11, %v667_v15  ;;  %v735_v21 = vadd.f32 %v11786_v20, %v670_v45  ;;  %v16150_v15 = vld [vmem:[#allocation23_spill] sm:$0xff] }
 0x263   :  { %v1586_v9 = vmul.f32 %v1564_v16, %v1544_v0  ;;  %v1584_v13 = vsel %vm1581_vm14, %v1583_v38, %v1579_v57  ;;  %v738_v7 = vadd.f32 %v11812_v8, %v673_v29  ;;  %v12406_v0 = vadd.f32 %v12024_v34, %v12022_v59  ;;  %v16154_v29 = vld [vmem:[#allocation20_spill] sm:$0xff] }
 0x264   :  { %v1589_v14 = vsub.f32 1.0, %v1584_v13  ;;  %v1591_v6 = vmul.f32 %v1584_v13, %v12235_v24  ;;  %v12422_v34 = vadd.f32 %v11966_v33, %v11964_v48  ;;  %v16149_v33 = vld [vmem:[#allocation22_spill] sm:$0xff] }
 0x265   :  { %v1587_v27 = vadd.f32 %v1586_v9, %v1477_v53  ;;  %16145 = vst [vmem:[#allocation88_spill] sm:$0xff] %v12406_v0  ;;  %v12429_v53 = vadd.f32 %v11939_v42, %v11937_v41  ;;  %v12437_v39 = vadd.f32 %v16150_v15, %v16149_v33  ;;  %v16153_v42 = vld [vmem:[#allocation19_spill] sm:$0xff] }
 0x266   :  { %16147 = vst [vmem:[#allocation90_spill] sm:$0xff] %v12422_v34  ;;  %v12446_v57 = vadd.f32 %v16154_v29, %v16153_v42 }
 0x267   :  { %10415 = vtanh.f32 %v1587_v27  ;;  %16148 = vst [vmem:[#allocation91_spill] sm:$0xff] %v12429_v53 }
 0x268   :  { %10417 = vtanh.f32 %v732_v35  ;;  %16151 = vst [vmem:[#allocation22_spill] sm:$0xff] %v12437_v39 }
 0x269   :  { %10419 = vtanh.f32 %v738_v7  ;;  %16155 = vst [vmem:[#allocation19_spill] sm:$0xff] %v12446_v57 }
 0x26a   :  { %10421 = vtanh.f32 %v11736_v61  ;;  %v12393_v61 = vadd.f32 %v12044_v19, %v12042_v18  ;;  %v1051_v18 = vpop.f32.mrf.mxu0  ;;  %v1116_v19 = vpop.f32.mrf.mxu1 }
 0x26b   :  { %10423 = vtanh.f32 %v735_v21  ;;  %v12448_v38 = vadd.f32 %v1116_v19, %v1051_v18 }
 0x26c   :  { %16143 = vst [vmem:[#allocation86_spill] sm:$0xff] %v12393_v61 }
 0x26d   :  { %v10416_v10 = vpop.eup %10415  ;;  %16156 = vst [vmem:[#allocation20_spill] sm:$0xff] %v12448_v38 }
 0x26e   :  { %v1590_v9 = vmul.f32 %v10416_v10, %v1589_v14  ;;  %v12382_v11 = vpop.eup %10417 }
 0x26f   :  { %16141 = vst [vmem:[#allocation84_spill] sm:$0xff] %v12382_v11  ;;  %v12389_v20 = vpop.eup %10419 }
 0x270   :  { %v12380_v28 = vadd.f32 %v1591_v6, %v1590_v9  ;;  %16142 = vst [vmem:[#allocation85_spill] sm:$0xff] %v12389_v20  ;;  %v12402_v24 = vpop.eup %10421 }
 0x271   :  { %16144 = vst [vmem:[#allocation87_spill] sm:$0xff] %v12402_v24  ;;  %v12411_v16 = vpop.eup %10423 }
 0x272   :  { %16140 = vst [vmem:[#allocation83_spill] sm:$0xff] %v12380_v28  ;;  %1625 = vmatmul.f32.vlgmr.msra.gmra.mxu2 %v12380_v28  ;;  %v15703_v56 = vrot.slane %v12380_v28, 1  ;;  %v15698_v8 = vrot.slane %v12380_v28, 6  ;;  %v15697_v22 = vrot.slane %v12380_v28, 7  ;;  %v15702_v49 = vrot.slane %v12380_v28, 2  ;;  %v1054_v25 = vpop.f32.mrf.mxu0  ;;  %v1119_v48 = vpop.f32.mrf.mxu1 }
 0x273   :  { %1703 = vmatpush.xpose.msra.mxu2 %v12382_v11  ;;  %16146 = vst [vmem:[#allocation89_spill] sm:$0xff] %v12411_v16  ;;  %v15701_v59 = vrot.slane %v12380_v28, 3  ;;  %v15700_v46 = vrot.slane %v12380_v28, 4  ;;  %v12439_v27 = vadd.f32 %v1119_v48, %v1054_v25  ;;  %v15699_v41 = vrot.slane %v12380_v28, 5 }
 0x274   :  { %1645 = vmatmul.f32.vlgmr.msra.gmra.mxu3 %v15703_v56  ;;  %1745 = vmatmul.f32.vlgmr.msrb.gmra.mxu0 %v15698_v8 }
 0x275   :  { %1723 = vmatpush.xpose.msra.mxu3 %v12389_v20  ;;  %1765 = vmatmul.f32.vlgmr.msrb.gmra.mxu1 %v15697_v22  ;;  %16152 = vst [vmem:[#allocation23_spill] sm:$0xff] %v12439_v27 }
 0x276   :  { %2057 = vmatpush.msrb.mxu0 %v12288_v40  ;;  %2077 = vmatpush.msrb.mxu1 %v12393_v61  ;;  %v15724_v61 = vmov 0.0  }
 0x277   :  { %1704 = vmatpush.xpose.msra.mxu2 %v12402_v24 }
 0x278   :  { %2058 = vmatpush.msrb.mxu0 %v12284_v23  ;;  %2078 = vmatpush.msrb.mxu1 %v12406_v0 }
 0x279   :  { %1724 = vmatpush.xpose.msra.mxu3 %v12411_v16 }
 0x27a   :  { %1665 = vmatmul.f32.vlgmr.msrb.gmra.mxu2 %v15702_v49  ;;  %v12456_v35 = vpop.f32.mrf.mxu0  ;;  %v12458_v13 = vpop.f32.mrf.mxu1  ;;  %v469_v49 = vld [vmem:[%s15648_s2] sm:$0xff] }
 0x27b   :  { %1931 = vmatpush.msrb.mxu2 %v12270_v50  ;;  %vm1158_vm15 = vcmp.eq.s32.totalorder %v469_v49, 0 }
 0x27c   :  { %1685 = vmatmul.f32.vlgmr.msrb.gmra.mxu3 %v15701_v59  ;;  %v12504_v23 = vsel %vm1158_vm15, -1000.0, %v15724_v61 }
 0x27d   :  { %1932 = vmatpush.msrb.mxu2 %v12259_v4  ;;  %1951 = vmatpush.msrb.mxu3 %v12422_v34  ;;  %16161 = vst [vmem:[#allocation96_spill] sm:$0xff] %v12504_v23  ;;  %v12507_v40 = vrot.slane %v12504_v23, 1  ;;  %v12512_v24 = vrot.slane %v12504_v23, 2  ;;  %v12518_v49 = vrot.slane %v12504_v23, 3 }
 0x27f   :  { %1952 = vmatpush.msrb.mxu3 %v12429_v53  ;;  %16162 = vst [vmem:[#allocation97_spill] sm:$0xff] %v12507_v40 }
 0x280   :  { %16164 = vst [vmem:[#allocation99_spill] sm:$0xff] %v12512_v24 }
 0x281   :  { %16166 = vst [vmem:[#allocation101_spill] sm:$0xff] %v12518_v49 }
 0x282   :  { %1705 = vmatmul.f32.vlgmr.msra.gmra.mxu2 %v15700_v46  ;;  %v12460_v45 = vpop.f32.mrf.mxu0  ;;  %v12462_v7 = vpop.f32.mrf.mxu1 }
 0x283   :  { %2014 = vmatpush.msra.mxu2 %v12437_v39  ;;  %v12533_v39 = vrot.slane %v12504_v23, 5 }
 0x284   :  { %1725 = vmatmul.f32.vlgmr.msra.gmra.mxu3 %v15699_v41 }
 0x285   :  { %2015 = vmatpush.msra.mxu2 %v12446_v57  ;;  %2034 = vmatpush.msra.mxu3 %v12439_v27  ;;  %v12526_v57 = vrot.slane %v12504_v23, 6  ;;  %16170 = vst [vmem:[#allocation105_spill] sm:$0xff] %v12533_v39 }
 0x287   :  { %2035 = vmatpush.msra.mxu3 %v12448_v38  ;;  %v12523_v38 = vrot.slane %v12504_v23, 4  ;;  %16168 = vst [vmem:[#allocation103_spill] sm:$0xff] %v12526_v57 }
 0x289   :  { %16167 = vst [vmem:[#allocation102_spill] sm:$0xff] %v12523_v38 }
 0x28a   :  { %v12464_v14 = vpop.f32.mrf.mxu0  ;;  %v12466_v10 = vpop.f32.mrf.mxu1 }
 0x292   :  { %v12468_v21 = vpop.f32.mrf.mxu0  ;;  %v12470_v9 = vpop.f32.mrf.mxu1 }
 0x29a   :  { %v12472_v6 = vpop.f32.mrf.mxu0  ;;  %v12474_v18 = vpop.f32.mrf.mxu1 }
 0x2a2   :  { %v12476_v19 = vpop.f32.mrf.mxu0  ;;  %v12478_v25 = vpop.f32.mrf.mxu1 }
 0x2aa   :  { %v12480_v48 = vpop.f32.mrf.mxu0  ;;  %v12482_v33 = vpop.f32.mrf.mxu1 }
 0x2b2   :  { %v12484_v15 = vpop.f32.mrf.mxu0  ;;  %v12486_v42 = vpop.f32.mrf.mxu1 }
 0x2ba   :  { %v12488_v29 = vpop.f32.mrf.mxu0  ;;  %v12490_v22 = vpop.f32.mrf.mxu1 }
 0x2bb   :  { %16157 = vst [vmem:[#allocation92_spill] sm:$0xff] %v12488_v29 }
 0x2bc   :  { %16158 = vst [vmem:[#allocation93_spill] sm:$0xff] %v12490_v22 }
 0x2c2   :  { %v12492_v8 = vpop.f32.mrf.mxu0  ;;  %v12494_v41 = vpop.f32.mrf.mxu1 }
 0x2ca   :  { %v12496_v46 = vpop.f32.mrf.mxu0  ;;  %v12498_v59 = vpop.f32.mrf.mxu1 }
 0x2cb   :  { %16159 = vst [vmem:[#allocation94_spill] sm:$0xff] %v12496_v46 }
 0x2cc   :  { %16160 = vst [vmem:[#allocation95_spill] sm:$0xff] %v12498_v59 }
 0x2d2   :  { %v12509_v16 = vpop.f32.mrf.mxu0  ;;  %v12514_v20 = vpop.f32.mrf.mxu1 }
 0x2d3   :  { %16163 = vst [vmem:[#allocation98_spill] sm:$0xff] %v12509_v16 }
 0x2d4   :  { %16165 = vst [vmem:[#allocation100_spill] sm:$0xff] %v12514_v20 }
 0x2f5   :  { %v1626_v56 = vpop.f32.mrf.mxu2 }
 0x2f6   :  { %v1785_v27 = vadd.f32 %v1626_v56, %v12504_v23 }
 0x2f7   :  { %v1646_v0 = vpop.f32.mrf.mxu3 }
 0x2f8   :  { %v1786_v11 = vadd.f32 %v12507_v40, %v1646_v0  ;;  %v1746_v0 = vpop.f32.mrf.mxu0  ;;  %v12530_v40 = vrot.slane %v12504_v23, 7 }
 0x2f9   :  { %v1791_v34 = vadd.f32 %v12526_v57, %v1746_v0 }
 0x2fa   :  { %v1801_v31 = vrot.slane %v1786_v11, 7  ;;  %16169 = vst [vmem:[#allocation104_spill] sm:$0xff] %v12530_v40 }
 0x2fd   :  { %v1666_v58 = vpop.f32.mrf.mxu2 }
 0x2fe   :  { %v1787_v54 = vadd.f32 %v12512_v24, %v1666_v58  ;;  %v1766_v58 = vpop.f32.mrf.mxu1  ;;  %v1802_v24 = vsel %vm16026_vm0, %v1801_v31, %v1785_v27  ;;  %v1811_v31 = vrot.slane %v1791_v34, 2 }
 0x2ff   :  { %v1686_v61 = vpop.f32.mrf.mxu3  ;;  %v1792_v56 = vadd.f32 %v12530_v40, %v1766_v58 }
 0x300   :  { %v1788_v52 = vadd.f32 %v12518_v49, %v1686_v61  ;;  %v1803_v63 = vrot.slane %v1787_v54, 6 }
 0x301   :  { %v1813_v16 = vrot.slane %v1792_v56, 1 }
 0x302   :  { %v1805_v61 = vrot.slane %v1788_v52, 5  ;;  %v1804_v53 = vsel %vm16025_vm1, %v1803_v63, %v1802_v24 }
 0x304   :  { %v1806_v23 = vsel %vm16024_vm2, %v1805_v61, %v1804_v53 }
 0x305   :  { %v1706_v49 = vpop.f32.mrf.mxu2 }
 0x306   :  { %v1789_v4 = vadd.f32 %v12523_v38, %v1706_v49 }
 0x307   :  { %v1726_v50 = vpop.f32.mrf.mxu3 }
 0x308   :  { %v1807_v28 = vrot.slane %v1789_v4, 4  ;;  %v1790_v59 = vadd.f32 %v12533_v39, %v1726_v50 }
 0x30a   :  { %v1809_v46 = vrot.slane %v1790_v59, 3  ;;  %v1808_v20 = vsel %vm16023_vm3, %v1807_v28, %v1806_v23 }
 0x30c   :  { %v1810_v22 = vsel %vm16022_vm4, %v1809_v46, %v1808_v20 }
 0x30d   :  { %v1812_v63 = vsel %vm16021_vm5, %v1811_v31, %v1810_v22 }
 0x30e   :  { %v1814_v24 = vsel %vm16020_vm6, %v1813_v16, %v1812_v63 }
 0x30f   :  { %v1817_v49 = vsel %vm16027_vm7, %v1814_v24, -inf }
 0x310   :  { %1818 = vmax.xlane.f32.xlu0 %v1817_v49 }
 0x383   :  { %v1819_v0 = vpop.xlane.xlu0 %1818 }
 0x384   :  { %v1821_v58 = vrot.slane %v1819_v0, 1  ;;  %v1822_v50 = vrot.slane %v1819_v0, 2  ;;  %v1823_v40 = vrot.slane %v1819_v0, 3  ;;  %v1824_v53 = vrot.slane %v1819_v0, 4 }
 0x385   :  { %v1825_v61 = vrot.slane %v1819_v0, 5  ;;  %v1836_v57 = vsub.f32 %v1785_v27, %v1819_v0  ;;  %v1826_v23 = vrot.slane %v1819_v0, 6  ;;  %v1827_v28 = vrot.slane %v1819_v0, 7 }
 0x386   :  { %v1837_v39 = vsub.f32 %v1786_v11, %v1821_v58  ;;  %v1838_v38 = vsub.f32 %v1787_v54, %v1822_v50  ;;  %v1839_v20 = vsub.f32 %v1788_v52, %v1823_v40  ;;  %v1840_v46 = vsub.f32 %v1789_v4, %v1824_v53 }
 0x387   :  { %v1844_v29 = vmul.f32 1.442695, %v1836_v57  ;;  %v1841_v22 = vsub.f32 %v1790_v59, %v1825_v61  ;;  %v1842_v31 = vsub.f32 %v1791_v34, %v1826_v23  ;;  %v1843_v49 = vsub.f32 %v1792_v56, %v1827_v28 }
 0x388   :  { %v1846_v16 = vmul.f32 1.442695, %v1837_v39  ;;  %v1848_v63 = vmul.f32 1.442695, %v1838_v38  ;;  %v1850_v24 = vmul.f32 1.442695, %v1839_v20 }
 0x389   :  { %10425 = vpow2.f32 %v1844_v29  ;;  %v1852_v60 = vmul.f32 1.442695, %v1840_v46  ;;  %v1854_v1 = vmul.f32 1.442695, %v1841_v22  ;;  %v1856_v17 = vmul.f32 1.442695, %v1842_v31 }
 0x38a   :  { %10427 = vpow2.f32 %v1846_v16  ;;  %v1858_v27 = vmul.f32 1.442695, %v1843_v49 }
 0x38b   :  { %10429 = vpow2.f32 %v1848_v63 }
 0x38c   :  { %10431 = vpow2.f32 %v1850_v24 }
 0x38d   :  { %10433 = vpow2.f32 %v1852_v60 }
 0x38e   :  { %10435 = vpow2.f32 %v1854_v1 }
 0x38f   :  { %v10426_v54 = vpop.eup %10425  ;;  %10437 = vpow2.f32 %v1856_v17 }
 0x390   :  { %v10428_v4 = vpop.eup %10427  ;;  %10439 = vpow2.f32 %v1858_v27  ;;  %v12576_v27 = vadd.f32 %v12462_v7, %v12460_v45  ;;  %v16174_v45 = vld [vmem:[#allocation28_spill] sm:$0xff] }
 0x391   :  { %v10430_v40 = vpop.eup %10429  ;;  %v1868_v52 = vrot.slane %v10428_v4, 7 }
 0x392   :  { %v12547_v11 = vpop.eup %10431  ;;  %v1870_v59 = vrot.slane %v10430_v40, 6 }
 0x393   :  { %v12549_v34 = vpop.eup %10433  ;;  %v1869_v39 = vsel %vm16026_vm0, %v1868_v52, %v10426_v54  ;;  %v1872_v57 = vrot.slane %v12547_v11, 5  ;;  %v16171_v52 = vld [vmem:[#allocation30_spill] sm:$0xff] }
 0x394   :  { %v12553_v38 = vpop.eup %10435  ;;  %v1871_v60 = vsel %vm16025_vm1, %v1870_v59, %v1869_v39  ;;  %v1874_v1 = vrot.slane %v12549_v34, 4  ;;  %v16172_v59 = vld [vmem:[#allocation31_spill] sm:$0xff] }
 0x395   :  { %v12557_v17 = vpop.eup %10437  ;;  %v1873_v29 = vsel %vm16024_vm2, %v1872_v57, %v1871_v60  ;;  %v1876_v56 = vrot.slane %v12553_v38, 3  ;;  %v12580_v39 = vadd.f32 %v16172_v59, %v16171_v52  ;;  %v12586_v60 = vadd.f32 %v12458_v13, %v12456_v35  ;;  %v16205_v59 = vld [vmem:[#allocation71_spill] sm:$0xff] }
 0x396   :  { %v12561_v0 = vpop.eup %10439  ;;  %v1875_v58 = vsel %vm16023_vm3, %v1874_v1, %v1873_v29  ;;  %v1878_v50 = vrot.slane %v12557_v17, 2  ;;  %v12598_v1 = vadd.f32 %v12470_v9, %v12468_v21  ;;  %v12607_v13 = vadd.f32 %v12466_v10, %v12464_v14  ;;  %v16176_v29 = vld [vmem:[#allocation39_spill] sm:$0xff] }
 0x397   :  { %v1877_v53 = vsel %vm16022_vm4, %v1876_v56, %v1875_v58  ;;  %v1880_v61 = vrot.slane %v12561_v0, 1  ;;  %v12612_v21 = vadd.f32 %v12307_v3, %v12305_v44  ;;  %v12621_v58 = vadd.f32 %v12478_v25, %v12476_v19  ;;  %v16177_v44 = vld [vmem:[#allocation35_spill] sm:$0xff]  ;;  %v16178_v3 = vld [vmem:[#allocation36_spill] sm:$0xff] }
 0x398   :  { %v1879_v23 = vsel %vm16021_vm5, %v1878_v50, %v1877_v53  ;;  %v12627_v14 = vadd.f32 %v12301_v47, %v12299_v62  ;;  %v12633_v10 = vadd.f32 %v16178_v3, %v16177_v44  ;;  %v12637_v19 = vadd.f32 %v12474_v18, %v12472_v6  ;;  %v16179_v18 = vld [vmem:[#allocation44_spill] sm:$0xff]  ;;  %v16188_v53 = vld [vmem:[#allocation51_spill] sm:$0xff] }
 0x399   :  { %v1881_v28 = vsel %vm16020_vm6, %v1880_v61, %v1879_v23  ;;  %v12644_v62 = vadd.f32 %v12319_v43, %v12317_v55  ;;  %v12652_v47 = vadd.f32 %v12313_v32, %v12311_v37  ;;  %v12663_v43 = vadd.f32 %v12329_v36, %v12327_v12  ;;  %v16182_v37 = vld [vmem:[#allocation41_spill] sm:$0xff]  ;;  %v16183_v32 = vld [vmem:[#allocation42_spill] sm:$0xff] }
 0x39a   :  { %v1883_v20 = vsel %vm16027_vm7, %v1881_v28, 0.0  ;;  %v12667_v50 = vadd.f32 %v12486_v42, %v12484_v15  ;;  %v12679_v12 = vadd.f32 %v12325_v30, %v12323_v26  ;;  %v12683_v36 = vadd.f32 %v12482_v33, %v12480_v48  ;;  %v16187_v42 = vld [vmem:[#allocation50_spill] sm:$0xff]  ;;  %v16190_v26 = vld [vmem:[#allocation47_spill] sm:$0xff]  ;;  %v16191_v30 = vld [vmem:[#allocation48_spill] sm:$0xff] }
 0x39b   :  { %1884 = vadd.xlane.f32.xlu0 %v1883_v20  ;;  %16181 = vst [vmem:[#allocation30_spill] sm:$0xff] %v12663_v43  ;;  %v12690_v61 = vadd.f32 %v16188_v53, %v16187_v42  ;;  %v12698_v48 = vadd.f32 %v16191_v30, %v16190_v26  ;;  %v12705_v28 = vadd.f32 %v12494_v41, %v12492_v8  ;;  %v16194_v20 = vld [vmem:[#allocation56_spill] sm:$0xff]  ;;  %v16203_v41 = vld [vmem:[#allocation54_spill] sm:$0xff]  ;;  %v12777_v42 = vld [vmem:[#allocation8 + $0x138] sm:$0xff] }
 0x39c   :  { %16186 = vst [vmem:[#allocation28_spill] sm:$0xff] %v12683_v36  ;;  %v12780_v53 = vld [vmem:[#allocation8 + $0x140] sm:$0xff]  ;;  %v12783_v26 = vld [vmem:[#allocation8 + $0x148] sm:$0xff]  ;;  %v12786_v30 = vld [vmem:[#allocation10 + $0x150] sm:$0xff] }
 0x39d   :  { %16192 = vst [vmem:[#allocation39_spill] sm:$0xff] %v12698_v48 }
 0x39e   :  { %16193 = vst [vmem:[#allocation35_spill] sm:$0xff] %v12705_v28 }
 0x39f   :  { %16222 = vst [vmem:[#allocation54_spill] sm:$0xff] %v12780_v53 }
 0x3a0   :  { %16223 = vst [vmem:[#allocation71_spill] sm:$0xff] %v12783_v26 }
 0x40e   :  { %v1885_v46 = vpop.xlane.xlu0 %1884 }
 0x40f   :  { %10441 = vrcp.f32 %v1885_v46 }
 0x415   :  { %v10442_v22 = vpop.eup %10441 }
 0x416   :  { %v1887_v31 = vmul.f32 %v10442_v22, %v1885_v46  ;;  %v12710_v46 = vadd.f32 %v16194_v20, %v12222_v51  ;;  %v16202_v51 = vld [vmem:[#allocation53_spill] sm:$0xff] }
 0x417   :  { %v12727_v52 = vadd.f32 %v16203_v41, %v16202_v51  ;;  %16221 = vst [vmem:[#allocation53_spill] sm:$0xff] %v12777_v42  ;;  %v12821_v51 = vld [vmem:[#allocation8 + $0xf8] sm:$0xff]  ;;  %v12824_v41 = vld [vmem:[#allocation8 + $0x100] sm:$0xff] }
 0x418   :  { %v1888_v16 = vsub.f32 2.0, %v1887_v31  ;;  %16195 = vst [vmem:[#allocation36_spill] sm:$0xff] %v12710_v46  ;;  %v16197_v31 = vld [vmem:[#allocation78_spill] sm:$0xff] }
 0x419   :  { %16204 = vst [vmem:[#allocation41_spill] sm:$0xff] %v12727_v52 }
 0x41a   :  { %v12570_v63 = vmul.f32 %v10442_v22, %v1888_v16  ;;  %v16196_v22 = vld [vmem:[#allocation77_spill] sm:$0xff]  ;;  %16234 = vst [vmem:[#allocation111_spill] sm:$0xff] %v12821_v51 }
 0x41b   :  { %v12714_v16 = vadd.f32 %v16197_v31, %v16196_v22  ;;  %v12799_v22 = vld [vmem:[#allocation10 + $0x138] sm:$0xff]  ;;  %v12805_v31 = vld [vmem:[#allocation8 + $0x108] sm:$0xff]  ;;  %16235 = vst [vmem:[#allocation112_spill] sm:$0xff] %v12824_v41 }
 0x41c   :  { %v1906_v24 = vmul.f32 %v10426_v54, %v12570_v63  ;;  %v1891_v49 = vrot.slane %v12570_v63, 1  ;;  %v16173_v54 = vld [vmem:[#allocation27_spill] sm:$0xff]  ;;  %v1892_v35 = vrot.slane %v12570_v63, 2  ;;  %v1893_v25 = vrot.slane %v12570_v63, 3  ;;  %16229 = vst [vmem:[#allocation106_spill] sm:$0xff] %v12805_v31 }
 0x41d   :  { %v12592_v7 = vadd.f32 %v16174_v45, %v16173_v54  ;;  %16185 = vst [vmem:[#allocation27_spill] sm:$0xff] %v12679_v12  ;;  %v1894_v15 = vrot.slane %v12570_v63, 4  ;;  %v1895_v33 = vrot.slane %v12570_v63, 5  ;;  %v16208_v45 = vld [vmem:[#allocation98_spill] sm:$0xff] }
 0x41e   :  { %10073 = vmatmul.msk.f32.vlgmr.msrb.gmra.mxu2 %vm16027_vm7, %v1906_v24  ;;  %10074 = vmatmul.msk.f32.vlgmr.msrb.gmra.mxu3 %vm16027_vm7, %v1906_v24  ;;  %v1907_v57 = vmul.f32 %v10428_v4, %v1891_v49  ;;  %v1908_v9 = vmul.f32 %v10430_v40, %v1892_v35  ;;  %v16175_v4 = vld [vmem:[#allocation38_spill] sm:$0xff]  ;;  %v1909_v6 = vmul.f32 %v12547_v11, %v1893_v25  ;;  %v16180_v40 = vld [vmem:[#allocation45_spill] sm:$0xff]  ;;  %v16209_v35 = vld [vmem:[#allocation100_spill] sm:$0xff] }
 0x41f   :  { %10075 = vmatmul.msk.f32.vlgmr.msra.gmra.mxu0 %vm16027_vm7, %v1906_v24  ;;  %2097 = vmatpush.msrb.mxu2 %v12576_v27  ;;  %v12617_v56 = vadd.f32 %v16176_v29, %v16175_v4  ;;  %v12658_v55 = vadd.f32 %v16180_v40, %v16179_v18  ;;  %v12673_v11 = vadd.f32 %v16183_v32, %v16182_v37  ;;  %v16199_v24 = vld [vmem:[#allocation92_spill] sm:$0xff]  ;;  %v16211_v4 = vld [vmem:[#allocation94_spill] sm:$0xff]  ;;  %v16212_v29 = vld [vmem:[#allocation95_spill] sm:$0xff]  ;;  %v1897_v32 = vrot.slane %v12570_v63, 7 }
 0x420   :  { %2120 = vmatpush.msrb.mxu3 %v12296_v5  ;;  %2140 = vmatpush.msra.mxu0 %v12580_v39  ;;  %16189 = vst [vmem:[#allocation38_spill] sm:$0xff] %v12690_v61  ;;  %v1910_v23 = vmul.f32 %v12549_v34, %v1894_v15  ;;  %v16200_v34 = vld [vmem:[#allocation93_spill] sm:$0xff]  ;;  %v1911_v8 = vmul.f32 %v12553_v38, %v1895_v33  ;;  %v1896_v38 = vrot.slane %v12570_v63, 6  ;;  %v12754_v25 = vld [vmem:[#allocation8 + $0x168] sm:$0xff]  ;;  %v12770_v37 = vld [vmem:[#allocation8 + $0x160] sm:$0xff] }
 0x421   :  { %10076 = vmatmul.msk.f32.vlgmr.msra.gmra.mxu1 %vm16027_vm7, %v1907_v57  ;;  %2098 = vmatpush.msrb.mxu2 %v12586_v60  ;;  %16184 = vst [vmem:[#allocation31_spill] sm:$0xff] %v12673_v11  ;;  %v12720_v49 = vadd.f32 %v16200_v34, %v16199_v24  ;;  %v12746_v44 = vadd.f32 %v16212_v29, %v16211_v4  ;;  %v12760_v18 = vld [vmem:[#allocation8 + $0x178] sm:$0xff]  ;;  %v12774_v15 = vld [vmem:[#allocation10 + $0x168] sm:$0xff]  ;;  %v12789_v63 = vld [vmem:[#allocation8 + $0x120] sm:$0xff] }
 0x422   :  { %2121 = vmatpush.msrb.mxu3 %v12292_v2  ;;  %2141 = vmatpush.msra.mxu0 %v12592_v7  ;;  %16198 = vst [vmem:[#allocation44_spill] sm:$0xff] %v12714_v16  ;;  %v1912_v3 = vmul.f32 %v12557_v17, %v1896_v38  ;;  %v12764_v17 = vld [vmem:[#allocation8 + $0x150] sm:$0xff]  ;;  %v12767_v40 = vld [vmem:[#allocation8 + $0x158] sm:$0xff]  ;;  %v12792_v33 = vld [vmem:[#allocation8 + $0x128] sm:$0xff]  ;;  %v1913_v20 = vmul.f32 %v12561_v0, %v1897_v32 }
 0x423   :  { %2160 = vmatpush.msra.mxu1 %v12598_v1  ;;  %16201 = vst [vmem:[#allocation45_spill] sm:$0xff] %v12720_v49  ;;  %v12808_v24 = vld [vmem:[#allocation8 + $0x110] sm:$0xff]  ;;  %v12811_v34 = vld [vmem:[#allocation8 + $0x118] sm:$0xff]  ;;  %v12814_v0 = vld [vmem:[#allocation10 + $0x120] sm:$0xff] }
 0x424   :  { %16213 = vst [vmem:[#allocation51_spill] sm:$0xff] %v12746_v44  ;;  %v12839_v38 = vld [vmem:[#allocation10 + $0xf0] sm:$0xff]  ;;  %v12842_v4 = vld [vmem:[#allocation8 + $0xc0] sm:$0xff]  ;;  %v12845_v29 = vld [vmem:[#allocation8 + $0xc8] sm:$0xff] }
 0x425   :  { %2161 = vmatpush.msra.mxu1 %v12607_v13  ;;  %16214 = vst [vmem:[#allocation47_spill] sm:$0xff] %v12754_v25  ;;  %v12851_v32 = vld [vmem:[#allocation10 + $0xd8] sm:$0xff] }
 0x426   :  { %10077 = vmatmul.msk.f32.vlgmr.msra.gmra.mxu2 %vm16027_vm7, %v1907_v57  ;;  %10078 = vmatmul.msk.f32.vlgmr.msra.gmra.mxu3 %vm16027_vm7, %v1907_v57  ;;  %v16206_v57 = vld [vmem:[#allocation72_spill] sm:$0xff]  ;;  %16216 = vst [vmem:[#allocation56_spill] sm:$0xff] %v12760_v18 }
 0x427   :  { %10079 = vmatmul.msk.f32.vlgmr.msrb.gmra.mxu0 %vm16027_vm7, %v1908_v9  ;;  %2183 = vmatpush.msra.mxu2 %v12612_v21  ;;  %v12731_v54 = vadd.f32 %v16206_v57, %v16205_v59  ;;  %16217 = vst [vmem:[#allocation77_spill] sm:$0xff] %v12764_v17  ;;  %v12827_v59 = vld [vmem:[#allocation10 + $0x108] sm:$0xff]  ;;  %v12830_v57 = vld [vmem:[#allocation8 + $0xd8] sm:$0xff] }
 0x428   :  { %2203 = vmatpush.msra.mxu3 %v12617_v56  ;;  %2223 = vmatpush.msrb.mxu0 %v12621_v58  ;;  %16218 = vst [vmem:[#allocation78_spill] sm:$0xff] %v12767_v40 }
 0x429   :  { %10080 = vmatmul.msk.f32.vlgmr.msrb.gmra.mxu1 %vm16027_vm7, %v1908_v9  ;;  %2184 = vmatpush.msra.mxu2 %v12627_v14  ;;  %16207 = vst [vmem:[#allocation42_spill] sm:$0xff] %v12731_v54 }
 0x42a   :  { %2204 = vmatpush.msra.mxu3 %v12633_v10  ;;  %2224 = vmatpush.msrb.mxu0 %v12637_v19  ;;  %16219 = vst [vmem:[#allocation92_spill] sm:$0xff] %v12770_v37 }
 0x42b   :  { %2246 = vmatpush.msrb.mxu1 %v12644_v62  ;;  %16220 = vst [vmem:[#allocation93_spill] sm:$0xff] %v12774_v15 }
 0x42c   :  { %16224 = vst [vmem:[#allocation72_spill] sm:$0xff] %v12786_v30 }
 0x42d   :  { %2247 = vmatpush.msrb.mxu1 %v12652_v47  ;;  %16225 = vst [vmem:[#allocation98_spill] sm:$0xff] %v12789_v63 }
 0x42e   :  { %10081 = vmatmul.msk.f32.vlgmr.msrb.gmra.mxu2 %vm16027_vm7, %v1908_v9  ;;  %10082 = vmatmul.msk.f32.vlgmr.msrb.gmra.mxu3 %vm16027_vm7, %v1909_v6  ;;  %v12737_v9 = vadd.f32 %v16209_v35, %v16208_v45  ;;  %16226 = vst [vmem:[#allocation100_spill] sm:$0xff] %v12792_v33  ;;  %v12833_v45 = vld [vmem:[#allocation8 + $0xe0] sm:$0xff]  ;;  %v12836_v35 = vld [vmem:[#allocation8 + $0xe8] sm:$0xff] }
 0x42f   :  { %10083 = vmatmul.msk.f32.vlgmr.msra.gmra.mxu0 %vm16027_vm7, %v1909_v6  ;;  %2266 = vmatpush.msrb.mxu2 %v12658_v55  ;;  %16228 = vst [vmem:[#allocation95_spill] sm:$0xff] %v12799_v22 }
 0x430   :  { %2286 = vmatpush.msrb.mxu3 %v12667_v50  ;;  %2309 = vmatpush.msra.mxu0 %v12663_v43  ;;  %16210 = vst [vmem:[#allocation50_spill] sm:$0xff] %v12737_v9 }
 0x431   :  { %10084 = vmatmul.msk.f32.vlgmr.msra.gmra.mxu1 %vm16027_vm7, %v1909_v6  ;;  %2267 = vmatpush.msrb.mxu2 %v12673_v11  ;;  %v12757_v6 = vld [vmem:[#allocation8 + $0x170] sm:$0xff]  ;;  %16230 = vst [vmem:[#allocation107_spill] sm:$0xff] %v12808_v24 }
 0x432   :  { %2287 = vmatpush.msrb.mxu3 %v12683_v36  ;;  %2310 = vmatpush.msra.mxu0 %v12679_v12  ;;  %16215 = vst [vmem:[#allocation48_spill] sm:$0xff] %v12757_v6 }
 0x433   :  { %2329 = vmatpush.msra.mxu1 %v12690_v61  ;;  %16231 = vst [vmem:[#allocation108_spill] sm:$0xff] %v12811_v34 }
 0x434   :  { %16232 = vst [vmem:[#allocation109_spill] sm:$0xff] %v12814_v0 }
 0x435   :  { %2330 = vmatpush.msra.mxu1 %v12698_v48  ;;  %16236 = vst [vmem:[#allocation113_spill] sm:$0xff] %v12827_v59 }
 0x436   :  { %10085 = vmatmul.msk.f32.vlgmr.msra.gmra.mxu2 %vm16027_vm7, %v1910_v23  ;;  %10086 = vmatmul.msk.f32.vlgmr.msra.gmra.mxu3 %vm16027_vm7, %v1910_v23  ;;  %16237 = vst [vmem:[#allocation114_spill] sm:$0xff] %v12830_v57 }
 0x437   :  { %10087 = vmatmul.msk.f32.vlgmr.msrb.gmra.mxu0 %vm16027_vm7, %v1910_v23  ;;  %2349 = vmatpush.msra.mxu2 %v12705_v28  ;;  %v12795_v23 = vld [vmem:[#allocation8 + $0x130] sm:$0xff]  ;;  %16238 = vst [vmem:[#allocation115_spill] sm:$0xff] %v12833_v45 }
 0x438   :  { %2372 = vmatpush.msra.mxu3 %v12714_v16  ;;  %2392 = vmatpush.msrb.mxu0 %v12710_v46  ;;  %16227 = vst [vmem:[#allocation94_spill] sm:$0xff] %v12795_v23 }
 0x439   :  { %10088 = vmatmul.msk.f32.vlgmr.msrb.gmra.mxu1 %vm16027_vm7, %v1911_v8  ;;  %2350 = vmatpush.msra.mxu2 %v12720_v49  ;;  %16239 = vst [vmem:[#allocation116_spill] sm:$0xff] %v12836_v35 }
 0x43a   :  { %2373 = vmatpush.msra.mxu3 %v12731_v54  ;;  %2393 = vmatpush.msrb.mxu0 %v12727_v52  ;;  %16240 = vst [vmem:[#allocation117_spill] sm:$0xff] %v12839_v38 }
 0x43b   :  { %2412 = vmatpush.msrb.mxu1 %v12737_v9  ;;  %16241 = vst [vmem:[#allocation118_spill] sm:$0xff] %v12842_v4 }
 0x43c   :  { %16242 = vst [vmem:[#allocation119_spill] sm:$0xff] %v12845_v29 }
 0x43d   :  { %2413 = vmatpush.msrb.mxu1 %v12746_v44  ;;  %16244 = vst [vmem:[#allocation121_spill] sm:$0xff] %v12851_v32 }
 0x43e   :  { %10089 = vmatmul.msk.f32.vlgmr.msrb.gmra.mxu2 %vm16027_vm7, %v1911_v8  ;;  %10090 = vmatmul.msk.f32.vlgmr.msrb.gmra.mxu3 %vm16027_vm7, %v1911_v8  ;;  %v12818_v8 = vld [vmem:[#allocation8 + $0xf0] sm:$0xff] }
 0x43f   :  { %10091 = vmatmul.msk.f32.vlgmr.msra.gmra.mxu0 %vm16027_vm7, %v1912_v3  ;;  %2489 = vmatpush.msrb.mxu2 %v12754_v25  ;;  %16233 = vst [vmem:[#allocation110_spill] sm:$0xff] %v12818_v8 }
 0x440   :  { %2509 = vmatpush.msrb.mxu3 %v12757_v6  ;;  %2529 = vmatpush.msra.mxu0 %v12760_v18 }
 0x441   :  { %10092 = vmatmul.msk.f32.vlgmr.msra.gmra.mxu1 %vm16027_vm7, %v1912_v3  ;;  %2490 = vmatpush.msrb.mxu2 %v12764_v17 }
 0x442   :  { %2510 = vmatpush.msrb.mxu3 %v12767_v40  ;;  %2530 = vmatpush.msra.mxu0 %v12770_v37 }
 0x443   :  { %2552 = vmatpush.msra.mxu1 %v12774_v15  ;;  %2491 = vmatpush.msrb.mxu2 %v12777_v42 }
 0x444   :  { %2511 = vmatpush.msrb.mxu3 %v12780_v53  ;;  %2531 = vmatpush.msra.mxu0 %v12783_v26 }
 0x445   :  { %2553 = vmatpush.msra.mxu1 %v12786_v30  ;;  %2492 = vmatpush.msrb.mxu2 %v12789_v63 }
 0x446   :  { %2512 = vmatpush.msrb.mxu3 %v12792_v33  ;;  %2532 = vmatpush.msra.mxu0 %v12795_v23 }
 0x447   :  { %2554 = vmatpush.msra.mxu1 %v12799_v22  ;;  %10093 = vmatmul.msk.f32.vlgmr.msra.gmra.mxu2 %vm16027_vm7, %v1912_v3  ;;  %v12848_v3 = vld [vmem:[#allocation8 + $0xd0] sm:$0xff] }
 0x448   :  { %10094 = vmatmul.msk.f32.vlgmr.msra.gmra.mxu3 %vm16027_vm7, %v1913_v20  ;;  %10095 = vmatmul.msk.f32.vlgmr.msrb.gmra.mxu0 %vm16027_vm7, %v1913_v20  ;;  %16243 = vst [vmem:[#allocation120_spill] sm:$0xff] %v12848_v3 }
 0x449   :  { %2493 = vmatpush.msrb.mxu2 %v12805_v31  ;;  %2513 = vmatpush.msrb.mxu3 %v12808_v24 }
 0x44a   :  { %2533 = vmatpush.msra.mxu0 %v12811_v34  ;;  %2555 = vmatpush.msra.mxu1 %v12814_v0 }
 0x44b   :  { %10096 = vmatmul.msk.f32.vlgmr.msrb.gmra.mxu1 %vm16027_vm7, %v1913_v20  ;;  %2494 = vmatpush.msrb.mxu2 %v12818_v8  ;;  %v12854_v20 = vld [vmem:[#allocation8 + $0xa8] sm:$0xff] }
 0x44c   :  { %2514 = vmatpush.msrb.mxu3 %v12821_v51  ;;  %2534 = vmatpush.msra.mxu0 %v12824_v41  ;;  %16245 = vst [vmem:[#allocation122_spill] sm:$0xff] %v12854_v20 }
 0x44d   :  { %2556 = vmatpush.msra.mxu1 %v12827_v59  ;;  %2495 = vmatpush.msrb.mxu2 %v12830_v57  ;;  %v12979_v57 = vld [vmem:[#allocation10 + $0x128] sm:$0xff]  ;;  %v16326_v59 = vld [vmem:[#allocation20_spill] sm:$0xff] }
 0x44e   :  { %2515 = vmatpush.msrb.mxu3 %v12833_v45  ;;  %2535 = vmatpush.msra.mxu0 %v12836_v35  ;;  %v12960_v35 = vld [vmem:[#allocation10] sm:$0xff]  ;;  %16289 = vst [vmem:[#allocation161_spill] sm:$0xff] %v12979_v57 }
 0x44f   :  { %2557 = vmatpush.msra.mxu1 %v12839_v38  ;;  %2496 = vmatpush.msrb.mxu2 %v12842_v4  ;;  %v12857_v38 = vld [vmem:[#allocation8 + $0xb0] sm:$0xff]  ;;  %v12860_v4 = vld [vmem:[#allocation8 + $0xb8] sm:$0xff]  ;;  %16280 = vst [vmem:[#allocation156_spill] sm:$0xff] %v12960_v35  ;;  %v12971_v45 = vld [vmem:[#allocation10 + $0x140] sm:$0xff] }
 0x450   :  { %2516 = vmatpush.msrb.mxu3 %v12845_v29  ;;  %2536 = vmatpush.msra.mxu0 %v12848_v3  ;;  %16246 = vst [vmem:[#allocation123_spill] sm:$0xff] %v12857_v38  ;;  %v12863_v29 = vld [vmem:[#allocation10 + $0xc0] sm:$0xff]  ;;  %v12866_v3 = vld [vmem:[#allocation8 + $0x90] sm:$0xff] }
 0x451   :  { %2558 = vmatpush.msra.mxu1 %v12851_v32  ;;  %2497 = vmatpush.msrb.mxu2 %v12854_v20  ;;  %16247 = vst [vmem:[#allocation124_spill] sm:$0xff] %v12860_v4  ;;  %v12869_v32 = vld [vmem:[#allocation8 + $0x98] sm:$0xff]  ;;  %v12872_v20 = vld [vmem:[#allocation8 + $0xa0] sm:$0xff] }
 0x452   :  { %2517 = vmatpush.msrb.mxu3 %v12857_v38  ;;  %2537 = vmatpush.msra.mxu0 %v12860_v4  ;;  %16248 = vst [vmem:[#allocation125_spill] sm:$0xff] %v12863_v29  ;;  %v12875_v38 = vld [vmem:[#allocation10 + $0xa8] sm:$0xff]  ;;  %v12878_v4 = vld [vmem:[#allocation8 + $0x78] sm:$0xff] }
 0x453   :  { %2559 = vmatpush.msra.mxu1 %v12863_v29  ;;  %16249 = vst [vmem:[#allocation126_spill] sm:$0xff] %v12866_v3  ;;  %2498 = vmatpush.msrb.mxu2 %v12866_v3  ;;  %v12881_v29 = vld [vmem:[#allocation8 + $0x80] sm:$0xff]  ;;  %v12884_v3 = vld [vmem:[#allocation8 + $0x88] sm:$0xff] }
 0x454   :  { %16250 = vst [vmem:[#allocation127_spill] sm:$0xff] %v12869_v32  ;;  %2518 = vmatpush.msrb.mxu3 %v12869_v32  ;;  %2538 = vmatpush.msra.mxu0 %v12872_v20  ;;  %v12887_v32 = vld [vmem:[#allocation10 + $0x90] sm:$0xff] }
 0x455   :  { %16251 = vst [vmem:[#allocation128_spill] sm:$0xff] %v12872_v20  ;;  %2560 = vmatpush.msra.mxu1 %v12875_v38  ;;  %2499 = vmatpush.msrb.mxu2 %v12878_v4  ;;  %v12890_v20 = vld [vmem:[#allocation8 + $0x60] sm:$0xff] }
 0x456   :  { %16252 = vst [vmem:[#allocation129_spill] sm:$0xff] %v12875_v38  ;;  %2519 = vmatpush.msrb.mxu3 %v12881_v29  ;;  %2539 = vmatpush.msra.mxu0 %v12884_v3  ;;  %v12893_v38 = vld [vmem:[#allocation8 + $0x68] sm:$0xff] }
 0x457   :  { %16253 = vst [vmem:[#allocation130_spill] sm:$0xff] %v12878_v4  ;;  %2561 = vmatpush.msra.mxu1 %v12887_v32  ;;  %2500 = vmatpush.msrb.mxu2 %v12890_v20  ;;  %v12896_v4 = vld [vmem:[#allocation8 + $0x70] sm:$0xff] }
 0x458   :  { %16254 = vst [vmem:[#allocation131_spill] sm:$0xff] %v12881_v29  ;;  %2520 = vmatpush.msrb.mxu3 %v12893_v38  ;;  %2540 = vmatpush.msra.mxu0 %v12896_v4  ;;  %v12899_v29 = vld [vmem:[#allocation10 + $0x78] sm:$0xff] }
 0x459   :  { %16255 = vst [vmem:[#allocation132_spill] sm:$0xff] %v12884_v3  ;;  %2562 = vmatpush.msra.mxu1 %v12899_v29  ;;  %v12902_v3 = vld [vmem:[#allocation8 + $0x48] sm:$0xff] }
 0x45a   :  { %16256 = vst [vmem:[#allocation133_spill] sm:$0xff] %v12887_v32  ;;  %2501 = vmatpush.msrb.mxu2 %v12902_v3  ;;  %v12905_v32 = vld [vmem:[#allocation8 + $0x50] sm:$0xff] }
 0x45b   :  { %16257 = vst [vmem:[#allocation134_spill] sm:$0xff] %v12890_v20  ;;  %2521 = vmatpush.msrb.mxu3 %v12905_v32  ;;  %v12908_v20 = vld [vmem:[#allocation8 + $0x58] sm:$0xff] }
 0x45c   :  { %16258 = vst [vmem:[#allocation135_spill] sm:$0xff] %v12893_v38  ;;  %2541 = vmatpush.msra.mxu0 %v12908_v20  ;;  %v12911_v38 = vld [vmem:[#allocation10 + $0x60] sm:$0xff] }
 0x45d   :  { %16259 = vst [vmem:[#allocation136_spill] sm:$0xff] %v12896_v4  ;;  %2563 = vmatpush.msra.mxu1 %v12911_v38  ;;  %v12914_v4 = vld [vmem:[#allocation8 + $0x30] sm:$0xff] }
 0x45e   :  { %16260 = vst [vmem:[#allocation137_spill] sm:$0xff] %v12899_v29  ;;  %2502 = vmatpush.msrb.mxu2 %v12914_v4  ;;  %v12917_v29 = vld [vmem:[#allocation8 + $0x38] sm:$0xff] }
 0x45f   :  { %16261 = vst [vmem:[#allocation138_spill] sm:$0xff] %v12902_v3  ;;  %2522 = vmatpush.msrb.mxu3 %v12917_v29  ;;  %v12920_v3 = vld [vmem:[#allocation8 + $0x40] sm:$0xff] }
 0x460   :  { %16262 = vst [vmem:[#allocation139_spill] sm:$0xff] %v12905_v32  ;;  %2542 = vmatpush.msra.mxu0 %v12920_v3  ;;  %v12923_v32 = vld [vmem:[#allocation10 + $0x48] sm:$0xff] }
 0x461   :  { %16263 = vst [vmem:[#allocation140_spill] sm:$0xff] %v12908_v20  ;;  %2564 = vmatpush.msra.mxu1 %v12923_v32  ;;  %v12926_v20 = vld [vmem:[#allocation8 + $0x18] sm:$0xff] }
 0x462   :  { %16264 = vst [vmem:[#allocation141_spill] sm:$0xff] %v12911_v38  ;;  %2503 = vmatpush.msrb.mxu2 %v12926_v20  ;;  %v12929_v38 = vld [vmem:[#allocation8 + $0x20] sm:$0xff] }
 0x463   :  { %16265 = vst [vmem:[#allocation142_spill] sm:$0xff] %v12914_v4  ;;  %2523 = vmatpush.msrb.mxu3 %v12929_v38  ;;  %v12932_v4 = vld [vmem:[#allocation8 + $0x28] sm:$0xff] }
 0x464   :  { %16266 = vst [vmem:[#allocation143_spill] sm:$0xff] %v12917_v29  ;;  %2543 = vmatpush.msra.mxu0 %v12932_v4  ;;  %v12938_v29 = vld [vmem:[#allocation10 + $0x30] sm:$0xff] }
 0x465   :  { %16267 = vst [vmem:[#allocation144_spill] sm:$0xff] %v12920_v3  ;;  %v10097_v3 = vld [vmem:[%s15646_s0 + $0x8] sm:$0xff]  ;;  %2565 = vmatpush.msra.mxu1 %v12938_v29 }
 0x466   :  { %16268 = vst [vmem:[#allocation145_spill] sm:$0xff] %v12923_v32  ;;  %v12941_v32 = vld [vmem:[#allocation8] sm:$0xff] }
 0x467   :  { %16269 = vst [vmem:[#allocation146_spill] sm:$0xff] %v12926_v20  ;;  %2504 = vmatpush.msrb.mxu2 %v12941_v32  ;;  %v12944_v20 = vld [vmem:[#allocation8 + $0x8] sm:$0xff] }
 0x468   :  { %16270 = vst [vmem:[#allocation147_spill] sm:$0xff] %v12929_v38  ;;  %2524 = vmatpush.msrb.mxu3 %v12944_v20  ;;  %v12947_v38 = vld [vmem:[#allocation8 + $0x10] sm:$0xff]  ;;  %2505 = vmatmul.f32.vlgmr.msrb.gmra.mxu2 %v10097_v3 }
 0x469   :  { %16271 = vst [vmem:[#allocation148_spill] sm:$0xff] %v12932_v4  ;;  %2544 = vmatpush.msra.mxu0 %v12947_v38  ;;  %v12950_v4 = vld [vmem:[#allocation10 + $0x18] sm:$0xff]  ;;  %2525 = vmatmul.f32.vlgmr.msrb.gmra.mxu3 %v10097_v3 }
 0x46a   :  { %16272 = vst [vmem:[#allocation149_spill] sm:$0xff] %v12938_v29  ;;  %2566 = vmatpush.msra.mxu1 %v12950_v4  ;;  %2545 = vmatmul.f32.vlgmr.msra.gmra.mxu0 %v10097_v3  ;;  %v12953_v29 = vld [vmem:[#allocation10 + $0x170] sm:$0xff]  ;;  %v12967_v3 = vld [vmem:[#allocation10 + $0x160] sm:$0xff] }
 0x46b   :  { %16273 = vst [vmem:[#allocation150_spill] sm:$0xff] %v12941_v32  ;;  %2572 = vmatpush.msra.mxu2 %v12953_v29  ;;  %v12956_v32 = vld [vmem:[#allocation10 + $0x178] sm:$0xff] }
 0x46c   :  { %16274 = vst [vmem:[#allocation151_spill] sm:$0xff] %v12944_v20  ;;  %2592 = vmatpush.msra.mxu3 %v12956_v32  ;;  %v16279_v20 = vld [vmem:[#allocation32_spill] sm:$0xff]  ;;  %2567 = vmatpush.msra.mxu1 %v12960_v35  ;;  %v16287_v35 = vld [vmem:[#allocation34_spill] sm:$0xff] }
 0x46d   :  { %16275 = vst [vmem:[#allocation152_spill] sm:$0xff] %v12947_v38  ;;  %2690 = vmatpush.xpose.msrb.mxu0 %v16279_v20  ;;  %v16281_v38 = vld [vmem:[#allocation83_spill] sm:$0xff] }
 0x46e   :  { %16276 = vst [vmem:[#allocation153_spill] sm:$0xff] %v12950_v4  ;;  %2568 = vmatmul.f32.vlgmr.msra.gmra.mxu1 %v16281_v38  ;;  %v12964_v4 = vld [vmem:[#allocation10 + $0x158] sm:$0xff]  ;;  %2593 = vmatpush.msra.mxu3 %v12967_v3  ;;  %v12974_v20 = vld [vmem:[#allocation10 + $0x148] sm:$0xff] }
 0x46f   :  { %16277 = vst [vmem:[#allocation154_spill] sm:$0xff] %v12953_v29  ;;  %2573 = vmatpush.msra.mxu2 %v12964_v4  ;;  %v16284_v29 = vld [vmem:[#allocation58_spill] sm:$0xff] }
 0x470   :  { %16278 = vst [vmem:[#allocation155_spill] sm:$0xff] %v12956_v32  ;;  %2710 = vmatpush.xpose.msrb.mxu1 %v16284_v29  ;;  %2594 = vmatpush.msra.mxu3 %v12974_v20  ;;  %v16288_v32 = vld [vmem:[#allocation59_spill] sm:$0xff]  ;;  %v16291_v29 = vld [vmem:[#allocation61_spill] sm:$0xff] }
 0x471   :  { %16282 = vst [vmem:[#allocation157_spill] sm:$0xff] %v12964_v4  ;;  %2574 = vmatpush.msra.mxu2 %v12971_v45  ;;  %2691 = vmatpush.xpose.msrb.mxu0 %v16287_v35  ;;  %v12982_v4 = vld [vmem:[#allocation10 + $0x130] sm:$0xff]  ;;  %v12994_v35 = vld [vmem:[#allocation10 + $0xf8] sm:$0xff] }
 0x472   :  { %16283 = vst [vmem:[#allocation158_spill] sm:$0xff] %v12967_v3  ;;  %2595 = vmatpush.msra.mxu3 %v12982_v4  ;;  %v16292_v3 = vld [vmem:[#allocation64_spill] sm:$0xff] }
 0x473   :  { %16285 = vst [vmem:[#allocation159_spill] sm:$0xff] %v12971_v45  ;;  %2575 = vmatpush.msra.mxu2 %v12979_v57  ;;  %v12987_v45 = vld [vmem:[#allocation10 + $0x110] sm:$0xff]  ;;  %v12997_v57 = vld [vmem:[#allocation10 + $0x100] sm:$0xff] }
 0x474   :  { %16286 = vst [vmem:[#allocation160_spill] sm:$0xff] %v12974_v20  ;;  %2711 = vmatpush.xpose.msrb.mxu1 %v16291_v29  ;;  %v12990_v20 = vld [vmem:[#allocation10 + $0x118] sm:$0xff] }
 0x475   :  { %2730 = vmatpush.xpose.msra.mxu0 %v16288_v32  ;;  %16290 = vst [vmem:[#allocation162_spill] sm:$0xff] %v12982_v4  ;;  %2576 = vmatpush.msra.mxu2 %v12987_v45  ;;  %v16295_v32 = vld [vmem:[#allocation62_spill] sm:$0xff]  ;;  %v16298_v29 = vld [vmem:[#allocation65_spill] sm:$0xff]  ;;  %v16324_v4 = vld [vmem:[#allocation23_spill] sm:$0xff] }
 0x476   :  { %16293 = vst [vmem:[#allocation163_spill] sm:$0xff] %v12987_v45  ;;  %2596 = vmatpush.msra.mxu3 %v12990_v20  ;;  %v13004_v45 = vld [vmem:[#allocation10 + $0xe8] sm:$0xff] }
 0x477   :  { %16294 = vst [vmem:[#allocation164_spill] sm:$0xff] %v12990_v20  ;;  %2577 = vmatpush.msra.mxu2 %v12994_v35  ;;  %v13007_v20 = vld [vmem:[#allocation10 + $0xc8] sm:$0xff] }
 0x478   :  { %2750 = vmatpush.xpose.msra.mxu1 %v16292_v3  ;;  %16296 = vst [vmem:[#allocation165_spill] sm:$0xff] %v12994_v35  ;;  %2597 = vmatpush.msra.mxu3 %v12997_v57  ;;  %v13001_v3 = vld [vmem:[#allocation10 + $0xe0] sm:$0xff]  ;;  %v13013_v35 = vld [vmem:[#allocation10 + $0xb0] sm:$0xff] }
 0x479   :  { %2731 = vmatpush.xpose.msra.mxu0 %v16295_v32  ;;  %16297 = vst [vmem:[#allocation166_spill] sm:$0xff] %v12997_v57  ;;  %2578 = vmatpush.msra.mxu2 %v13001_v3  ;;  %v13010_v32 = vld [vmem:[#allocation10 + $0xd0] sm:$0xff]  ;;  %v16322_v57 = vld [vmem:[#allocation91_spill] sm:$0xff] }
 0x47a   :  { %16299 = vst [vmem:[#allocation167_spill] sm:$0xff] %v13001_v3  ;;  %2598 = vmatpush.msra.mxu3 %v13004_v45  ;;  %v13019_v3 = vld [vmem:[#allocation10 + $0x98] sm:$0xff] }
 0x47b   :  { %16300 = vst [vmem:[#allocation168_spill] sm:$0xff] %v13004_v45  ;;  %2579 = vmatpush.msra.mxu2 %v13007_v20  ;;  %v13022_v45 = vld [vmem:[#allocation10 + $0xa0] sm:$0xff] }
 0x47c   :  { %2751 = vmatpush.xpose.msra.mxu1 %v16298_v29  ;;  %16301 = vst [vmem:[#allocation169_spill] sm:$0xff] %v13007_v20  ;;  %2599 = vmatpush.msra.mxu3 %v13010_v32  ;;  %v13016_v29 = vld [vmem:[#allocation10 + $0xb8] sm:$0xff]  ;;  %v13025_v20 = vld [vmem:[#allocation10 + $0x80] sm:$0xff] }
 0x47d   :  { %16302 = vst [vmem:[#allocation170_spill] sm:$0xff] %v13010_v32  ;;  %2580 = vmatpush.msra.mxu2 %v13013_v35  ;;  %v13028_v32 = vld [vmem:[#allocation10 + $0x88] sm:$0xff] }
 0x47e   :  { %16303 = vst [vmem:[#allocation171_spill] sm:$0xff] %v13013_v35  ;;  %2600 = vmatpush.msra.mxu3 %v13016_v29  ;;  %v13031_v35 = vld [vmem:[#allocation10 + $0x68] sm:$0xff] }
 0x47f   :  { %16304 = vst [vmem:[#allocation172_spill] sm:$0xff] %v13016_v29  ;;  %2581 = vmatpush.msra.mxu2 %v13019_v3  ;;  %v13034_v29 = vld [vmem:[#allocation10 + $0x70] sm:$0xff] }
 0x480   :  { %16305 = vst [vmem:[#allocation173_spill] sm:$0xff] %v13019_v3  ;;  %2601 = vmatpush.msra.mxu3 %v13022_v45  ;;  %v13037_v3 = vld [vmem:[#allocation10 + $0x50] sm:$0xff] }
 0x481   :  { %16306 = vst [vmem:[#allocation174_spill] sm:$0xff] %v13022_v45  ;;  %2582 = vmatpush.msra.mxu2 %v13025_v20  ;;  %v13040_v45 = vld [vmem:[#allocation10 + $0x58] sm:$0xff] }
 0x482   :  { %16307 = vst [vmem:[#allocation175_spill] sm:$0xff] %v13025_v20  ;;  %2602 = vmatpush.msra.mxu3 %v13028_v32  ;;  %v13043_v20 = vld [vmem:[#allocation10 + $0x38] sm:$0xff] }
 0x483   :  { %16308 = vst [vmem:[#allocation176_spill] sm:$0xff] %v13028_v32  ;;  %2583 = vmatpush.msra.mxu2 %v13031_v35  ;;  %v13046_v32 = vld [vmem:[#allocation10 + $0x40] sm:$0xff] }
 0x484   :  { %16309 = vst [vmem:[#allocation177_spill] sm:$0xff] %v13031_v35  ;;  %2603 = vmatpush.msra.mxu3 %v13034_v29  ;;  %v13049_v35 = vld [vmem:[#allocation10 + $0x20] sm:$0xff] }
 0x485   :  { %16310 = vst [vmem:[#allocation178_spill] sm:$0xff] %v13034_v29  ;;  %2584 = vmatpush.msra.mxu2 %v13037_v3  ;;  %v13052_v29 = vld [vmem:[#allocation10 + $0x28] sm:$0xff] }
 0x486   :  { %16311 = vst [vmem:[#allocation179_spill] sm:$0xff] %v13037_v3  ;;  %2604 = vmatpush.msra.mxu3 %v13040_v45  ;;  %v13055_v3 = vld [vmem:[#allocation10 + $0x8] sm:$0xff] }
 0x487   :  { %16312 = vst [vmem:[#allocation180_spill] sm:$0xff] %v13040_v45  ;;  %2585 = vmatpush.msra.mxu2 %v13043_v20  ;;  %v13058_v45 = vld [vmem:[#allocation10 + $0x10] sm:$0xff] }
 0x488   :  { %16313 = vst [vmem:[#allocation181_spill] sm:$0xff] %v13043_v20  ;;  %2605 = vmatpush.msra.mxu3 %v13046_v32  ;;  %v16320_v20 = vld [vmem:[#allocation90_spill] sm:$0xff] }
 0x489   :  { %16314 = vst [vmem:[#allocation182_spill] sm:$0xff] %v13046_v32  ;;  %2586 = vmatpush.msra.mxu2 %v13049_v35  ;;  %v16319_v32 = vld [vmem:[#allocation66_spill] sm:$0xff] }
 0x48a   :  { %16315 = vst [vmem:[#allocation183_spill] sm:$0xff] %v13049_v35  ;;  %2606 = vmatpush.msra.mxu3 %v13052_v29  ;;  %v16321_v35 = vld [vmem:[#allocation63_spill] sm:$0xff] }
 0x48b   :  { %16316 = vst [vmem:[#allocation184_spill] sm:$0xff] %v13052_v29  ;;  %2587 = vmatpush.msra.mxu2 %v13055_v3  ;;  %v16323_v29 = vld [vmem:[#allocation22_spill] sm:$0xff] }
 0x48c   :  { %16317 = vst [vmem:[#allocation185_spill] sm:$0xff] %v13055_v3  ;;  %2607 = vmatpush.msra.mxu3 %v13058_v45  ;;  %2588 = vmatmul.f32.vlgmr.msra.gmra.mxu2 %v16281_v38  ;;  %v16325_v3 = vld [vmem:[#allocation19_spill] sm:$0xff] }
 0x48d   :  { %16318 = vst [vmem:[#allocation186_spill] sm:$0xff] %v13058_v45  ;;  %2608 = vmatmul.f32.vlgmr.msra.gmra.mxu3 %v16281_v38  ;;  %2981 = vmatpush.msrb.mxu2 %v16319_v32 }
 0x48e   :  { %3001 = vmatpush.msrb.mxu3 %v16320_v20 }
 0x48f   :  { %2982 = vmatpush.msrb.mxu2 %v16321_v35 }
 0x490   :  { %3002 = vmatpush.msrb.mxu3 %v16322_v57 }
 0x491   :  { %3064 = vmatpush.msra.mxu2 %v16323_v29 }
 0x492   :  { %3084 = vmatpush.msra.mxu3 %v16324_v4 }
 0x493   :  { %3065 = vmatpush.msra.mxu2 %v16325_v3 }
 0x494   :  { %3085 = vmatpush.msra.mxu3 %v16326_v59 }
 0x49c   :  { %v13071_v8 = vpop.f32.mrf.mxu0 }
 0x49e   :  { %v1997_v45 = vpop.f32.mrf.mxu1 }
 0x49f   :  { %v2444_v30 = vrot.slane %v1997_v45, 7 }
 0x4a1   :  { %v1934_v41 = vpop.f32.mrf.mxu2  ;;  %v1954_v51 = vpop.f32.mrf.mxu3 }
 0x4a2   :  { %v2445_v42 = vsel %vm16026_vm0, %v2444_v30, %v1934_v41 }
 0x4a4   :  { %v2060_v35 = vpop.f32.mrf.mxu0 }
 0x4a5   :  { %v2446_v63 = vrot.slane %v2060_v35, 6 }
 0x4a6   :  { %v2080_v32 = vpop.f32.mrf.mxu1 }
 0x4a7   :  { %v2447_v15 = vsel %vm16025_vm1, %v2446_v63, %v2445_v42 }
 0x4a9   :  { %v2017_v0 = vpop.f32.mrf.mxu2  ;;  %v13073_v20 = vpop.f32.mrf.mxu3 }
 0x4ac   :  { %v2143_v4 = vpop.f32.mrf.mxu0 }
 0x4ae   :  { %v13075_v34 = vpop.f32.mrf.mxu1 }
 0x4b1   :  { %v13077_v57 = vpop.f32.mrf.mxu2  ;;  %v2123_v29 = vpop.f32.mrf.mxu3 }
 0x4b2   :  { %v2448_v26 = vrot.slane %v2123_v29, 5 }
 0x4b4   :  { %v13079_v59 = vpop.f32.mrf.mxu0  ;;  %v2449_v40 = vsel %vm16024_vm2, %v2448_v26, %v2447_v15  ;;  %v16327_v15 = vld [vmem:[#allocation75_spill] sm:$0xff] }
 0x4b6   :  { %v2249_v24 = vpop.f32.mrf.mxu1 }
 0x4b7   :  { %v2452_v44 = vrot.slane %v2249_v24, 3 }
 0x4b9   :  { %v2186_v3 = vpop.f32.mrf.mxu2  ;;  %v2206_v31 = vpop.f32.mrf.mxu3 }
 0x4ba   :  { %v2450_v53 = vrot.slane %v2186_v3, 4  ;;  %v16328_v3 = vld [vmem:[#allocation73_spill] sm:$0xff] }
 0x4bc   :  { %v2312_v37 = vpop.f32.mrf.mxu0  ;;  %v2451_v6 = vsel %vm16023_vm3, %v2450_v53, %v2449_v40  ;;  %v2458_v40 = vrot.slane %v2017_v0, 7 }
 0x4bd   :  { %v2454_v9 = vrot.slane %v2312_v37, 2  ;;  %v2453_v45 = vsel %vm16022_vm4, %v2452_v44, %v2451_v6  ;;  %v2460_v37 = vrot.slane %v2080_v32, 6  ;;  %v2462_v44 = vrot.slane %v2143_v4, 5 }
 0x4be   :  { %v2332_v22 = vpop.f32.mrf.mxu1  ;;  %v2464_v6 = vrot.slane %v2206_v31, 4 }
 0x4bf   :  { %v2455_v29 = vsel %vm16021_vm5, %v2454_v9, %v2453_v45 }
 0x4c1   :  { %v2269_v23 = vpop.f32.mrf.mxu2  ;;  %v13081_v33 = vpop.f32.mrf.mxu3 }
 0x4c8   :  { %v13086_v17 = vpop.f32.mrf.mxu1 }
 0x4ca   :  { %v13088_v18 = vpop.f32.mrf.mxu2 }
 0x4cb   :  { %v2375_v25 = vpop.f32.mrf.mxu3 }
 0x4cc   :  { %v2456_v35 = vrot.slane %v2375_v25, 1  ;;  %v2459_v25 = vsel %vm16026_vm0, %v2458_v40, %v1954_v51  ;;  %v16330_v40 = vld [vmem:[#allocation76_spill] sm:$0xff] }
 0x4cd   :  { %v2461_v9 = vsel %vm16025_vm1, %v2460_v37, %v2459_v25  ;;  %v2474_v25 = vrot.slane %v13077_v57, 6  ;;  %v2482_v57 = vrot.slane %v13088_v18, 2 }
 0x4ce   :  { %v2457_v42 = vsel %vm16020_vm6, %v2456_v35, %v2455_v29  ;;  %v2466_v35 = vrot.slane %v2269_v23, 3  ;;  %v2463_v45 = vsel %vm16024_vm2, %v2462_v44, %v2461_v9  ;;  %v2472_v23 = vrot.slane %v13073_v20, 7 }
 0x4cf   :  { %v2465_v29 = vsel %vm16023_vm3, %v2464_v6, %v2463_v45  ;;  %v2476_v45 = vrot.slane %v13075_v34, 5  ;;  %v2478_v20 = vrot.slane %v13079_v59, 4 }
 0x4d0   :  { %v2473_v44 = vsel %vm16026_vm0, %v2472_v23, %v13071_v8 }
 0x4d1   :  { %v2475_v6 = vsel %vm16025_vm1, %v2474_v25, %v2473_v44 }
 0x4eb   :  { %v2569_v30 = vpop.f32.mrf.mxu1  ;;  %v2506_v63 = vpop.f32.mrf.mxu2 }
 0x4ec   :  { %v2507_v41 = vadd.f32 %v2506_v63, %v2457_v42  ;;  %v2570_v26 = vadd.f32 %v2569_v30, %v16327_v15  ;;  %v2395_v30 = vpop.f32.mrf.mxu0  ;;  %v2526_v51 = vpop.f32.mrf.mxu3 }
 0x4ee   :  { %v2549_v52 = vadd.f32 %v2507_v41, %v16328_v3  ;;  %v16329_v41 = vld [vmem:[#allocation74_spill] sm:$0xff] }
 0x4f0   :  { %v2612_v54 = vadd.f32 %v2570_v26, %v2549_v52  ;;  %v2467_v52 = vsel %vm16022_vm4, %v2466_v35, %v2465_v29  ;;  %v2477_v29 = vsel %vm16024_vm2, %v2476_v45, %v2475_v6 }
 0x4f1   :  { %v2479_v8 = vsel %vm16023_vm3, %v2478_v20, %v2477_v29 }
 0x4f2   :  { %v10098_v49 = vmul.f32 -1.442695, %v2612_v54  ;;  %v2470_v54 = vrot.slane %v2395_v30, 1  ;;  %v2480_v30 = vrot.slane %v13081_v33, 3  ;;  %v2484_v33 = vrot.slane %v13086_v17, 1 }
 0x4f4   :  { %10443 = vpow2.f32 %v10098_v49  ;;  %v2468_v49 = vrot.slane %v2332_v22, 2 }
 0x4f6   :  { %v2469_v0 = vsel %vm16021_vm5, %v2468_v49, %v2467_v52 }
 0x4f7   :  { %v2471_v4 = vsel %vm16020_vm6, %v2470_v54, %v2469_v0 }
 0x4f8   :  { %v2527_v42 = vadd.f32 %v2526_v51, %v2471_v4  ;;  %v2481_v51 = vsel %vm16022_vm4, %v2480_v30, %v2479_v8 }
 0x4f9   :  { %v2483_v59 = vsel %vm16021_vm5, %v2482_v57, %v2481_v51 }
 0x4fa   :  { %v10444_v53 = vpop.eup %10443  ;;  %v2550_v26 = vadd.f32 %v2527_v42, %v16329_v41 }
 0x4fb   :  { %v2616_v24 = vadd.f32 1.0, %v10444_v53 }
 0x4fd   :  { %10445 = vrcp.f32 %v2616_v24  ;;  %v2628_v49 = vand.u32 2147483648, %v2616_v24  ;;  %vm2622_vm9 = vweird.f32 %v2616_v24  ;;  %v2626_v54 = vand.u32 2147483647, %v2616_v24 }
 0x4ff   :  { %v2629_v18 = vor.u32 1.1754944e-38, %v2628_v49  ;;  %vm2627_vm11 = vcmp.eq.f32.partialorder %v2626_v54, 8.507059e+37 }
 0x503   :  { %v10446_v32 = vpop.eup %10445 }
 0x504   :  { %v2618_v31 = vmul.f32 %v10446_v32, %v2616_v24  ;;  %vm2623_vm8 = vweird.f32 %v10446_v32 }
 0x505   :  { %vm2624_vm10 = vmor %vm2622_vm9, %vm2623_vm8 }
 0x506   :  { %v2619_v37 = vsub.f32 1.0, %v2618_v31  ;;  %v2546_v31 = vpop.f32.mrf.mxu0 }
 0x508   :  { %v2620_v35 = vmul.f32 %v10446_v32, %v2619_v37 }
 0x50a   :  { %v2621_v52 = vadd.f32 %v10446_v32, %v2620_v35 }
 0x50c   :  { %v2625_v42 = vsel %vm2624_vm10, %v10446_v32, %v2621_v52 }
 0x50d   :  { %v2630_v24 = vsel %vm2627_vm11, %v2629_v18, %v2625_v42  ;;  %v16338_v18 = vld [vmem:[#allocation14_spill] sm:$0xff] }
 0x50f   :  { %v2589_v63 = vpop.f32.mrf.mxu2 }
 0x510   :  { %v2590_v53 = vadd.f32 %v2589_v63, %v16330_v40  ;;  %v2609_v34 = vpop.f32.mrf.mxu3  ;;  %v16331_v63 = vld [vmem:[#allocation81_spill] sm:$0xff] }
 0x511   :  { %v2610_v23 = vadd.f32 %v2609_v34, %v16331_v63  ;;  %v16334_v34 = vld [vmem:[#allocation84_spill] sm:$0xff] }
 0x512   :  { %v2632_v22 = vadd.f32 %v2590_v53, %v2550_v26  ;;  %v2485_v26 = vsel %vm16020_vm6, %v2484_v33, %v2483_v59  ;;  %v16335_v59 = vld [vmem:[#allocation85_spill] sm:$0xff] }
 0x513   :  { %v2547_v53 = vadd.f32 %v2546_v31, %v2485_v26  ;;  %v2652_v25 = vmul.f32 %v2630_v24, %v2610_v23  ;;  %v16337_v33 = vld [vmem:[#allocation89_spill] sm:$0xff]  ;;  %v16339_v23 = vld [vmem:[#allocation16_spill] sm:$0xff]  ;;  %v16340_v26 = vld [vmem:[#allocation15_spill] sm:$0xff] }
 0x514   :  { %v10099_v9 = vmul.f32 -1.442695, %v2632_v22  ;;  %v16332_v22 = vld [vmem:[#allocation82_spill] sm:$0xff] }
 0x515   :  { %v2551_v44 = vadd.f32 %v2547_v53, %v16332_v22  ;;  %v16341_v53 = vld [vmem:[#allocation17_spill] sm:$0xff] }
 0x516   :  { %10447 = vpow2.f32 %v10099_v9 }
 0x517   :  { %v2653_v6 = vadd.f32 %v2652_v25, %v2551_v44  ;;  %v16343_v44 = vld [vmem:[#allocation79_spill] sm:$0xff] }
 0x51c   :  { %v10448_v0 = vpop.eup %10447 }
 0x51d   :  { %v2636_v4 = vadd.f32 1.0, %v10448_v0 }
 0x51f   :  { %10449 = vrcp.f32 %v2636_v4  ;;  %v2648_v32 = vand.u32 2147483648, %v2636_v4  ;;  %v2646_v17 = vand.u32 2147483647, %v2636_v4  ;;  %vm2642_vm13 = vweird.f32 %v2636_v4 }
 0x520   :  { %10451 = vtanh.f32 %v2653_v6  ;;  %v16345_v6 = vld [vmem:[#allocation67_spill] sm:$0xff] }
 0x521   :  { %v2649_v29 = vor.u32 1.1754944e-38, %v2648_v32  ;;  %vm2647_vm15 = vcmp.eq.f32.partialorder %v2646_v17, 8.507059e+37  ;;  %v16347_v17 = vld [vmem:[#allocation69_spill] sm:$0xff] }
 0x525   :  { %v10450_v37 = vpop.eup %10449 }
 0x526   :  { %v2638_v9 = vmul.f32 %v10450_v37, %v2636_v4  ;;  %vm2643_vm12 = vweird.f32 %v10450_v37  ;;  %v10452_v49 = vpop.eup %10451  ;;  %v16336_v4 = vld [vmem:[#allocation87_spill] sm:$0xff] }
 0x527   :  { %vm2644_vm14 = vmor %vm2642_vm13, %vm2643_vm12 }
 0x528   :  { %v2639_v35 = vsub.f32 1.0, %v2638_v9  ;;  %v16344_v9 = vld [vmem:[#allocation68_spill] sm:$0xff] }
 0x52a   :  { %v2640_v45 = vmul.f32 %v10450_v37, %v2639_v35 }
 0x52c   :  { %v2641_v20 = vadd.f32 %v10450_v37, %v2640_v45  ;;  %v16346_v45 = vld [vmem:[#allocation70_spill] sm:$0xff] }
 0x52e   :  { %v2645_v30 = vsel %vm2644_vm14, %v10450_v37, %v2641_v20  ;;  %v16342_v37 = vld [vmem:[#allocation80_spill] sm:$0xff]  ;;  %v16348_v20 = vld [vmem:[#allocation86_spill] sm:$0xff] }
 0x52f   :  { %v2650_v57 = vsel %vm2647_vm15, %v2649_v29, %v2645_v30  ;;  %v16349_v29 = vld [vmem:[#allocation88_spill] sm:$0xff] }
 0x530   :  { %v2655_v52 = vsub.f32 1.0, %v2650_v57  ;;  %v2657_v54 = vmul.f32 %v2650_v57, %v16281_v38 }
 0x532   :  { %v2656_v8 = vmul.f32 %v10452_v49, %v2655_v52 }
 0x534   :  { %v13123_v0 = vadd.f32 %v2657_v54, %v2656_v8  ;;  %v16350_v8 = vld [vmem:[#allocation97_spill] sm:$0xff] }
 0x536   :  { %16333 = vst [vmem:[#allocation75_spill] sm:$0xff] %v13123_v0  ;;  %2692 = vmatmul.f32.vlgmr.msrb.gmra.mxu0 %v13123_v0  ;;  %v15875_v51 = vrot.slane %v13123_v0, 1  ;;  %v15874_v42 = vrot.slane %v13123_v0, 2  ;;  %v15873_v31 = vrot.slane %v13123_v0, 3  ;;  %v15872_v24 = vrot.slane %v13123_v0, 4 }
 0x537   :  { %2770 = vmatpush.xpose.msrb.mxu0 %v16334_v34  ;;  %v15876_v25 = vrot.slane %v13123_v0, 5  ;;  %v15871_v35 = vrot.slane %v13123_v0, 6  ;;  %v15878_v32 = vrot.slane %v13123_v0, 7 }
 0x538   :  { %2712 = vmatmul.f32.vlgmr.msrb.gmra.mxu1 %v15875_v51 }
 0x539   :  { %2790 = vmatpush.xpose.msrb.mxu1 %v16335_v59 }
 0x53b   :  { %2771 = vmatpush.xpose.msrb.mxu0 %v16336_v4 }
 0x53d   :  { %2791 = vmatpush.xpose.msrb.mxu1 %v16337_v33 }
 0x53e   :  { %2732 = vmatmul.f32.vlgmr.msra.gmra.mxu0 %v15874_v42  ;;  %v16352_v42 = vld [vmem:[#allocation101_spill] sm:$0xff] }
 0x53f   :  { %2810 = vmatpush.xpose.msra.mxu0 %v16338_v18 }
 0x540   :  { %2752 = vmatmul.f32.vlgmr.msra.gmra.mxu1 %v15873_v31 }
 0x541   :  { %2830 = vmatpush.xpose.msra.mxu1 %v16339_v23 }
 0x543   :  { %2811 = vmatpush.xpose.msra.mxu0 %v16340_v26 }
 0x545   :  { %2831 = vmatpush.xpose.msra.mxu1 %v16341_v53 }
 0x546   :  { %2772 = vmatmul.f32.vlgmr.msrb.gmra.mxu0 %v15872_v24 }
 0x547   :  { %3021 = vmatpush.msrb.mxu0 %v16342_v37 }
 0x548   :  { %2792 = vmatmul.f32.vlgmr.msrb.gmra.mxu1 %v15876_v25 }
 0x549   :  { %3022 = vmatpush.msrb.mxu0 %v16343_v44  ;;  %3044 = vmatpush.msrb.mxu1 %v16344_v9  ;;  %v16355_v44 = vld [vmem:[#allocation105_spill] sm:$0xff] }
 0x54b   :  { %3045 = vmatpush.msrb.mxu1 %v16345_v6 }
 0x54e   :  { %2812 = vmatmul.f32.vlgmr.msra.gmra.mxu0 %v15871_v35  ;;  %v16351_v35 = vld [vmem:[#allocation99_spill] sm:$0xff] }
 0x54f   :  { %3107 = vmatpush.msra.mxu0 %v16346_v45 }
 0x550   :  { %2832 = vmatmul.f32.vlgmr.msra.gmra.mxu1 %v15878_v32  ;;  %v16353_v32 = vld [vmem:[#allocation102_spill] sm:$0xff] }
 0x551   :  { %3108 = vmatpush.msra.mxu0 %v16347_v17  ;;  %3127 = vmatpush.msra.mxu1 %v16348_v20  ;;  %v16354_v17 = vld [vmem:[#allocation96_spill] sm:$0xff] }
 0x553   :  { %3128 = vmatpush.msra.mxu1 %v16349_v29 }
 0x5b3   :  { %v2693_v30 = vpop.f32.mrf.mxu0 }
 0x5b4   :  { %v2836_v6 = vadd.f32 %v2693_v30, %v16354_v17  ;;  %v16357_v30 = vld [vmem:[#allocation104_spill] sm:$0xff] }
 0x5b5   :  { %v2713_v57 = vpop.f32.mrf.mxu1 }
 0x5b6   :  { %v2837_v54 = vadd.f32 %v2713_v57, %v16350_v8 }
 0x5b8   :  { %v2852_v31 = vrot.slane %v2837_v54, 7 }
 0x5ba   :  { %v2853_v29 = vsel %vm16026_vm0, %v2852_v31, %v2836_v6 }
 0x5bb   :  { %v2733_v52 = vpop.f32.mrf.mxu0 }
 0x5bc   :  { %v2838_v24 = vadd.f32 %v2733_v52, %v16351_v35 }
 0x5bd   :  { %v2753_v49 = vpop.f32.mrf.mxu1 }
 0x5be   :  { %v2839_v51 = vadd.f32 %v2753_v49, %v16352_v42  ;;  %v2854_v38 = vrot.slane %v2838_v24, 6  ;;  %v16356_v49 = vld [vmem:[#allocation103_spill] sm:$0xff] }
 0x5c0   :  { %v2856_v9 = vrot.slane %v2839_v51, 5  ;;  %v2855_v53 = vsel %vm16025_vm1, %v2854_v38, %v2853_v29 }
 0x5c2   :  { %v2857_v52 = vsel %vm16024_vm2, %v2856_v9, %v2855_v53 }
 0x5c3   :  { %v2773_v25 = vpop.f32.mrf.mxu0 }
 0x5c4   :  { %v2840_v45 = vadd.f32 %v2773_v25, %v16353_v32 }
 0x5c5   :  { %v2793_v20 = vpop.f32.mrf.mxu1 }
 0x5c6   :  { %v2841_v37 = vadd.f32 %v2793_v20, %v16355_v44  ;;  %v2858_v57 = vrot.slane %v2840_v45, 4 }
 0x5c8   :  { %v2860_v35 = vrot.slane %v2841_v37, 3  ;;  %v2859_v26 = vsel %vm16023_vm3, %v2858_v57, %v2857_v52 }
 0x5ca   :  { %v2861_v31 = vsel %vm16022_vm4, %v2860_v35, %v2859_v26 }
 0x5cb   :  { %v2813_v8 = vpop.f32.mrf.mxu0 }
 0x5cc   :  { %v2842_v42 = vadd.f32 %v2813_v8, %v16356_v49 }
 0x5cd   :  { %v2833_v25 = vpop.f32.mrf.mxu1 }
 0x5ce   :  { %v2862_v32 = vrot.slane %v2842_v42, 2  ;;  %v2843_v17 = vadd.f32 %v2833_v25, %v16357_v30 }
 0x5d0   :  { %v2864_v23 = vrot.slane %v2843_v17, 1  ;;  %v2863_v20 = vsel %vm16021_vm5, %v2862_v32, %v2861_v31 }
 0x5d2   :  { %v2865_v38 = vsel %vm16020_vm6, %v2864_v23, %v2863_v20 }
 0x5d3   :  { %v2867_v29 = vsel %vm16027_vm7, %v2865_v38, -inf }
 0x5d4   :  { %2868 = vmax.xlane.f32.xlu1 %v2867_v29 }
 0x647   :  { %v2869_v53 = vpop.xlane.xlu1 %2868 }
 0x648   :  { %v2871_v9 = vrot.slane %v2869_v53, 1  ;;  %v2872_v44 = vrot.slane %v2869_v53, 2  ;;  %v2873_v8 = vrot.slane %v2869_v53, 3  ;;  %v2874_v49 = vrot.slane %v2869_v53, 4 }
 0x649   :  { %v2875_v57 = vrot.slane %v2869_v53, 5  ;;  %v2886_v52 = vsub.f32 %v2836_v6, %v2869_v53  ;;  %v2876_v18 = vrot.slane %v2869_v53, 6  ;;  %v2877_v33 = vrot.slane %v2869_v53, 7 }
 0x64a   :  { %v2887_v25 = vsub.f32 %v2837_v54, %v2871_v9  ;;  %v2888_v30 = vsub.f32 %v2838_v24, %v2872_v44  ;;  %v2889_v26 = vsub.f32 %v2839_v51, %v2873_v8  ;;  %v2890_v35 = vsub.f32 %v2840_v45, %v2874_v49 }
 0x64b   :  { %v2894_v4 = vmul.f32 1.442695, %v2886_v52  ;;  %v2891_v32 = vsub.f32 %v2841_v37, %v2875_v57  ;;  %v2892_v31 = vsub.f32 %v2842_v42, %v2876_v18  ;;  %v2893_v29 = vsub.f32 %v2843_v17, %v2877_v33 }
 0x64c   :  { %v2896_v23 = vmul.f32 1.442695, %v2887_v25  ;;  %v2898_v20 = vmul.f32 1.442695, %v2888_v30  ;;  %v2900_v38 = vmul.f32 1.442695, %v2889_v26 }
 0x64d   :  { %10453 = vpow2.f32 %v2894_v4  ;;  %v2902_v59 = vmul.f32 1.442695, %v2890_v35  ;;  %v2904_v34 = vmul.f32 1.442695, %v2891_v32  ;;  %v2906_v22 = vmul.f32 1.442695, %v2892_v31 }
 0x64e   :  { %10455 = vpow2.f32 %v2896_v23  ;;  %v2908_v6 = vmul.f32 1.442695, %v2893_v29 }
 0x64f   :  { %10457 = vpow2.f32 %v2898_v20 }
 0x650   :  { %10459 = vpow2.f32 %v2900_v38 }
 0x651   :  { %10461 = vpow2.f32 %v2902_v59 }
 0x652   :  { %10463 = vpow2.f32 %v2904_v34 }
 0x653   :  { %v10454_v24 = vpop.eup %10453  ;;  %10465 = vpow2.f32 %v2906_v22 }
 0x654   :  { %v10456_v51 = vpop.eup %10455  ;;  %10467 = vpow2.f32 %v2908_v6 }
 0x655   :  { %v10458_v37 = vpop.eup %10457  ;;  %v2918_v42 = vrot.slane %v10456_v51, 7 }
 0x656   :  { %v10460_v18 = vpop.eup %10459  ;;  %v2920_v44 = vrot.slane %v10458_v37, 6 }
 0x657   :  { %v13179_v45 = vpop.eup %10461  ;;  %v2919_v4 = vsel %vm16026_vm0, %v2918_v42, %v10454_v24  ;;  %v2922_v33 = vrot.slane %v10460_v18, 5 }
 0x658   :  { %v13182_v17 = vpop.eup %10463  ;;  %v2921_v54 = vsel %vm16025_vm1, %v2920_v44, %v2919_v4  ;;  %v2924_v59 = vrot.slane %v13179_v45, 4 }
 0x659   :  { %v13186_v34 = vpop.eup %10465  ;;  %v2923_v22 = vsel %vm16024_vm2, %v2922_v33, %v2921_v54  ;;  %v2926_v49 = vrot.slane %v13182_v17, 3  ;;  %v16358_v54 = vld [vmem:[#allocation45_spill] sm:$0xff] }
 0x65a   :  { %v13190_v30 = vpop.eup %10467  ;;  %v2925_v53 = vsel %vm16023_vm3, %v2924_v59, %v2923_v22  ;;  %v2928_v9 = vrot.slane %v13186_v34, 2  ;;  %v16359_v59 = vld [vmem:[#allocation42_spill] sm:$0xff]  ;;  %v16360_v22 = vld [vmem:[#allocation41_spill] sm:$0xff] }
 0x65b   :  { %v2927_v8 = vsel %vm16022_vm4, %v2926_v49, %v2925_v53  ;;  %v2930_v57 = vrot.slane %v13190_v30, 1  ;;  %v16361_v49 = vld [vmem:[#allocation50_spill] sm:$0xff]  ;;  %v16362_v53 = vld [vmem:[#allocation51_spill] sm:$0xff] }
 0x65c   :  { %v2929_v52 = vsel %vm16021_vm5, %v2928_v9, %v2927_v8  ;;  %v16363_v9 = vld [vmem:[#allocation47_spill] sm:$0xff]  ;;  %v16364_v8 = vld [vmem:[#allocation48_spill] sm:$0xff] }
 0x65d   :  { %v2931_v25 = vsel %vm16020_vm6, %v2930_v57, %v2929_v52  ;;  %v16365_v57 = vld [vmem:[#allocation56_spill] sm:$0xff]  ;;  %v16366_v52 = vld [vmem:[#allocation77_spill] sm:$0xff] }
 0x65e   :  { %v2933_v26 = vsel %vm16027_vm7, %v2931_v25, 0.0  ;;  %v16367_v25 = vld [vmem:[#allocation78_spill] sm:$0xff] }
 0x65f   :  { %2934 = vadd.xlane.f32.xlu1 %v2933_v26  ;;  %v16368_v26 = vld [vmem:[#allocation92_spill] sm:$0xff] }
 0x6d2   :  { %v2935_v35 = vpop.xlane.xlu1 %2934 }
 0x6d3   :  { %10469 = vrcp.f32 %v2935_v35 }
 0x6d9   :  { %v10470_v32 = vpop.eup %10469 }
 0x6da   :  { %v2937_v31 = vmul.f32 %v10470_v32, %v2935_v35  ;;  %v16369_v35 = vld [vmem:[#allocation93_spill] sm:$0xff] }
 0x6dc   :  { %v2938_v23 = vsub.f32 2.0, %v2937_v31  ;;  %v16371_v31 = vld [vmem:[#allocation54_spill] sm:$0xff] }
 0x6de   :  { %v13199_v20 = vmul.f32 %v10470_v32, %v2938_v23  ;;  %v16370_v32 = vld [vmem:[#allocation53_spill] sm:$0xff]  ;;  %v16372_v23 = vld [vmem:[#allocation71_spill] sm:$0xff] }
 0x6e0   :  { %v2956_v38 = vmul.f32 %v10454_v24, %v13199_v20  ;;  %v2941_v29 = vrot.slane %v13199_v20, 1  ;;  %v2942_v24 = vrot.slane %v13199_v20, 2  ;;  %v2943_v42 = vrot.slane %v13199_v20, 3 }
 0x6e1   :  { %v2944_v44 = vrot.slane %v13199_v20, 4 }
 0x6e2   :  { %10100 = vmatmul.msk.f32.vlgmr.msrb.gmra.mxu2 %vm16027_vm7, %v2956_v38  ;;  %10101 = vmatmul.msk.f32.vlgmr.msrb.gmra.mxu3 %vm16027_vm7, %v2956_v38  ;;  %v2957_v6 = vmul.f32 %v10456_v51, %v2941_v29  ;;  %v2958_v51 = vmul.f32 %v10458_v37, %v2942_v24  ;;  %v2959_v37 = vmul.f32 %v10460_v18, %v2943_v42  ;;  %v2945_v18 = vrot.slane %v13199_v20, 5  ;;  %v16374_v29 = vld [vmem:[#allocation98_spill] sm:$0xff]  ;;  %v16377_v42 = vld [vmem:[#allocation95_spill] sm:$0xff] }
 0x6e3   :  { %10102 = vmatmul.msk.f32.vlgmr.msrb.gmra.mxu0 %vm16027_vm7, %v2956_v38  ;;  %3147 = vmatpush.msrb.mxu2 %v12576_v27  ;;  %v2960_v4 = vmul.f32 %v13179_v45, %v2944_v44  ;;  %v2946_v45 = vrot.slane %v13199_v20, 6  ;;  %v16373_v38 = vld [vmem:[#allocation72_spill] sm:$0xff]  ;;  %v16376_v24 = vld [vmem:[#allocation94_spill] sm:$0xff] }
 0x6e4   :  { %3170 = vmatpush.msrb.mxu3 %v12296_v5  ;;  %3190 = vmatpush.msrb.mxu0 %v12580_v39  ;;  %v2961_v33 = vmul.f32 %v13182_v17, %v2945_v18  ;;  %v16380_v44 = vld [vmem:[#allocation108_spill] sm:$0xff]  ;;  %v16381_v18 = vld [vmem:[#allocation109_spill] sm:$0xff] }
 0x6e5   :  { %10103 = vmatmul.msk.f32.vlgmr.msrb.gmra.mxu1 %vm16027_vm7, %v2957_v6  ;;  %3148 = vmatpush.msrb.mxu2 %v12586_v60  ;;  %v2962_v17 = vmul.f32 %v13186_v34, %v2946_v45  ;;  %v2947_v34 = vrot.slane %v13199_v20, 7  ;;  %v16378_v20 = vld [vmem:[#allocation106_spill] sm:$0xff]  ;;  %v16385_v45 = vld [vmem:[#allocation113_spill] sm:$0xff] }
 0x6e6   :  { %3171 = vmatpush.msrb.mxu3 %v12292_v2  ;;  %3191 = vmatpush.msrb.mxu0 %v12592_v7 }
 0x6e7   :  { %3210 = vmatpush.msrb.mxu1 %v12598_v1 }
 0x6e9   :  { %3211 = vmatpush.msrb.mxu1 %v12607_v13 }
 0x6ea   :  { %10104 = vmatmul.msk.f32.vlgmr.msra.gmra.mxu2 %vm16027_vm7, %v2957_v6  ;;  %10105 = vmatmul.msk.f32.vlgmr.msra.gmra.mxu3 %vm16027_vm7, %v2957_v6  ;;  %v16375_v6 = vld [vmem:[#allocation100_spill] sm:$0xff] }
 0x6eb   :  { %10106 = vmatmul.msk.f32.vlgmr.msra.gmra.mxu0 %vm16027_vm7, %v2958_v51  ;;  %3233 = vmatpush.msra.mxu2 %v12612_v21 }
 0x6ec   :  { %3253 = vmatpush.msra.mxu3 %v12617_v56  ;;  %3273 = vmatpush.msra.mxu0 %v12621_v58 }
 0x6ed   :  { %10107 = vmatmul.msk.f32.vlgmr.msra.gmra.mxu1 %vm16027_vm7, %v2958_v51  ;;  %3234 = vmatpush.msra.mxu2 %v12627_v14 }
 0x6ee   :  { %3254 = vmatpush.msra.mxu3 %v12633_v10  ;;  %3274 = vmatpush.msra.mxu0 %v12637_v19 }
 0x6ef   :  { %3296 = vmatpush.msra.mxu1 %v12644_v62 }
 0x6f1   :  { %3297 = vmatpush.msra.mxu1 %v12652_v47 }
 0x6f2   :  { %10108 = vmatmul.msk.f32.vlgmr.msrb.gmra.mxu2 %vm16027_vm7, %v2958_v51  ;;  %10109 = vmatmul.msk.f32.vlgmr.msrb.gmra.mxu3 %vm16027_vm7, %v2959_v37  ;;  %v2963_v51 = vmul.f32 %v13190_v30, %v2947_v34  ;;  %v16383_v30 = vld [vmem:[#allocation111_spill] sm:$0xff]  ;;  %v16393_v34 = vld [vmem:[#allocation121_spill] sm:$0xff] }
 0x6f3   :  { %10110 = vmatmul.msk.f32.vlgmr.msrb.gmra.mxu0 %vm16027_vm7, %v2959_v37  ;;  %3316 = vmatpush.msrb.mxu2 %v12658_v55 }
 0x6f4   :  { %3336 = vmatpush.msrb.mxu3 %v12667_v50  ;;  %3359 = vmatpush.msrb.mxu0 %v12663_v43 }
 0x6f5   :  { %10111 = vmatmul.msk.f32.vlgmr.msrb.gmra.mxu1 %vm16027_vm7, %v2959_v37  ;;  %3317 = vmatpush.msrb.mxu2 %v12673_v11  ;;  %v16379_v37 = vld [vmem:[#allocation107_spill] sm:$0xff] }
 0x6f6   :  { %3337 = vmatpush.msrb.mxu3 %v12683_v36  ;;  %3360 = vmatpush.msrb.mxu0 %v12679_v12 }
 0x6f7   :  { %3379 = vmatpush.msrb.mxu1 %v12690_v61 }
 0x6f9   :  { %3380 = vmatpush.msrb.mxu1 %v12698_v48 }
 0x6fa   :  { %10112 = vmatmul.msk.f32.vlgmr.msra.gmra.mxu2 %vm16027_vm7, %v2960_v4  ;;  %10113 = vmatmul.msk.f32.vlgmr.msra.gmra.mxu3 %vm16027_vm7, %v2960_v4 }
 0x6fb   :  { %10114 = vmatmul.msk.f32.vlgmr.msra.gmra.mxu0 %vm16027_vm7, %v2960_v4  ;;  %3399 = vmatpush.msra.mxu2 %v12705_v28  ;;  %v16382_v4 = vld [vmem:[#allocation110_spill] sm:$0xff] }
 0x6fc   :  { %3422 = vmatpush.msra.mxu3 %v12714_v16  ;;  %3442 = vmatpush.msra.mxu0 %v12710_v46 }
 0x6fd   :  { %10115 = vmatmul.msk.f32.vlgmr.msra.gmra.mxu1 %vm16027_vm7, %v2961_v33  ;;  %3400 = vmatpush.msra.mxu2 %v16358_v54 }
 0x6fe   :  { %3423 = vmatpush.msra.mxu3 %v16359_v59  ;;  %3443 = vmatpush.msra.mxu0 %v16360_v22 }
 0x6ff   :  { %3462 = vmatpush.msra.mxu1 %v16361_v49 }
 0x701   :  { %3463 = vmatpush.msra.mxu1 %v16362_v53 }
 0x702   :  { %10116 = vmatmul.msk.f32.vlgmr.msrb.gmra.mxu2 %vm16027_vm7, %v2961_v33  ;;  %10117 = vmatmul.msk.f32.vlgmr.msrb.gmra.mxu3 %vm16027_vm7, %v2961_v33  ;;  %v16384_v33 = vld [vmem:[#allocation112_spill] sm:$0xff] }
 0x703   :  { %10118 = vmatmul.msk.f32.vlgmr.msrb.gmra.mxu0 %vm16027_vm7, %v2962_v17  ;;  %3539 = vmatpush.msrb.mxu2 %v16363_v9  ;;  %v16387_v9 = vld [vmem:[#allocation115_spill] sm:$0xff] }
 0x704   :  { %3559 = vmatpush.msrb.mxu3 %v16364_v8  ;;  %3579 = vmatpush.msrb.mxu0 %v16365_v57  ;;  %v16388_v8 = vld [vmem:[#allocation116_spill] sm:$0xff]  ;;  %v16389_v57 = vld [vmem:[#allocation117_spill] sm:$0xff] }
 0x705   :  { %10119 = vmatmul.msk.f32.vlgmr.msrb.gmra.mxu1 %vm16027_vm7, %v2962_v17  ;;  %3540 = vmatpush.msrb.mxu2 %v16366_v52  ;;  %v16390_v52 = vld [vmem:[#allocation118_spill] sm:$0xff] }
 0x706   :  { %3560 = vmatpush.msrb.mxu3 %v16367_v25  ;;  %3580 = vmatpush.msrb.mxu0 %v16368_v26  ;;  %v16391_v25 = vld [vmem:[#allocation119_spill] sm:$0xff]  ;;  %v16392_v26 = vld [vmem:[#allocation120_spill] sm:$0xff] }
 0x707   :  { %3602 = vmatpush.msrb.mxu1 %v16369_v35  ;;  %3541 = vmatpush.msrb.mxu2 %v16370_v32  ;;  %v16394_v35 = vld [vmem:[#allocation122_spill] sm:$0xff]  ;;  %v16395_v32 = vld [vmem:[#allocation123_spill] sm:$0xff] }
 0x708   :  { %3561 = vmatpush.msrb.mxu3 %v16371_v31  ;;  %3581 = vmatpush.msrb.mxu0 %v16372_v23  ;;  %v16396_v31 = vld [vmem:[#allocation124_spill] sm:$0xff]  ;;  %v16397_v23 = vld [vmem:[#allocation125_spill] sm:$0xff] }
 0x709   :  { %3603 = vmatpush.msrb.mxu1 %v16373_v38  ;;  %3542 = vmatpush.msrb.mxu2 %v16374_v29  ;;  %v16398_v38 = vld [vmem:[#allocation126_spill] sm:$0xff]  ;;  %v16399_v29 = vld [vmem:[#allocation127_spill] sm:$0xff] }
 0x70a   :  { %3562 = vmatpush.msrb.mxu3 %v16375_v6  ;;  %3582 = vmatpush.msrb.mxu0 %v16376_v24  ;;  %v16400_v6 = vld [vmem:[#allocation128_spill] sm:$0xff]  ;;  %v16401_v24 = vld [vmem:[#allocation129_spill] sm:$0xff] }
 0x70b   :  { %3604 = vmatpush.msrb.mxu1 %v16377_v42  ;;  %10120 = vmatmul.msk.f32.vlgmr.msra.gmra.mxu2 %vm16027_vm7, %v2962_v17  ;;  %v16386_v17 = vld [vmem:[#allocation114_spill] sm:$0xff]  ;;  %v16403_v42 = vld [vmem:[#allocation131_spill] sm:$0xff] }
 0x70c   :  { %10121 = vmatmul.msk.f32.vlgmr.msra.gmra.mxu3 %vm16027_vm7, %v2963_v51  ;;  %10122 = vmatmul.msk.f32.vlgmr.msra.gmra.mxu0 %vm16027_vm7, %v2963_v51 }
 0x70d   :  { %3543 = vmatpush.msrb.mxu2 %v16378_v20  ;;  %3563 = vmatpush.msrb.mxu3 %v16379_v37  ;;  %v16404_v20 = vld [vmem:[#allocation132_spill] sm:$0xff]  ;;  %v16405_v37 = vld [vmem:[#allocation133_spill] sm:$0xff] }
 0x70e   :  { %3583 = vmatpush.msrb.mxu0 %v16380_v44  ;;  %3605 = vmatpush.msrb.mxu1 %v16381_v18  ;;  %v16406_v44 = vld [vmem:[#allocation134_spill] sm:$0xff]  ;;  %v16407_v18 = vld [vmem:[#allocation135_spill] sm:$0xff] }
 0x70f   :  { %10123 = vmatmul.msk.f32.vlgmr.msra.gmra.mxu1 %vm16027_vm7, %v2963_v51  ;;  %3544 = vmatpush.msrb.mxu2 %v16382_v4  ;;  %v16402_v51 = vld [vmem:[#allocation130_spill] sm:$0xff]  ;;  %v16408_v4 = vld [vmem:[#allocation136_spill] sm:$0xff] }
 0x710   :  { %3564 = vmatpush.msrb.mxu3 %v16383_v30  ;;  %3584 = vmatpush.msrb.mxu0 %v16384_v33  ;;  %v16409_v30 = vld [vmem:[#allocation137_spill] sm:$0xff]  ;;  %v16410_v33 = vld [vmem:[#allocation138_spill] sm:$0xff] }
 0x711   :  { %3606 = vmatpush.msrb.mxu1 %v16385_v45  ;;  %3545 = vmatpush.msrb.mxu2 %v16386_v17  ;;  %v16411_v45 = vld [vmem:[#allocation139_spill] sm:$0xff]  ;;  %v16412_v17 = vld [vmem:[#allocation140_spill] sm:$0xff] }
 0x712   :  { %3565 = vmatpush.msrb.mxu3 %v16387_v9  ;;  %3585 = vmatpush.msrb.mxu0 %v16388_v8  ;;  %v16413_v9 = vld [vmem:[#allocation141_spill] sm:$0xff]  ;;  %v16414_v8 = vld [vmem:[#allocation142_spill] sm:$0xff] }
 0x713   :  { %3607 = vmatpush.msrb.mxu1 %v16389_v57  ;;  %3546 = vmatpush.msrb.mxu2 %v16390_v52  ;;  %v16415_v57 = vld [vmem:[#allocation143_spill] sm:$0xff]  ;;  %v16416_v52 = vld [vmem:[#allocation144_spill] sm:$0xff] }
 0x714   :  { %3566 = vmatpush.msrb.mxu3 %v16391_v25  ;;  %3586 = vmatpush.msrb.mxu0 %v16392_v26  ;;  %v16417_v25 = vld [vmem:[#allocation145_spill] sm:$0xff]  ;;  %v16418_v26 = vld [vmem:[#allocation146_spill] sm:$0xff] }
 0x715   :  { %3608 = vmatpush.msrb.mxu1 %v16393_v34  ;;  %3547 = vmatpush.msrb.mxu2 %v16394_v35  ;;  %v16419_v34 = vld [vmem:[#allocation147_spill] sm:$0xff]  ;;  %v16420_v35 = vld [vmem:[#allocation148_spill] sm:$0xff] }
 0x716   :  { %3567 = vmatpush.msrb.mxu3 %v16395_v32  ;;  %3587 = vmatpush.msrb.mxu0 %v16396_v31  ;;  %v10124_v32 = vld [vmem:[%s15646_s0 + $0x10] sm:$0xff]  ;;  %v16421_v31 = vld [vmem:[#allocation149_spill] sm:$0xff] }
 0x717   :  { %3609 = vmatpush.msrb.mxu1 %v16397_v23  ;;  %3548 = vmatpush.msrb.mxu2 %v16398_v38  ;;  %v16422_v23 = vld [vmem:[#allocation150_spill] sm:$0xff]  ;;  %v16423_v38 = vld [vmem:[#allocation151_spill] sm:$0xff] }
 0x718   :  { %3568 = vmatpush.msrb.mxu3 %v16399_v29  ;;  %3588 = vmatpush.msrb.mxu0 %v16400_v6  ;;  %v16424_v29 = vld [vmem:[#allocation152_spill] sm:$0xff]  ;;  %v16425_v6 = vld [vmem:[#allocation153_spill] sm:$0xff] }
 0x719   :  { %3610 = vmatpush.msrb.mxu1 %v16401_v24  ;;  %3549 = vmatpush.msrb.mxu2 %v16402_v51  ;;  %v16426_v24 = vld [vmem:[#allocation154_spill] sm:$0xff]  ;;  %v16427_v51 = vld [vmem:[#allocation155_spill] sm:$0xff] }
 0x71a   :  { %3569 = vmatpush.msrb.mxu3 %v16403_v42  ;;  %3589 = vmatpush.msrb.mxu0 %v16404_v20  ;;  %v16428_v42 = vld [vmem:[#allocation32_spill] sm:$0xff] }
 0x71b   :  { %3611 = vmatpush.msrb.mxu1 %v16405_v37  ;;  %3550 = vmatpush.msrb.mxu2 %v16406_v44  ;;  %v16429_v20 = vld [vmem:[#allocation156_spill] sm:$0xff]  ;;  %v16430_v37 = vld [vmem:[#allocation157_spill] sm:$0xff]  ;;  %v16431_v44 = vld [vmem:[#allocation158_spill] sm:$0xff] }
 0x71c   :  { %3570 = vmatpush.msrb.mxu3 %v16407_v18  ;;  %3590 = vmatpush.msrb.mxu0 %v16408_v4  ;;  %v16432_v18 = vld [vmem:[#allocation58_spill] sm:$0xff]  ;;  %v16433_v4 = vld [vmem:[#allocation159_spill] sm:$0xff] }
 0x71d   :  { %3612 = vmatpush.msrb.mxu1 %v16409_v30  ;;  %3551 = vmatpush.msrb.mxu2 %v16410_v33  ;;  %v16434_v30 = vld [vmem:[#allocation160_spill] sm:$0xff]  ;;  %v16435_v33 = vld [vmem:[#allocation34_spill] sm:$0xff] }
 0x71e   :  { %3571 = vmatpush.msrb.mxu3 %v16411_v45  ;;  %3591 = vmatpush.msrb.mxu0 %v16412_v17  ;;  %v16436_v45 = vld [vmem:[#allocation59_spill] sm:$0xff]  ;;  %v16437_v17 = vld [vmem:[#allocation161_spill] sm:$0xff] }
 0x71f   :  { %3613 = vmatpush.msrb.mxu1 %v16413_v9  ;;  %3552 = vmatpush.msrb.mxu2 %v16414_v8  ;;  %v16438_v9 = vld [vmem:[#allocation162_spill] sm:$0xff]  ;;  %v16439_v8 = vld [vmem:[#allocation61_spill] sm:$0xff] }
 0x720   :  { %3572 = vmatpush.msrb.mxu3 %v16415_v57  ;;  %3592 = vmatpush.msrb.mxu0 %v16416_v52  ;;  %v16440_v57 = vld [vmem:[#allocation64_spill] sm:$0xff]  ;;  %v16441_v52 = vld [vmem:[#allocation163_spill] sm:$0xff] }
 0x721   :  { %3614 = vmatpush.msrb.mxu1 %v16417_v25  ;;  %3553 = vmatpush.msrb.mxu2 %v16418_v26  ;;  %v16442_v25 = vld [vmem:[#allocation164_spill] sm:$0xff]  ;;  %v16443_v26 = vld [vmem:[#allocation62_spill] sm:$0xff] }
 0x722   :  { %3573 = vmatpush.msrb.mxu3 %v16419_v34  ;;  %3593 = vmatpush.msrb.mxu0 %v16420_v35  ;;  %v16444_v34 = vld [vmem:[#allocation165_spill] sm:$0xff]  ;;  %v16445_v35 = vld [vmem:[#allocation166_spill] sm:$0xff] }
 0x723   :  { %3615 = vmatpush.msrb.mxu1 %v16421_v31  ;;  %3554 = vmatpush.msrb.mxu2 %v16422_v23  ;;  %v16447_v31 = vld [vmem:[#allocation167_spill] sm:$0xff]  ;;  %v16448_v23 = vld [vmem:[#allocation168_spill] sm:$0xff] }
 0x724   :  { %3574 = vmatpush.msrb.mxu3 %v16423_v38  ;;  %3594 = vmatpush.msrb.mxu0 %v16424_v29  ;;  %v16449_v38 = vld [vmem:[#allocation169_spill] sm:$0xff]  ;;  %v16450_v29 = vld [vmem:[#allocation170_spill] sm:$0xff] }
 0x725   :  { %3616 = vmatpush.msrb.mxu1 %v16425_v6  ;;  %3555 = vmatmul.f32.vlgmr.msrb.gmra.mxu2 %v10124_v32  ;;  %v16451_v6 = vld [vmem:[#allocation171_spill] sm:$0xff] }
 0x726   :  { %3575 = vmatmul.f32.vlgmr.msrb.gmra.mxu3 %v10124_v32  ;;  %3595 = vmatmul.f32.vlgmr.msrb.gmra.mxu0 %v10124_v32  ;;  %v16446_v32 = vld [vmem:[#allocation65_spill] sm:$0xff] }
 0x727   :  { %3622 = vmatpush.msra.mxu2 %v16426_v24  ;;  %3642 = vmatpush.msra.mxu3 %v16427_v51  ;;  %v16452_v24 = vld [vmem:[#allocation172_spill] sm:$0xff]  ;;  %v16453_v51 = vld [vmem:[#allocation173_spill] sm:$0xff] }
 0x728   :  { %3740 = vmatpush.xpose.msra.mxu0 %v16428_v42  ;;  %3617 = vmatpush.msrb.mxu1 %v16429_v20  ;;  %v16454_v20 = vld [vmem:[#allocation174_spill] sm:$0xff] }
 0x729   :  { %3618 = vmatmul.f32.vlgmr.msrb.gmra.mxu1 %v13123_v0  ;;  %3623 = vmatpush.msra.mxu2 %v16430_v37  ;;  %v16455_v37 = vld [vmem:[#allocation175_spill] sm:$0xff] }
 0x72a   :  { %3643 = vmatpush.msra.mxu3 %v16431_v44  ;;  %3760 = vmatpush.xpose.msra.mxu1 %v16432_v18  ;;  %v16456_v44 = vld [vmem:[#allocation176_spill] sm:$0xff] }
 0x72b   :  { %3624 = vmatpush.msra.mxu2 %v16433_v4  ;;  %v16457_v4 = vld [vmem:[#allocation177_spill] sm:$0xff] }
 0x72c   :  { %3644 = vmatpush.msra.mxu3 %v16434_v30  ;;  %3741 = vmatpush.xpose.msra.mxu0 %v16435_v33  ;;  %v16458_v30 = vld [vmem:[#allocation178_spill] sm:$0xff] }
 0x72d   :  { %3625 = vmatpush.msra.mxu2 %v16437_v17  ;;  %v16459_v17 = vld [vmem:[#allocation179_spill] sm:$0xff] }
 0x72e   :  { %3645 = vmatpush.msra.mxu3 %v16438_v9  ;;  %3761 = vmatpush.xpose.msra.mxu1 %v16439_v8  ;;  %v16460_v9 = vld [vmem:[#allocation180_spill] sm:$0xff] }
 0x72f   :  { %3626 = vmatpush.msra.mxu2 %v16441_v52  ;;  %v16461_v52 = vld [vmem:[#allocation181_spill] sm:$0xff] }
 0x730   :  { %3780 = vmatpush.xpose.msrb.mxu0 %v16436_v45  ;;  %3646 = vmatpush.msra.mxu3 %v16442_v25  ;;  %v16462_v25 = vld [vmem:[#allocation182_spill] sm:$0xff] }
 0x731   :  { %3627 = vmatpush.msra.mxu2 %v16444_v34  ;;  %v16463_v34 = vld [vmem:[#allocation183_spill] sm:$0xff] }
 0x732   :  { %3800 = vmatpush.xpose.msrb.mxu1 %v16440_v57  ;;  %3647 = vmatpush.msra.mxu3 %v16445_v35  ;;  %v16464_v35 = vld [vmem:[#allocation184_spill] sm:$0xff] }
 0x733   :  { %3628 = vmatpush.msra.mxu2 %v16447_v31  ;;  %v16465_v31 = vld [vmem:[#allocation185_spill] sm:$0xff] }
 0x734   :  { %3781 = vmatpush.xpose.msrb.mxu0 %v16443_v26  ;;  %3648 = vmatpush.msra.mxu3 %v16448_v23  ;;  %v16466_v23 = vld [vmem:[#allocation186_spill] sm:$0xff] }
 0x735   :  { %3629 = vmatpush.msra.mxu2 %v16449_v38  ;;  %v16467_v38 = vld [vmem:[#allocation66_spill] sm:$0xff] }
 0x736   :  { %3801 = vmatpush.xpose.msrb.mxu1 %v16446_v32  ;;  %3649 = vmatpush.msra.mxu3 %v16450_v29  ;;  %v16468_v29 = vld [vmem:[#allocation90_spill] sm:$0xff] }
 0x737   :  { %3630 = vmatpush.msra.mxu2 %v16451_v6  ;;  %v16469_v6 = vld [vmem:[#allocation63_spill] sm:$0xff] }
 0x738   :  { %3650 = vmatpush.msra.mxu3 %v16452_v24  ;;  %v16470_v24 = vld [vmem:[#allocation91_spill] sm:$0xff] }
 0x739   :  { %3631 = vmatpush.msra.mxu2 %v16453_v51  ;;  %v16471_v51 = vld [vmem:[#allocation22_spill] sm:$0xff] }
 0x73a   :  { %3651 = vmatpush.msra.mxu3 %v16454_v20  ;;  %v16472_v20 = vld [vmem:[#allocation23_spill] sm:$0xff] }
 0x73b   :  { %3632 = vmatpush.msra.mxu2 %v16455_v37  ;;  %v16473_v37 = vld [vmem:[#allocation19_spill] sm:$0xff] }
 0x73c   :  { %3652 = vmatpush.msra.mxu3 %v16456_v44  ;;  %v16474_v44 = vld [vmem:[#allocation20_spill] sm:$0xff] }
 0x73d   :  { %3633 = vmatpush.msra.mxu2 %v16457_v4 }
 0x73e   :  { %3653 = vmatpush.msra.mxu3 %v16458_v30 }
 0x73f   :  { %3634 = vmatpush.msra.mxu2 %v16459_v17 }
 0x740   :  { %3654 = vmatpush.msra.mxu3 %v16460_v9 }
 0x741   :  { %3635 = vmatpush.msra.mxu2 %v16461_v52 }
 0x742   :  { %3655 = vmatpush.msra.mxu3 %v16462_v25 }
 0x743   :  { %3636 = vmatpush.msra.mxu2 %v16463_v34 }
 0x744   :  { %3656 = vmatpush.msra.mxu3 %v16464_v35 }
 0x745   :  { %3637 = vmatpush.msra.mxu2 %v16465_v31 }
 0x746   :  { %3657 = vmatpush.msra.mxu3 %v16466_v23  ;;  %3638 = vmatmul.f32.vlgmr.msra.gmra.mxu2 %v13123_v0 }
 0x747   :  { %3658 = vmatmul.f32.vlgmr.msra.gmra.mxu3 %v13123_v0  ;;  %4031 = vmatpush.msrb.mxu2 %v16467_v38 }
 0x748   :  { %4051 = vmatpush.msrb.mxu3 %v16468_v29 }
 0x749   :  { %4032 = vmatpush.msrb.mxu2 %v16469_v6 }
 0x74a   :  { %4052 = vmatpush.msrb.mxu3 %v16470_v24 }
 0x74b   :  { %4114 = vmatpush.msra.mxu2 %v16471_v51 }
 0x74c   :  { %4134 = vmatpush.msra.mxu3 %v16472_v20 }
 0x74d   :  { %4115 = vmatpush.msra.mxu2 %v16473_v37 }
 0x74e   :  { %4135 = vmatpush.msra.mxu3 %v16474_v44 }
 0x760   :  { %v13387_v9 = vpop.f32.mrf.mxu0 }
 0x762   :  { %v3047_v4 = vpop.f32.mrf.mxu1 }
 0x763   :  { %v3494_v57 = vrot.slane %v3047_v4, 7 }
 0x765   :  { %v2984_v30 = vpop.f32.mrf.mxu2  ;;  %v3004_v17 = vpop.f32.mrf.mxu3 }
 0x766   :  { %v3495_v33 = vsel %vm16026_vm0, %v3494_v57, %v2984_v30 }
 0x768   :  { %v3110_v35 = vpop.f32.mrf.mxu0 }
 0x769   :  { %v3496_v26 = vrot.slane %v3110_v35, 6 }
 0x76a   :  { %v3130_v52 = vpop.f32.mrf.mxu1 }
 0x76b   :  { %v3497_v18 = vsel %vm16025_vm1, %v3496_v26, %v3495_v33 }
 0x76d   :  { %v3067_v25 = vpop.f32.mrf.mxu2  ;;  %v13389_v34 = vpop.f32.mrf.mxu3 }
 0x770   :  { %v3193_v20 = vpop.f32.mrf.mxu0 }
 0x772   :  { %v13391_v31 = vpop.f32.mrf.mxu1 }
 0x775   :  { %v13393_v23 = vpop.f32.mrf.mxu2  ;;  %v3173_v51 = vpop.f32.mrf.mxu3 }
 0x776   :  { %v3498_v8 = vrot.slane %v3173_v51, 5 }
 0x778   :  { %v13395_v44 = vpop.f32.mrf.mxu0  ;;  %v3499_v53 = vsel %vm16024_vm2, %v3498_v8, %v3497_v18 }
 0x77a   :  { %v3299_v24 = vpop.f32.mrf.mxu1 }
 0x77b   :  { %v3502_v46 = vrot.slane %v3299_v24, 3 }
 0x77d   :  { %v3236_v37 = vpop.f32.mrf.mxu2  ;;  %v3256_v6 = vpop.f32.mrf.mxu3 }
 0x77e   :  { %v3500_v45 = vrot.slane %v3236_v37, 4 }
 0x780   :  { %v3362_v42 = vpop.f32.mrf.mxu0  ;;  %v3501_v59 = vsel %vm16023_vm3, %v3500_v45, %v3499_v53  ;;  %v3508_v53 = vrot.slane %v3067_v25, 7 }
 0x781   :  { %v3504_v16 = vrot.slane %v3362_v42, 2  ;;  %v3503_v51 = vsel %vm16022_vm4, %v3502_v46, %v3501_v59  ;;  %v3510_v42 = vrot.slane %v3130_v52, 6  ;;  %v3512_v46 = vrot.slane %v3193_v20, 5 }
 0x782   :  { %v3382_v29 = vpop.f32.mrf.mxu1  ;;  %v3514_v59 = vrot.slane %v3256_v6, 4 }
 0x783   :  { %v3505_v37 = vsel %vm16021_vm5, %v3504_v16, %v3503_v51 }
 0x785   :  { %v3319_v38 = vpop.f32.mrf.mxu2  ;;  %v13397_v32 = vpop.f32.mrf.mxu3 }
 0x78c   :  { %v13402_v49 = vpop.f32.mrf.mxu1 }
 0x78e   :  { %v13404_v22 = vpop.f32.mrf.mxu2 }
 0x78f   :  { %v3425_v54 = vpop.f32.mrf.mxu3 }
 0x790   :  { %v3506_v35 = vrot.slane %v3425_v54, 1  ;;  %v3509_v54 = vsel %vm16026_vm0, %v3508_v53, %v3004_v17  ;;  %v3524_v53 = vrot.slane %v13393_v23, 6  ;;  %v3532_v23 = vrot.slane %v13404_v22, 2 }
 0x791   :  { %v3511_v16 = vsel %vm16025_vm1, %v3510_v42, %v3509_v54 }
 0x792   :  { %v3507_v33 = vsel %vm16020_vm6, %v3506_v35, %v3505_v37  ;;  %v3516_v35 = vrot.slane %v3319_v38, 3  ;;  %v3513_v51 = vsel %vm16024_vm2, %v3512_v46, %v3511_v16  ;;  %v3522_v38 = vrot.slane %v13389_v34, 7 }
 0x793   :  { %v3515_v37 = vsel %vm16023_vm3, %v3514_v59, %v3513_v51  ;;  %v3526_v59 = vrot.slane %v13391_v31, 5  ;;  %v3528_v34 = vrot.slane %v13395_v44, 4  ;;  %v3530_v51 = vrot.slane %v13397_v32, 3 }
 0x794   :  { %v3523_v54 = vsel %vm16026_vm0, %v3522_v38, %v13387_v9  ;;  %v3534_v32 = vrot.slane %v13402_v49, 1 }
 0x795   :  { %v3525_v46 = vsel %vm16025_vm1, %v3524_v53, %v3523_v54 }
 0x7a6   :  { %v3619_v57 = vpop.f32.mrf.mxu1 }
 0x7a7   :  { %v3620_v18 = vadd.f32 %v3619_v57, %v16327_v15  ;;  %v3445_v57 = vpop.f32.mrf.mxu0 }
 0x7a8   :  { %v3556_v26 = vpop.f32.mrf.mxu2  ;;  %v3520_v25 = vrot.slane %v3445_v57, 1 }
 0x7a9   :  { %v3557_v4 = vadd.f32 %v3556_v26, %v3507_v33  ;;  %v3517_v33 = vsel %vm16022_vm4, %v3516_v35, %v3515_v37  ;;  %v3576_v17 = vpop.f32.mrf.mxu3  ;;  %v3527_v35 = vsel %vm16024_vm2, %v3526_v59, %v3525_v46 }
 0x7aa   :  { %v3529_v9 = vsel %vm16023_vm3, %v3528_v34, %v3527_v35 }
 0x7ab   :  { %v3599_v8 = vadd.f32 %v3557_v4, %v16328_v3 }
 0x7ad   :  { %v3662_v30 = vadd.f32 %v3620_v18, %v3599_v8 }
 0x7af   :  { %v10125_v28 = vmul.f32 -1.442695, %v3662_v30 }
 0x7b1   :  { %10471 = vpow2.f32 %v10125_v28  ;;  %v3518_v28 = vrot.slane %v3382_v29, 2 }
 0x7b3   :  { %v3519_v26 = vsel %vm16021_vm5, %v3518_v28, %v3517_v33 }
 0x7b4   :  { %v3521_v20 = vsel %vm16020_vm6, %v3520_v25, %v3519_v26  ;;  %v3531_v25 = vsel %vm16022_vm4, %v3530_v51, %v3529_v9 }
 0x7b5   :  { %v3577_v4 = vadd.f32 %v3576_v17, %v3521_v20  ;;  %v3533_v44 = vsel %vm16021_vm5, %v3532_v23, %v3531_v25  ;;  %v3596_v20 = vpop.f32.mrf.mxu0  ;;  %v16479_v25 = vld [vmem:[#allocation87_spill] sm:$0xff] }
 0x7b7   :  { %v10472_v45 = vpop.eup %10471  ;;  %v3600_v8 = vadd.f32 %v3577_v4, %v16329_v41 }
 0x7b8   :  { %v3666_v24 = vadd.f32 1.0, %v10472_v45 }
 0x7ba   :  { %10473 = vrcp.f32 %v3666_v24  ;;  %v3678_v57 = vand.u32 2147483648, %v3666_v24  ;;  %vm3672_vm9 = vweird.f32 %v3666_v24  ;;  %v3676_v33 = vand.u32 2147483647, %v3666_v24 }
 0x7bc   :  { %v3679_v22 = vor.u32 1.1754944e-38, %v3678_v57  ;;  %vm3677_vm11 = vcmp.eq.f32.partialorder %v3676_v33, 8.507059e+37  ;;  %v16477_v33 = vld [vmem:[#allocation84_spill] sm:$0xff] }
 0x7c0   :  { %v10474_v52 = vpop.eup %10473 }
 0x7c1   :  { %v3668_v6 = vmul.f32 %v10474_v52, %v3666_v24  ;;  %vm3673_vm8 = vweird.f32 %v10474_v52 }
 0x7c2   :  { %vm3674_vm10 = vmor %vm3672_vm9, %vm3673_vm8 }
 0x7c3   :  { %v3669_v45 = vsub.f32 1.0, %v3668_v6  ;;  %v3535_v6 = vsel %vm16020_vm6, %v3534_v32, %v3533_v44  ;;  %v16480_v44 = vld [vmem:[#allocation89_spill] sm:$0xff]  ;;  %v16482_v32 = vld [vmem:[#allocation16_spill] sm:$0xff] }
 0x7c5   :  { %v3670_v16 = vmul.f32 %v10474_v52, %v3669_v45 }
 0x7c7   :  { %v3671_v37 = vadd.f32 %v10474_v52, %v3670_v16 }
 0x7c9   :  { %v3639_v18 = vpop.f32.mrf.mxu2  ;;  %v3675_v17 = vsel %vm3674_vm10, %v10474_v52, %v3671_v37 }
 0x7ca   :  { %v3640_v30 = vadd.f32 %v3639_v18, %v16330_v40  ;;  %v3659_v31 = vpop.f32.mrf.mxu3  ;;  %v3680_v24 = vsel %vm3677_vm11, %v3679_v22, %v3675_v17  ;;  %v3597_v18 = vadd.f32 %v3596_v20, %v3535_v6  ;;  %v16481_v17 = vld [vmem:[#allocation14_spill] sm:$0xff]  ;;  %v16483_v20 = vld [vmem:[#allocation15_spill] sm:$0xff] }
 0x7cb   :  { %v3660_v4 = vadd.f32 %v3659_v31, %v16331_v63 }
 0x7cc   :  { %v3682_v29 = vadd.f32 %v3640_v30, %v3600_v8  ;;  %v16475_v30 = vld [vmem:[#allocation82_spill] sm:$0xff] }
 0x7cd   :  { %v3702_v38 = vmul.f32 %v3680_v24, %v3660_v4  ;;  %v3601_v53 = vadd.f32 %v3597_v18, %v16475_v30  ;;  %v16484_v4 = vld [vmem:[#allocation17_spill] sm:$0xff]  ;;  %v16485_v24 = vld [vmem:[#allocation80_spill] sm:$0xff]  ;;  %v16486_v18 = vld [vmem:[#allocation79_spill] sm:$0xff] }
 0x7ce   :  { %v10126_v42 = vmul.f32 -1.442695, %v3682_v29 }
 0x7cf   :  { %v3703_v29 = vadd.f32 %v3702_v38, %v3601_v53  ;;  %v16487_v38 = vld [vmem:[#allocation68_spill] sm:$0xff] }
 0x7d0   :  { %10475 = vpow2.f32 %v10126_v42 }
 0x7d6   :  { %v10476_v28 = vpop.eup %10475 }
 0x7d7   :  { %v3686_v26 = vadd.f32 1.0, %v10476_v28  ;;  %v16478_v28 = vld [vmem:[#allocation85_spill] sm:$0xff] }
 0x7d9   :  { %10477 = vrcp.f32 %v3686_v26  ;;  %v3698_v52 = vand.u32 2147483648, %v3686_v26  ;;  %v3696_v49 = vand.u32 2147483647, %v3686_v26  ;;  %vm3692_vm13 = vweird.f32 %v3686_v26 }
 0x7da   :  { %10479 = vtanh.f32 %v3703_v29  ;;  %v16489_v29 = vld [vmem:[#allocation70_spill] sm:$0xff] }
 0x7db   :  { %v3699_v16 = vor.u32 1.1754944e-38, %v3698_v52  ;;  %vm3697_vm15 = vcmp.eq.f32.partialorder %v3696_v49, 8.507059e+37  ;;  %v16491_v52 = vld [vmem:[#allocation86_spill] sm:$0xff] }
 0x7df   :  { %v10478_v8 = vpop.eup %10477 }
 0x7e0   :  { %v3688_v45 = vmul.f32 %v10478_v8, %v3686_v26  ;;  %vm3693_vm12 = vweird.f32 %v10478_v8  ;;  %v10480_v51 = vpop.eup %10479 }
 0x7e1   :  { %vm3694_vm14 = vmor %vm3692_vm13, %vm3693_vm12 }
 0x7e2   :  { %v3689_v54 = vsub.f32 1.0, %v3688_v45 }
 0x7e4   :  { %v3690_v42 = vmul.f32 %v10478_v8, %v3689_v54  ;;  %v16490_v54 = vld [vmem:[#allocation69_spill] sm:$0xff] }
 0x7e6   :  { %v3691_v46 = vadd.f32 %v10478_v8, %v3690_v42  ;;  %v16492_v42 = vld [vmem:[#allocation88_spill] sm:$0xff] }
 0x7e8   :  { %v3695_v59 = vsel %vm3694_vm14, %v10478_v8, %v3691_v46  ;;  %v16488_v8 = vld [vmem:[#allocation67_spill] sm:$0xff] }
 0x7e9   :  { %v3700_v34 = vsel %vm3697_vm15, %v3699_v16, %v3695_v59 }
 0x7ea   :  { %v3705_v35 = vsub.f32 1.0, %v3700_v34  ;;  %v3707_v37 = vmul.f32 %v3700_v34, %v13123_v0  ;;  %v16493_v34 = vld [vmem:[#allocation97_spill] sm:$0xff] }
 0x7ec   :  { %v3706_v23 = vmul.f32 %v10480_v51, %v3705_v35  ;;  %v16494_v51 = vld [vmem:[#allocation99_spill] sm:$0xff] }
 0x7ee   :  { %v13439_v57 = vadd.f32 %v3707_v37, %v3706_v23 }
 0x7f0   :  { %16476 = vst [vmem:[#allocation73_spill] sm:$0xff] %v13439_v57  ;;  %3742 = vmatmul.f32.vlgmr.msra.gmra.mxu0 %v13439_v57  ;;  %v15891_v9 = vrot.slane %v13439_v57, 1  ;;  %v15890_v31 = vrot.slane %v13439_v57, 2  ;;  %v15888_v26 = vrot.slane %v13439_v57, 3  ;;  %v15887_v22 = vrot.slane %v13439_v57, 4 }
 0x7f1   :  { %3820 = vmatpush.xpose.msra.mxu0 %v16477_v33  ;;  %v15886_v6 = vrot.slane %v13439_v57, 5  ;;  %v15885_v53 = vrot.slane %v13439_v57, 6  ;;  %v15889_v45 = vrot.slane %v13439_v57, 7 }
 0x7f2   :  { %3762 = vmatmul.f32.vlgmr.msra.gmra.mxu1 %v15891_v9  ;;  %v16497_v9 = vld [vmem:[#allocation96_spill] sm:$0xff] }
 0x7f3   :  { %3840 = vmatpush.xpose.msra.mxu1 %v16478_v28 }
 0x7f5   :  { %3821 = vmatpush.xpose.msra.mxu0 %v16479_v25 }
 0x7f7   :  { %3841 = vmatpush.xpose.msra.mxu1 %v16480_v44 }
 0x7f8   :  { %3782 = vmatmul.f32.vlgmr.msrb.gmra.mxu0 %v15890_v31 }
 0x7f9   :  { %3860 = vmatpush.xpose.msrb.mxu0 %v16481_v17 }
 0x7fa   :  { %3802 = vmatmul.f32.vlgmr.msrb.gmra.mxu1 %v15888_v26 }
 0x7fb   :  { %3880 = vmatpush.xpose.msrb.mxu1 %v16482_v32 }
 0x7fd   :  { %3861 = vmatpush.xpose.msrb.mxu0 %v16483_v20 }
 0x7ff   :  { %3881 = vmatpush.xpose.msrb.mxu1 %v16484_v4 }
 0x800   :  { %3822 = vmatmul.f32.vlgmr.msra.gmra.mxu0 %v15887_v22 }
 0x801   :  { %4071 = vmatpush.msra.mxu0 %v16485_v24 }
 0x802   :  { %3842 = vmatmul.f32.vlgmr.msra.gmra.mxu1 %v15886_v6 }
 0x803   :  { %4072 = vmatpush.msra.mxu0 %v16486_v18  ;;  %4094 = vmatpush.msra.mxu1 %v16487_v38 }
 0x805   :  { %4095 = vmatpush.msra.mxu1 %v16488_v8 }
 0x808   :  { %3862 = vmatmul.f32.vlgmr.msrb.gmra.mxu0 %v15885_v53  ;;  %v16495_v53 = vld [vmem:[#allocation101_spill] sm:$0xff] }
 0x809   :  { %4157 = vmatpush.msrb.mxu0 %v16489_v29  ;;  %v16498_v29 = vld [vmem:[#allocation105_spill] sm:$0xff] }
 0x80a   :  { %3882 = vmatmul.f32.vlgmr.msrb.gmra.mxu1 %v15889_v45  ;;  %v16496_v45 = vld [vmem:[#allocation102_spill] sm:$0xff] }
 0x80b   :  { %4158 = vmatpush.msrb.mxu0 %v16490_v54  ;;  %4177 = vmatpush.msrb.mxu1 %v16491_v52 }
 0x80d   :  { %4178 = vmatpush.msrb.mxu1 %v16492_v42 }
 0x86d   :  { %v3743_v49 = vpop.f32.mrf.mxu0 }
 0x86e   :  { %v3886_v0 = vadd.f32 %v3743_v49, %v16497_v9  ;;  %v16500_v49 = vld [vmem:[#allocation104_spill] sm:$0xff] }
 0x86f   :  { %v3763_v46 = vpop.f32.mrf.mxu1 }
 0x870   :  { %v3887_v35 = vadd.f32 %v3763_v46, %v16493_v34 }
 0x872   :  { %v3902_v37 = vrot.slane %v3887_v35, 7 }
 0x874   :  { %v3903_v42 = vsel %vm16026_vm0, %v3902_v37, %v3886_v0 }
 0x875   :  { %v3783_v16 = vpop.f32.mrf.mxu0 }
 0x876   :  { %v3888_v23 = vadd.f32 %v3783_v16, %v16494_v51 }
 0x877   :  { %v3803_v59 = vpop.f32.mrf.mxu1 }
 0x878   :  { %v3889_v6 = vadd.f32 %v3803_v59, %v16495_v53  ;;  %v3904_v26 = vrot.slane %v3888_v23, 6  ;;  %v16499_v59 = vld [vmem:[#allocation103_spill] sm:$0xff] }
 0x87a   :  { %v3906_v54 = vrot.slane %v3889_v6, 5  ;;  %v3905_v38 = vsel %vm16025_vm1, %v3904_v26, %v3903_v42 }
 0x87c   :  { %v3907_v16 = vsel %vm16024_vm2, %v3906_v54, %v3905_v38 }
 0x87d   :  { %v3823_v22 = vpop.f32.mrf.mxu0 }
 0x87e   :  { %v3890_v31 = vadd.f32 %v3823_v22, %v16496_v45 }
 0x87f   :  { %v3843_v52 = vpop.f32.mrf.mxu1 }
 0x880   :  { %v3891_v8 = vadd.f32 %v3843_v52, %v16498_v29  ;;  %v3908_v46 = vrot.slane %v3890_v31, 4 }
 0x882   :  { %v3910_v51 = vrot.slane %v3891_v8, 3  ;;  %v3909_v18 = vsel %vm16023_vm3, %v3908_v46, %v3907_v16 }
 0x884   :  { %v3911_v37 = vsel %vm16022_vm4, %v3910_v51, %v3909_v18 }
 0x885   :  { %v3863_v34 = vpop.f32.mrf.mxu0 }
 0x886   :  { %v3892_v53 = vadd.f32 %v3863_v34, %v16499_v59 }
 0x887   :  { %v3883_v22 = vpop.f32.mrf.mxu1 }
 0x888   :  { %v3912_v45 = vrot.slane %v3892_v53, 2  ;;  %v3893_v9 = vadd.f32 %v3883_v22, %v16500_v49 }
 0x88a   :  { %v3914_v24 = vrot.slane %v3893_v9, 1  ;;  %v3913_v52 = vsel %vm16021_vm5, %v3912_v45, %v3911_v37 }
 0x88c   :  { %v3915_v26 = vsel %vm16020_vm6, %v3914_v24, %v3913_v52 }
 0x88d   :  { %v3917_v42 = vsel %vm16027_vm7, %v3915_v26, -inf }
 0x88e   :  { %3918 = vmax.xlane.f32.xlu2 %v3917_v42 }
 0x901   :  { %v3919_v38 = vpop.xlane.xlu2 %3918 }
 0x902   :  { %v3921_v54 = vrot.slane %v3919_v38, 1  ;;  %v3922_v29 = vrot.slane %v3919_v38, 2  ;;  %v3923_v34 = vrot.slane %v3919_v38, 3  ;;  %v3924_v59 = vrot.slane %v3919_v38, 4 }
 0x903   :  { %v3925_v46 = vrot.slane %v3919_v38, 5  ;;  %v3936_v16 = vsub.f32 %v3886_v0, %v3919_v38  ;;  %v3926_v4 = vrot.slane %v3919_v38, 6  ;;  %v3927_v20 = vrot.slane %v3919_v38, 7 }
 0x904   :  { %v3937_v22 = vsub.f32 %v3887_v35, %v3921_v54  ;;  %v3938_v49 = vsub.f32 %v3888_v23, %v3922_v29  ;;  %v3939_v18 = vsub.f32 %v3889_v6, %v3923_v34  ;;  %v3940_v51 = vsub.f32 %v3890_v31, %v3924_v59 }
 0x905   :  { %v3944_v32 = vmul.f32 1.442695, %v3936_v16  ;;  %v3941_v45 = vsub.f32 %v3891_v8, %v3925_v46  ;;  %v3942_v37 = vsub.f32 %v3892_v53, %v3926_v4  ;;  %v3943_v42 = vsub.f32 %v3893_v9, %v3927_v20 }
 0x906   :  { %v3946_v24 = vmul.f32 1.442695, %v3937_v22  ;;  %v3948_v52 = vmul.f32 1.442695, %v3938_v49  ;;  %v3950_v26 = vmul.f32 1.442695, %v3939_v18 }
 0x907   :  { %10481 = vpow2.f32 %v3944_v32  ;;  %v3952_v17 = vmul.f32 1.442695, %v3940_v51  ;;  %v3954_v44 = vmul.f32 1.442695, %v3941_v45  ;;  %v3956_v25 = vmul.f32 1.442695, %v3942_v37 }
 0x908   :  { %10483 = vpow2.f32 %v3946_v24  ;;  %v3958_v0 = vmul.f32 1.442695, %v3943_v42 }
 0x909   :  { %10485 = vpow2.f32 %v3948_v52 }
 0x90a   :  { %10487 = vpow2.f32 %v3950_v26 }
 0x90b   :  { %10489 = vpow2.f32 %v3952_v17 }
 0x90c   :  { %10491 = vpow2.f32 %v3954_v44 }
 0x90d   :  { %v10482_v29 = vpop.eup %10481  ;;  %10493 = vpow2.f32 %v3956_v25 }
 0x90e   :  { %v10484_v31 = vpop.eup %10483  ;;  %10495 = vpow2.f32 %v3958_v0 }
 0x90f   :  { %v10486_v6 = vpop.eup %10485  ;;  %v3968_v4 = vrot.slane %v10484_v31, 7 }
 0x910   :  { %v10488_v8 = vpop.eup %10487  ;;  %v3970_v53 = vrot.slane %v10486_v6, 6 }
 0x911   :  { %v13495_v35 = vpop.eup %10489  ;;  %v3969_v9 = vsel %vm16026_vm0, %v3968_v4, %v10482_v29  ;;  %v3972_v32 = vrot.slane %v10488_v8, 5 }
 0x912   :  { %v13498_v20 = vpop.eup %10491  ;;  %v3971_v23 = vsel %vm16025_vm1, %v3970_v53, %v3969_v9  ;;  %v3974_v17 = vrot.slane %v13495_v35, 4 }
 0x913   :  { %v13502_v44 = vpop.eup %10493  ;;  %v3973_v25 = vsel %vm16024_vm2, %v3972_v32, %v3971_v23  ;;  %v3976_v59 = vrot.slane %v13498_v20, 3  ;;  %v16501_v32 = vld [vmem:[#allocation35_spill] sm:$0xff] }
 0x914   :  { %v13506_v49 = vpop.eup %10495  ;;  %v3975_v38 = vsel %vm16023_vm3, %v3974_v17, %v3973_v25  ;;  %v3978_v54 = vrot.slane %v13502_v44, 2  ;;  %v16502_v17 = vld [vmem:[#allocation44_spill] sm:$0xff] }
 0x915   :  { %v3977_v34 = vsel %vm16022_vm4, %v3976_v59, %v3975_v38  ;;  %v3980_v46 = vrot.slane %v13506_v49, 1  ;;  %v16503_v25 = vld [vmem:[#allocation36_spill] sm:$0xff]  ;;  %v16504_v59 = vld [vmem:[#allocation45_spill] sm:$0xff]  ;;  %v16505_v38 = vld [vmem:[#allocation42_spill] sm:$0xff] }
 0x916   :  { %v3979_v16 = vsel %vm16021_vm5, %v3978_v54, %v3977_v34  ;;  %v16506_v54 = vld [vmem:[#allocation41_spill] sm:$0xff]  ;;  %v16507_v34 = vld [vmem:[#allocation50_spill] sm:$0xff] }
 0x917   :  { %v3981_v22 = vsel %vm16020_vm6, %v3980_v46, %v3979_v16  ;;  %v16508_v46 = vld [vmem:[#allocation51_spill] sm:$0xff] }
 0x918   :  { %v3983_v18 = vsel %vm16027_vm7, %v3981_v22, 0.0  ;;  %v13578_v16 = vld [vmem:[#allocation8 + $0x168] sm:$0xff]  ;;  %v13581_v22 = vld [vmem:[#allocation8 + $0x170] sm:$0xff] }
 0x919   :  { %3984 = vadd.xlane.f32.xlu2 %v3983_v18  ;;  %16509 = vst [vmem:[#allocation74_spill] sm:$0xff] %v13578_v16  ;;  %v13584_v18 = vld [vmem:[#allocation8 + $0x178] sm:$0xff] }
 0x91a   :  { %16510 = vst [vmem:[#allocation76_spill] sm:$0xff] %v13581_v22 }
 0x91b   :  { %16511 = vst [vmem:[#allocation81_spill] sm:$0xff] %v13584_v18 }
 0x98c   :  { %v3985_v51 = vpop.xlane.xlu2 %3984 }
 0x98d   :  { %10497 = vrcp.f32 %v3985_v51 }
 0x993   :  { %v10498_v45 = vpop.eup %10497 }
 0x994   :  { %v3987_v37 = vmul.f32 %v10498_v45, %v3985_v51  ;;  %v13591_v51 = vld [vmem:[#allocation8 + $0x158] sm:$0xff] }
 0x995   :  { %16513 = vst [vmem:[#allocation48_spill] sm:$0xff] %v13591_v51 }
 0x996   :  { %v3988_v24 = vsub.f32 2.0, %v3987_v37 }
 0x998   :  { %v13515_v52 = vmul.f32 %v10498_v45, %v3988_v24  ;;  %v13594_v45 = vld [vmem:[#allocation8 + $0x160] sm:$0xff]  ;;  %v13598_v24 = vld [vmem:[#allocation10 + $0x168] sm:$0xff] }
 0x999   :  { %16514 = vst [vmem:[#allocation56_spill] sm:$0xff] %v13594_v45 }
 0x99a   :  { %v4006_v26 = vmul.f32 %v10482_v29, %v13515_v52  ;;  %v3991_v42 = vrot.slane %v13515_v52, 1  ;;  %v3992_v29 = vrot.slane %v13515_v52, 2  ;;  %v3993_v4 = vrot.slane %v13515_v52, 3  ;;  %16515 = vst [vmem:[#allocation77_spill] sm:$0xff] %v13598_v24 }
 0x99b   :  { %v3994_v53 = vrot.slane %v13515_v52, 4  ;;  %v3997_v37 = vrot.slane %v13515_v52, 7 }
 0x99c   :  { %10127 = vmatmul.msk.f32.vlgmr.msrb.gmra.mxu2 %vm16027_vm7, %v4006_v26  ;;  %10128 = vmatmul.msk.f32.vlgmr.msrb.gmra.mxu3 %vm16027_vm7, %v4006_v26  ;;  %v4007_v0 = vmul.f32 %v10484_v31, %v3991_v42  ;;  %v4008_v31 = vmul.f32 %v10486_v6, %v3992_v29  ;;  %v4009_v6 = vmul.f32 %v10488_v8, %v3993_v4  ;;  %v3995_v8 = vrot.slane %v13515_v52, 5  ;;  %v13604_v42 = vld [vmem:[#allocation8 + $0x140] sm:$0xff]  ;;  %v13610_v29 = vld [vmem:[#allocation10 + $0x150] sm:$0xff] }
 0x99d   :  { %10129 = vmatmul.msk.f32.vlgmr.msra.gmra.mxu0 %vm16027_vm7, %v4006_v26  ;;  %4197 = vmatpush.msrb.mxu2 %v12576_v27  ;;  %v4010_v9 = vmul.f32 %v13495_v35, %v3994_v53  ;;  %v3996_v35 = vrot.slane %v13515_v52, 6  ;;  %v13601_v26 = vld [vmem:[#allocation8 + $0x138] sm:$0xff]  ;;  %16517 = vst [vmem:[#allocation92_spill] sm:$0xff] %v13604_v42  ;;  %v13613_v52 = vld [vmem:[#allocation8 + $0x120] sm:$0xff]  ;;  %v13619_v4 = vld [vmem:[#allocation8 + $0x130] sm:$0xff] }
 0x99e   :  { %4220 = vmatpush.msrb.mxu3 %v12296_v5  ;;  %4240 = vmatpush.msra.mxu0 %v12580_v39  ;;  %v4011_v23 = vmul.f32 %v13498_v20, %v3995_v8  ;;  %16516 = vst [vmem:[#allocation78_spill] sm:$0xff] %v13601_v26  ;;  %v13623_v53 = vld [vmem:[#allocation10 + $0x138] sm:$0xff]  ;;  %v13629_v8 = vld [vmem:[#allocation8 + $0x108] sm:$0xff] }
 0x99f   :  { %10130 = vmatmul.msk.f32.vlgmr.msra.gmra.mxu1 %vm16027_vm7, %v4007_v0  ;;  %4198 = vmatpush.msrb.mxu2 %v12586_v60  ;;  %v4012_v20 = vmul.f32 %v13502_v44, %v3996_v35  ;;  %v13588_v44 = vld [vmem:[#allocation8 + $0x150] sm:$0xff]  ;;  %16519 = vst [vmem:[#allocation53_spill] sm:$0xff] %v13610_v29 }
 0x9a0   :  { %4221 = vmatpush.msrb.mxu3 %v12292_v2  ;;  %4241 = vmatpush.msra.mxu0 %v12592_v7  ;;  %16512 = vst [vmem:[#allocation47_spill] sm:$0xff] %v13588_v44  ;;  %v13642_v35 = vld [vmem:[#allocation8 + $0xf0] sm:$0xff] }
 0x9a1   :  { %4260 = vmatpush.msra.mxu1 %v12598_v1  ;;  %16520 = vst [vmem:[#allocation54_spill] sm:$0xff] %v13613_v52 }
 0x9a2   :  { %16522 = vst [vmem:[#allocation72_spill] sm:$0xff] %v13619_v4 }
 0x9a3   :  { %4261 = vmatpush.msra.mxu1 %v12607_v13  ;;  %16523 = vst [vmem:[#allocation98_spill] sm:$0xff] %v13623_v53 }
 0x9a4   :  { %10131 = vmatmul.msk.f32.vlgmr.msra.gmra.mxu2 %vm16027_vm7, %v4007_v0  ;;  %10132 = vmatmul.msk.f32.vlgmr.msra.gmra.mxu3 %vm16027_vm7, %v4007_v0  ;;  %v13607_v0 = vld [vmem:[#allocation8 + $0x148] sm:$0xff]  ;;  %16524 = vst [vmem:[#allocation100_spill] sm:$0xff] %v13629_v8 }
 0x9a5   :  { %10133 = vmatmul.msk.f32.vlgmr.msrb.gmra.mxu0 %vm16027_vm7, %v4008_v31  ;;  %4283 = vmatpush.msra.mxu2 %v12612_v21  ;;  %16518 = vst [vmem:[#allocation93_spill] sm:$0xff] %v13607_v0 }
 0x9a6   :  { %4303 = vmatpush.msra.mxu3 %v12617_v56  ;;  %4323 = vmatpush.msrb.mxu0 %v12621_v58  ;;  %16528 = vst [vmem:[#allocation107_spill] sm:$0xff] %v13642_v35 }
 0x9a7   :  { %10134 = vmatmul.msk.f32.vlgmr.msrb.gmra.mxu1 %vm16027_vm7, %v4008_v31  ;;  %4284 = vmatpush.msra.mxu2 %v12627_v14 }
 0x9a8   :  { %4304 = vmatpush.msra.mxu3 %v12633_v10  ;;  %4324 = vmatpush.msrb.mxu0 %v12637_v19 }
 0x9a9   :  { %4346 = vmatpush.msrb.mxu1 %v12644_v62 }
 0x9ab   :  { %4347 = vmatpush.msrb.mxu1 %v12652_v47 }
 0x9ac   :  { %10135 = vmatmul.msk.f32.vlgmr.msrb.gmra.mxu2 %vm16027_vm7, %v4008_v31  ;;  %10136 = vmatmul.msk.f32.vlgmr.msrb.gmra.mxu3 %vm16027_vm7, %v4009_v6  ;;  %v13616_v31 = vld [vmem:[#allocation8 + $0x128] sm:$0xff] }
 0x9ad   :  { %10137 = vmatmul.msk.f32.vlgmr.msra.gmra.mxu0 %vm16027_vm7, %v4009_v6  ;;  %4366 = vmatpush.msrb.mxu2 %v12658_v55  ;;  %16521 = vst [vmem:[#allocation71_spill] sm:$0xff] %v13616_v31 }
 0x9ae   :  { %4386 = vmatpush.msrb.mxu3 %v12667_v50  ;;  %4409 = vmatpush.msra.mxu0 %v12663_v43 }
 0x9af   :  { %10138 = vmatmul.msk.f32.vlgmr.msra.gmra.mxu1 %vm16027_vm7, %v4009_v6  ;;  %4367 = vmatpush.msrb.mxu2 %v12673_v11  ;;  %v4013_v6 = vmul.f32 %v13506_v49, %v3997_v37  ;;  %v13638_v49 = vld [vmem:[#allocation10 + $0x120] sm:$0xff] }
 0x9b0   :  { %4387 = vmatpush.msrb.mxu3 %v12683_v36  ;;  %4410 = vmatpush.msra.mxu0 %v12679_v12  ;;  %16527 = vst [vmem:[#allocation106_spill] sm:$0xff] %v13638_v49  ;;  %v13648_v37 = vld [vmem:[#allocation8 + $0x100] sm:$0xff] }
 0x9b1   :  { %4429 = vmatpush.msra.mxu1 %v12690_v61  ;;  %16530 = vst [vmem:[#allocation109_spill] sm:$0xff] %v13648_v37 }
 0x9b3   :  { %4430 = vmatpush.msra.mxu1 %v12698_v48 }
 0x9b4   :  { %10139 = vmatmul.msk.f32.vlgmr.msra.gmra.mxu2 %vm16027_vm7, %v4010_v9  ;;  %10140 = vmatmul.msk.f32.vlgmr.msra.gmra.mxu3 %vm16027_vm7, %v4010_v9 }
 0x9b5   :  { %10141 = vmatmul.msk.f32.vlgmr.msrb.gmra.mxu0 %vm16027_vm7, %v4010_v9  ;;  %4449 = vmatpush.msra.mxu2 %v16501_v32  ;;  %v13632_v9 = vld [vmem:[#allocation8 + $0x110] sm:$0xff] }
 0x9b6   :  { %4472 = vmatpush.msra.mxu3 %v16502_v17  ;;  %4492 = vmatpush.msrb.mxu0 %v16503_v25  ;;  %16525 = vst [vmem:[#allocation94_spill] sm:$0xff] %v13632_v9 }
 0x9b7   :  { %10142 = vmatmul.msk.f32.vlgmr.msrb.gmra.mxu1 %vm16027_vm7, %v4011_v23  ;;  %4450 = vmatpush.msra.mxu2 %v16504_v59 }
 0x9b8   :  { %4473 = vmatpush.msra.mxu3 %v16505_v38  ;;  %4493 = vmatpush.msrb.mxu0 %v16506_v54 }
 0x9b9   :  { %4512 = vmatpush.msrb.mxu1 %v16507_v34 }
 0x9bb   :  { %4513 = vmatpush.msrb.mxu1 %v16508_v46 }
 0x9bc   :  { %10143 = vmatmul.msk.f32.vlgmr.msrb.gmra.mxu2 %vm16027_vm7, %v4011_v23  ;;  %10144 = vmatmul.msk.f32.vlgmr.msrb.gmra.mxu3 %vm16027_vm7, %v4011_v23  ;;  %v13635_v23 = vld [vmem:[#allocation8 + $0x118] sm:$0xff] }
 0x9bd   :  { %10145 = vmatmul.msk.f32.vlgmr.msra.gmra.mxu0 %vm16027_vm7, %v4012_v20  ;;  %4589 = vmatpush.msrb.mxu2 %v13578_v16  ;;  %16526 = vst [vmem:[#allocation95_spill] sm:$0xff] %v13635_v23 }
 0x9be   :  { %4609 = vmatpush.msrb.mxu3 %v13581_v22  ;;  %4629 = vmatpush.msra.mxu0 %v13584_v18 }
 0x9bf   :  { %10146 = vmatmul.msk.f32.vlgmr.msra.gmra.mxu1 %vm16027_vm7, %v4012_v20  ;;  %4590 = vmatpush.msrb.mxu2 %v13588_v44 }
 0x9c0   :  { %4610 = vmatpush.msrb.mxu3 %v13591_v51  ;;  %4630 = vmatpush.msra.mxu0 %v13594_v45 }
 0x9c1   :  { %4652 = vmatpush.msra.mxu1 %v13598_v24  ;;  %4591 = vmatpush.msrb.mxu2 %v13601_v26 }
 0x9c2   :  { %4611 = vmatpush.msrb.mxu3 %v13604_v42  ;;  %4631 = vmatpush.msra.mxu0 %v13607_v0 }
 0x9c3   :  { %4653 = vmatpush.msra.mxu1 %v13610_v29  ;;  %4592 = vmatpush.msrb.mxu2 %v13613_v52 }
 0x9c4   :  { %4612 = vmatpush.msrb.mxu3 %v13616_v31  ;;  %4632 = vmatpush.msra.mxu0 %v13619_v4 }
 0x9c5   :  { %4654 = vmatpush.msra.mxu1 %v13623_v53  ;;  %10147 = vmatmul.msk.f32.vlgmr.msra.gmra.mxu2 %vm16027_vm7, %v4012_v20  ;;  %v13645_v20 = vld [vmem:[#allocation8 + $0xf8] sm:$0xff]  ;;  %v16620_v53 = vld [vmem:[#allocation20_spill] sm:$0xff] }
 0x9c6   :  { %10148 = vmatmul.msk.f32.vlgmr.msra.gmra.mxu3 %vm16027_vm7, %v4013_v6  ;;  %10149 = vmatmul.msk.f32.vlgmr.msrb.gmra.mxu0 %vm16027_vm7, %v4013_v6  ;;  %16529 = vst [vmem:[#allocation108_spill] sm:$0xff] %v13645_v20 }
 0x9c7   :  { %4593 = vmatpush.msrb.mxu2 %v13629_v8  ;;  %4613 = vmatpush.msrb.mxu3 %v13632_v9  ;;  %v13651_v9 = vld [vmem:[#allocation10 + $0x108] sm:$0xff] }
 0x9c8   :  { %4633 = vmatpush.msra.mxu0 %v13635_v23  ;;  %4655 = vmatpush.msra.mxu1 %v13638_v49  ;;  %16531 = vst [vmem:[#allocation110_spill] sm:$0xff] %v13651_v9  ;;  %v13654_v23 = vld [vmem:[#allocation8 + $0xd8] sm:$0xff]  ;;  %v13784_v49 = vld [vmem:[#allocation10] sm:$0xff]  ;;  %v13803_v8 = vld [vmem:[#allocation10 + $0x128] sm:$0xff] }
 0x9c9   :  { %10150 = vmatmul.msk.f32.vlgmr.msrb.gmra.mxu1 %vm16027_vm7, %v4013_v6  ;;  %4594 = vmatpush.msrb.mxu2 %v13642_v35  ;;  %16532 = vst [vmem:[#allocation111_spill] sm:$0xff] %v13654_v23  ;;  %v13657_v6 = vld [vmem:[#allocation8 + $0xe0] sm:$0xff]  ;;  %v13660_v35 = vld [vmem:[#allocation8 + $0xe8] sm:$0xff] }
 0x9ca   :  { %4614 = vmatpush.msrb.mxu3 %v13645_v20  ;;  %4634 = vmatpush.msra.mxu0 %v13648_v37  ;;  %16533 = vst [vmem:[#allocation112_spill] sm:$0xff] %v13657_v6  ;;  %v13663_v20 = vld [vmem:[#allocation10 + $0xf0] sm:$0xff]  ;;  %v13666_v37 = vld [vmem:[#allocation8 + $0xc0] sm:$0xff] }
 0x9cb   :  { %4656 = vmatpush.msra.mxu1 %v13651_v9  ;;  %4595 = vmatpush.msrb.mxu2 %v13654_v23  ;;  %16534 = vst [vmem:[#allocation113_spill] sm:$0xff] %v13660_v35  ;;  %v13669_v9 = vld [vmem:[#allocation8 + $0xc8] sm:$0xff]  ;;  %v13672_v23 = vld [vmem:[#allocation8 + $0xd0] sm:$0xff] }
 0x9cc   :  { %4615 = vmatpush.msrb.mxu3 %v13657_v6  ;;  %4635 = vmatpush.msra.mxu0 %v13660_v35  ;;  %16535 = vst [vmem:[#allocation114_spill] sm:$0xff] %v13663_v20  ;;  %v13675_v6 = vld [vmem:[#allocation10 + $0xd8] sm:$0xff]  ;;  %v13678_v35 = vld [vmem:[#allocation8 + $0xa8] sm:$0xff] }
 0x9cd   :  { %4657 = vmatpush.msra.mxu1 %v13663_v20  ;;  %16536 = vst [vmem:[#allocation115_spill] sm:$0xff] %v13666_v37  ;;  %4596 = vmatpush.msrb.mxu2 %v13666_v37  ;;  %v13681_v20 = vld [vmem:[#allocation8 + $0xb0] sm:$0xff]  ;;  %v13684_v37 = vld [vmem:[#allocation8 + $0xb8] sm:$0xff] }
 0x9ce   :  { %16537 = vst [vmem:[#allocation116_spill] sm:$0xff] %v13669_v9  ;;  %4616 = vmatpush.msrb.mxu3 %v13669_v9  ;;  %4636 = vmatpush.msra.mxu0 %v13672_v23  ;;  %v13687_v9 = vld [vmem:[#allocation10 + $0xc0] sm:$0xff] }
 0x9cf   :  { %16538 = vst [vmem:[#allocation117_spill] sm:$0xff] %v13672_v23  ;;  %4658 = vmatpush.msra.mxu1 %v13675_v6  ;;  %4597 = vmatpush.msrb.mxu2 %v13678_v35  ;;  %v13690_v23 = vld [vmem:[#allocation8 + $0x90] sm:$0xff] }
 0x9d0   :  { %16539 = vst [vmem:[#allocation118_spill] sm:$0xff] %v13675_v6  ;;  %4617 = vmatpush.msrb.mxu3 %v13681_v20  ;;  %4637 = vmatpush.msra.mxu0 %v13684_v37  ;;  %v13693_v6 = vld [vmem:[#allocation8 + $0x98] sm:$0xff] }
 0x9d1   :  { %16540 = vst [vmem:[#allocation119_spill] sm:$0xff] %v13678_v35  ;;  %4659 = vmatpush.msra.mxu1 %v13687_v9  ;;  %4598 = vmatpush.msrb.mxu2 %v13690_v23  ;;  %v13696_v35 = vld [vmem:[#allocation8 + $0xa0] sm:$0xff] }
 0x9d2   :  { %16541 = vst [vmem:[#allocation120_spill] sm:$0xff] %v13681_v20  ;;  %4618 = vmatpush.msrb.mxu3 %v13693_v6  ;;  %4638 = vmatpush.msra.mxu0 %v13696_v35  ;;  %v13699_v20 = vld [vmem:[#allocation10 + $0xa8] sm:$0xff] }
 0x9d3   :  { %16542 = vst [vmem:[#allocation121_spill] sm:$0xff] %v13684_v37  ;;  %4660 = vmatpush.msra.mxu1 %v13699_v20  ;;  %v13702_v37 = vld [vmem:[#allocation8 + $0x78] sm:$0xff] }
 0x9d4   :  { %16543 = vst [vmem:[#allocation122_spill] sm:$0xff] %v13687_v9  ;;  %4599 = vmatpush.msrb.mxu2 %v13702_v37  ;;  %v13705_v9 = vld [vmem:[#allocation8 + $0x80] sm:$0xff] }
 0x9d5   :  { %16544 = vst [vmem:[#allocation123_spill] sm:$0xff] %v13690_v23  ;;  %4619 = vmatpush.msrb.mxu3 %v13705_v9  ;;  %v13708_v23 = vld [vmem:[#allocation8 + $0x88] sm:$0xff] }
 0x9d6   :  { %16545 = vst [vmem:[#allocation124_spill] sm:$0xff] %v13693_v6  ;;  %4639 = vmatpush.msra.mxu0 %v13708_v23  ;;  %v13711_v6 = vld [vmem:[#allocation10 + $0x90] sm:$0xff] }
 0x9d7   :  { %16546 = vst [vmem:[#allocation125_spill] sm:$0xff] %v13696_v35  ;;  %4661 = vmatpush.msra.mxu1 %v13711_v6  ;;  %v13714_v35 = vld [vmem:[#allocation8 + $0x60] sm:$0xff] }
 0x9d8   :  { %16547 = vst [vmem:[#allocation126_spill] sm:$0xff] %v13699_v20  ;;  %4600 = vmatpush.msrb.mxu2 %v13714_v35  ;;  %v13717_v20 = vld [vmem:[#allocation8 + $0x68] sm:$0xff] }
 0x9d9   :  { %16548 = vst [vmem:[#allocation127_spill] sm:$0xff] %v13702_v37  ;;  %4620 = vmatpush.msrb.mxu3 %v13717_v20  ;;  %v13720_v37 = vld [vmem:[#allocation8 + $0x70] sm:$0xff] }
 0x9da   :  { %16549 = vst [vmem:[#allocation128_spill] sm:$0xff] %v13705_v9  ;;  %4640 = vmatpush.msra.mxu0 %v13720_v37  ;;  %v13723_v9 = vld [vmem:[#allocation10 + $0x78] sm:$0xff] }
 0x9db   :  { %16550 = vst [vmem:[#allocation129_spill] sm:$0xff] %v13708_v23  ;;  %4662 = vmatpush.msra.mxu1 %v13723_v9  ;;  %v13726_v23 = vld [vmem:[#allocation8 + $0x48] sm:$0xff] }
 0x9dc   :  { %16551 = vst [vmem:[#allocation130_spill] sm:$0xff] %v13711_v6  ;;  %4601 = vmatpush.msrb.mxu2 %v13726_v23  ;;  %v13729_v6 = vld [vmem:[#allocation8 + $0x50] sm:$0xff] }
 0x9dd   :  { %16552 = vst [vmem:[#allocation131_spill] sm:$0xff] %v13714_v35  ;;  %4621 = vmatpush.msrb.mxu3 %v13729_v6  ;;  %v13732_v35 = vld [vmem:[#allocation8 + $0x58] sm:$0xff] }
 0x9de   :  { %16553 = vst [vmem:[#allocation132_spill] sm:$0xff] %v13717_v20  ;;  %4641 = vmatpush.msra.mxu0 %v13732_v35  ;;  %v13735_v20 = vld [vmem:[#allocation10 + $0x60] sm:$0xff] }
 0x9df   :  { %16554 = vst [vmem:[#allocation133_spill] sm:$0xff] %v13720_v37  ;;  %4663 = vmatpush.msra.mxu1 %v13735_v20  ;;  %v13738_v37 = vld [vmem:[#allocation8 + $0x30] sm:$0xff] }
 0x9e0   :  { %16555 = vst [vmem:[#allocation134_spill] sm:$0xff] %v13723_v9  ;;  %4602 = vmatpush.msrb.mxu2 %v13738_v37  ;;  %v13741_v9 = vld [vmem:[#allocation8 + $0x38] sm:$0xff] }
 0x9e1   :  { %16556 = vst [vmem:[#allocation135_spill] sm:$0xff] %v13726_v23  ;;  %4622 = vmatpush.msrb.mxu3 %v13741_v9  ;;  %v13744_v23 = vld [vmem:[#allocation8 + $0x40] sm:$0xff] }
 0x9e2   :  { %16557 = vst [vmem:[#allocation136_spill] sm:$0xff] %v13729_v6  ;;  %4642 = vmatpush.msra.mxu0 %v13744_v23  ;;  %v13747_v6 = vld [vmem:[#allocation10 + $0x48] sm:$0xff] }
 0x9e3   :  { %16558 = vst [vmem:[#allocation137_spill] sm:$0xff] %v13732_v35  ;;  %4664 = vmatpush.msra.mxu1 %v13747_v6  ;;  %v13750_v35 = vld [vmem:[#allocation8 + $0x18] sm:$0xff] }
 0x9e4   :  { %16559 = vst [vmem:[#allocation138_spill] sm:$0xff] %v13735_v20  ;;  %4603 = vmatpush.msrb.mxu2 %v13750_v35  ;;  %v13753_v20 = vld [vmem:[#allocation8 + $0x20] sm:$0xff] }
 0x9e5   :  { %16560 = vst [vmem:[#allocation139_spill] sm:$0xff] %v13738_v37  ;;  %4623 = vmatpush.msrb.mxu3 %v13753_v20  ;;  %v13756_v37 = vld [vmem:[#allocation8 + $0x28] sm:$0xff] }
 0x9e6   :  { %16561 = vst [vmem:[#allocation140_spill] sm:$0xff] %v13741_v9  ;;  %4643 = vmatpush.msra.mxu0 %v13756_v37  ;;  %v13762_v9 = vld [vmem:[#allocation10 + $0x30] sm:$0xff] }
 0x9e7   :  { %16562 = vst [vmem:[#allocation141_spill] sm:$0xff] %v13744_v23  ;;  %v10151_v23 = vld [vmem:[%s15646_s0 + $0x18] sm:$0xff]  ;;  %4665 = vmatpush.msra.mxu1 %v13762_v9 }
 0x9e8   :  { %16563 = vst [vmem:[#allocation142_spill] sm:$0xff] %v13747_v6  ;;  %v13765_v6 = vld [vmem:[#allocation8] sm:$0xff] }
 0x9e9   :  { %16564 = vst [vmem:[#allocation143_spill] sm:$0xff] %v13750_v35  ;;  %4604 = vmatpush.msrb.mxu2 %v13765_v6  ;;  %v13768_v35 = vld [vmem:[#allocation8 + $0x8] sm:$0xff] }
 0x9ea   :  { %16565 = vst [vmem:[#allocation144_spill] sm:$0xff] %v13753_v20  ;;  %4624 = vmatpush.msrb.mxu3 %v13768_v35  ;;  %v13771_v20 = vld [vmem:[#allocation8 + $0x10] sm:$0xff]  ;;  %4605 = vmatmul.f32.vlgmr.msrb.gmra.mxu2 %v10151_v23 }
 0x9eb   :  { %16566 = vst [vmem:[#allocation145_spill] sm:$0xff] %v13756_v37  ;;  %4644 = vmatpush.msra.mxu0 %v13771_v20  ;;  %v13774_v37 = vld [vmem:[#allocation10 + $0x18] sm:$0xff]  ;;  %4625 = vmatmul.f32.vlgmr.msrb.gmra.mxu3 %v10151_v23 }
 0x9ec   :  { %16567 = vst [vmem:[#allocation146_spill] sm:$0xff] %v13762_v9  ;;  %4666 = vmatpush.msra.mxu1 %v13774_v37  ;;  %4645 = vmatmul.f32.vlgmr.msra.gmra.mxu0 %v10151_v23  ;;  %v13777_v9 = vld [vmem:[#allocation10 + $0x170] sm:$0xff]  ;;  %v13791_v23 = vld [vmem:[#allocation10 + $0x160] sm:$0xff] }
 0x9ed   :  { %16568 = vst [vmem:[#allocation147_spill] sm:$0xff] %v13765_v6  ;;  %4672 = vmatpush.msra.mxu2 %v13777_v9  ;;  %v13780_v6 = vld [vmem:[#allocation10 + $0x178] sm:$0xff] }
 0x9ee   :  { %16569 = vst [vmem:[#allocation148_spill] sm:$0xff] %v13768_v35  ;;  %4692 = vmatpush.msra.mxu3 %v13780_v6  ;;  %v16574_v35 = vld [vmem:[#allocation32_spill] sm:$0xff]  ;;  %4667 = vmatpush.msra.mxu1 %v13784_v49 }
 0x9ef   :  { %16570 = vst [vmem:[#allocation149_spill] sm:$0xff] %v13771_v20  ;;  %4790 = vmatpush.xpose.msrb.mxu0 %v16574_v35  ;;  %4668 = vmatmul.f32.vlgmr.msra.gmra.mxu1 %v13439_v57  ;;  %v13795_v20 = vld [vmem:[#allocation10 + $0x140] sm:$0xff]  ;;  %v13798_v35 = vld [vmem:[#allocation10 + $0x148] sm:$0xff] }
 0x9f0   :  { %16571 = vst [vmem:[#allocation150_spill] sm:$0xff] %v13774_v37  ;;  %v13788_v37 = vld [vmem:[#allocation10 + $0x158] sm:$0xff]  ;;  %4693 = vmatpush.msra.mxu3 %v13791_v23 }
 0x9f1   :  { %16572 = vst [vmem:[#allocation151_spill] sm:$0xff] %v13777_v9  ;;  %4673 = vmatpush.msra.mxu2 %v13788_v37  ;;  %v16578_v9 = vld [vmem:[#allocation58_spill] sm:$0xff] }
 0x9f2   :  { %16573 = vst [vmem:[#allocation152_spill] sm:$0xff] %v13780_v6  ;;  %4810 = vmatpush.xpose.msrb.mxu1 %v16578_v9  ;;  %4694 = vmatpush.msra.mxu3 %v13798_v35  ;;  %v16582_v6 = vld [vmem:[#allocation59_spill] sm:$0xff]  ;;  %v16585_v9 = vld [vmem:[#allocation61_spill] sm:$0xff] }
 0x9f3   :  { %16575 = vst [vmem:[#allocation153_spill] sm:$0xff] %v13784_v49  ;;  %4674 = vmatpush.msra.mxu2 %v13795_v20  ;;  %v16581_v49 = vld [vmem:[#allocation34_spill] sm:$0xff] }
 0x9f4   :  { %16576 = vst [vmem:[#allocation154_spill] sm:$0xff] %v13788_v37  ;;  %4791 = vmatpush.xpose.msrb.mxu0 %v16581_v49  ;;  %v13806_v37 = vld [vmem:[#allocation10 + $0x130] sm:$0xff]  ;;  %v13818_v49 = vld [vmem:[#allocation10 + $0xf8] sm:$0xff] }
 0x9f5   :  { %16577 = vst [vmem:[#allocation155_spill] sm:$0xff] %v13791_v23  ;;  %4675 = vmatpush.msra.mxu2 %v13803_v8  ;;  %4695 = vmatpush.msra.mxu3 %v13806_v37  ;;  %v16586_v23 = vld [vmem:[#allocation64_spill] sm:$0xff] }
 0x9f6   :  { %16579 = vst [vmem:[#allocation156_spill] sm:$0xff] %v13795_v20  ;;  %4811 = vmatpush.xpose.msrb.mxu1 %v16585_v9  ;;  %v13811_v20 = vld [vmem:[#allocation10 + $0x110] sm:$0xff]  ;;  %v16592_v9 = vld [vmem:[#allocation65_spill] sm:$0xff] }
 0x9f7   :  { %16580 = vst [vmem:[#allocation157_spill] sm:$0xff] %v13798_v35  ;;  %4676 = vmatpush.msra.mxu2 %v13811_v20  ;;  %v13814_v35 = vld [vmem:[#allocation10 + $0x118] sm:$0xff] }
 0x9f8   :  { %4830 = vmatpush.xpose.msra.mxu0 %v16582_v6  ;;  %16583 = vst [vmem:[#allocation158_spill] sm:$0xff] %v13803_v8  ;;  %4696 = vmatpush.msra.mxu3 %v13814_v35  ;;  %v16589_v6 = vld [vmem:[#allocation62_spill] sm:$0xff] }
 0x9f9   :  { %16584 = vst [vmem:[#allocation159_spill] sm:$0xff] %v13806_v37  ;;  %4677 = vmatpush.msra.mxu2 %v13818_v49  ;;  %v13821_v8 = vld [vmem:[#allocation10 + $0x100] sm:$0xff]  ;;  %v16618_v37 = vld [vmem:[#allocation23_spill] sm:$0xff] }
 0x9fa   :  { %4850 = vmatpush.xpose.msra.mxu1 %v16586_v23  ;;  %16587 = vst [vmem:[#allocation160_spill] sm:$0xff] %v13811_v20  ;;  %4697 = vmatpush.msra.mxu3 %v13821_v8  ;;  %v13825_v23 = vld [vmem:[#allocation10 + $0xe0] sm:$0xff]  ;;  %v13828_v20 = vld [vmem:[#allocation10 + $0xe8] sm:$0xff] }
 0x9fb   :  { %16588 = vst [vmem:[#allocation161_spill] sm:$0xff] %v13814_v35  ;;  %4678 = vmatpush.msra.mxu2 %v13825_v23  ;;  %v13831_v35 = vld [vmem:[#allocation10 + $0xc8] sm:$0xff] }
 0x9fc   :  { %4831 = vmatpush.xpose.msra.mxu0 %v16589_v6  ;;  %16590 = vst [vmem:[#allocation162_spill] sm:$0xff] %v13818_v49  ;;  %4698 = vmatpush.msra.mxu3 %v13828_v20  ;;  %v13834_v6 = vld [vmem:[#allocation10 + $0xd0] sm:$0xff] }
 0x9fd   :  { %16591 = vst [vmem:[#allocation163_spill] sm:$0xff] %v13821_v8  ;;  %4679 = vmatpush.msra.mxu2 %v13831_v35  ;;  %v13837_v49 = vld [vmem:[#allocation10 + $0xb0] sm:$0xff]  ;;  %v16616_v8 = vld [vmem:[#allocation91_spill] sm:$0xff] }
 0x9fe   :  { %4851 = vmatpush.xpose.msra.mxu1 %v16592_v9  ;;  %16593 = vst [vmem:[#allocation164_spill] sm:$0xff] %v13825_v23  ;;  %4699 = vmatpush.msra.mxu3 %v13834_v6  ;;  %v13840_v9 = vld [vmem:[#allocation10 + $0xb8] sm:$0xff] }
 0x9ff   :  { %16594 = vst [vmem:[#allocation165_spill] sm:$0xff] %v13828_v20  ;;  %4680 = vmatpush.msra.mxu2 %v13837_v49  ;;  %v13843_v23 = vld [vmem:[#allocation10 + $0x98] sm:$0xff]  ;;  %v13846_v20 = vld [vmem:[#allocation10 + $0xa0] sm:$0xff] }
 0xa00   :  { %16595 = vst [vmem:[#allocation166_spill] sm:$0xff] %v13831_v35  ;;  %4700 = vmatpush.msra.mxu3 %v13840_v9  ;;  %v13849_v35 = vld [vmem:[#allocation10 + $0x80] sm:$0xff] }
 0xa01   :  { %16596 = vst [vmem:[#allocation167_spill] sm:$0xff] %v13834_v6  ;;  %4681 = vmatpush.msra.mxu2 %v13843_v23  ;;  %v13852_v6 = vld [vmem:[#allocation10 + $0x88] sm:$0xff] }
 0xa02   :  { %16597 = vst [vmem:[#allocation168_spill] sm:$0xff] %v13837_v49  ;;  %4701 = vmatpush.msra.mxu3 %v13846_v20  ;;  %v13855_v49 = vld [vmem:[#allocation10 + $0x68] sm:$0xff] }
 0xa03   :  { %16598 = vst [vmem:[#allocation169_spill] sm:$0xff] %v13840_v9  ;;  %4682 = vmatpush.msra.mxu2 %v13849_v35  ;;  %v13858_v9 = vld [vmem:[#allocation10 + $0x70] sm:$0xff] }
 0xa04   :  { %16599 = vst [vmem:[#allocation170_spill] sm:$0xff] %v13843_v23  ;;  %4702 = vmatpush.msra.mxu3 %v13852_v6  ;;  %v13861_v23 = vld [vmem:[#allocation10 + $0x50] sm:$0xff] }
 0xa05   :  { %16600 = vst [vmem:[#allocation171_spill] sm:$0xff] %v13846_v20  ;;  %4683 = vmatpush.msra.mxu2 %v13855_v49  ;;  %v13864_v20 = vld [vmem:[#allocation10 + $0x58] sm:$0xff] }
 0xa06   :  { %16601 = vst [vmem:[#allocation172_spill] sm:$0xff] %v13849_v35  ;;  %4703 = vmatpush.msra.mxu3 %v13858_v9  ;;  %v13867_v35 = vld [vmem:[#allocation10 + $0x38] sm:$0xff] }
 0xa07   :  { %16602 = vst [vmem:[#allocation173_spill] sm:$0xff] %v13852_v6  ;;  %4684 = vmatpush.msra.mxu2 %v13861_v23  ;;  %v13870_v6 = vld [vmem:[#allocation10 + $0x40] sm:$0xff] }
 0xa08   :  { %16603 = vst [vmem:[#allocation174_spill] sm:$0xff] %v13855_v49  ;;  %4704 = vmatpush.msra.mxu3 %v13864_v20  ;;  %v13873_v49 = vld [vmem:[#allocation10 + $0x20] sm:$0xff] }
 0xa09   :  { %16604 = vst [vmem:[#allocation175_spill] sm:$0xff] %v13858_v9  ;;  %4685 = vmatpush.msra.mxu2 %v13867_v35  ;;  %v13876_v9 = vld [vmem:[#allocation10 + $0x28] sm:$0xff] }
 0xa0a   :  { %16605 = vst [vmem:[#allocation176_spill] sm:$0xff] %v13861_v23  ;;  %4705 = vmatpush.msra.mxu3 %v13870_v6  ;;  %v13879_v23 = vld [vmem:[#allocation10 + $0x8] sm:$0xff] }
 0xa0b   :  { %16606 = vst [vmem:[#allocation177_spill] sm:$0xff] %v13864_v20  ;;  %4686 = vmatpush.msra.mxu2 %v13873_v49  ;;  %v13882_v20 = vld [vmem:[#allocation10 + $0x10] sm:$0xff] }
 0xa0c   :  { %16607 = vst [vmem:[#allocation178_spill] sm:$0xff] %v13867_v35  ;;  %4706 = vmatpush.msra.mxu3 %v13876_v9  ;;  %v16614_v35 = vld [vmem:[#allocation90_spill] sm:$0xff] }
 0xa0d   :  { %16608 = vst [vmem:[#allocation179_spill] sm:$0xff] %v13870_v6  ;;  %4687 = vmatpush.msra.mxu2 %v13879_v23  ;;  %v16613_v6 = vld [vmem:[#allocation66_spill] sm:$0xff] }
 0xa0e   :  { %16609 = vst [vmem:[#allocation180_spill] sm:$0xff] %v13873_v49  ;;  %4707 = vmatpush.msra.mxu3 %v13882_v20  ;;  %4688 = vmatmul.f32.vlgmr.msra.gmra.mxu2 %v13439_v57  ;;  %v16615_v49 = vld [vmem:[#allocation63_spill] sm:$0xff] }
 0xa0f   :  { %16610 = vst [vmem:[#allocation181_spill] sm:$0xff] %v13876_v9  ;;  %4708 = vmatmul.f32.vlgmr.msra.gmra.mxu3 %v13439_v57  ;;  %5081 = vmatpush.msrb.mxu2 %v16613_v6  ;;  %v16617_v9 = vld [vmem:[#allocation22_spill] sm:$0xff] }
 0xa10   :  { %16611 = vst [vmem:[#allocation182_spill] sm:$0xff] %v13879_v23  ;;  %5101 = vmatpush.msrb.mxu3 %v16614_v35  ;;  %v16619_v23 = vld [vmem:[#allocation19_spill] sm:$0xff] }
 0xa11   :  { %16612 = vst [vmem:[#allocation183_spill] sm:$0xff] %v13882_v20  ;;  %5082 = vmatpush.msrb.mxu2 %v16615_v49 }
 0xa12   :  { %5102 = vmatpush.msrb.mxu3 %v16616_v8 }
 0xa13   :  { %5164 = vmatpush.msra.mxu2 %v16617_v9 }
 0xa14   :  { %5184 = vmatpush.msra.mxu3 %v16618_v37 }
 0xa15   :  { %5165 = vmatpush.msra.mxu2 %v16619_v23 }
 0xa16   :  { %5185 = vmatpush.msra.mxu3 %v16620_v53 }
 0xa1a   :  { %v13895_v52 = vpop.f32.mrf.mxu0 }
 0xa1c   :  { %v4097_v20 = vpop.f32.mrf.mxu1 }
 0xa1d   :  { %v4544_v18 = vrot.slane %v4097_v20, 7 }
 0xa1f   :  { %v4034_v4 = vpop.f32.mrf.mxu2  ;;  %v4054_v31 = vpop.f32.mrf.mxu3 }
 0xa20   :  { %v4545_v46 = vsel %vm16026_vm0, %v4544_v18, %v4034_v4 }
 0xa22   :  { %v4160_v49 = vpop.f32.mrf.mxu0 }
 0xa23   :  { %v4546_v44 = vrot.slane %v4160_v49, 6 }
 0xa24   :  { %v4180_v6 = vpop.f32.mrf.mxu1 }
 0xa25   :  { %v4547_v34 = vsel %vm16025_vm1, %v4546_v44, %v4545_v46 }
 0xa27   :  { %v4117_v29 = vpop.f32.mrf.mxu2  ;;  %v13897_v35 = vpop.f32.mrf.mxu3 }
 0xa2a   :  { %v4243_v37 = vpop.f32.mrf.mxu0 }
 0xa2c   :  { %v13899_v0 = vpop.f32.mrf.mxu1 }
 0xa2f   :  { %v13901_v8 = vpop.f32.mrf.mxu2  ;;  %v4223_v9 = vpop.f32.mrf.mxu3 }
 0xa30   :  { %v4548_v22 = vrot.slane %v4223_v9, 5 }
 0xa32   :  { %v13903_v53 = vpop.f32.mrf.mxu0  ;;  %v4549_v38 = vsel %vm16024_vm2, %v4548_v22, %v4547_v34 }
 0xa34   :  { %v4349_v42 = vpop.f32.mrf.mxu1 }
 0xa35   :  { %v4552_v48 = vrot.slane %v4349_v42, 3 }
 0xa37   :  { %v4286_v23 = vpop.f32.mrf.mxu2  ;;  %v4306_v26 = vpop.f32.mrf.mxu3 }
 0xa38   :  { %v4550_v16 = vrot.slane %v4286_v23, 4 }
 0xa3a   :  { %v4412_v54 = vpop.f32.mrf.mxu0  ;;  %v4551_v17 = vsel %vm16023_vm3, %v4550_v16, %v4549_v38  ;;  %v4558_v38 = vrot.slane %v4117_v29, 7 }
 0xa3b   :  { %v4554_v61 = vrot.slane %v4412_v54, 2  ;;  %v4553_v9 = vsel %vm16022_vm4, %v4552_v48, %v4551_v17  ;;  %v4560_v54 = vrot.slane %v4180_v6, 6  ;;  %v4562_v48 = vrot.slane %v4243_v37, 5 }
 0xa3c   :  { %v4432_v24 = vpop.f32.mrf.mxu1  ;;  %v4564_v17 = vrot.slane %v4306_v26, 4 }
 0xa3d   :  { %v4555_v20 = vsel %vm16021_vm5, %v4554_v61, %v4553_v9 }
 0xa3f   :  { %v4369_v45 = vpop.f32.mrf.mxu2  ;;  %v13905_v51 = vpop.f32.mrf.mxu3 }
 0xa46   :  { %v13910_v59 = vpop.f32.mrf.mxu1 }
 0xa48   :  { %v13912_v25 = vpop.f32.mrf.mxu2 }
 0xa49   :  { %v4475_v32 = vpop.f32.mrf.mxu3 }
 0xa4a   :  { %v4556_v49 = vrot.slane %v4475_v32, 1  ;;  %v4559_v32 = vsel %vm16026_vm0, %v4558_v38, %v4054_v31  ;;  %v4574_v38 = vrot.slane %v13901_v8, 6  ;;  %v4582_v8 = vrot.slane %v13912_v25, 2 }
 0xa4b   :  { %v4561_v61 = vsel %vm16025_vm1, %v4560_v54, %v4559_v32 }
 0xa4c   :  { %v4557_v46 = vsel %vm16020_vm6, %v4556_v49, %v4555_v20  ;;  %v4566_v49 = vrot.slane %v4369_v45, 3  ;;  %v4563_v9 = vsel %vm16024_vm2, %v4562_v48, %v4561_v61  ;;  %v4572_v45 = vrot.slane %v13897_v35, 7 }
 0xa4d   :  { %v4565_v20 = vsel %vm16023_vm3, %v4564_v17, %v4563_v9  ;;  %v4576_v17 = vrot.slane %v13899_v0, 5  ;;  %v4578_v35 = vrot.slane %v13903_v53, 4  ;;  %v4580_v9 = vrot.slane %v13905_v51, 3 }
 0xa4e   :  { %v4573_v32 = vsel %vm16026_vm0, %v4572_v45, %v13895_v52  ;;  %v4584_v51 = vrot.slane %v13910_v59, 1 }
 0xa4f   :  { %v4575_v48 = vsel %vm16025_vm1, %v4574_v38, %v4573_v32 }
 0xa6c   :  { %v4669_v18 = vpop.f32.mrf.mxu1 }
 0xa6d   :  { %v4606_v44 = vpop.f32.mrf.mxu2  ;;  %v4670_v34 = vadd.f32 %v4669_v18, %v16327_v15  ;;  %v4495_v18 = vpop.f32.mrf.mxu0 }
 0xa6e   :  { %v4607_v4 = vadd.f32 %v4606_v44, %v4557_v46  ;;  %v4567_v46 = vsel %vm16022_vm4, %v4566_v49, %v4565_v20  ;;  %v4570_v29 = vrot.slane %v4495_v18, 1  ;;  %v4626_v31 = vpop.f32.mrf.mxu3  ;;  %v4577_v49 = vsel %vm16024_vm2, %v4576_v17, %v4575_v48 }
 0xa6f   :  { %v4579_v52 = vsel %vm16023_vm3, %v4578_v35, %v4577_v49 }
 0xa70   :  { %v4649_v22 = vadd.f32 %v4607_v4, %v16328_v3 }
 0xa72   :  { %v4712_v23 = vadd.f32 %v4670_v34, %v4649_v22 }
 0xa74   :  { %v10152_v12 = vmul.f32 -1.442695, %v4712_v23 }
 0xa76   :  { %10499 = vpow2.f32 %v10152_v12  ;;  %v4568_v12 = vrot.slane %v4432_v24, 2 }
 0xa78   :  { %v4569_v44 = vsel %vm16021_vm5, %v4568_v12, %v4567_v46 }
 0xa79   :  { %v4571_v37 = vsel %vm16020_vm6, %v4570_v29, %v4569_v44  ;;  %v4581_v29 = vsel %vm16022_vm4, %v4580_v9, %v4579_v52  ;;  %v16622_v52 = vld [vmem:[#allocation87_spill] sm:$0xff] }
 0xa7a   :  { %v4627_v4 = vadd.f32 %v4626_v31, %v4571_v37  ;;  %v4583_v53 = vsel %vm16021_vm5, %v4582_v8, %v4581_v29  ;;  %v4646_v37 = vpop.f32.mrf.mxu0 }
 0xa7c   :  { %v10500_v16 = vpop.eup %10499  ;;  %v4650_v22 = vadd.f32 %v4627_v4, %v16329_v41 }
 0xa7d   :  { %v4716_v42 = vadd.f32 1.0, %v10500_v16 }
 0xa7f   :  { %10501 = vrcp.f32 %v4716_v42  ;;  %v4728_v18 = vand.u32 2147483648, %v4716_v42  ;;  %vm4722_vm9 = vweird.f32 %v4716_v42  ;;  %v4726_v46 = vand.u32 2147483647, %v4716_v42 }
 0xa81   :  { %v4729_v25 = vor.u32 1.1754944e-38, %v4728_v18  ;;  %vm4727_vm11 = vcmp.eq.f32.partialorder %v4726_v46, 8.507059e+37 }
 0xa85   :  { %v10502_v6 = vpop.eup %10501 }
 0xa86   :  { %v4718_v26 = vmul.f32 %v10502_v6, %v4716_v42  ;;  %vm4723_vm8 = vweird.f32 %v10502_v6 }
 0xa87   :  { %vm4724_vm10 = vmor %vm4722_vm9, %vm4723_vm8 }
 0xa88   :  { %v4719_v16 = vsub.f32 1.0, %v4718_v26  ;;  %v4585_v26 = vsel %vm16020_vm6, %v4584_v51, %v4583_v53  ;;  %v16625_v53 = vld [vmem:[#allocation16_spill] sm:$0xff]  ;;  %v16627_v51 = vld [vmem:[#allocation17_spill] sm:$0xff] }
 0xa8a   :  { %v4720_v61 = vmul.f32 %v10502_v6, %v4719_v16 }
 0xa8c   :  { %v4721_v20 = vadd.f32 %v10502_v6, %v4720_v61 }
 0xa8e   :  { %v4725_v31 = vsel %vm4724_vm10, %v10502_v6, %v4721_v20 }
 0xa8f   :  { %v4730_v42 = vsel %vm4727_vm11, %v4729_v25, %v4725_v31  ;;  %v16628_v25 = vld [vmem:[#allocation80_spill] sm:$0xff] }
 0xa91   :  { %v4689_v34 = vpop.f32.mrf.mxu2 }
 0xa92   :  { %v4690_v23 = vadd.f32 %v4689_v34, %v16330_v40  ;;  %v4709_v0 = vpop.f32.mrf.mxu3  ;;  %v4647_v34 = vadd.f32 %v4646_v37, %v4585_v26  ;;  %v16630_v26 = vld [vmem:[#allocation68_spill] sm:$0xff] }
 0xa93   :  { %v4710_v4 = vadd.f32 %v4709_v0, %v16331_v63  ;;  %v16624_v0 = vld [vmem:[#allocation14_spill] sm:$0xff] }
 0xa94   :  { %v4732_v24 = vadd.f32 %v4690_v23, %v4650_v22  ;;  %v4651_v23 = vadd.f32 %v4647_v34, %v16475_v30 }
 0xa95   :  { %v4752_v45 = vmul.f32 %v4730_v42, %v4710_v4  ;;  %v16629_v4 = vld [vmem:[#allocation79_spill] sm:$0xff] }
 0xa96   :  { %v10153_v54 = vmul.f32 -1.442695, %v4732_v24  ;;  %v16631_v42 = vld [vmem:[#allocation67_spill] sm:$0xff] }
 0xa97   :  { %v4753_v16 = vadd.f32 %v4752_v45, %v4651_v23  ;;  %v16633_v23 = vld [vmem:[#allocation69_spill] sm:$0xff] }
 0xa98   :  { %10503 = vpow2.f32 %v10153_v54 }
 0xa9e   :  { %v10504_v12 = vpop.eup %10503 }
 0xa9f   :  { %v4736_v44 = vadd.f32 1.0, %v10504_v12  ;;  %v16623_v12 = vld [vmem:[#allocation89_spill] sm:$0xff] }
 0xaa1   :  { %10505 = vrcp.f32 %v4736_v44  ;;  %v4748_v6 = vand.u32 2147483648, %v4736_v44  ;;  %v4746_v59 = vand.u32 2147483647, %v4736_v44  ;;  %vm4742_vm13 = vweird.f32 %v4736_v44 }
 0xaa2   :  { %10507 = vtanh.f32 %v4753_v16  ;;  %v16635_v16 = vld [vmem:[#allocation88_spill] sm:$0xff] }
 0xaa3   :  { %v4749_v48 = vor.u32 1.1754944e-38, %v4748_v6  ;;  %vm4747_vm15 = vcmp.eq.f32.partialorder %v4746_v59, 8.507059e+37 }
 0xaa7   :  { %v10506_v22 = vpop.eup %10505 }
 0xaa8   :  { %v4738_v38 = vmul.f32 %v10506_v22, %v4736_v44  ;;  %vm4743_vm12 = vweird.f32 %v10506_v22  ;;  %v10508_v49 = vpop.eup %10507  ;;  %v16626_v44 = vld [vmem:[#allocation15_spill] sm:$0xff] }
 0xaa9   :  { %vm4744_vm14 = vmor %vm4742_vm13, %vm4743_vm12 }
 0xaaa   :  { %v4739_v24 = vsub.f32 1.0, %v4738_v38  ;;  %v16634_v38 = vld [vmem:[#allocation86_spill] sm:$0xff] }
 0xaac   :  { %v4740_v32 = vmul.f32 %v10506_v22, %v4739_v24 }
 0xaae   :  { %v4741_v54 = vadd.f32 %v10506_v22, %v4740_v32 }
 0xab0   :  { %v4745_v61 = vsel %vm4744_vm14, %v10506_v22, %v4741_v54  ;;  %v16632_v22 = vld [vmem:[#allocation70_spill] sm:$0xff]  ;;  %v16636_v54 = vld [vmem:[#allocation97_spill] sm:$0xff] }
 0xab1   :  { %v4750_v17 = vsel %vm4747_vm15, %v4749_v48, %v4745_v61  ;;  %v16637_v61 = vld [vmem:[#allocation99_spill] sm:$0xff] }
 0xab2   :  { %v4755_v35 = vsub.f32 1.0, %v4750_v17  ;;  %v4757_v8 = vmul.f32 %v4750_v17, %v13439_v57 }
 0xab4   :  { %v4756_v9 = vmul.f32 %v10508_v49, %v4755_v35  ;;  %v16638_v49 = vld [vmem:[#allocation101_spill] sm:$0xff] }
 0xab6   :  { %v13947_v20 = vadd.f32 %v4757_v8, %v4756_v9 }
 0xab8   :  { %16621 = vst [vmem:[#allocation184_spill] sm:$0xff] %v13947_v20  ;;  %4792 = vmatmul.f32.vlgmr.msrb.gmra.mxu0 %v13947_v20  ;;  %v16002_v18 = vrot.slane %v13947_v20, 1  ;;  %v16001_v46 = vrot.slane %v13947_v20, 2  ;;  %v16000_v29 = vrot.slane %v13947_v20, 3  ;;  %v15999_v31 = vrot.slane %v13947_v20, 4 }
 0xab9   :  { %4870 = vmatpush.xpose.msrb.mxu0 %v16477_v33  ;;  %v15998_v37 = vrot.slane %v13947_v20, 5  ;;  %v15996_v34 = vrot.slane %v13947_v20, 6  ;;  %v15997_v45 = vrot.slane %v13947_v20, 7 }
 0xaba   :  { %4812 = vmatmul.f32.vlgmr.msrb.gmra.mxu1 %v16002_v18 }
 0xabb   :  { %4890 = vmatpush.xpose.msrb.mxu1 %v16478_v28 }
 0xabd   :  { %4871 = vmatpush.xpose.msrb.mxu0 %v16622_v52 }
 0xabf   :  { %4891 = vmatpush.xpose.msrb.mxu1 %v16623_v12 }
 0xac0   :  { %4832 = vmatmul.f32.vlgmr.msra.gmra.mxu0 %v16001_v46 }
 0xac1   :  { %4910 = vmatpush.xpose.msra.mxu0 %v16624_v0 }
 0xac2   :  { %4852 = vmatmul.f32.vlgmr.msra.gmra.mxu1 %v16000_v29 }
 0xac3   :  { %4930 = vmatpush.xpose.msra.mxu1 %v16625_v53 }
 0xac5   :  { %4911 = vmatpush.xpose.msra.mxu0 %v16626_v44 }
 0xac7   :  { %4931 = vmatpush.xpose.msra.mxu1 %v16627_v51 }
 0xac8   :  { %4872 = vmatmul.f32.vlgmr.msrb.gmra.mxu0 %v15999_v31  ;;  %v16640_v31 = vld [vmem:[#allocation96_spill] sm:$0xff] }
 0xac9   :  { %5121 = vmatpush.msrb.mxu0 %v16628_v25 }
 0xaca   :  { %4892 = vmatmul.f32.vlgmr.msrb.gmra.mxu1 %v15998_v37 }
 0xacb   :  { %5122 = vmatpush.msrb.mxu0 %v16629_v4  ;;  %5144 = vmatpush.msrb.mxu1 %v16630_v26 }
 0xacd   :  { %5145 = vmatpush.msrb.mxu1 %v16631_v42 }
 0xad0   :  { %4912 = vmatmul.f32.vlgmr.msra.gmra.mxu0 %v15996_v34 }
 0xad1   :  { %5207 = vmatpush.msra.mxu0 %v16632_v22 }
 0xad2   :  { %4932 = vmatmul.f32.vlgmr.msra.gmra.mxu1 %v15997_v45  ;;  %v16639_v45 = vld [vmem:[#allocation102_spill] sm:$0xff] }
 0xad3   :  { %5208 = vmatpush.msra.mxu0 %v16633_v23  ;;  %5227 = vmatpush.msra.mxu1 %v16634_v38 }
 0xad5   :  { %5228 = vmatpush.msra.mxu1 %v16635_v16  ;;  %v16641_v16 = vld [vmem:[#allocation105_spill] sm:$0xff] }
 0xb35   :  { %v4793_v24 = vpop.f32.mrf.mxu0 }
 0xb36   :  { %v4936_v29 = vadd.f32 %v4793_v24, %v16640_v31  ;;  %v16643_v24 = vld [vmem:[#allocation104_spill] sm:$0xff] }
 0xb37   :  { %v4813_v6 = vpop.f32.mrf.mxu1 }
 0xb38   :  { %v4937_v48 = vadd.f32 %v4813_v6, %v16636_v54 }
 0xb3a   :  { %v4952_v35 = vrot.slane %v4937_v48, 7 }
 0xb3c   :  { %v4953_v18 = vsel %vm16026_vm0, %v4952_v35, %v4936_v29 }
 0xb3d   :  { %v4833_v32 = vpop.f32.mrf.mxu0 }
 0xb3e   :  { %v4938_v17 = vadd.f32 %v4833_v32, %v16637_v61 }
 0xb3f   :  { %v4853_v59 = vpop.f32.mrf.mxu1 }
 0xb40   :  { %v4939_v9 = vadd.f32 %v4853_v59, %v16638_v49  ;;  %v4954_v34 = vrot.slane %v4938_v17, 6  ;;  %v16642_v59 = vld [vmem:[#allocation103_spill] sm:$0xff] }
 0xb42   :  { %v4956_v57 = vrot.slane %v4939_v9, 5  ;;  %v4955_v23 = vsel %vm16025_vm1, %v4954_v34, %v4953_v18 }
 0xb44   :  { %v4957_v32 = vsel %vm16024_vm2, %v4956_v57, %v4955_v23 }
 0xb45   :  { %v4873_v8 = vpop.f32.mrf.mxu0 }
 0xb46   :  { %v4940_v37 = vadd.f32 %v4873_v8, %v16639_v45 }
 0xb47   :  { %v4893_v46 = vpop.f32.mrf.mxu1 }
 0xb48   :  { %v4941_v38 = vadd.f32 %v4893_v46, %v16641_v16  ;;  %v4958_v6 = vrot.slane %v4940_v37, 4 }
 0xb4a   :  { %v4960_v61 = vrot.slane %v4941_v38, 3  ;;  %v4959_v22 = vsel %vm16023_vm3, %v4958_v6, %v4957_v32 }
 0xb4c   :  { %v4961_v35 = vsel %vm16022_vm4, %v4960_v61, %v4959_v22 }
 0xb4d   :  { %v4913_v54 = vpop.f32.mrf.mxu0 }
 0xb4e   :  { %v4942_v49 = vadd.f32 %v4913_v54, %v16642_v59 }
 0xb4f   :  { %v4933_v8 = vpop.f32.mrf.mxu1 }
 0xb50   :  { %v4962_v45 = vrot.slane %v4942_v49, 2  ;;  %v4943_v31 = vadd.f32 %v4933_v8, %v16643_v24 }
 0xb52   :  { %v4964_v42 = vrot.slane %v4943_v31, 1  ;;  %v4963_v46 = vsel %vm16021_vm5, %v4962_v45, %v4961_v35 }
 0xb54   :  { %v4965_v18 = vsel %vm16020_vm6, %v4964_v42, %v4963_v46 }
 0xb55   :  { %v4967_v34 = vsel %vm16027_vm7, %v4965_v18, -inf }
 0xb56   :  { %4968 = vmax.xlane.f32.xlu0 %v4967_v34 }
 0xbc9   :  { %v4969_v57 = vpop.xlane.xlu0 %4968 }
 0xbca   :  { %v4971_v23 = vrot.slane %v4969_v57, 1  ;;  %v4972_v16 = vrot.slane %v4969_v57, 2  ;;  %v4973_v54 = vrot.slane %v4969_v57, 3  ;;  %v4974_v59 = vrot.slane %v4969_v57, 4 }
 0xbcb   :  { %v4975_v6 = vrot.slane %v4969_v57, 5  ;;  %v4986_v32 = vsub.f32 %v4936_v29, %v4969_v57  ;;  %v4976_v26 = vrot.slane %v4969_v57, 6  ;;  %v4977_v4 = vrot.slane %v4969_v57, 7 }
 0xbcc   :  { %v4987_v8 = vsub.f32 %v4937_v48, %v4971_v23  ;;  %v4988_v24 = vsub.f32 %v4938_v17, %v4972_v16  ;;  %v4989_v22 = vsub.f32 %v4939_v9, %v4973_v54  ;;  %v4990_v61 = vsub.f32 %v4940_v37, %v4974_v59 }
 0xbcd   :  { %v4994_v25 = vmul.f32 1.442695, %v4986_v32  ;;  %v4991_v45 = vsub.f32 %v4941_v38, %v4975_v6  ;;  %v4992_v35 = vsub.f32 %v4942_v49, %v4976_v26  ;;  %v4993_v34 = vsub.f32 %v4943_v31, %v4977_v4 }
 0xbce   :  { %v4996_v42 = vmul.f32 1.442695, %v4987_v8  ;;  %v4998_v46 = vmul.f32 1.442695, %v4988_v24  ;;  %v5000_v18 = vmul.f32 1.442695, %v4989_v22 }
 0xbcf   :  { %10509 = vpow2.f32 %v4994_v25  ;;  %v5002_v51 = vmul.f32 1.442695, %v4990_v61  ;;  %v5004_v44 = vmul.f32 1.442695, %v4991_v45  ;;  %v5006_v53 = vmul.f32 1.442695, %v4992_v35 }
 0xbd0   :  { %10511 = vpow2.f32 %v4996_v42  ;;  %v5008_v29 = vmul.f32 1.442695, %v4993_v34 }
 0xbd1   :  { %10513 = vpow2.f32 %v4998_v46 }
 0xbd2   :  { %10515 = vpow2.f32 %v5000_v18 }
 0xbd3   :  { %10517 = vpow2.f32 %v5002_v51 }
 0xbd4   :  { %10519 = vpow2.f32 %v5004_v44 }
 0xbd5   :  { %v10510_v16 = vpop.eup %10509  ;;  %10521 = vpow2.f32 %v5006_v53 }
 0xbd6   :  { %v10512_v37 = vpop.eup %10511  ;;  %10523 = vpow2.f32 %v5008_v29 }
 0xbd7   :  { %v10514_v38 = vpop.eup %10513  ;;  %v5018_v26 = vrot.slane %v10512_v37, 7 }
 0xbd8   :  { %v10516_v48 = vpop.eup %10515  ;;  %v5020_v17 = vrot.slane %v10514_v38, 6 }
 0xbd9   :  { %v14003_v49 = vpop.eup %10517  ;;  %v5019_v31 = vsel %vm16026_vm0, %v5018_v26, %v10510_v16  ;;  %v5022_v25 = vrot.slane %v10516_v48, 5 }
 0xbda   :  { %v14006_v4 = vpop.eup %10519  ;;  %v5021_v9 = vsel %vm16025_vm1, %v5020_v17, %v5019_v31  ;;  %v5024_v51 = vrot.slane %v14003_v49, 4  ;;  %v16645_v31 = vld [vmem:[#allocation38_spill] sm:$0xff] }
 0xbdb   :  { %v14010_v44 = vpop.eup %10521  ;;  %v5023_v53 = vsel %vm16024_vm2, %v5022_v25, %v5021_v9  ;;  %v5026_v59 = vrot.slane %v14006_v4, 3 }
 0xbdc   :  { %v14014_v24 = vpop.eup %10523  ;;  %v5025_v57 = vsel %vm16023_vm3, %v5024_v51, %v5023_v53  ;;  %v5028_v23 = vrot.slane %v14010_v44, 2  ;;  %v16646_v51 = vld [vmem:[#allocation39_spill] sm:$0xff] }
 0xbdd   :  { %v5027_v54 = vsel %vm16022_vm4, %v5026_v59, %v5025_v57  ;;  %v5030_v6 = vrot.slane %v14014_v24, 1  ;;  %v16647_v53 = vld [vmem:[#allocation35_spill] sm:$0xff]  ;;  %v16648_v57 = vld [vmem:[#allocation44_spill] sm:$0xff] }
 0xbde   :  { %v5029_v32 = vsel %vm16021_vm5, %v5028_v23, %v5027_v54  ;;  %v16649_v23 = vld [vmem:[#allocation36_spill] sm:$0xff]  ;;  %v16650_v54 = vld [vmem:[#allocation45_spill] sm:$0xff] }
 0xbdf   :  { %v5031_v8 = vsel %vm16020_vm6, %v5030_v6, %v5029_v32  ;;  %v16651_v6 = vld [vmem:[#allocation42_spill] sm:$0xff]  ;;  %v16652_v32 = vld [vmem:[#allocation41_spill] sm:$0xff] }
 0xbe0   :  { %v5033_v22 = vsel %vm16027_vm7, %v5031_v8, 0.0  ;;  %v16653_v8 = vld [vmem:[#allocation50_spill] sm:$0xff] }
 0xbe1   :  { %5034 = vadd.xlane.f32.xlu1 %v5033_v22  ;;  %v16654_v22 = vld [vmem:[#allocation51_spill] sm:$0xff] }
 0xc54   :  { %v5035_v61 = vpop.xlane.xlu1 %5034 }
 0xc55   :  { %10525 = vrcp.f32 %v5035_v61 }
 0xc5b   :  { %v10526_v45 = vpop.eup %10525 }
 0xc5c   :  { %v5037_v35 = vmul.f32 %v10526_v45, %v5035_v61  ;;  %v16655_v61 = vld [vmem:[#allocation74_spill] sm:$0xff] }
 0xc5e   :  { %v5038_v42 = vsub.f32 2.0, %v5037_v35  ;;  %v16657_v35 = vld [vmem:[#allocation81_spill] sm:$0xff] }
 0xc60   :  { %v14023_v46 = vmul.f32 %v10526_v45, %v5038_v42  ;;  %v16656_v45 = vld [vmem:[#allocation76_spill] sm:$0xff]  ;;  %v16658_v42 = vld [vmem:[#allocation47_spill] sm:$0xff] }
 0xc62   :  { %v5056_v18 = vmul.f32 %v10510_v16, %v14023_v46  ;;  %v5041_v34 = vrot.slane %v14023_v46, 1  ;;  %v5042_v16 = vrot.slane %v14023_v46, 2  ;;  %v5043_v26 = vrot.slane %v14023_v46, 3 }
 0xc63   :  { %v5044_v17 = vrot.slane %v14023_v46, 4  ;;  %v5045_v25 = vrot.slane %v14023_v46, 5 }
 0xc64   :  { %10154 = vmatmul.msk.f32.vlgmr.msrb.gmra.mxu2 %vm16027_vm7, %v5056_v18  ;;  %10155 = vmatmul.msk.f32.vlgmr.msrb.gmra.mxu3 %vm16027_vm7, %v5056_v18  ;;  %v5057_v29 = vmul.f32 %v10512_v37, %v5041_v34  ;;  %v5058_v37 = vmul.f32 %v10514_v38, %v5042_v16  ;;  %v5059_v38 = vmul.f32 %v10516_v48, %v5043_v26  ;;  %v16644_v48 = vld [vmem:[#allocation27_spill] sm:$0xff]  ;;  %v16660_v34 = vld [vmem:[#allocation56_spill] sm:$0xff]  ;;  %v16662_v16 = vld [vmem:[#allocation78_spill] sm:$0xff] }
 0xc65   :  { %10156 = vmatmul.msk.f32.vlgmr.msrb.gmra.mxu0 %vm16027_vm7, %v5056_v18  ;;  %5247 = vmatpush.msrb.mxu2 %v12576_v27  ;;  %v5060_v9 = vmul.f32 %v14003_v49, %v5044_v17  ;;  %v5061_v59 = vmul.f32 %v14006_v4, %v5045_v25  ;;  %v5046_v49 = vrot.slane %v14023_v46, 6  ;;  %v16659_v18 = vld [vmem:[#allocation48_spill] sm:$0xff]  ;;  %v16664_v26 = vld [vmem:[#allocation93_spill] sm:$0xff]  ;;  %v16666_v17 = vld [vmem:[#allocation54_spill] sm:$0xff] }
 0xc66   :  { %5270 = vmatpush.msrb.mxu3 %v12296_v5  ;;  %5290 = vmatpush.msrb.mxu0 %v12580_v39  ;;  %v16667_v25 = vld [vmem:[#allocation71_spill] sm:$0xff] }
 0xc67   :  { %10157 = vmatmul.msk.f32.vlgmr.msrb.gmra.mxu1 %vm16027_vm7, %v5057_v29  ;;  %5248 = vmatpush.msrb.mxu2 %v12586_v60  ;;  %v5062_v4 = vmul.f32 %v14010_v44, %v5046_v49  ;;  %v5047_v44 = vrot.slane %v14023_v46, 7  ;;  %v16669_v49 = vld [vmem:[#allocation98_spill] sm:$0xff]  ;;  %v16670_v46 = vld [vmem:[#allocation100_spill] sm:$0xff] }
 0xc68   :  { %5271 = vmatpush.msrb.mxu3 %v12292_v2  ;;  %5291 = vmatpush.msrb.mxu0 %v12592_v7 }
 0xc69   :  { %5310 = vmatpush.msrb.mxu1 %v12598_v1 }
 0xc6b   :  { %5311 = vmatpush.msrb.mxu1 %v12607_v13 }
 0xc6c   :  { %10158 = vmatmul.msk.f32.vlgmr.msra.gmra.mxu2 %vm16027_vm7, %v5057_v29  ;;  %10159 = vmatmul.msk.f32.vlgmr.msra.gmra.mxu3 %vm16027_vm7, %v5057_v29  ;;  %v16661_v29 = vld [vmem:[#allocation77_spill] sm:$0xff] }
 0xc6d   :  { %10160 = vmatmul.msk.f32.vlgmr.msra.gmra.mxu0 %vm16027_vm7, %v5058_v37  ;;  %5333 = vmatpush.msra.mxu2 %v12612_v21 }
 0xc6e   :  { %5353 = vmatpush.msra.mxu3 %v12617_v56  ;;  %5373 = vmatpush.msra.mxu0 %v12621_v58 }
 0xc6f   :  { %10161 = vmatmul.msk.f32.vlgmr.msra.gmra.mxu1 %vm16027_vm7, %v5058_v37  ;;  %5334 = vmatpush.msra.mxu2 %v12627_v14 }
 0xc70   :  { %5354 = vmatpush.msra.mxu3 %v12633_v10  ;;  %5374 = vmatpush.msra.mxu0 %v12637_v19 }
 0xc71   :  { %5396 = vmatpush.msra.mxu1 %v12644_v62 }
 0xc73   :  { %5397 = vmatpush.msra.mxu1 %v12652_v47 }
 0xc74   :  { %10162 = vmatmul.msk.f32.vlgmr.msrb.gmra.mxu2 %vm16027_vm7, %v5058_v37  ;;  %10163 = vmatmul.msk.f32.vlgmr.msrb.gmra.mxu3 %vm16027_vm7, %v5059_v38  ;;  %v16663_v37 = vld [vmem:[#allocation92_spill] sm:$0xff] }
 0xc75   :  { %10164 = vmatmul.msk.f32.vlgmr.msrb.gmra.mxu0 %vm16027_vm7, %v5059_v38  ;;  %5416 = vmatpush.msrb.mxu2 %v12658_v55 }
 0xc76   :  { %5436 = vmatpush.msrb.mxu3 %v12667_v50  ;;  %5459 = vmatpush.msrb.mxu0 %v12663_v43 }
 0xc77   :  { %10165 = vmatmul.msk.f32.vlgmr.msrb.gmra.mxu1 %vm16027_vm7, %v5059_v38  ;;  %5417 = vmatpush.msrb.mxu2 %v12673_v11  ;;  %v16665_v38 = vld [vmem:[#allocation53_spill] sm:$0xff] }
 0xc78   :  { %5437 = vmatpush.msrb.mxu3 %v12683_v36  ;;  %5460 = vmatpush.msrb.mxu0 %v16644_v48 }
 0xc79   :  { %5479 = vmatpush.msrb.mxu1 %v16645_v31 }
 0xc7b   :  { %5480 = vmatpush.msrb.mxu1 %v16646_v51 }
 0xc7c   :  { %10166 = vmatmul.msk.f32.vlgmr.msra.gmra.mxu2 %vm16027_vm7, %v5060_v9  ;;  %10167 = vmatmul.msk.f32.vlgmr.msra.gmra.mxu3 %vm16027_vm7, %v5060_v9 }
 0xc7d   :  { %10168 = vmatmul.msk.f32.vlgmr.msra.gmra.mxu0 %vm16027_vm7, %v5060_v9  ;;  %5499 = vmatpush.msra.mxu2 %v16647_v53  ;;  %v16668_v9 = vld [vmem:[#allocation72_spill] sm:$0xff] }
 0xc7e   :  { %5522 = vmatpush.msra.mxu3 %v16648_v57  ;;  %5542 = vmatpush.msra.mxu0 %v16649_v23 }
 0xc7f   :  { %10169 = vmatmul.msk.f32.vlgmr.msra.gmra.mxu1 %vm16027_vm7, %v5061_v59  ;;  %5500 = vmatpush.msra.mxu2 %v16650_v54 }
 0xc80   :  { %5523 = vmatpush.msra.mxu3 %v16651_v6  ;;  %5543 = vmatpush.msra.mxu0 %v16652_v32 }
 0xc81   :  { %5562 = vmatpush.msra.mxu1 %v16653_v8 }
 0xc83   :  { %5563 = vmatpush.msra.mxu1 %v16654_v22 }
 0xc84   :  { %10170 = vmatmul.msk.f32.vlgmr.msrb.gmra.mxu2 %vm16027_vm7, %v5061_v59  ;;  %10171 = vmatmul.msk.f32.vlgmr.msrb.gmra.mxu3 %vm16027_vm7, %v5061_v59  ;;  %v5063_v59 = vmul.f32 %v14014_v24, %v5047_v44  ;;  %v16675_v24 = vld [vmem:[#allocation108_spill] sm:$0xff] }
 0xc85   :  { %10172 = vmatmul.msk.f32.vlgmr.msrb.gmra.mxu0 %vm16027_vm7, %v5062_v4  ;;  %5639 = vmatpush.msrb.mxu2 %v16655_v61  ;;  %v16671_v61 = vld [vmem:[#allocation94_spill] sm:$0xff]  ;;  %v16679_v44 = vld [vmem:[#allocation112_spill] sm:$0xff] }
 0xc86   :  { %5659 = vmatpush.msrb.mxu3 %v16656_v45  ;;  %5679 = vmatpush.msrb.mxu0 %v16657_v35  ;;  %v16672_v45 = vld [vmem:[#allocation95_spill] sm:$0xff]  ;;  %v16673_v35 = vld [vmem:[#allocation106_spill] sm:$0xff] }
 0xc87   :  { %10173 = vmatmul.msk.f32.vlgmr.msrb.gmra.mxu1 %vm16027_vm7, %v5062_v4  ;;  %5640 = vmatpush.msrb.mxu2 %v16658_v42  ;;  %v16674_v42 = vld [vmem:[#allocation107_spill] sm:$0xff] }
 0xc88   :  { %5660 = vmatpush.msrb.mxu3 %v16659_v18  ;;  %5680 = vmatpush.msrb.mxu0 %v16660_v34  ;;  %v16676_v18 = vld [vmem:[#allocation109_spill] sm:$0xff]  ;;  %v16678_v34 = vld [vmem:[#allocation111_spill] sm:$0xff] }
 0xc89   :  { %5702 = vmatpush.msrb.mxu1 %v16661_v29  ;;  %5641 = vmatpush.msrb.mxu2 %v16662_v16  ;;  %v16680_v29 = vld [vmem:[#allocation113_spill] sm:$0xff]  ;;  %v16681_v16 = vld [vmem:[#allocation114_spill] sm:$0xff] }
 0xc8a   :  { %5661 = vmatpush.msrb.mxu3 %v16663_v37  ;;  %5681 = vmatpush.msrb.mxu0 %v16664_v26  ;;  %v16682_v37 = vld [vmem:[#allocation115_spill] sm:$0xff]  ;;  %v16683_v26 = vld [vmem:[#allocation116_spill] sm:$0xff] }
 0xc8b   :  { %5703 = vmatpush.msrb.mxu1 %v16665_v38  ;;  %5642 = vmatpush.msrb.mxu2 %v16666_v17  ;;  %v16684_v38 = vld [vmem:[#allocation117_spill] sm:$0xff]  ;;  %v16685_v17 = vld [vmem:[#allocation118_spill] sm:$0xff] }
 0xc8c   :  { %5662 = vmatpush.msrb.mxu3 %v16667_v25  ;;  %5682 = vmatpush.msrb.mxu0 %v16668_v9  ;;  %v16686_v25 = vld [vmem:[#allocation119_spill] sm:$0xff]  ;;  %v16687_v9 = vld [vmem:[#allocation120_spill] sm:$0xff] }
 0xc8d   :  { %5704 = vmatpush.msrb.mxu1 %v16669_v49  ;;  %10174 = vmatmul.msk.f32.vlgmr.msra.gmra.mxu2 %vm16027_vm7, %v5062_v4  ;;  %v16677_v4 = vld [vmem:[#allocation110_spill] sm:$0xff] }
 0xc8e   :  { %10175 = vmatmul.msk.f32.vlgmr.msra.gmra.mxu3 %vm16027_vm7, %v5063_v59  ;;  %10176 = vmatmul.msk.f32.vlgmr.msra.gmra.mxu0 %vm16027_vm7, %v5063_v59  ;;  %v16689_v49 = vld [vmem:[#allocation122_spill] sm:$0xff] }
 0xc8f   :  { %5643 = vmatpush.msrb.mxu2 %v16670_v46  ;;  %5663 = vmatpush.msrb.mxu3 %v16671_v61  ;;  %v16690_v46 = vld [vmem:[#allocation123_spill] sm:$0xff]  ;;  %v16691_v61 = vld [vmem:[#allocation124_spill] sm:$0xff] }
 0xc90   :  { %5683 = vmatpush.msrb.mxu0 %v16672_v45  ;;  %5705 = vmatpush.msrb.mxu1 %v16673_v35  ;;  %v16692_v45 = vld [vmem:[#allocation125_spill] sm:$0xff]  ;;  %v16693_v35 = vld [vmem:[#allocation126_spill] sm:$0xff] }
 0xc91   :  { %10177 = vmatmul.msk.f32.vlgmr.msra.gmra.mxu1 %vm16027_vm7, %v5063_v59  ;;  %5644 = vmatpush.msrb.mxu2 %v16674_v42  ;;  %v16688_v59 = vld [vmem:[#allocation121_spill] sm:$0xff]  ;;  %v16694_v42 = vld [vmem:[#allocation127_spill] sm:$0xff] }
 0xc92   :  { %5664 = vmatpush.msrb.mxu3 %v16675_v24  ;;  %5684 = vmatpush.msrb.mxu0 %v16676_v18  ;;  %v16695_v24 = vld [vmem:[#allocation128_spill] sm:$0xff]  ;;  %v16696_v18 = vld [vmem:[#allocation129_spill] sm:$0xff] }
 0xc93   :  { %5706 = vmatpush.msrb.mxu1 %v16677_v4  ;;  %5645 = vmatpush.msrb.mxu2 %v16678_v34  ;;  %v16697_v4 = vld [vmem:[#allocation130_spill] sm:$0xff]  ;;  %v16698_v34 = vld [vmem:[#allocation131_spill] sm:$0xff] }
 0xc94   :  { %5665 = vmatpush.msrb.mxu3 %v16679_v44  ;;  %5685 = vmatpush.msrb.mxu0 %v16680_v29  ;;  %v16699_v44 = vld [vmem:[#allocation132_spill] sm:$0xff]  ;;  %v16700_v29 = vld [vmem:[#allocation133_spill] sm:$0xff] }
 0xc95   :  { %5707 = vmatpush.msrb.mxu1 %v16681_v16  ;;  %5646 = vmatpush.msrb.mxu2 %v16682_v37  ;;  %v16701_v16 = vld [vmem:[#allocation134_spill] sm:$0xff]  ;;  %v16702_v37 = vld [vmem:[#allocation135_spill] sm:$0xff] }
 0xc96   :  { %5666 = vmatpush.msrb.mxu3 %v16683_v26  ;;  %5686 = vmatpush.msrb.mxu0 %v16684_v38  ;;  %v16703_v26 = vld [vmem:[#allocation136_spill] sm:$0xff]  ;;  %v16704_v38 = vld [vmem:[#allocation137_spill] sm:$0xff] }
 0xc97   :  { %5708 = vmatpush.msrb.mxu1 %v16685_v17  ;;  %5647 = vmatpush.msrb.mxu2 %v16686_v25  ;;  %v16705_v17 = vld [vmem:[#allocation138_spill] sm:$0xff]  ;;  %v16706_v25 = vld [vmem:[#allocation139_spill] sm:$0xff] }
 0xc98   :  { %5667 = vmatpush.msrb.mxu3 %v16687_v9  ;;  %5687 = vmatpush.msrb.mxu0 %v16688_v59  ;;  %v16707_v9 = vld [vmem:[#allocation140_spill] sm:$0xff]  ;;  %v16708_v59 = vld [vmem:[#allocation141_spill] sm:$0xff] }
 0xc99   :  { %5709 = vmatpush.msrb.mxu1 %v16689_v49  ;;  %5648 = vmatpush.msrb.mxu2 %v16690_v46  ;;  %v16709_v49 = vld [vmem:[#allocation142_spill] sm:$0xff]  ;;  %v16710_v46 = vld [vmem:[#allocation143_spill] sm:$0xff] }
 0xc9a   :  { %5668 = vmatpush.msrb.mxu3 %v16691_v61  ;;  %5688 = vmatpush.msrb.mxu0 %v16692_v45  ;;  %v16711_v61 = vld [vmem:[#allocation144_spill] sm:$0xff]  ;;  %v16712_v45 = vld [vmem:[#allocation145_spill] sm:$0xff] }
 0xc9b   :  { %5710 = vmatpush.msrb.mxu1 %v16693_v35  ;;  %5649 = vmatpush.msrb.mxu2 %v16694_v42  ;;  %v10178_v35 = vld [vmem:[%s15646_s0 + $0x20] sm:$0xff] }
 0xc9c   :  { %5669 = vmatpush.msrb.mxu3 %v16695_v24  ;;  %5689 = vmatpush.msrb.mxu0 %v16696_v18  ;;  %v16713_v42 = vld [vmem:[#allocation146_spill] sm:$0xff]  ;;  %v16714_v24 = vld [vmem:[#allocation147_spill] sm:$0xff]  ;;  %v16715_v18 = vld [vmem:[#allocation148_spill] sm:$0xff] }
 0xc9d   :  { %5711 = vmatpush.msrb.mxu1 %v16697_v4  ;;  %5650 = vmatpush.msrb.mxu2 %v16698_v34  ;;  %v16716_v4 = vld [vmem:[#allocation149_spill] sm:$0xff]  ;;  %v16717_v34 = vld [vmem:[#allocation150_spill] sm:$0xff] }
 0xc9e   :  { %5670 = vmatpush.msrb.mxu3 %v16699_v44  ;;  %5690 = vmatpush.msrb.mxu0 %v16700_v29  ;;  %v16718_v44 = vld [vmem:[#allocation151_spill] sm:$0xff]  ;;  %v16719_v29 = vld [vmem:[#allocation152_spill] sm:$0xff] }
 0xc9f   :  { %5712 = vmatpush.msrb.mxu1 %v16701_v16  ;;  %5651 = vmatpush.msrb.mxu2 %v16702_v37  ;;  %v16720_v16 = vld [vmem:[#allocation32_spill] sm:$0xff]  ;;  %v16721_v37 = vld [vmem:[#allocation153_spill] sm:$0xff] }
 0xca0   :  { %5671 = vmatpush.msrb.mxu3 %v16703_v26  ;;  %5691 = vmatpush.msrb.mxu0 %v16704_v38  ;;  %v16722_v26 = vld [vmem:[#allocation154_spill] sm:$0xff]  ;;  %v16723_v38 = vld [vmem:[#allocation155_spill] sm:$0xff] }
 0xca1   :  { %5713 = vmatpush.msrb.mxu1 %v16705_v17  ;;  %5652 = vmatpush.msrb.mxu2 %v16706_v25  ;;  %v16724_v17 = vld [vmem:[#allocation58_spill] sm:$0xff]  ;;  %v16725_v25 = vld [vmem:[#allocation156_spill] sm:$0xff] }
 0xca2   :  { %5672 = vmatpush.msrb.mxu3 %v16707_v9  ;;  %5692 = vmatpush.msrb.mxu0 %v16708_v59  ;;  %v16726_v9 = vld [vmem:[#allocation157_spill] sm:$0xff]  ;;  %v16727_v59 = vld [vmem:[#allocation34_spill] sm:$0xff] }
 0xca3   :  { %5714 = vmatpush.msrb.mxu1 %v16709_v49  ;;  %5653 = vmatpush.msrb.mxu2 %v16710_v46  ;;  %v16728_v49 = vld [vmem:[#allocation59_spill] sm:$0xff]  ;;  %v16729_v46 = vld [vmem:[#allocation158_spill] sm:$0xff] }
 0xca4   :  { %5673 = vmatpush.msrb.mxu3 %v16711_v61  ;;  %5693 = vmatpush.msrb.mxu0 %v16712_v45  ;;  %v16730_v61 = vld [vmem:[#allocation159_spill] sm:$0xff]  ;;  %v16731_v45 = vld [vmem:[#allocation61_spill] sm:$0xff] }
 0xca5   :  { %5715 = vmatpush.msrb.mxu1 %v16713_v42  ;;  %5654 = vmatpush.msrb.mxu2 %v16714_v24  ;;  %v16733_v42 = vld [vmem:[#allocation160_spill] sm:$0xff]  ;;  %v16734_v24 = vld [vmem:[#allocation161_spill] sm:$0xff] }
 0xca6   :  { %5674 = vmatpush.msrb.mxu3 %v16715_v18  ;;  %5694 = vmatpush.msrb.mxu0 %v16716_v4  ;;  %v16735_v18 = vld [vmem:[#allocation62_spill] sm:$0xff] }
 0xca7   :  { %5716 = vmatpush.msrb.mxu1 %v16717_v34  ;;  %5655 = vmatmul.f32.vlgmr.msrb.gmra.mxu2 %v10178_v35  ;;  %v16736_v4 = vld [vmem:[#allocation162_spill] sm:$0xff]  ;;  %v16737_v34 = vld [vmem:[#allocation163_spill] sm:$0xff] }
 0xca8   :  { %5675 = vmatmul.f32.vlgmr.msrb.gmra.mxu3 %v10178_v35  ;;  %5695 = vmatmul.f32.vlgmr.msrb.gmra.mxu0 %v10178_v35  ;;  %v16732_v35 = vld [vmem:[#allocation64_spill] sm:$0xff] }
 0xca9   :  { %5722 = vmatpush.msra.mxu2 %v16718_v44  ;;  %5742 = vmatpush.msra.mxu3 %v16719_v29  ;;  %v16738_v44 = vld [vmem:[#allocation65_spill] sm:$0xff]  ;;  %v16739_v29 = vld [vmem:[#allocation164_spill] sm:$0xff] }
 0xcaa   :  { %5840 = vmatpush.xpose.msra.mxu0 %v16720_v16  ;;  %5717 = vmatpush.msrb.mxu1 %v16721_v37  ;;  %v16740_v16 = vld [vmem:[#allocation165_spill] sm:$0xff]  ;;  %v16741_v37 = vld [vmem:[#allocation166_spill] sm:$0xff] }
 0xcab   :  { %5718 = vmatmul.f32.vlgmr.msrb.gmra.mxu1 %v13947_v20  ;;  %5723 = vmatpush.msra.mxu2 %v16722_v26  ;;  %v16742_v26 = vld [vmem:[#allocation167_spill] sm:$0xff] }
 0xcac   :  { %5743 = vmatpush.msra.mxu3 %v16723_v38  ;;  %5860 = vmatpush.xpose.msra.mxu1 %v16724_v17  ;;  %v16743_v38 = vld [vmem:[#allocation168_spill] sm:$0xff]  ;;  %v16744_v17 = vld [vmem:[#allocation169_spill] sm:$0xff] }
 0xcad   :  { %5724 = vmatpush.msra.mxu2 %v16725_v25  ;;  %v16745_v25 = vld [vmem:[#allocation170_spill] sm:$0xff] }
 0xcae   :  { %5744 = vmatpush.msra.mxu3 %v16726_v9  ;;  %5841 = vmatpush.xpose.msra.mxu0 %v16727_v59  ;;  %v16746_v9 = vld [vmem:[#allocation171_spill] sm:$0xff]  ;;  %v16747_v59 = vld [vmem:[#allocation172_spill] sm:$0xff] }
 0xcaf   :  { %5725 = vmatpush.msra.mxu2 %v16729_v46  ;;  %v16749_v46 = vld [vmem:[#allocation174_spill] sm:$0xff] }
 0xcb0   :  { %5745 = vmatpush.msra.mxu3 %v16730_v61  ;;  %5861 = vmatpush.xpose.msra.mxu1 %v16731_v45  ;;  %v16750_v61 = vld [vmem:[#allocation175_spill] sm:$0xff]  ;;  %v16751_v45 = vld [vmem:[#allocation176_spill] sm:$0xff] }
 0xcb1   :  { %5726 = vmatpush.msra.mxu2 %v16733_v42  ;;  %v16753_v42 = vld [vmem:[#allocation178_spill] sm:$0xff] }
 0xcb2   :  { %5880 = vmatpush.xpose.msrb.mxu0 %v16728_v49  ;;  %5746 = vmatpush.msra.mxu3 %v16734_v24  ;;  %v16748_v49 = vld [vmem:[#allocation173_spill] sm:$0xff]  ;;  %v16754_v24 = vld [vmem:[#allocation179_spill] sm:$0xff] }
 0xcb3   :  { %5727 = vmatpush.msra.mxu2 %v16736_v4  ;;  %v16756_v4 = vld [vmem:[#allocation181_spill] sm:$0xff] }
 0xcb4   :  { %5900 = vmatpush.xpose.msrb.mxu1 %v16732_v35  ;;  %5747 = vmatpush.msra.mxu3 %v16737_v34  ;;  %v16752_v35 = vld [vmem:[#allocation177_spill] sm:$0xff]  ;;  %v16757_v34 = vld [vmem:[#allocation182_spill] sm:$0xff] }
 0xcb5   :  { %5728 = vmatpush.msra.mxu2 %v16739_v29  ;;  %v16759_v29 = vld [vmem:[#allocation66_spill] sm:$0xff] }
 0xcb6   :  { %5881 = vmatpush.xpose.msrb.mxu0 %v16735_v18  ;;  %5748 = vmatpush.msra.mxu3 %v16740_v16  ;;  %v16755_v18 = vld [vmem:[#allocation180_spill] sm:$0xff]  ;;  %v16760_v16 = vld [vmem:[#allocation90_spill] sm:$0xff] }
 0xcb7   :  { %5729 = vmatpush.msra.mxu2 %v16741_v37  ;;  %v16761_v37 = vld [vmem:[#allocation63_spill] sm:$0xff] }
 0xcb8   :  { %5901 = vmatpush.xpose.msrb.mxu1 %v16738_v44  ;;  %5749 = vmatpush.msra.mxu3 %v16742_v26  ;;  %v16758_v44 = vld [vmem:[#allocation183_spill] sm:$0xff] }
 0xcb9   :  { %5730 = vmatpush.msra.mxu2 %v16743_v38  ;;  %v16762_v26 = vld [vmem:[#allocation91_spill] sm:$0xff]  ;;  %v16763_v38 = vld [vmem:[#allocation22_spill] sm:$0xff] }
 0xcba   :  { %5750 = vmatpush.msra.mxu3 %v16744_v17  ;;  %v16764_v17 = vld [vmem:[#allocation23_spill] sm:$0xff] }
 0xcbb   :  { %5731 = vmatpush.msra.mxu2 %v16745_v25  ;;  %v16765_v25 = vld [vmem:[#allocation19_spill] sm:$0xff] }
 0xcbc   :  { %5751 = vmatpush.msra.mxu3 %v16746_v9  ;;  %v16766_v9 = vld [vmem:[#allocation20_spill] sm:$0xff] }
 0xcbd   :  { %5732 = vmatpush.msra.mxu2 %v16747_v59 }
 0xcbe   :  { %5752 = vmatpush.msra.mxu3 %v16748_v49 }
 0xcbf   :  { %5733 = vmatpush.msra.mxu2 %v16749_v46 }
 0xcc0   :  { %5753 = vmatpush.msra.mxu3 %v16750_v61 }
 0xcc1   :  { %5734 = vmatpush.msra.mxu2 %v16751_v45 }
 0xcc2   :  { %5754 = vmatpush.msra.mxu3 %v16752_v35 }
 0xcc3   :  { %5735 = vmatpush.msra.mxu2 %v16753_v42 }
 0xcc4   :  { %5755 = vmatpush.msra.mxu3 %v16754_v24 }
 0xcc5   :  { %5736 = vmatpush.msra.mxu2 %v16755_v18 }
 0xcc6   :  { %5756 = vmatpush.msra.mxu3 %v16756_v4 }
 0xcc7   :  { %5737 = vmatpush.msra.mxu2 %v16757_v34 }
 0xcc8   :  { %5757 = vmatpush.msra.mxu3 %v16758_v44  ;;  %5738 = vmatmul.f32.vlgmr.msra.gmra.mxu2 %v13947_v20 }
 0xcc9   :  { %5758 = vmatmul.f32.vlgmr.msra.gmra.mxu3 %v13947_v20  ;;  %6131 = vmatpush.msrb.mxu2 %v16759_v29 }
 0xcca   :  { %6151 = vmatpush.msrb.mxu3 %v16760_v16 }
 0xccb   :  { %6132 = vmatpush.msrb.mxu2 %v16761_v37 }
 0xccc   :  { %6152 = vmatpush.msrb.mxu3 %v16762_v26 }
 0xccd   :  { %6214 = vmatpush.msra.mxu2 %v16763_v38 }
 0xcce   :  { %6234 = vmatpush.msra.mxu3 %v16764_v17 }
 0xccf   :  { %6215 = vmatpush.msra.mxu2 %v16765_v25 }
 0xcd0   :  { %6235 = vmatpush.msra.mxu3 %v16766_v9 }
 0xce2   :  { %v14211_v61 = vpop.f32.mrf.mxu0 }
 0xce4   :  { %v5147_v59 = vpop.f32.mrf.mxu1 }
 0xce5   :  { %v5594_v22 = vrot.slane %v5147_v59, 7 }
 0xce7   :  { %v5084_v49 = vpop.f32.mrf.mxu2  ;;  %v5104_v46 = vpop.f32.mrf.mxu3 }
 0xce8   :  { %v5595_v6 = vsel %vm16026_vm0, %v5594_v22, %v5084_v49 }
 0xcea   :  { %v5210_v24 = vpop.f32.mrf.mxu0 }
 0xceb   :  { %v5596_v9 = vrot.slane %v5210_v24, 6 }
 0xcec   :  { %v5230_v45 = vpop.f32.mrf.mxu1 }
 0xced   :  { %v5597_v54 = vsel %vm16025_vm1, %v5596_v9, %v5595_v6 }
 0xcef   :  { %v5167_v35 = vpop.f32.mrf.mxu2  ;;  %v14213_v42 = vpop.f32.mrf.mxu3 }
 0xcf2   :  { %v5293_v44 = vpop.f32.mrf.mxu0 }
 0xcf4   :  { %v14215_v18 = vpop.f32.mrf.mxu1 }
 0xcf7   :  { %v14217_v4 = vpop.f32.mrf.mxu2  ;;  %v5273_v34 = vpop.f32.mrf.mxu3 }
 0xcf8   :  { %v5598_v8 = vrot.slane %v5273_v34, 5 }
 0xcfa   :  { %v14219_v26 = vpop.f32.mrf.mxu0  ;;  %v5599_v57 = vsel %vm16024_vm2, %v5598_v8, %v5597_v54 }
 0xcfc   :  { %v5399_v29 = vpop.f32.mrf.mxu1 }
 0xcfd   :  { %v5602_v36 = vrot.slane %v5399_v29, 3 }
 0xcff   :  { %v5336_v16 = vpop.f32.mrf.mxu2  ;;  %v5356_v37 = vpop.f32.mrf.mxu3 }
 0xd00   :  { %v5600_v32 = vrot.slane %v5336_v16, 4 }
 0xd02   :  { %v5462_v23 = vpop.f32.mrf.mxu0  ;;  %v5601_v31 = vsel %vm16023_vm3, %v5600_v32, %v5599_v57  ;;  %v5608_v57 = vrot.slane %v5167_v35, 7 }
 0xd03   :  { %v5604_v11 = vrot.slane %v5462_v23, 2  ;;  %v5603_v59 = vsel %vm16022_vm4, %v5602_v36, %v5601_v31  ;;  %v5610_v23 = vrot.slane %v5230_v45, 6  ;;  %v5612_v36 = vrot.slane %v5293_v44, 5 }
 0xd04   :  { %v5482_v38 = vpop.f32.mrf.mxu1  ;;  %v5614_v31 = vrot.slane %v5356_v37, 4 }
 0xd05   :  { %v5605_v34 = vsel %vm16021_vm5, %v5604_v11, %v5603_v59 }
 0xd07   :  { %v5419_v17 = vpop.f32.mrf.mxu2  ;;  %v14221_v25 = vpop.f32.mrf.mxu3 }
 0xd0e   :  { %v14226_v53 = vpop.f32.mrf.mxu1 }
 0xd10   :  { %v14228_v51 = vpop.f32.mrf.mxu2 }
 0xd11   :  { %v5525_v48 = vpop.f32.mrf.mxu3 }
 0xd12   :  { %v5606_v24 = vrot.slane %v5525_v48, 1  ;;  %v5609_v48 = vsel %vm16026_vm0, %v5608_v57, %v5104_v46  ;;  %v5624_v57 = vrot.slane %v14217_v4, 6  ;;  %v5632_v4 = vrot.slane %v14228_v51, 2 }
 0xd13   :  { %v5611_v11 = vsel %vm16025_vm1, %v5610_v23, %v5609_v48 }
 0xd14   :  { %v5607_v6 = vsel %vm16020_vm6, %v5606_v24, %v5605_v34  ;;  %v5616_v24 = vrot.slane %v5419_v17, 3  ;;  %v5613_v59 = vsel %vm16024_vm2, %v5612_v36, %v5611_v11  ;;  %v5622_v17 = vrot.slane %v14213_v42, 7 }
 0xd15   :  { %v5615_v34 = vsel %vm16023_vm3, %v5614_v31, %v5613_v59  ;;  %v5626_v31 = vrot.slane %v14215_v18, 5  ;;  %v5628_v42 = vrot.slane %v14219_v26, 4  ;;  %v5630_v59 = vrot.slane %v14221_v25, 3 }
 0xd16   :  { %v5623_v48 = vsel %vm16026_vm0, %v5622_v17, %v14211_v61  ;;  %v5634_v25 = vrot.slane %v14226_v53, 1 }
 0xd17   :  { %v5625_v36 = vsel %vm16025_vm1, %v5624_v57, %v5623_v48 }
 0xd28   :  { %v5719_v22 = vpop.f32.mrf.mxu1 }
 0xd29   :  { %v5720_v54 = vadd.f32 %v5719_v22, %v16327_v15  ;;  %v5545_v22 = vpop.f32.mrf.mxu0 }
 0xd2a   :  { %v5656_v49 = vpop.f32.mrf.mxu2  ;;  %v5620_v35 = vrot.slane %v5545_v22, 1 }
 0xd2b   :  { %v5657_v16 = vadd.f32 %v5656_v49, %v5607_v6  ;;  %v5617_v6 = vsel %vm16022_vm4, %v5616_v24, %v5615_v34  ;;  %v5676_v46 = vpop.f32.mrf.mxu3  ;;  %v5627_v24 = vsel %vm16024_vm2, %v5626_v31, %v5625_v36 }
 0xd2c   :  { %v5629_v61 = vsel %vm16023_vm3, %v5628_v42, %v5627_v24 }
 0xd2d   :  { %v5699_v8 = vadd.f32 %v5657_v16, %v16328_v3 }
 0xd2f   :  { %v5762_v9 = vadd.f32 %v5720_v54, %v5699_v8 }
 0xd31   :  { %v10179_v43 = vmul.f32 -1.442695, %v5762_v9 }
 0xd33   :  { %10527 = vpow2.f32 %v10179_v43  ;;  %v5618_v43 = vrot.slane %v5482_v38, 2 }
 0xd35   :  { %v5619_v49 = vsel %vm16021_vm5, %v5618_v43, %v5617_v6 }
 0xd36   :  { %v5621_v44 = vsel %vm16020_vm6, %v5620_v35, %v5619_v49  ;;  %v5631_v35 = vsel %vm16022_vm4, %v5630_v59, %v5629_v61 }
 0xd37   :  { %v5677_v16 = vadd.f32 %v5676_v46, %v5621_v44  ;;  %v5633_v26 = vsel %vm16021_vm5, %v5632_v4, %v5631_v35  ;;  %v5696_v44 = vpop.f32.mrf.mxu0  ;;  %v16771_v35 = vld [vmem:[#allocation80_spill] sm:$0xff] }
 0xd39   :  { %v10528_v32 = vpop.eup %10527  ;;  %v5700_v8 = vadd.f32 %v5677_v16, %v16329_v41 }
 0xd3a   :  { %v5766_v29 = vadd.f32 1.0, %v10528_v32 }
 0xd3c   :  { %10529 = vrcp.f32 %v5766_v29  ;;  %v5778_v22 = vand.u32 2147483648, %v5766_v29  ;;  %vm5772_vm9 = vweird.f32 %v5766_v29  ;;  %v5776_v6 = vand.u32 2147483647, %v5766_v29 }
 0xd3e   :  { %v5779_v51 = vor.u32 1.1754944e-38, %v5778_v22  ;;  %vm5777_vm11 = vcmp.eq.f32.partialorder %v5776_v6, 8.507059e+37 }
 0xd42   :  { %v10530_v45 = vpop.eup %10529 }
 0xd43   :  { %v5768_v37 = vmul.f32 %v10530_v45, %v5766_v29  ;;  %vm5773_vm8 = vweird.f32 %v10530_v45 }
 0xd44   :  { %vm5774_vm10 = vmor %vm5772_vm9, %vm5773_vm8 }
 0xd45   :  { %v5769_v32 = vsub.f32 1.0, %v5768_v37  ;;  %v5635_v37 = vsel %vm16020_vm6, %v5634_v25, %v5633_v26  ;;  %v16774_v26 = vld [vmem:[#allocation67_spill] sm:$0xff]  ;;  %v16775_v25 = vld [vmem:[#allocation70_spill] sm:$0xff] }
 0xd47   :  { %v5770_v11 = vmul.f32 %v10530_v45, %v5769_v32 }
 0xd49   :  { %v5771_v34 = vadd.f32 %v10530_v45, %v5770_v11 }
 0xd4b   :  { %v5739_v54 = vpop.f32.mrf.mxu2  ;;  %v5775_v46 = vsel %vm5774_vm10, %v10530_v45, %v5771_v34 }
 0xd4c   :  { %v5740_v9 = vadd.f32 %v5739_v54, %v16330_v40  ;;  %v5759_v18 = vpop.f32.mrf.mxu3  ;;  %v5780_v29 = vsel %vm5777_vm11, %v5779_v51, %v5775_v46  ;;  %v5697_v54 = vadd.f32 %v5696_v44, %v5635_v37  ;;  %v16776_v44 = vld [vmem:[#allocation69_spill] sm:$0xff]  ;;  %v16777_v51 = vld [vmem:[#allocation86_spill] sm:$0xff] }
 0xd4d   :  { %v5760_v16 = vadd.f32 %v5759_v18, %v16331_v63  ;;  %v16773_v18 = vld [vmem:[#allocation68_spill] sm:$0xff] }
 0xd4e   :  { %v5782_v38 = vadd.f32 %v5740_v9, %v5700_v8  ;;  %v5701_v9 = vadd.f32 %v5697_v54, %v16475_v30 }
 0xd4f   :  { %v5802_v17 = vmul.f32 %v5780_v29, %v5760_v16  ;;  %v16778_v16 = vld [vmem:[#allocation88_spill] sm:$0xff] }
 0xd50   :  { %v10180_v23 = vmul.f32 -1.442695, %v5782_v38 }
 0xd51   :  { %v5803_v32 = vadd.f32 %v5802_v17, %v5701_v9 }
 0xd52   :  { %10531 = vpow2.f32 %v10180_v23 }
 0xd58   :  { %v10532_v43 = vpop.eup %10531 }
 0xd59   :  { %v5786_v49 = vadd.f32 1.0, %v10532_v43  ;;  %v16769_v43 = vld [vmem:[#allocation15_spill] sm:$0xff] }
 0xd5b   :  { %10533 = vrcp.f32 %v5786_v49  ;;  %v5798_v45 = vand.u32 2147483648, %v5786_v49  ;;  %v5796_v53 = vand.u32 2147483647, %v5786_v49  ;;  %vm5792_vm13 = vweird.f32 %v5786_v49 }
 0xd5c   :  { %10535 = vtanh.f32 %v5803_v32 }
 0xd5d   :  { %v5799_v36 = vor.u32 1.1754944e-38, %v5798_v45  ;;  %vm5797_vm15 = vcmp.eq.f32.partialorder %v5796_v53, 8.507059e+37  ;;  %v16781_v45 = vld [vmem:[#allocation101_spill] sm:$0xff] }
 0xd61   :  { %v10534_v8 = vpop.eup %10533 }
 0xd62   :  { %v5788_v57 = vmul.f32 %v10534_v8, %v5786_v49  ;;  %vm5793_vm12 = vweird.f32 %v10534_v8  ;;  %v10536_v24 = vpop.eup %10535 }
 0xd63   :  { %vm5794_vm14 = vmor %vm5792_vm13, %vm5793_vm12 }
 0xd64   :  { %v5789_v38 = vsub.f32 1.0, %v5788_v57  ;;  %v16780_v57 = vld [vmem:[#allocation99_spill] sm:$0xff] }
 0xd66   :  { %v5790_v48 = vmul.f32 %v10534_v8, %v5789_v38 }
 0xd68   :  { %v5791_v23 = vadd.f32 %v10534_v8, %v5790_v48 }
 0xd6a   :  { %v5795_v11 = vsel %vm5794_vm14, %v10534_v8, %v5791_v23  ;;  %v16779_v8 = vld [vmem:[#allocation97_spill] sm:$0xff] }
 0xd6b   :  { %v5800_v31 = vsel %vm5797_vm15, %v5799_v36, %v5795_v11  ;;  %v16782_v36 = vld [vmem:[#allocation102_spill] sm:$0xff] }
 0xd6c   :  { %v5805_v42 = vsub.f32 1.0, %v5800_v31  ;;  %v5807_v4 = vmul.f32 %v5800_v31, %v13947_v20  ;;  %v16783_v31 = vld [vmem:[#allocation96_spill] sm:$0xff] }
 0xd6e   :  { %v5806_v59 = vmul.f32 %v10536_v24, %v5805_v42 }
 0xd70   :  { %v14263_v34 = vadd.f32 %v5807_v4, %v5806_v59 }
 0xd72   :  { %16767 = vst [vmem:[#allocation185_spill] sm:$0xff] %v14263_v34  ;;  %5842 = vmatmul.f32.vlgmr.msra.gmra.mxu0 %v14263_v34  ;;  %v16014_v22 = vrot.slane %v14263_v34, 1  ;;  %v16013_v61 = vrot.slane %v14263_v34, 2  ;;  %v16012_v6 = vrot.slane %v14263_v34, 3  ;;  %v16009_v49 = vrot.slane %v14263_v34, 6 }
 0xd73   :  { %5920 = vmatpush.xpose.msra.mxu0 %v16477_v33  ;;  %v16768_v33 = vld [vmem:[#allocation16_spill] sm:$0xff]  ;;  %v16008_v46 = vrot.slane %v14263_v34, 7 }
 0xd74   :  { %5862 = vmatmul.f32.vlgmr.msra.gmra.mxu1 %v16014_v22 }
 0xd75   :  { %5940 = vmatpush.xpose.msra.mxu1 %v16478_v28  ;;  %v16011_v28 = vrot.slane %v14263_v34, 4 }
 0xd77   :  { %5921 = vmatpush.xpose.msra.mxu0 %v16622_v52  ;;  %v16770_v52 = vld [vmem:[#allocation17_spill] sm:$0xff] }
 0xd79   :  { %5941 = vmatpush.xpose.msra.mxu1 %v16623_v12  ;;  %v16010_v12 = vrot.slane %v14263_v34, 5 }
 0xd7a   :  { %5882 = vmatmul.f32.vlgmr.msrb.gmra.mxu0 %v16013_v61 }
 0xd7b   :  { %5960 = vmatpush.xpose.msrb.mxu0 %v16624_v0  ;;  %v16772_v0 = vld [vmem:[#allocation79_spill] sm:$0xff] }
 0xd7c   :  { %5902 = vmatmul.f32.vlgmr.msrb.gmra.mxu1 %v16012_v6 }
 0xd7d   :  { %5980 = vmatpush.xpose.msrb.mxu1 %v16768_v33  ;;  %v16784_v33 = vld [vmem:[#allocation105_spill] sm:$0xff] }
 0xd7f   :  { %5961 = vmatpush.xpose.msrb.mxu0 %v16769_v43 }
 0xd81   :  { %5981 = vmatpush.xpose.msrb.mxu1 %v16770_v52 }
 0xd82   :  { %5922 = vmatmul.f32.vlgmr.msra.gmra.mxu0 %v16011_v28 }
 0xd83   :  { %6171 = vmatpush.msra.mxu0 %v16771_v35 }
 0xd84   :  { %5942 = vmatmul.f32.vlgmr.msra.gmra.mxu1 %v16010_v12 }
 0xd85   :  { %6172 = vmatpush.msra.mxu0 %v16772_v0  ;;  %6194 = vmatpush.msra.mxu1 %v16773_v18 }
 0xd87   :  { %6195 = vmatpush.msra.mxu1 %v16774_v26 }
 0xd8a   :  { %5962 = vmatmul.f32.vlgmr.msrb.gmra.mxu0 %v16009_v49 }
 0xd8b   :  { %6257 = vmatpush.msrb.mxu0 %v16775_v25  ;;  %v16785_v25 = vld [vmem:[#allocation103_spill] sm:$0xff] }
 0xd8c   :  { %5982 = vmatmul.f32.vlgmr.msrb.gmra.mxu1 %v16008_v46 }
 0xd8d   :  { %6258 = vmatpush.msrb.mxu0 %v16776_v44  ;;  %6277 = vmatpush.msrb.mxu1 %v16777_v51 }
 0xd8f   :  { %6278 = vmatpush.msrb.mxu1 %v16778_v16 }
 0xdef   :  { %v5843_v37 = vpop.f32.mrf.mxu0 }
 0xdf0   :  { %v5986_v42 = vadd.f32 %v5843_v37, %v16783_v31  ;;  %v16786_v37 = vld [vmem:[#allocation104_spill] sm:$0xff] }
 0xdf1   :  { %v5863_v29 = vpop.f32.mrf.mxu1 }
 0xdf2   :  { %v5987_v9 = vadd.f32 %v5863_v29, %v16779_v8 }
 0xdf4   :  { %v6002_v38 = vrot.slane %v5987_v9, 7 }
 0xdf6   :  { %v6003_v59 = vsel %vm16026_vm0, %v6002_v38, %v5986_v42 }
 0xdf7   :  { %v5883_v54 = vpop.f32.mrf.mxu0 }
 0xdf8   :  { %v5988_v32 = vadd.f32 %v5883_v54, %v16780_v57 }
 0xdf9   :  { %v5903_v17 = vpop.f32.mrf.mxu1 }
 0xdfa   :  { %v5989_v48 = vadd.f32 %v5903_v17, %v16781_v45  ;;  %v6004_v23 = vrot.slane %v5988_v32, 6 }
 0xdfc   :  { %v6006_v4 = vrot.slane %v5989_v48, 5  ;;  %v6005_v52 = vsel %vm16025_vm1, %v6004_v23, %v6003_v59 }
 0xdfe   :  { %v6007_v0 = vsel %vm16024_vm2, %v6006_v4, %v6005_v52 }
 0xdff   :  { %v5923_v53 = vpop.f32.mrf.mxu0 }
 0xe00   :  { %v5990_v11 = vadd.f32 %v5923_v53, %v16782_v36 }
 0xe01   :  { %v5943_v24 = vpop.f32.mrf.mxu1 }
 0xe02   :  { %v5991_v43 = vadd.f32 %v5943_v24, %v16784_v33  ;;  %v6008_v35 = vrot.slane %v5990_v11, 4 }
 0xe04   :  { %v6010_v18 = vrot.slane %v5991_v43, 3  ;;  %v6009_v51 = vsel %vm16023_vm3, %v6008_v35, %v6007_v0 }
 0xe06   :  { %v6011_v17 = vsel %vm16022_vm4, %v6010_v18, %v6009_v51 }
 0xe07   :  { %v5963_v26 = vpop.f32.mrf.mxu0 }
 0xe08   :  { %v5992_v44 = vadd.f32 %v5963_v26, %v16785_v25 }
 0xe09   :  { %v5983_v16 = vpop.f32.mrf.mxu1 }
 0xe0a   :  { %v6012_v29 = vrot.slane %v5992_v44, 2  ;;  %v5993_v54 = vadd.f32 %v5983_v16, %v16786_v37 }
 0xe0c   :  { %v6014_v38 = vrot.slane %v5993_v54, 1  ;;  %v6013_v53 = vsel %vm16021_vm5, %v6012_v29, %v6011_v17 }
 0xe0e   :  { %v6015_v23 = vsel %vm16020_vm6, %v6014_v38, %v6013_v53 }
 0xe0f   :  { %v6017_v24 = vsel %vm16027_vm7, %v6015_v23, -inf }
 0xe10   :  { %6018 = vmax.xlane.f32.xlu2 %v6017_v24 }
 0xe83   :  { %v6019_v59 = vpop.xlane.xlu2 %6018 }
 0xe84   :  { %v6021_v4 = vrot.slane %v6019_v59, 1  ;;  %v6022_v52 = vrot.slane %v6019_v59, 2  ;;  %v6023_v26 = vrot.slane %v6019_v59, 3  ;;  %v6024_v46 = vrot.slane %v6019_v59, 4 }
 0xe85   :  { %v6025_v35 = vrot.slane %v6019_v59, 5  ;;  %v6036_v0 = vsub.f32 %v5986_v42, %v6019_v59  ;;  %v6026_v49 = vrot.slane %v6019_v59, 6  ;;  %v6027_v12 = vrot.slane %v6019_v59, 7 }
 0xe86   :  { %v6037_v16 = vsub.f32 %v5987_v9, %v6021_v4  ;;  %v6038_v28 = vsub.f32 %v5988_v32, %v6022_v52  ;;  %v6039_v18 = vsub.f32 %v5989_v48, %v6023_v26  ;;  %v6040_v51 = vsub.f32 %v5990_v11, %v6024_v46 }
 0xe87   :  { %v6044_v6 = vmul.f32 1.442695, %v6036_v0  ;;  %v6041_v29 = vsub.f32 %v5991_v43, %v6025_v35  ;;  %v6042_v17 = vsub.f32 %v5992_v44, %v6026_v49  ;;  %v6043_v24 = vsub.f32 %v5993_v54, %v6027_v12 }
 0xe88   :  { %v6046_v38 = vmul.f32 1.442695, %v6037_v16  ;;  %v6048_v53 = vmul.f32 1.442695, %v6038_v28  ;;  %v6050_v23 = vmul.f32 1.442695, %v6039_v18 }
 0xe89   :  { %10537 = vpow2.f32 %v6044_v6  ;;  %v6052_v61 = vmul.f32 1.442695, %v6040_v51  ;;  %v6054_v22 = vmul.f32 1.442695, %v6041_v29  ;;  %v6056_v30 = vmul.f32 1.442695, %v6042_v17 }
 0xe8a   :  { %10539 = vpow2.f32 %v6046_v38  ;;  %v6058_v42 = vmul.f32 1.442695, %v6043_v24 }
 0xe8b   :  { %10541 = vpow2.f32 %v6048_v53 }
 0xe8c   :  { %10543 = vpow2.f32 %v6050_v23 }
 0xe8d   :  { %10545 = vpow2.f32 %v6052_v61 }
 0xe8e   :  { %10547 = vpow2.f32 %v6054_v22 }
 0xe8f   :  { %v10538_v9 = vpop.eup %10537  ;;  %10549 = vpow2.f32 %v6056_v30 }
 0xe90   :  { %v10540_v46 = vpop.eup %10539  ;;  %10551 = vpow2.f32 %v6058_v42 }
 0xe91   :  { %v10542_v32 = vpop.eup %10541  ;;  %v6068_v49 = vrot.slane %v10540_v46, 7 }
 0xe92   :  { %v10544_v48 = vpop.eup %10543  ;;  %v6070_v28 = vrot.slane %v10542_v32, 6 }
 0xe93   :  { %v14319_v11 = vpop.eup %10545  ;;  %v6069_v6 = vsel %vm16026_vm0, %v6068_v49, %v10538_v9  ;;  %v6072_v12 = vrot.slane %v10544_v48, 5  ;;  %v16799_v49 = vld [vmem:[#allocation50_spill] sm:$0xff] }
 0xe94   :  { %v14322_v43 = vpop.eup %10547  ;;  %v6071_v44 = vsel %vm16025_vm1, %v6070_v28, %v6069_v6  ;;  %v6074_v61 = vrot.slane %v14319_v11, 4  ;;  %v10943_v6 = vld [vmem:[#allocation8 + $0x170] sm:$0xff] }
 0xe95   :  { %v14326_v22 = vpop.eup %10549  ;;  %v6073_v30 = vsel %vm16024_vm2, %v6072_v12, %v6071_v44  ;;  %v6076_v54 = vrot.slane %v14322_v43, 3  ;;  %v10944_v12 = vld [vmem:[#allocation8 + $0x178] sm:$0xff] }
 0xe96   :  { %v14330_v59 = vpop.eup %10551  ;;  %v6075_v4 = vsel %vm16023_vm3, %v6074_v61, %v6073_v30  ;;  %v6078_v52 = vrot.slane %v14326_v22, 2  ;;  %v10946_v44 = vld [vmem:[#allocation8 + $0x158] sm:$0xff]  ;;  %v10947_v61 = vld [vmem:[#allocation8 + $0x160] sm:$0xff]  ;;  %v10948_v30 = vld [vmem:[#allocation10 + $0x168] sm:$0xff] }
 0xe97   :  { %v6077_v26 = vsel %vm16022_vm4, %v6076_v54, %v6075_v4  ;;  %v6080_v35 = vrot.slane %v14330_v59, 1  ;;  %v10949_v54 = vld [vmem:[#allocation8 + $0x138] sm:$0xff]  ;;  %v10950_v4 = vld [vmem:[#allocation8 + $0x140] sm:$0xff] }
 0xe98   :  { %v6079_v0 = vsel %vm16021_vm5, %v6078_v52, %v6077_v26  ;;  %v10951_v52 = vld [vmem:[#allocation8 + $0x148] sm:$0xff]  ;;  %v10952_v26 = vld [vmem:[#allocation10 + $0x150] sm:$0xff] }
 0xe99   :  { %v6081_v16 = vsel %vm16020_vm6, %v6080_v35, %v6079_v0  ;;  %v10953_v35 = vld [vmem:[#allocation8 + $0x120] sm:$0xff]  ;;  %v10954_v0 = vld [vmem:[#allocation8 + $0x128] sm:$0xff] }
 0xe9a   :  { %v6083_v18 = vsel %vm16027_vm7, %v6081_v16, 0.0  ;;  %v10955_v16 = vld [vmem:[#allocation8 + $0x130] sm:$0xff] }
 0xe9b   :  { %6084 = vadd.xlane.f32.xlu0 %v6083_v18 }
 0xf0e   :  { %v6085_v51 = vpop.xlane.xlu0 %6084 }
 0xf0f   :  { %10553 = vrcp.f32 %v6085_v51 }
 0xf15   :  { %v10554_v29 = vpop.eup %10553 }
 0xf16   :  { %v6087_v17 = vmul.f32 %v10554_v29, %v6085_v51  ;;  %v10956_v51 = vld [vmem:[#allocation10 + $0x138] sm:$0xff] }
 0xf18   :  { %v6088_v38 = vsub.f32 2.0, %v6087_v17  ;;  %v10958_v17 = vld [vmem:[#allocation8 + $0x110] sm:$0xff] }
 0xf1a   :  { %v14339_v53 = vmul.f32 %v10554_v29, %v6088_v38  ;;  %v10957_v29 = vld [vmem:[#allocation8 + $0x108] sm:$0xff]  ;;  %v10959_v38 = vld [vmem:[#allocation8 + $0x118] sm:$0xff] }
 0xf1c   :  { %v6106_v23 = vmul.f32 %v10538_v9, %v14339_v53  ;;  %v6091_v24 = vrot.slane %v14339_v53, 1  ;;  %v6092_v9 = vrot.slane %v14339_v53, 2 }
 0xf1e   :  { %10181 = vmatmul.msk.f32.vlgmr.msrb.gmra.mxu2 %vm16027_vm7, %v6106_v23  ;;  %10182 = vmatmul.msk.f32.vlgmr.msrb.gmra.mxu3 %vm16027_vm7, %v6106_v23  ;;  %v6107_v42 = vmul.f32 %v10540_v46, %v6091_v24  ;;  %v6108_v46 = vmul.f32 %v10542_v32, %v6092_v9  ;;  %v16798_v32 = vld [vmem:[#allocation41_spill] sm:$0xff]  ;;  %v10963_v24 = vld [vmem:[#allocation8 + $0x100] sm:$0xff] }
 0xf1f   :  { %10183 = vmatmul.msk.f32.vlgmr.msra.gmra.mxu0 %vm16027_vm7, %v6106_v23  ;;  %6297 = vmatpush.msrb.mxu2 %v12576_v27  ;;  %v16787_v27 = vld [vmem:[#allocation30_spill] sm:$0xff]  ;;  %v10961_v23 = vld [vmem:[#allocation8 + $0xf0] sm:$0xff]  ;;  %v10965_v9 = vld [vmem:[#allocation8 + $0xd8] sm:$0xff] }
 0xf20   :  { %6320 = vmatpush.msrb.mxu3 %v12296_v5  ;;  %6340 = vmatpush.msra.mxu0 %v12580_v39  ;;  %v6094_v39 = vrot.slane %v14339_v53, 4 }
 0xf21   :  { %10184 = vmatmul.msk.f32.vlgmr.msra.gmra.mxu1 %vm16027_vm7, %v6107_v42  ;;  %6298 = vmatpush.msrb.mxu2 %v12586_v60  ;;  %v16788_v60 = vld [vmem:[#allocation31_spill] sm:$0xff] }
 0xf22   :  { %6321 = vmatpush.msrb.mxu3 %v12292_v2  ;;  %6341 = vmatpush.msra.mxu0 %v12592_v7  ;;  %v6093_v2 = vrot.slane %v14339_v53, 3  ;;  %v16789_v7 = vld [vmem:[#allocation28_spill] sm:$0xff] }
 0xf23   :  { %6360 = vmatpush.msra.mxu1 %v12598_v1  ;;  %v16790_v1 = vld [vmem:[#allocation27_spill] sm:$0xff] }
 0xf24   :  { %v6109_v5 = vmul.f32 %v10544_v48, %v6093_v2  ;;  %v16800_v48 = vld [vmem:[#allocation51_spill] sm:$0xff] }
 0xf25   :  { %6361 = vmatpush.msra.mxu1 %v12607_v13  ;;  %v16791_v13 = vld [vmem:[#allocation38_spill] sm:$0xff]  ;;  %v10967_v2 = vld [vmem:[#allocation8 + $0xe8] sm:$0xff] }
 0xf26   :  { %10185 = vmatmul.msk.f32.vlgmr.msra.gmra.mxu2 %vm16027_vm7, %v6107_v42  ;;  %10186 = vmatmul.msk.f32.vlgmr.msra.gmra.mxu3 %vm16027_vm7, %v6107_v42  ;;  %v10964_v42 = vld [vmem:[#allocation10 + $0x108] sm:$0xff] }
 0xf27   :  { %10187 = vmatmul.msk.f32.vlgmr.msrb.gmra.mxu0 %vm16027_vm7, %v6108_v46  ;;  %6383 = vmatpush.msra.mxu2 %v12612_v21  ;;  %v6095_v21 = vrot.slane %v14339_v53, 5 }
 0xf28   :  { %6403 = vmatpush.msra.mxu3 %v12617_v56  ;;  %6423 = vmatpush.msrb.mxu0 %v12621_v58  ;;  %v6110_v56 = vmul.f32 %v14319_v11, %v6094_v39  ;;  %v16792_v58 = vld [vmem:[#allocation39_spill] sm:$0xff] }
 0xf29   :  { %10188 = vmatmul.msk.f32.vlgmr.msrb.gmra.mxu1 %vm16027_vm7, %v6108_v46  ;;  %6384 = vmatpush.msra.mxu2 %v12627_v14  ;;  %v16793_v14 = vld [vmem:[#allocation35_spill] sm:$0xff] }
 0xf2a   :  { %6404 = vmatpush.msra.mxu3 %v12633_v10  ;;  %6424 = vmatpush.msrb.mxu0 %v12637_v19  ;;  %v6111_v10 = vmul.f32 %v14322_v43, %v6095_v21  ;;  %v16794_v19 = vld [vmem:[#allocation44_spill] sm:$0xff]  ;;  %v10942_v11 = vld [vmem:[#allocation8 + $0x168] sm:$0xff]  ;;  %v10975_v21 = vld [vmem:[#allocation8 + $0xb8] sm:$0xff] }
 0xf2b   :  { %6446 = vmatpush.msrb.mxu1 %v12644_v62  ;;  %v16795_v62 = vld [vmem:[#allocation36_spill] sm:$0xff]  ;;  %v10970_v39 = vld [vmem:[#allocation8 + $0xc8] sm:$0xff] }
 0xf2c   :  { %v10945_v43 = vld [vmem:[#allocation8 + $0x150] sm:$0xff] }
 0xf2d   :  { %6447 = vmatpush.msrb.mxu1 %v12652_v47  ;;  %v16796_v47 = vld [vmem:[#allocation45_spill] sm:$0xff] }
 0xf2e   :  { %10189 = vmatmul.msk.f32.vlgmr.msrb.gmra.mxu2 %vm16027_vm7, %v6108_v46  ;;  %10190 = vmatmul.msk.f32.vlgmr.msrb.gmra.mxu3 %vm16027_vm7, %v6109_v5  ;;  %v10966_v46 = vld [vmem:[#allocation8 + $0xe0] sm:$0xff] }
 0xf2f   :  { %10191 = vmatmul.msk.f32.vlgmr.msra.gmra.mxu0 %vm16027_vm7, %v6109_v5  ;;  %6466 = vmatpush.msrb.mxu2 %v12658_v55  ;;  %v6096_v55 = vrot.slane %v14339_v53, 6 }
 0xf30   :  { %6486 = vmatpush.msrb.mxu3 %v12667_v50  ;;  %6509 = vmatpush.msra.mxu0 %v16787_v27  ;;  %v16797_v50 = vld [vmem:[#allocation42_spill] sm:$0xff] }
 0xf31   :  { %10192 = vmatmul.msk.f32.vlgmr.msra.gmra.mxu1 %vm16027_vm7, %v6109_v5  ;;  %6467 = vmatpush.msrb.mxu2 %v16788_v60  ;;  %v6112_v28 = vmul.f32 %v14326_v22, %v6096_v55  ;;  %v6097_v22 = vrot.slane %v14339_v53, 7  ;;  %v10960_v53 = vld [vmem:[#allocation10 + $0x120] sm:$0xff]  ;;  %v10968_v5 = vld [vmem:[#allocation10 + $0xf0] sm:$0xff]  ;;  %v10983_v55 = vld [vmem:[#allocation8 + $0x88] sm:$0xff] }
 0xf32   :  { %6487 = vmatpush.msrb.mxu3 %v16789_v7  ;;  %6510 = vmatpush.msra.mxu0 %v16790_v1  ;;  %v10969_v27 = vld [vmem:[#allocation8 + $0xc0] sm:$0xff]  ;;  %v10971_v60 = vld [vmem:[#allocation8 + $0xd0] sm:$0xff]  ;;  %v10972_v7 = vld [vmem:[#allocation10 + $0xd8] sm:$0xff] }
 0xf33   :  { %6529 = vmatpush.msra.mxu1 %v16791_v13  ;;  %v6113_v18 = vmul.f32 %v14330_v59, %v6097_v22  ;;  %v10962_v59 = vld [vmem:[#allocation8 + $0xf8] sm:$0xff]  ;;  %v10973_v1 = vld [vmem:[#allocation8 + $0xa8] sm:$0xff]  ;;  %v10974_v13 = vld [vmem:[#allocation8 + $0xb0] sm:$0xff] }
 0xf34   :  { %v10995_v22 = vld [vmem:[#allocation8 + $0x40] sm:$0xff] }
 0xf35   :  { %6530 = vmatpush.msra.mxu1 %v16792_v58  ;;  %v10977_v58 = vld [vmem:[#allocation8 + $0x90] sm:$0xff] }
 0xf36   :  { %10193 = vmatmul.msk.f32.vlgmr.msra.gmra.mxu2 %vm16027_vm7, %v6110_v56  ;;  %10194 = vmatmul.msk.f32.vlgmr.msra.gmra.mxu3 %vm16027_vm7, %v6110_v56 }
 0xf37   :  { %10195 = vmatmul.msk.f32.vlgmr.msrb.gmra.mxu0 %vm16027_vm7, %v6110_v56  ;;  %6549 = vmatpush.msra.mxu2 %v16793_v14  ;;  %v10976_v56 = vld [vmem:[#allocation10 + $0xc0] sm:$0xff]  ;;  %v10978_v14 = vld [vmem:[#allocation8 + $0x98] sm:$0xff] }
 0xf38   :  { %6572 = vmatpush.msra.mxu3 %v16794_v19  ;;  %6592 = vmatpush.msrb.mxu0 %v16795_v62  ;;  %v10980_v19 = vld [vmem:[#allocation10 + $0xa8] sm:$0xff]  ;;  %v10981_v62 = vld [vmem:[#allocation8 + $0x78] sm:$0xff] }
 0xf39   :  { %10196 = vmatmul.msk.f32.vlgmr.msrb.gmra.mxu1 %vm16027_vm7, %v6111_v10  ;;  %6550 = vmatpush.msra.mxu2 %v16796_v47  ;;  %v10982_v47 = vld [vmem:[#allocation8 + $0x80] sm:$0xff] }
 0xf3a   :  { %6573 = vmatpush.msra.mxu3 %v16797_v50  ;;  %6593 = vmatpush.msrb.mxu0 %v16798_v32  ;;  %v10984_v50 = vld [vmem:[#allocation10 + $0x90] sm:$0xff]  ;;  %v10985_v32 = vld [vmem:[#allocation8 + $0x60] sm:$0xff] }
 0xf3b   :  { %6612 = vmatpush.msrb.mxu1 %v16799_v49  ;;  %v10986_v49 = vld [vmem:[#allocation8 + $0x68] sm:$0xff] }
 0xf3d   :  { %6613 = vmatpush.msrb.mxu1 %v16800_v48  ;;  %v10987_v48 = vld [vmem:[#allocation8 + $0x70] sm:$0xff] }
 0xf3e   :  { %10197 = vmatmul.msk.f32.vlgmr.msrb.gmra.mxu2 %vm16027_vm7, %v6111_v10  ;;  %10198 = vmatmul.msk.f32.vlgmr.msrb.gmra.mxu3 %vm16027_vm7, %v6111_v10  ;;  %v10979_v10 = vld [vmem:[#allocation8 + $0xa0] sm:$0xff] }
 0xf3f   :  { %10199 = vmatmul.msk.f32.vlgmr.msra.gmra.mxu0 %vm16027_vm7, %v6112_v28  ;;  %6689 = vmatpush.msrb.mxu2 %v10942_v11  ;;  %v10989_v11 = vld [vmem:[#allocation8 + $0x48] sm:$0xff] }
 0xf40   :  { %6709 = vmatpush.msrb.mxu3 %v10943_v6  ;;  %6729 = vmatpush.msra.mxu0 %v10944_v12  ;;  %v10990_v6 = vld [vmem:[#allocation8 + $0x50] sm:$0xff]  ;;  %v10991_v12 = vld [vmem:[#allocation8 + $0x58] sm:$0xff] }
 0xf41   :  { %10200 = vmatmul.msk.f32.vlgmr.msra.gmra.mxu1 %vm16027_vm7, %v6112_v28  ;;  %6690 = vmatpush.msrb.mxu2 %v10945_v43  ;;  %v10992_v43 = vld [vmem:[#allocation10 + $0x60] sm:$0xff] }
 0xf42   :  { %6710 = vmatpush.msrb.mxu3 %v10946_v44  ;;  %6730 = vmatpush.msra.mxu0 %v10947_v61  ;;  %v10993_v44 = vld [vmem:[#allocation8 + $0x30] sm:$0xff]  ;;  %v10994_v61 = vld [vmem:[#allocation8 + $0x38] sm:$0xff] }
 0xf43   :  { %6752 = vmatpush.msra.mxu1 %v10948_v30  ;;  %6691 = vmatpush.msrb.mxu2 %v10949_v54  ;;  %v10996_v30 = vld [vmem:[#allocation10 + $0x48] sm:$0xff]  ;;  %v10997_v54 = vld [vmem:[#allocation8 + $0x18] sm:$0xff] }
 0xf44   :  { %6711 = vmatpush.msrb.mxu3 %v10950_v4  ;;  %6731 = vmatpush.msra.mxu0 %v10951_v52  ;;  %v10998_v4 = vld [vmem:[#allocation8 + $0x20] sm:$0xff]  ;;  %v10999_v52 = vld [vmem:[#allocation8 + $0x28] sm:$0xff] }
 0xf45   :  { %6753 = vmatpush.msra.mxu1 %v10952_v26  ;;  %6692 = vmatpush.msrb.mxu2 %v10953_v35  ;;  %v10205_v26 = vld [vmem:[%s15646_s0 + $0x28] sm:$0xff]  ;;  %v11000_v35 = vld [vmem:[#allocation10 + $0x30] sm:$0xff] }
 0xf46   :  { %6712 = vmatpush.msrb.mxu3 %v10954_v0  ;;  %6732 = vmatpush.msra.mxu0 %v10955_v16  ;;  %v11001_v0 = vld [vmem:[#allocation8] sm:$0xff]  ;;  %v16801_v16 = vld [vmem:[#allocation21_spill] sm:$0xff] }
 0xf47   :  { %6754 = vmatpush.msra.mxu1 %v10956_v51  ;;  %10201 = vmatmul.msk.f32.vlgmr.msra.gmra.mxu2 %vm16027_vm7, %v6112_v28  ;;  %v10988_v28 = vld [vmem:[#allocation10 + $0x78] sm:$0xff]  ;;  %10555 = vtanh.f32 %v16801_v16  ;;  %v11003_v51 = vld [vmem:[#allocation8 + $0x10] sm:$0xff]  ;;  %v425_v16 = vld [vmem:[%s15659_s13 + $0x28] sm:$0xff] }
 0xf48   :  { %10202 = vmatmul.msk.f32.vlgmr.msra.gmra.mxu3 %vm16027_vm7, %v6113_v18  ;;  %10203 = vmatmul.msk.f32.vlgmr.msrb.gmra.mxu0 %vm16027_vm7, %v6113_v18 }
 0xf49   :  { %6693 = vmatpush.msrb.mxu2 %v10957_v29  ;;  %6713 = vmatpush.msrb.mxu3 %v10958_v17  ;;  %v11004_v29 = vld [vmem:[#allocation10 + $0x18] sm:$0xff] }
 0xf4a   :  { %6733 = vmatpush.msra.mxu0 %v10959_v38  ;;  %6755 = vmatpush.msra.mxu1 %v10960_v53  ;;  %v435_v17 = vld [vmem:[%s15659_s13 + $0x78] sm:$0xff]  ;;  %v11005_v38 = vld [vmem:[#allocation10 + $0x170] sm:$0xff] }
 0xf4b   :  { %10204 = vmatmul.msk.f32.vlgmr.msrb.gmra.mxu1 %vm16027_vm7, %v6113_v18  ;;  %6694 = vmatpush.msrb.mxu2 %v10961_v23  ;;  %v11002_v18 = vld [vmem:[#allocation8 + $0x8] sm:$0xff]  ;;  %v11006_v53 = vld [vmem:[#allocation10 + $0x178] sm:$0xff]  ;;  %v434_v23 = vld [vmem:[%s15659_s13 + $0x70] sm:$0xff] }
 0xf4c   :  { %6714 = vmatpush.msrb.mxu3 %v10962_v59  ;;  %6734 = vmatpush.msra.mxu0 %v10963_v24  ;;  %v16802_v59 = vld [vmem:[#allocation18_spill] sm:$0xff] }
 0xf4d   :  { %6756 = vmatpush.msra.mxu1 %v10964_v42  ;;  %6695 = vmatpush.msrb.mxu2 %v10965_v9  ;;  %10557 = vtanh.f32 %v16802_v59  ;;  %v11007_v24 = vld [vmem:[#allocation10] sm:$0xff]  ;;  %v16803_v42 = vld [vmem:[#allocation25_spill] sm:$0xff] }
 0xf4e   :  { %6715 = vmatpush.msrb.mxu3 %v10966_v46  ;;  %6735 = vmatpush.msra.mxu0 %v10967_v2  ;;  %10559 = vtanh.f32 %v16803_v42  ;;  %v11008_v9 = vld [vmem:[#allocation10 + $0x158] sm:$0xff]  ;;  %v433_v46 = vld [vmem:[%s15659_s13 + $0x68] sm:$0xff]  ;;  %v14425_v2 = vpop.eup %10555  ;;  %v11029_v42 = vld [vmem:[#allocation10 + $0x70] sm:$0xff] }
 0xf4f   :  { %6757 = vmatpush.msra.mxu1 %v10968_v5  ;;  %6696 = vmatpush.msrb.mxu2 %v10969_v27  ;;  %v11009_v5 = vld [vmem:[#allocation10 + $0x160] sm:$0xff]  ;;  %v423_v59 = vld [vmem:[%s15659_s13 + $0x18] sm:$0xff] }
 0xf50   :  { %6716 = vmatpush.msrb.mxu3 %v10970_v39  ;;  %6736 = vmatpush.msra.mxu0 %v10971_v60  ;;  %v11010_v27 = vld [vmem:[#allocation10 + $0x140] sm:$0xff]  ;;  %v11011_v60 = vld [vmem:[#allocation10 + $0x148] sm:$0xff] }
 0xf51   :  { %6758 = vmatpush.msra.mxu1 %v10972_v7  ;;  %6697 = vmatpush.msrb.mxu2 %v10973_v1  ;;  %v432_v39 = vld [vmem:[%s15659_s13 + $0x60] sm:$0xff]  ;;  %v16804_v7 = vld [vmem:[#allocation24_spill] sm:$0xff]  ;;  %v11012_v1 = vld [vmem:[#allocation10 + $0x128] sm:$0xff] }
 0xf52   :  { %6717 = vmatpush.msrb.mxu3 %v10974_v13  ;;  %6737 = vmatpush.msra.mxu0 %v10975_v21  ;;  %10561 = vtanh.f32 %v16804_v7  ;;  %v16805_v21 = vld [vmem:[#allocation29_spill] sm:$0xff] }
 0xf53   :  { %6759 = vmatpush.msra.mxu1 %v10976_v56  ;;  %6698 = vmatpush.msrb.mxu2 %v10977_v58  ;;  %v14432_v13 = vpop.eup %10557  ;;  %10563 = vtanh.f32 %v16805_v21  ;;  %v11013_v56 = vld [vmem:[#allocation10 + $0x130] sm:$0xff]  ;;  %v431_v58 = vld [vmem:[%s15659_s13 + $0x58] sm:$0xff]  ;;  %v421_v21 = vld [vmem:[%s15659_s13 + $0x8] sm:$0xff] }
 0xf54   :  { %6718 = vmatpush.msrb.mxu3 %v10978_v14  ;;  %6738 = vmatpush.msra.mxu0 %v10979_v10  ;;  %v14438_v14 = vpop.eup %10559  ;;  %v11014_v10 = vld [vmem:[#allocation10 + $0x110] sm:$0xff]  ;;  %v16814_v7 = vld [vmem:[#allocation49_spill] sm:$0xff] }
 0xf55   :  { %6760 = vmatpush.msra.mxu1 %v10980_v19  ;;  %6699 = vmatpush.msrb.mxu2 %v10981_v62  ;;  %v11015_v19 = vld [vmem:[#allocation10 + $0x118] sm:$0xff]  ;;  %v430_v62 = vld [vmem:[%s15659_s13 + $0x50] sm:$0xff] }
 0xf56   :  { %6719 = vmatpush.msrb.mxu3 %v10982_v47  ;;  %6739 = vmatpush.msra.mxu0 %v10983_v55  ;;  %v11016_v47 = vld [vmem:[#allocation10 + $0xf8] sm:$0xff]  ;;  %v16806_v55 = vld [vmem:[#allocation26_spill] sm:$0xff] }
 0xf57   :  { %6761 = vmatpush.msra.mxu1 %v10984_v50  ;;  %6700 = vmatpush.msrb.mxu2 %v10985_v32  ;;  %10565 = vtanh.f32 %v16806_v55  ;;  %v11017_v50 = vld [vmem:[#allocation10 + $0x100] sm:$0xff]  ;;  %v16807_v32 = vld [vmem:[#allocation83_spill] sm:$0xff] }
 0xf58   :  { %6720 = vmatpush.msrb.mxu3 %v10986_v49  ;;  %6740 = vmatpush.msra.mxu0 %v10987_v48  ;;  %v429_v49 = vld [vmem:[%s15659_s13 + $0x48] sm:$0xff]  ;;  %v14450_v48 = vpop.eup %10561 }
 0xf59   :  { %6762 = vmatpush.msra.mxu1 %v10988_v28  ;;  %6701 = vmatpush.msrb.mxu2 %v10989_v11  ;;  %v11018_v28 = vld [vmem:[#allocation10 + $0xe0] sm:$0xff]  ;;  %v14452_v11 = vpop.eup %10563  ;;  %v11036_v55 = vld [vmem:[#allocation10 + $0x8] sm:$0xff] }
 0xf5a   :  { %6721 = vmatpush.msrb.mxu3 %v10990_v6  ;;  %6741 = vmatpush.msra.mxu0 %v10991_v12  ;;  %v11019_v6 = vld [vmem:[#allocation10 + $0xe8] sm:$0xff]  ;;  %v428_v12 = vld [vmem:[%s15659_s13 + $0x40] sm:$0xff] }
 0xf5b   :  { %6763 = vmatpush.msra.mxu1 %v10992_v43  ;;  %6702 = vmatpush.msrb.mxu2 %v10993_v44  ;;  %v16808_v43 = vld [vmem:[#allocation37_spill] sm:$0xff]  ;;  %v11020_v44 = vld [vmem:[#allocation10 + $0xc8] sm:$0xff] }
 0xf5c   :  { %6722 = vmatpush.msrb.mxu3 %v10994_v61  ;;  %6742 = vmatpush.msra.mxu0 %v10995_v22  ;;  %10567 = vtanh.f32 %v16808_v43  ;;  %v11021_v61 = vld [vmem:[#allocation10 + $0xd0] sm:$0xff]  ;;  %v427_v22 = vld [vmem:[%s15659_s13 + $0x38] sm:$0xff] }
 0xf5d   :  { %6764 = vmatpush.msra.mxu1 %v10996_v30  ;;  %6703 = vmatpush.msrb.mxu2 %v10997_v54  ;;  %v14463_v30 = vpop.eup %10565  ;;  %v11022_v54 = vld [vmem:[#allocation10 + $0xb0] sm:$0xff] }
 0xf5e   :  { %6723 = vmatpush.msrb.mxu3 %v10998_v4  ;;  %6743 = vmatpush.msra.mxu0 %v10999_v52  ;;  %v11023_v4 = vld [vmem:[#allocation10 + $0xb8] sm:$0xff]  ;;  %v426_v52 = vld [vmem:[%s15659_s13 + $0x30] sm:$0xff] }
 0xf5f   :  { %6765 = vmatpush.msra.mxu1 %v11000_v35  ;;  %6704 = vmatpush.msrb.mxu2 %v11001_v0  ;;  %v11024_v35 = vld [vmem:[#allocation10 + $0x98] sm:$0xff]  ;;  %v11025_v0 = vld [vmem:[#allocation10 + $0xa0] sm:$0xff] }
 0xf60   :  { %6724 = vmatpush.msrb.mxu3 %v11002_v18  ;;  %6744 = vmatpush.msra.mxu0 %v11003_v51  ;;  %v16810_v51 = vrot.slane %v16807_v32, 1 }
 0xf61   :  { %6766 = vmatpush.msra.mxu1 %v11004_v29  ;;  %6705 = vmatmul.f32.vlgmr.msrb.gmra.mxu2 %v10205_v26  ;;  %v11026_v29 = vld [vmem:[#allocation10 + $0x80] sm:$0xff] }
 0xf62   :  { %6725 = vmatmul.f32.vlgmr.msrb.gmra.mxu3 %v10205_v26  ;;  %6745 = vmatmul.f32.vlgmr.msra.gmra.mxu0 %v10205_v26  ;;  %v16809_v26 = vld [vmem:[#allocation33_spill] sm:$0xff]  ;;  %v14473_v18 = vpop.eup %10567 }
 0xf63   :  { %6772 = vmatpush.msra.mxu2 %v11005_v38  ;;  %6792 = vmatpush.msra.mxu3 %v11006_v53  ;;  %10569 = vtanh.f32 %v16809_v26  ;;  %v11027_v38 = vld [vmem:[#allocation10 + $0x88] sm:$0xff]  ;;  %v16823_v26 = vrot.slane %v16807_v32, 4 }
 0xf64   :  { %6870 = vmatpush.msrb.mxu0 %v435_v17  ;;  %6767 = vmatpush.msra.mxu1 %v11007_v24  ;;  %v424_v17 = vld [vmem:[%s15659_s13 + $0x20] sm:$0xff]  ;;  %v16811_v53 = vld [vmem:[#allocation55_spill] sm:$0xff] }
 0xf65   :  { %6768 = vmatmul.f32.vlgmr.msra.gmra.mxu1 %v14263_v34  ;;  %6773 = vmatpush.msra.mxu2 %v11008_v9  ;;  %10571 = vtanh.f32 %v16811_v53  ;;  %v11030_v9 = vld [vmem:[#allocation10 + $0x50] sm:$0xff] }
 0xf66   :  { %6793 = vmatpush.msra.mxu3 %v11009_v5  ;;  %6871 = vmatpush.msrb.mxu0 %v434_v23  ;;  %v11028_v23 = vld [vmem:[#allocation10 + $0x68] sm:$0xff] }
 0xf67   :  { %6934 = vmatpush.xpose.msrb.mxu1 %v14425_v2  ;;  %6774 = vmatpush.msra.mxu2 %v11010_v27  ;;  %v16812_v5 = vld [vmem:[#allocation43_spill] sm:$0xff]  ;;  %v11031_v27 = vld [vmem:[#allocation10 + $0x58] sm:$0xff] }
 0xf68   :  { %6794 = vmatpush.msra.mxu3 %v11011_v60  ;;  %6872 = vmatpush.msrb.mxu0 %v433_v46  ;;  %v422_v46 = vld [vmem:[%s15659_s13 + $0x10] sm:$0xff]  ;;  %10573 = vtanh.f32 %v16812_v5  ;;  %v11032_v60 = vld [vmem:[#allocation10 + $0x38] sm:$0xff] }
 0xf69   :  { %6775 = vmatpush.msra.mxu2 %v11012_v1  ;;  %v14485_v24 = vpop.eup %10569  ;;  %v11033_v1 = vld [vmem:[#allocation10 + $0x40] sm:$0xff] }
 0xf6a   :  { %6795 = vmatpush.msra.mxu3 %v11013_v56  ;;  %6873 = vmatpush.msrb.mxu0 %v432_v39  ;;  %v16813_v39 = vld [vmem:[#allocation52_spill] sm:$0xff] }
 0xf6b   :  { %6935 = vmatpush.xpose.msrb.mxu1 %v14432_v13  ;;  %6776 = vmatpush.msra.mxu2 %v11014_v10  ;;  %10575 = vtanh.f32 %v16813_v39  ;;  %v14497_v56 = vpop.eup %10571  ;;  %v11034_v10 = vld [vmem:[#allocation10 + $0x20] sm:$0xff] }
 0xf6c   :  { %6796 = vmatpush.msra.mxu3 %v11015_v19  ;;  %6874 = vmatpush.msrb.mxu0 %v431_v58  ;;  %10577 = vtanh.f32 %v16814_v7  ;;  %v16815_v58 = vrot.slane %v16807_v32, 2  ;;  %v11035_v19 = vld [vmem:[#allocation10 + $0x28] sm:$0xff] }
 0xf6d   :  { %6777 = vmatpush.msra.mxu2 %v11016_v47  ;;  %v16816_v47 = vld [vmem:[#allocation40_spill] sm:$0xff] }
 0xf6e   :  { %6797 = vmatpush.msra.mxu3 %v11017_v50  ;;  %6936 = vmatmul.f32.vlgmr.msrb.gmra.mxu1 %v16807_v32  ;;  %10579 = vtanh.f32 %v16816_v47  ;;  %v14506_v50 = vpop.eup %10573 }
 0xf6f   :  { %6954 = vmatpush.xpose.msra.mxu1 %v14438_v14  ;;  %6875 = vmatpush.msrb.mxu0 %v430_v62  ;;  %v420_v62 = vld [vmem:[%s15659_s13] sm:$0xff] }
 0xf70   :  { %6778 = vmatpush.msra.mxu2 %v11018_v28  ;;  %6798 = vmatpush.msra.mxu3 %v11019_v6  ;;  %v11037_v28 = vld [vmem:[#allocation10 + $0x10] sm:$0xff] }
 0xf71   :  { %6876 = vmatpush.msrb.mxu0 %v429_v49  ;;  %v16817_v49 = vld [vmem:[#allocation46_spill] sm:$0xff]  ;;  %v14510_v6 = vpop.eup %10575 }
 0xf72   :  { %6779 = vmatpush.msra.mxu2 %v11020_v44  ;;  %6799 = vmatpush.msra.mxu3 %v11021_v61  ;;  %10581 = vtanh.f32 %v16817_v49  ;;  %v14514_v43 = vpop.eup %10577  ;;  %v16819_v61 = vld [vmem:[#allocation57_spill] sm:$0xff] }
 0xf73   :  { %6955 = vmatpush.xpose.msra.mxu1 %v14450_v48  ;;  %6877 = vmatpush.msrb.mxu0 %v428_v12  ;;  %v16818_v12 = vld [vmem:[#allocation60_spill] sm:$0xff] }
 0xf74   :  { %6780 = vmatpush.msra.mxu2 %v11022_v54  ;;  %6800 = vmatpush.msra.mxu3 %v11023_v4  ;;  %10583 = vtanh.f32 %v16818_v12  ;;  %v14521_v44 = vpop.eup %10579 }
 0xf75   :  { %6878 = vmatpush.msrb.mxu0 %v427_v22  ;;  %10585 = vtanh.f32 %v16819_v61  ;;  %v16820_v22 = vrot.slane %v16807_v32, 3 }
 0xf76   :  { %6781 = vmatpush.msra.mxu2 %v11024_v35  ;;  %6801 = vmatpush.msra.mxu3 %v11025_v0  ;;  %v16824_v0 = vrot.slane %v16807_v32, 5 }
 0xf77   :  { %6974 = vmatpush.xpose.msrb.mxu1 %v14452_v11  ;;  %6879 = vmatpush.msrb.mxu0 %v426_v52  ;;  %v16822_v52 = vld [vmem:[#allocation75_spill] sm:$0xff] }
 0xf78   :  { %6956 = vmatmul.f32.vlgmr.msra.gmra.mxu1 %v16810_v51  ;;  %6782 = vmatpush.msra.mxu2 %v11026_v29  ;;  %v14526_v54 = vpop.eup %10581  ;;  %v16826_v51 = vld [vmem:[#allocation73_spill] sm:$0xff]  ;;  %v16827_v29 = vrot.slane %v16807_v32, 7 }
 0xf79   :  { %6802 = vmatpush.msra.mxu3 %v11027_v38  ;;  %6880 = vmatpush.msrb.mxu0 %v425_v16  ;;  %16821 = vst [vmem:[#allocation186_spill] sm:$0xff] %v14526_v54  ;;  %v16825_v16 = vrot.slane %v16807_v32, 6 }
 0xf7a   :  { %6783 = vmatpush.msra.mxu2 %v11028_v23  ;;  %v14528_v4 = vpop.eup %10583 }
 0xf7b   :  { %6975 = vmatpush.xpose.msrb.mxu1 %v14463_v30  ;;  %6803 = vmatpush.msra.mxu3 %v11029_v42  ;;  %v14537_v35 = vpop.eup %10585 }
 0xf7c   :  { %6881 = vmatpush.msrb.mxu0 %v424_v17  ;;  %6784 = vmatpush.msra.mxu2 %v11030_v9 }
 0xf7d   :  { %6804 = vmatpush.msra.mxu3 %v11031_v27 }
 0xf7e   :  { %6882 = vmatpush.msrb.mxu0 %v423_v59  ;;  %6785 = vmatpush.msra.mxu2 %v11032_v60 }
 0xf7f   :  { %6994 = vmatpush.xpose.msra.mxu1 %v14473_v18  ;;  %6805 = vmatpush.msra.mxu3 %v11033_v1 }
 0xf80   :  { %6883 = vmatpush.msrb.mxu0 %v422_v46  ;;  %6976 = vmatmul.f32.vlgmr.msrb.gmra.mxu1 %v16815_v58 }
 0xf81   :  { %6786 = vmatpush.msra.mxu2 %v11034_v10  ;;  %6806 = vmatpush.msra.mxu3 %v11035_v19 }
 0xf82   :  { %6884 = vmatpush.msrb.mxu0 %v421_v21 }
 0xf83   :  { %6995 = vmatpush.xpose.msra.mxu1 %v14485_v24  ;;  %6787 = vmatpush.msra.mxu2 %v11036_v55 }
 0xf84   :  { %6807 = vmatpush.msra.mxu3 %v11037_v28  ;;  %6788 = vmatmul.f32.vlgmr.msra.gmra.mxu2 %v14263_v34 }
 0xf85   :  { %6885 = vmatpush.msrb.mxu0 %v420_v62  ;;  %6808 = vmatmul.f32.vlgmr.msra.gmra.mxu3 %v14263_v34 }
 0xf86   :  { %6886 = vmatmul.f32.vlgmr.msrb.gmra.mxu0 %v16807_v32  ;;  %7014 = vmatpush.xpose.msrb.mxu2 %v14506_v50 }
 0xf87   :  { %7054 = vmatpush.xpose.msrb.mxu1 %v14497_v56  ;;  %7034 = vmatpush.xpose.msrb.mxu3 %v14514_v43 }
 0xf88   :  { %7557 = vmatpush.xpose.msra.mxu0 %v14514_v43  ;;  %6996 = vmatmul.f32.vlgmr.msra.gmra.mxu1 %v16820_v22 }
 0xf8a   :  { %7015 = vmatpush.xpose.msrb.mxu2 %v14521_v44 }
 0xf8b   :  { %7055 = vmatpush.xpose.msrb.mxu1 %v14510_v6  ;;  %7035 = vmatpush.xpose.msrb.mxu3 %v14526_v54 }
 0xf8c   :  { %7558 = vmatpush.xpose.msra.mxu0 %v14526_v54 }
 0xf8d   :  { %7016 = vmatmul.f32.vlgmr.msrb.gmra.mxu2 %v16823_v26 }
 0xf8e   :  { %7074 = vmatpush.xpose.msra.mxu2 %v14528_v4  ;;  %6889 = vmatmul.f32.gmra.mxu0 %v16822_v52 }
 0xf8f   :  { %7036 = vmatmul.f32.vlgmr.msrb.gmra.mxu3 %v16824_v0 }
 0xf90   :  { %7056 = vmatmul.f32.vlgmr.msrb.gmra.mxu1 %v16825_v16 }
 0xf92   :  { %7075 = vmatpush.xpose.msra.mxu2 %v14537_v35 }
 0xf95   :  { %7076 = vmatmul.f32.vlgmr.msra.gmra.mxu2 %v16827_v29 }
 0xf96   :  { %6892 = vmatmul.f32.gmra.mxu0 %v16826_v51 }
 0xf9c   :  { %v14549_v59 = vpop.f32.mrf.mxu0 }
 0xf9e   :  { %6895 = vmatmul.f32.gmra.mxu0 %v13947_v20  ;;  %v6197_v17 = vpop.f32.mrf.mxu1 }
 0xf9f   :  { %v6644_v47 = vrot.slane %v6197_v17, 7 }
 0xfa1   :  { %v6134_v38 = vpop.f32.mrf.mxu2  ;;  %v6154_v53 = vpop.f32.mrf.mxu3 }
 0xfa2   :  { %v6645_v28 = vsel %vm16026_vm0, %v6644_v47, %v6134_v38 }
 0xfa4   :  { %v6260_v5 = vpop.f32.mrf.mxu0 }
 0xfa5   :  { %v6646_v62 = vrot.slane %v6260_v5, 6 }
 0xfa6   :  { %6898 = vmatmul.f32.gmra.mxu0 %v14263_v34  ;;  %v6280_v23 = vpop.f32.mrf.mxu1 }
 0xfa7   :  { %v6647_v61 = vsel %vm16025_vm1, %v6646_v62, %v6645_v28 }
 0xfa9   :  { %v6217_v42 = vpop.f32.mrf.mxu2  ;;  %v14551_v9 = vpop.f32.mrf.mxu3 }
 0xfac   :  { %v6343_v60 = vpop.f32.mrf.mxu0 }
 0xfae   :  { %v14553_v46 = vpop.f32.mrf.mxu1 }
 0xfb1   :  { %v14555_v27 = vpop.f32.mrf.mxu2  ;;  %v6323_v32 = vpop.f32.mrf.mxu3 }
 0xfb2   :  { %v6648_v55 = vrot.slane %v6323_v32, 5 }
 0xfb4   :  { %v14557_v58 = vpop.f32.mrf.mxu0  ;;  %v6649_v22 = vsel %vm16024_vm2, %v6648_v55, %v6647_v61 }
 0xfb6   :  { %v6449_v39 = vpop.f32.mrf.mxu1 }
 0xfb7   :  { %v6652_v20 = vrot.slane %v6449_v39, 3  ;;  %v6658_v39 = vrot.slane %v6217_v42, 7 }
 0xfb9   :  { %v6386_v7 = vpop.f32.mrf.mxu2  ;;  %v6406_v1 = vpop.f32.mrf.mxu3 }
 0xfba   :  { %v6650_v49 = vrot.slane %v6386_v7, 4 }
 0xfbc   :  { %v6512_v26 = vpop.f32.mrf.mxu0  ;;  %v6651_v16 = vsel %vm16023_vm3, %v6650_v49, %v6649_v22 }
 0xfbd   :  { %v6654_v51 = vrot.slane %v6512_v26, 2  ;;  %v6653_v17 = vsel %vm16022_vm4, %v6652_v20, %v6651_v16  ;;  %v6659_v20 = vsel %vm16026_vm0, %v6658_v39, %v6154_v53  ;;  %v6660_v16 = vrot.slane %v6280_v23, 6 }
 0xfbe   :  { %v6532_v21 = vpop.f32.mrf.mxu1  ;;  %v6672_v39 = vrot.slane %v14551_v9, 7 }
 0xfbf   :  { %v6655_v38 = vsel %vm16021_vm5, %v6654_v51, %v6653_v17  ;;  %v6662_v51 = vrot.slane %v6343_v60, 5  ;;  %v6664_v17 = vrot.slane %v6406_v1, 4  ;;  %v6668_v53 = vrot.slane %v6532_v21, 2  ;;  %v14588_v1 = vld [vmem:[%s15660_s14] ss:$0 sm:$0xff] }
 0xfc1   :  { %v6469_v10 = vpop.f32.mrf.mxu2  ;;  %v14559_v19 = vpop.f32.mrf.mxu3 }
 0xfc5   :  { %v6595_v22 = vpop.f32.mrf.mxu0 }
 0xfc6   :  { %v6670_v23 = vrot.slane %v6595_v22, 1 }
 0xfc8   :  { %v14562_v12 = vpop.f32.mrf.mxu1 }
 0xfca   :  { %v14566_v0 = vpop.f32.mrf.mxu2 }
 0xfcb   :  { %v6575_v29 = vpop.f32.mrf.mxu3 }
 0xfcc   :  { %v6656_v5 = vrot.slane %v6575_v29, 1 }
 0xfce   :  { %v6657_v7 = vsel %vm16020_vm6, %v6656_v5, %v6655_v38  ;;  %v6661_v5 = vsel %vm16025_vm1, %v6660_v16, %v6659_v20 }
 0xfe2   :  { %v6769_v32 = vpop.f32.mrf.mxu1 }
 0xfe3   :  { %v6770_v55 = vadd.f32 %v6769_v32, %v16327_v15  ;;  %v6666_v15 = vrot.slane %v6469_v10, 3  ;;  %v14579_v32 = vpop.f32.mrf.mxu0 }
 0xfe4   :  { %v6706_v47 = vpop.f32.mrf.mxu2 }
 0xfe5   :  { %v6707_v62 = vadd.f32 %v6706_v47, %v6657_v7  ;;  %v6726_v7 = vpop.f32.mrf.mxu3 }
 0xfe7   :  { %v6749_v28 = vadd.f32 %v6707_v62, %v16328_v3  ;;  %v6663_v3 = vsel %vm16024_vm2, %v6662_v51, %v6661_v5 }
 0xfe9   :  { %v6812_v61 = vadd.f32 %v6770_v55, %v6749_v28 }
 0xfeb   :  { %v10206_v54 = vmul.f32 -1.442695, %v6812_v61  ;;  %v6937_v49 = vpop.f32.mrf.mxu1 }
 0xfed   :  { %10587 = vpow2.f32 %v10206_v54  ;;  %v6665_v54 = vsel %vm16023_vm3, %v6664_v17, %v6663_v3  ;;  %v6673_v3 = vsel %vm16026_vm0, %v6672_v39, %v14549_v59 }
 0xfee   :  { %v6667_v42 = vsel %vm16022_vm4, %v6666_v15, %v6665_v54 }
 0xfef   :  { %v6669_v60 = vsel %vm16021_vm5, %v6668_v53, %v6667_v42  ;;  %v1160_v53 = vlaneseq }
 0xff0   :  { %v6671_v62 = vsel %vm16020_vm6, %v6670_v23, %v6669_v60 }
 0xff1   :  { %v6727_v28 = vadd.f32 %v6726_v7, %v6671_v62  ;;  %v14618_v59 = vshrl.u32 %v1160_v53, 7  ;;  %v6680_v7 = vrot.slane %v14559_v19, 3 }
 0xff3   :  { %v10588_v26 = vpop.eup %10587  ;;  %v6750_v20 = vadd.f32 %v6727_v28, %v16329_v41  ;;  %v14626_v62 = vadd.s32 8, %v14618_v59 }
 0xff4   :  { %v14576_v38 = vadd.f32 1.0, %v10588_v26  ;;  %v6674_v26 = vrot.slane %v14555_v27, 6  ;;  %v6676_v27 = vrot.slane %v14553_v46, 5  ;;  %v6682_v46 = vrot.slane %v14566_v0, 2 }
 0xff5   :  { %v6957_v29 = vpop.f32.mrf.mxu1  ;;  %10368 = vset.pattern.permute.xlu2 %v14626_v62  ;;  %10374 = vset.pattern.permute.xlu0 %v14626_v62 }
 0xff6   :  { %10589 = vrcp.f32 %v14576_v38  ;;  %v6675_v54 = vsel %vm16025_vm1, %v6674_v26, %v6673_v3  ;;  %v14607_v42 = vadd.f32 %v6957_v29, %v16779_v8  ;;  %v6678_v29 = vrot.slane %v14557_v58, 4  ;;  %10369 = vset.pattern.permute.xlu1 %v14626_v62 }
 0xff7   :  { %v6677_v60 = vsel %vm16024_vm2, %v6676_v27, %v6675_v54  ;;  %v6826_v19 = vand.u32 2147483647, %v14576_v38  ;;  %v6828_v0 = vand.u32 2147483648, %v14576_v38  ;;  %vm6822_vm9 = vweird.f32 %v14576_v38 }
 0xff9   :  { %vm6827_vm11 = vcmp.eq.f32.partialorder %v6826_v19, 8.507059e+37 }
 0xffc   :  { %v14590_v10 = vpop.eup %10589 }
 0xffd   :  { %v6977_v47 = vpop.f32.mrf.mxu1  ;;  %v6818_v21 = vmul.f32 %v14590_v10, %v14576_v38  ;;  %vm6823_vm8 = vweird.f32 %v14590_v10 }
 0xffe   :  { %v14611_v41 = vadd.f32 %v6977_v47, %v16780_v57  ;;  %v7098_v47 = vrot.slane %v14607_v42, 7  ;;  %vm14654_vm10 = vmor %vm6822_vm9, %vm6823_vm8 }
 0xfff   :  { %v6819_v5 = vsub.f32 1.0, %v6818_v21 }
0x1000   :  { %v7100_v28 = vrot.slane %v14611_v41, 6 }
0x1003   :  { %v6887_v55 = vpop.f32.mrf.mxu0 }
0x1004   :  { %v14594_v61 = vadd.f32 %v14588_v1, %v6887_v55  ;;  %v14629_v55 = vadd.f32 %v6937_v49, %v16783_v31  ;;  %v6679_v49 = vsel %vm16023_vm3, %v6678_v29, %v6677_v60  ;;  %v6829_v29 = vor.u32 1.1754944e-38, %v6828_v0 }
0x1005   :  { %v6997_v17 = vpop.f32.mrf.mxu1 }
0x1006   :  { %7088 = vmax.xlane.f32.xlu1 %v14594_v61  ;;  %v14615_v23 = vadd.f32 %v6997_v17, %v16781_v45  ;;  %v6684_v17 = vrot.slane %v14562_v12, 1 }
0x1007   :  { %v6789_v22 = vpop.f32.mrf.mxu2 }
0x1008   :  { %v6790_v16 = vadd.f32 %v6789_v22, %v16330_v40  ;;  %v6809_v51 = vpop.f32.mrf.mxu3  ;;  %v6820_v40 = vmul.f32 %v14590_v10, %v6819_v5  ;;  %v7102_v58 = vrot.slane %v14615_v23, 5  ;;  %v6681_v5 = vsel %vm16022_vm4, %v6680_v7, %v6679_v49 }
0x100a   :  { %v6832_v15 = vadd.f32 %v6790_v16, %v6750_v20  ;;  %v6821_v21 = vadd.f32 %v14590_v10, %v6820_v40 }
0x100c   :  { %v10207_v9 = vmul.f32 -1.442695, %v6832_v15  ;;  %v7099_v15 = vsel %vm16026_vm0, %v7098_v47, %v14629_v55  ;;  %v6825_v12 = vsel %vm14654_vm10, %v14590_v10, %v6821_v21  ;;  %v6810_v47 = vadd.f32 %v6809_v51, %v16331_v63  ;;  %v14675_v10 = vld [vmem:[%s15648_s2] sm:$0xff] }
0x100d   :  { %v7057_v38 = vpop.f32.mrf.mxu1  ;;  %v7101_v27 = vsel %vm16025_vm1, %v7100_v28, %v7099_v15  ;;  %v1231_v21 = vperm.slane %v14675_v10, 5 }
0x100e   :  { %10591 = vpow2.f32 %v10207_v9  ;;  %v6683_v9 = vsel %vm16021_vm5, %v6682_v46, %v6681_v5  ;;  %v7103_v60 = vsel %vm16024_vm2, %v7102_v58, %v7101_v27 }
0x100f   :  { %v6685_v28 = vsel %vm16020_vm6, %v6684_v17, %v6683_v9  ;;  %1242 = vperm.xlu0 %10374, %v1231_v21   ;;  %v16830_v17 = vld [vmem:[#allocation82_spill] sm:$0xff] }
0x1010   :  { %v7017_v39 = vpop.f32.mrf.mxu2  ;;  %v6747_v58 = vadd.f32 %v14579_v32, %v6685_v28 }
0x1011   :  { %v14638_v22 = vadd.f32 %v7017_v39, %v16782_v36  ;;  %v14668_v39 = vadd.f32 %v7057_v38, %v16785_v25 }
0x1012   :  { %v7037_v26 = vpop.f32.mrf.mxu3  ;;  %v6751_v15 = vadd.f32 %v6747_v58, %v16830_v17 }
0x1013   :  { %v14645_v20 = vadd.f32 %v7037_v26, %v16784_v33  ;;  %v7104_v54 = vrot.slane %v14638_v22, 4  ;;  %v6830_v26 = vsel %vm6827_vm11, %v6829_v29, %v6825_v12  ;;  %v7108_v49 = vrot.slane %v14668_v39, 2 }
0x1014   :  { %v10592_v16 = vpop.eup %10591  ;;  %v6852_v0 = vmul.f32 %v6830_v26, %v6810_v47  ;;  %v1192_v12 = vperm.slane %v14675_v10, 2 }
0x1015   :  { %v6836_v40 = vadd.f32 1.0, %v10592_v16  ;;  %v7106_v7 = vrot.slane %v14645_v20, 3  ;;  %v7105_v46 = vsel %vm16023_vm3, %v7104_v54, %v7103_v60 }
0x1016   :  { %v6853_v54 = vadd.f32 %v6852_v0, %v6751_v15  ;;  %v1179_v15 = vperm.slane %v14675_v10, 1 }
0x1017   :  { %10593 = vrcp.f32 %v6836_v40  ;;  %v7107_v51 = vsel %vm16022_vm4, %v7106_v7, %v7105_v46  ;;  %v6848_v60 = vand.u32 2147483648, %v6836_v40  ;;  %v6846_v7 = vand.u32 2147483647, %v6836_v40  ;;  %10375 = vset.pattern.permute.xlu0 %v14618_v59 }
0x1018   :  { %v7077_v19 = vpop.f32.mrf.mxu2  ;;  %v7109_v3 = vsel %vm16021_vm5, %v7108_v49, %v7107_v51  ;;  %10595 = vtanh.f32 %v6853_v54  ;;  %vm6842_vm13 = vweird.f32 %v6836_v40  ;;  %v1205_v51 = vperm.slane %v14675_v10, 3 }
0x1019   :  { %v14680_v63 = vadd.f32 %v7077_v19, %v16786_v37  ;;  %v6849_v46 = vor.u32 1.1754944e-38, %v6848_v60  ;;  %vm6847_vm15 = vcmp.eq.f32.partialorder %v6846_v7, 8.507059e+37  ;;  %v1166_v19 = vperm.slane %v14675_v10, 0 }
0x101b   :  { %v7110_v16 = vrot.slane %v14680_v63, 1 }
0x101d   :  { %v10594_v5 = vpop.eup %10593  ;;  %v7111_v32 = vsel %vm16020_vm6, %v7110_v16, %v7109_v3  ;;  %v1244_v3 = vperm.slane %v14675_v10, 6 }
0x101e   :  { %v6838_v38 = vmul.f32 %v10594_v5, %v6836_v40  ;;  %v7113_v9 = vsel %vm16027_vm7, %v7111_v32, -inf  ;;  %vm6843_vm12 = vweird.f32 %v10594_v5  ;;  %v10596_v0 = vpop.eup %10595  ;;  %v16832_v40 = vrot.slane %v16822_v52, 5 }
0x101f   :  { %7114 = vmax.xlane.f32.xlu2 %v7113_v9  ;;  %1203 = vperm.xlu1 %10369, %v1192_v12   ;;  %vm6844_vm14 = vmor %vm6842_vm13, %vm6843_vm12 }
0x1020   :  { %v6839_v27 = vsub.f32 1.0, %v6838_v38  ;;  %1171 = vperm.xlu0 %10375, %v1166_v19   ;;  %v1257_v38 = vperm.slane %v14675_v10, 7 }
0x1022   :  { %v6840_v29 = vmul.f32 %v10594_v5, %v6839_v27 }
0x1024   :  { %v6841_v47 = vadd.f32 %v10594_v5, %v6840_v29 }
0x1026   :  { %v6845_v28 = vsel %vm6844_vm14, %v10594_v5, %v6841_v47  ;;  %v1218_v5 = vperm.slane %v14675_v10, 4 }
0x1027   :  { %v6850_v26 = vsel %vm6847_vm15, %v6849_v46, %v6845_v28  ;;  %1216 = vperm.xlu1 %10369, %v1205_v51  }
0x1028   :  { %v6855_v58 = vsub.f32 1.0, %v6850_v26  ;;  %v6857_v16 = vmul.f32 %v6850_v26, %v14263_v34 }
0x102a   :  { %v6856_v49 = vmul.f32 %v10596_v0, %v6855_v58  ;;  %v14721_v0 = vand.u32 127, %v1160_v53 }
0x102c   :  { %v14694_v17 = vadd.f32 %v6857_v16, %v6856_v49 }
0x102e   :  { %16831 = vst [vmem:[#allocation84_spill] sm:$0xff] %v14694_v17  ;;  %6901 = vmatmul.f32.gmra.mxu0 %v14694_v17 }
0x102f   :  { %10373 = vset.pattern.permute.xlu1 %v14618_v59 }
0x1036   :  { %7559 = vmatmul.f32.vlgmr.msra.gmra.mxu0 %v16832_v40 }
0x1037   :  { %1177 = vperm.xlu2 %10368, %v1166_v19   ;;  %1210 = vperm.xlu1 %10373, %v1205_v51  }
0x103f   :  { %10370 = vset.pattern.permute.xlu2 %v14618_v59  ;;  %10376 = vset.pattern.permute.xlu1 %v14626_v62 }
0x1047   :  { %1197 = vperm.xlu2 %10370, %v1192_v12   ;;  %1229 = vperm.xlu1 %10376, %v1218_v5  }
0x104f   :  { %10371 = vset.pattern.permute.xlu2 %v14626_v62  ;;  %10378 = vset.pattern.permute.xlu1 %v14618_v59 }
0x1057   :  { %1190 = vperm.xlu2 %10371, %v1179_v15   ;;  %1223 = vperm.xlu1 %10378, %v1218_v5  }
0x105f   :  { %10372 = vset.pattern.permute.xlu2 %v14618_v59 }
0x1067   :  { %1184 = vperm.xlu2 %10372, %v1179_v15  }
0x106f   :  { %1236 = vperm.xlu2 %10372, %v1231_v21  }
0x1077   :  { %10377 = vset.pattern.permute.xlu2 %v14626_v62 }
0x1079   :  { %v7089_v32 = vpop.xlane.xlu1 %7088 }
0x107f   :  { %1255 = vperm.xlu2 %10377, %v1244_v3  }
0x1081   :  { %v14714_v54 = vpop.permute.xlu0 %1242 }
0x1082   :  { %vm14784_vm12 = vcmp.eq.s32.totalorder %v14714_v54, %v14721_v0 }
0x1087   :  { %1268 = vperm.xlu2 %10377, %v1257_v38  }
0x1091   :  { %v1204_v27 = vpop.permute.xlu1 %1203 }
0x1092   :  { %v7115_v9 = vpop.xlane.xlu2 %7114  ;;  %vm14729_vm8 = vcmp.eq.s32.totalorder %v1204_v27, %v14721_v0  ;;  %v16042_v27 = vmov 1.0  }
0x1093   :  { %v7116_v59 = vmax.f32 %v7089_v32, %v7115_v9  ;;  %v1172_v9 = vpop.permute.xlu0 %1171  ;;  %10214 = vmatpush.msk.msrb.mxu2 %vm14729_vm8, %v16042_v27 }
0x1094   :  { %vm14739_vm10 = vcmp.eq.s32.totalorder %v1172_v9, %v14721_v0 }
0x1095   :  { %v7117_v21 = vsub.f32 %v14594_v61, %v7116_v59  ;;  %v7121_v12 = vrot.slane %v7116_v59, 1  ;;  %v7122_v60 = vrot.slane %v7116_v59, 2  ;;  %v7123_v29 = vrot.slane %v7116_v59, 3 }
0x1096   :  { %v7124_v7 = vrot.slane %v7116_v59, 4  ;;  %v7125_v47 = vrot.slane %v7116_v59, 5  ;;  %v7126_v46 = vrot.slane %v7116_v59, 6  ;;  %v7127_v28 = vrot.slane %v7116_v59, 7 }
0x1097   :  { %v7118_v26 = vmul.f32 1.442695, %v7117_v21  ;;  %v7136_v58 = vsub.f32 %v14629_v55, %v7116_v59  ;;  %v7137_v19 = vsub.f32 %v14607_v42, %v7121_v12  ;;  %v7138_v51 = vsub.f32 %v14611_v41, %v7122_v60 }
0x1098   :  { %v7139_v49 = vsub.f32 %v14615_v23, %v7123_v29  ;;  %v7140_v61 = vsub.f32 %v14638_v22, %v7124_v7  ;;  %v7141_v16 = vsub.f32 %v14645_v20, %v7125_v47  ;;  %v7142_v40 = vsub.f32 %v14668_v39, %v7126_v46 }
0x1099   :  { %10597 = vpow2.f32 %v7118_v26  ;;  %v7144_v5 = vmul.f32 1.442695, %v7136_v58  ;;  %v7146_v15 = vmul.f32 1.442695, %v7137_v19  ;;  %v7143_v55 = vsub.f32 %v14680_v63, %v7127_v28  ;;  %v1217_v20 = vpop.permute.xlu1 %1216 }
0x109a   :  { %v7148_v32 = vmul.f32 1.442695, %v7138_v51  ;;  %v7150_v42 = vmul.f32 1.442695, %v7139_v49  ;;  %v1178_v53 = vpop.permute.xlu2 %1177  ;;  %v7152_v23 = vmul.f32 1.442695, %v7140_v61  ;;  %vm14747_vm11 = vcmp.eq.s32.totalorder %v1217_v20, %v14721_v0 }
0x109b   :  { %10599 = vpow2.f32 %v7144_v5  ;;  %v7154_v22 = vmul.f32 1.442695, %v7141_v16  ;;  %vm14734_vm9 = vcmp.eq.s32.totalorder %v1178_v53, %v14721_v0  ;;  %v7156_v59 = vmul.f32 1.442695, %v7142_v40 }
0x109c   :  { %10601 = vpow2.f32 %v7146_v15  ;;  %10208 = vmatpush.msk.msra.mxu3 %vm14734_vm9, %v16042_v27  ;;  %v7158_v12 = vmul.f32 1.442695, %v7143_v55  ;;  %v16841_v40 = vmov 0 }
0x109d   :  { %10603 = vpow2.f32 %v7148_v32  ;;  %v16842_v40 = vsel %vm14784_vm12, 4294967295, %v16841_v40 }
0x109e   :  { %10605 = vpow2.f32 %v7150_v42  ;;  %10209 = vmatpush.msk.msra.mxu3 %vm14739_vm10, %v16042_v27 }
0x109f   :  { %v14754_v60 = vpop.eup %10597  ;;  %10607 = vpow2.f32 %v7152_v23 }
0x10a0   :  { %7160 = vadd.xlane.f32.xlu0 %v14754_v60  ;;  %10609 = vpow2.f32 %v7154_v22  ;;  %10217 = vmatpush.msk.msrb.mxu3 %vm14747_vm11, %v16042_v27 }
0x10a1   :  { %v14763_v29 = vpop.eup %10599  ;;  %10611 = vpow2.f32 %v7156_v59  ;;  %v6890_v59 = vpop.f32.mrf.mxu0 }
0x10a2   :  { %v14765_v7 = vpop.eup %10601  ;;  %10613 = vpow2.f32 %v7158_v12  ;;  %v1198_v5 = vpop.permute.xlu2 %1197 }
0x10a3   :  { %v14767_v47 = vpop.eup %10603  ;;  %v7170_v46 = vrot.slane %v14765_v7, 7  ;;  %vm14793_vm13 = vcmp.eq.s32.totalorder %v1198_v5, %v14721_v0 }
0x10a4   :  { %v14770_v28 = vpop.eup %10605  ;;  %v7172_v26 = vrot.slane %v14767_v47, 6  ;;  %10215 = vmatpush.msk.msrb.mxu2 %vm14793_vm13, %v16042_v27 }
0x10a5   :  { %v14773_v58 = vpop.eup %10607  ;;  %v7171_v19 = vsel %vm16026_vm0, %v7170_v46, %v14763_v29  ;;  %v7174_v51 = vrot.slane %v14770_v28, 5 }
0x10a6   :  { %v14778_v49 = vpop.eup %10609  ;;  %v7173_v61 = vsel %vm16025_vm1, %v7172_v26, %v7171_v19  ;;  %v7176_v16 = vrot.slane %v14773_v58, 4  ;;  %10223 = vmatpush.msk.msra.mxu2 %vm14784_vm12, %v16042_v27 }
0x10a7   :  { %v14788_v15 = vpop.eup %10611  ;;  %v7175_v55 = vsel %vm16024_vm2, %v7174_v51, %v7173_v61  ;;  %v7178_v32 = vrot.slane %v14778_v49, 3  ;;  %v14821_v51 = vadd.f32 %v14588_v1, %v6890_v59 }
0x10a8   :  { %v14797_v53 = vpop.eup %10613  ;;  %v7177_v23 = vsel %vm16023_vm3, %v7176_v16, %v7175_v55  ;;  %v7180_v54 = vrot.slane %v14788_v15, 2  ;;  %v16849_v55 = vmov 0 }
0x10a9   :  { %v7179_v22 = vsel %vm16022_vm4, %v7178_v32, %v7177_v23  ;;  %v7182_v9 = vrot.slane %v14797_v53, 1  ;;  %v1211_v46 = vpop.permute.xlu1 %1210  ;;  %v16853_v23 = vmov 0 }
0x10aa   :  { %v7181_v20 = vsel %vm16021_vm5, %v7180_v54, %v7179_v22  ;;  %vm14813_vm14 = vcmp.eq.s32.totalorder %v1211_v46, %v14721_v0  ;;  %v16855_v22 = vmov 0 }
0x10ab   :  { %v7183_v12 = vsel %vm16020_vm6, %v7182_v9, %v7181_v20  ;;  %10218 = vmatpush.msk.msrb.mxu3 %vm14813_vm14, %v16042_v27 }
0x10ac   :  { %v7185_v26 = vsel %vm16027_vm7, %v7183_v12, 0.0 }
0x10ad   :  { %7186 = vadd.xlane.f32.xlu1 %v7185_v26 }
0x10b0   :  { %7611 = vmax.xlane.f32.xlu2 %v14821_v51 }
0x10b1   :  { %v1191_v61 = vpop.permute.xlu2 %1190 }
0x10b2   :  { %vm14825_vm15 = vcmp.eq.s32.totalorder %v1191_v61, %v14721_v0  ;;  %v16857_v61 = vmov 0 }
0x10b3   :  { %10211 = vmatpush.msk.msra.mxu1 %vm14825_vm15, %v16042_v27  ;;  %10235 = vmatpush.msk.msrb.mxu0 %vm14825_vm15, %v16042_v27 }
0x10b4   :  { %1249 = vperm.xlu0 %10375, %v1244_v3  }
0x10b9   :  { %v1230_v32 = vpop.permute.xlu1 %1229 }
0x10ba   :  { %vm14850_vm5 = vcmp.eq.s32.totalorder %v1230_v32, %v14721_v0 }
0x10bc   :  { %10379 = vset.pattern.permute.xlu0 %v14626_v62 }
0x10c1   :  { %v1185_v5 = vpop.permute.xlu2 %1184 }
0x10c2   :  { %vm14839_vm6 = vcmp.eq.s32.totalorder %v1185_v5, %v14721_v0 }
0x10c3   :  { %v16850_v55 = vsel %vm14839_vm6, 4294967295, %v16849_v55  ;;  %10212 = vmatpush.msk.msra.mxu1 %vm14839_vm6, %v16042_v27  ;;  %10236 = vmatpush.msk.msrb.mxu0 %vm14839_vm6, %v16042_v27 }
0x10c5   :  { %10247 = vmatpush.msk.msra.mxu0 %vm14784_vm12, %v16042_v27  ;;  %10220 = vmatpush.msk.msrb.mxu1 %vm14850_vm5, %v16042_v27 }
0x10c6   :  { %1262 = vperm.xlu1 %10378, %v1257_v38  }
0x10c9   :  { %v1237_v62 = vpop.permute.xlu2 %1236  ;;  %v1224_v54 = vpop.permute.xlu1 %1223 }
0x10ca   :  { %vm14863_vm4 = vcmp.eq.s32.totalorder %v1237_v62, %v14721_v0  ;;  %vm14874_vm3 = vcmp.eq.s32.totalorder %v1224_v54, %v14721_v0 }
0x10cb   :  { %v16854_v23 = vsel %vm14863_vm4, 4294967295, %v16853_v23  ;;  %10224 = vmatpush.msk.msra.mxu2 %vm14863_vm4, %v16042_v27  ;;  %10248 = vmatpush.msk.msra.mxu0 %vm14863_vm4, %v16042_v27  ;;  %v16856_v22 = vsel %vm14874_vm3, 4294967295, %v16855_v22  ;;  %vm16867_vm4 = vcmask 130048  }
0x10cc   :  { %10221 = vmatpush.msk.msrb.mxu1 %vm14874_vm3, %v16042_v27  ;;  %vm16868_vm12 = vmmov %vm16867_vm4 }
0x10cd   :  { %vm16869_vm6 = vmmov %vm16867_vm4 }
0x10d9   :  { %v1256_v20 = vpop.permute.xlu2 %1255 }
0x10da   :  { %vm14884_vm2 = vcmp.eq.s32.totalorder %v1256_v20, %v14721_v0  ;;  %v16859_v20 = vmov 0 }
0x10db   :  { %v16858_v61 = vsel %vm14884_vm2, 4294967295, %v16857_v61 }
0x1113   :  { %v7161_v10 = vpop.xlane.xlu0 %7160 }
0x1120   :  { %v7187_v38 = vpop.xlane.xlu1 %7186 }
0x1121   :  { %v7188_v9 = vadd.f32 %v7187_v38, %v7161_v10  ;;  %v1269_v10 = vpop.permute.xlu2 %1268 }
0x1122   :  { %vm14896_vm1 = vcmp.eq.s32.totalorder %v1269_v10, %v14721_v0  ;;  %v16873_v10 = vrot.slane %v16822_v52, 3 }
0x1123   :  { %10615 = vrcp.f32 %v7188_v9  ;;  %v16860_v20 = vsel %vm14896_vm1, 4294967295, %v16859_v20 }
0x1126   :  { %v1250_v54 = vpop.permute.xlu0 %1249 }
0x1127   :  { %vm14904_vm0 = vcmp.eq.s32.totalorder %v1250_v54, %v14721_v0 }
0x1129   :  { %v10616_v59 = vpop.eup %10615 }
0x112a   :  { %v7190_v12 = vmul.f32 %v10616_v59, %v7188_v9 }
0x112c   :  { %v7191_v46 = vsub.f32 2.0, %v7190_v12 }
0x112e   :  { %v14881_v26 = vmul.f32 %v10616_v59, %v7191_v46 }
0x1130   :  { %v7210_v5 = vmul.f32 %v14763_v29, %v14881_v26  ;;  %v7195_v32 = vrot.slane %v14881_v26, 1  ;;  %v7196_v62 = vrot.slane %v14881_v26, 2  ;;  %v16861_v29 = vmov 0 }
0x1131   :  { %v16862_v29 = vsel %vm14904_vm0, 4294967295, %v16861_v29  ;;  %v7199_v59 = vrot.slane %v14881_v26, 5  ;;  %v7201_v54 = vrot.slane %v14881_v26, 7 }
0x1132   :  { %10210 = vmatmul.msk.f32.vlgmr.msra.gmra.mxu3 %vm16027_vm7, %v7210_v5  ;;  %v7211_v38 = vmul.f32 %v14765_v7, %v7195_v32  ;;  %v7212_v9 = vmul.f32 %v14767_v47, %v7196_v62  ;;  %16863 = vst [vmem:[#allocation85_spill] sm:$0xff] %v16862_v29  ;;  %v7197_v7 = vrot.slane %v14881_v26, 3  ;;  %v7198_v47 = vrot.slane %v14881_v26, 4 }
0x1133   :  { %10226 = vmatpush.msk.msra.mxu3 %vm14884_vm2, %v16042_v27  ;;  %v16864_v5 = vmov 0  ;;  %v7215_v62 = vmul.f32 %v14778_v49, %v7199_v59  ;;  %v7217_v49 = vmul.f32 %v14797_v53, %v7201_v54  ;;  %v16872_v53 = vrot.slane %v16822_v52, 2 }
0x1134   :  { %10213 = vmatmul.msk.f32.vlgmr.msra.gmra.mxu1 %vm16027_vm7, %v7211_v38  ;;  %10216 = vmatmul.msk.f32.vlgmr.msrb.gmra.mxu2 %vm16027_vm7, %v7212_v9  ;;  %v7213_v46 = vmul.f32 %v14770_v28, %v7197_v7  ;;  %v7214_v32 = vmul.f32 %v14773_v58, %v7198_v47  ;;  %v7200_v28 = vrot.slane %v14881_v26, 6  ;;  %v16874_v38 = vrot.slane %v16822_v52, 4 }
0x1135   :  { %10227 = vmatpush.msk.msra.mxu3 %vm14904_vm0, %v16042_v27  ;;  %7457 = vmatpush.xpose.msrb.mxu2 %v14425_v2  ;;  %v16875_v9 = vrot.slane %v16822_v52, 6  ;;  %v16876_v7 = vrot.slane %v16822_v52, 7 }
0x1136   :  { %10229 = vmatpush.msk.msra.mxu1 %vm14896_vm1, %v16042_v27  ;;  %v7216_v58 = vmul.f32 %v14788_v15, %v7200_v28  ;;  %v16871_v15 = vrot.slane %v16822_v52, 1 }
0x1138   :  { %v1263_v12 = vpop.permute.xlu1 %1262 }
0x1139   :  { %vm14922_vm7 = vcmp.eq.s32.totalorder %v1263_v12, %v14721_v0  ;;  %7458 = vmatpush.xpose.msrb.mxu2 %v14432_v13 }
0x113a   :  { %v16865_v5 = vsel %vm14922_vm7, 4294967295, %v16864_v5  ;;  %10219 = vmatmul.msk.f32.vlgmr.msrb.gmra.mxu3 %vm16867_vm4, %v7213_v46  ;;  %10230 = vmatpush.msk.msra.mxu1 %vm14922_vm7, %v16042_v27 }
0x113b   :  { %16866 = vst [vmem:[#allocation87_spill] sm:$0xff] %v16865_v5  ;;  %7477 = vmatpush.xpose.msrb.mxu3 %v14438_v14 }
0x113c   :  { %10222 = vmatmul.msk.f32.vlgmr.msrb.gmra.mxu1 %vm16868_vm12, %v7214_v32  ;;  %10225 = vmatmul.msk.f32.vlgmr.msra.gmra.mxu2 %vm16869_vm6, %v7215_v62  ;;  %vm16870_vm6 = vmmov %vm16867_vm4  ;;  %vm16878_vm12 = vcmask 1041409  }
0x113d   :  { %7497 = vmatpush.xpose.msrb.mxu1 %v14452_v11  ;;  %7517 = vmatpush.xpose.msra.mxu2 %v14473_v18 }
0x113f   :  { %7478 = vmatpush.xpose.msrb.mxu3 %v14450_v48 }
0x1141   :  { %7498 = vmatpush.xpose.msrb.mxu1 %v14463_v30  ;;  %7518 = vmatpush.xpose.msra.mxu2 %v14485_v24 }
0x1142   :  { %10228 = vmatmul.msk.f32.vlgmr.msra.gmra.mxu3 %vm16867_vm4, %v7216_v58  ;;  %vm1162_vm4 = vcmp.ge.s32.totalorder %v14721_v0, 16 }
0x1143   :  { %7537 = vmatpush.xpose.msra.mxu3 %v14506_v50 }
0x1144   :  { %10231 = vmatmul.msk.f32.vlgmr.msra.gmra.mxu1 %vm16870_vm6, %v7217_v49  ;;  %7459 = vmatmul.f32.vlgmr.msrb.gmra.mxu2 %v16822_v52  ;;  %v15002_v52 = vpop.f32.mrf.mxu0  ;;  %vm1163_vm6 = vcmp.lt.s32.totalorder %v14721_v0, 24 }
0x1145   :  { %7577 = vmatpush.xpose.msra.mxu1 %v14497_v56  ;;  %7597 = vmatpush.xpose.msrb.mxu2 %v14528_v4 }
0x1147   :  { %7538 = vmatpush.xpose.msra.mxu3 %v14521_v44 }
0x1149   :  { %7578 = vmatpush.xpose.msra.mxu1 %v14510_v6  ;;  %7598 = vmatpush.xpose.msrb.mxu2 %v14537_v35 }
0x114a   :  { %7479 = vmatmul.f32.vlgmr.msrb.gmra.mxu3 %v16871_v15 }
0x114b   :  { %10232 = vmatpush.msk.msrb.mxu3 %vm14734_vm9, %v16042_v27 }
0x114c   :  { %7499 = vmatmul.f32.vlgmr.msrb.gmra.mxu1 %v16872_v53  ;;  %7519 = vmatmul.f32.vlgmr.msra.gmra.mxu2 %v16873_v10  ;;  %v15004_v12 = vpop.f32.mrf.mxu0 }
0x114d   :  { %10233 = vmatpush.msk.msrb.mxu3 %vm14739_vm10, %v16042_v27  ;;  %10238 = vmatpush.msk.msrb.mxu1 %vm14729_vm8, %v16042_v27  ;;  %16877 = vst [vmem:[#allocation89_spill] sm:$0xff] %v15004_v12 }
0x114e   :  { %10241 = vmatpush.msk.msra.mxu2 %vm14747_vm11, %v16042_v27 }
0x114f   :  { %10239 = vmatpush.msk.msrb.mxu1 %vm14793_vm13, %v16042_v27 }
0x1150   :  { %10242 = vmatpush.msk.msra.mxu2 %vm14813_vm14, %v16042_v27 }
0x1152   :  { %7539 = vmatmul.f32.vlgmr.msra.gmra.mxu3 %v16874_v38 }
0x1153   :  { %10244 = vmatpush.msk.msra.mxu3 %vm14850_vm5, %v16042_v27 }
0x1154   :  { %7579 = vmatmul.f32.vlgmr.msra.gmra.mxu1 %v16875_v9  ;;  %7599 = vmatmul.f32.vlgmr.msrb.gmra.mxu2 %v16876_v7  ;;  %v15009_v53 = vpop.f32.mrf.mxu0 }
0x1155   :  { %10245 = vmatpush.msk.msra.mxu3 %vm14874_vm3, %v16042_v27  ;;  %10250 = vmatpush.msk.msra.mxu1 %vm14884_vm2, %v16042_v27  ;;  %16879 = vst [vmem:[#allocation14_spill] sm:$0xff] %v15009_v53  ;;  %vm16882_vm2 = vcmask 1044484  }
0x1156   :  { %10253 = vmatpush.msk.msrb.mxu2 %vm14896_vm1, %v16042_v27  ;;  %vm1164_vm1 = vmand %vm1162_vm4, %vm1163_vm6  ;;  %vm16892_vm4 = vcmask 1043459   ;;  %vm16893_vm6 = vcmask 1044484  }
0x1157   :  { %10251 = vmatpush.msk.msra.mxu1 %vm14904_vm0, %v16042_v27  ;;  %vm16881_vm0 = vcmask 1043459  }
0x1158   :  { %10254 = vmatpush.msk.msrb.mxu2 %vm14922_vm7, %v16042_v27  ;;  %vm16880_vm7 = vcmask 1042434  }
0x11b1   :  { %v7261_v47 = vpop.f32.mrf.mxu1 }
0x11b2   :  { %v7411_v28 = vrot.slane %v7261_v47, 7 }
0x11b5   :  { %v7238_v59 = vpop.f32.mrf.mxu3 }
0x11b6   :  { %v7412_v49 = vsel %vm16878_vm12, %v7411_v28, %v7238_v59  ;;  %v7193_v59 = vmul.f32 %v14754_v60, %v14881_v26  ;;  %v16883_v28 = vmov 0.0   ;;  %vm16885_vm12 = vcmask 1045509  }
0x11b7   :  { %v7284_v46 = vpop.f32.mrf.mxu2 }
0x11b8   :  { %v7413_v62 = vrot.slane %v7284_v46, 6 }
0x11b9   :  { %v7330_v32 = vpop.f32.mrf.mxu1 }
0x11ba   :  { %v7414_v10 = vsel %vm16880_vm7, %v7413_v62, %v7412_v49  ;;  %v7417_v7 = vrot.slane %v7330_v32, 4  ;;  %v15020_v49 = vpop.f32.mrf.mxu0  ;;  %vm16888_vm7 = vcmask 1047559  }
0x11bb   :  { %16886 = vst [vmem:[#allocation76_spill] sm:$0xff] %v15020_v49 }
0x11bd   :  { %v7307_v54 = vpop.f32.mrf.mxu3 }
0x11be   :  { %v7415_v58 = vrot.slane %v7307_v54, 5  ;;  %v15017_v54 = vsel %vm1164_vm1, 0.0001, %v16883_v28  ;;  %vm16890_vm1 = vcmask 1041409  }
0x11bf   :  { %v7353_v15 = vpop.f32.mrf.mxu2  ;;  %16884 = vst [vmem:[#allocation74_spill] sm:$0xff] %v15017_v54  ;;  %v7402_v32 = vadd.f32 %v7193_v59, %v15017_v54 }
0x11c0   :  { %v7416_v38 = vsel %vm16881_vm0, %v7415_v58, %v7414_v10  ;;  %v7419_v46 = vrot.slane %v7353_v15, 3  ;;  %vm16887_vm0 = vcmask 1046534  }
0x11c1   :  { %v7399_v9 = vpop.f32.mrf.mxu1  ;;  %v7418_v47 = vsel %vm16882_vm2, %v7417_v7, %v7416_v38  ;;  %vm16891_vm2 = vcmask 1042434  }
0x11c2   :  { %v7420_v17 = vsel %vm16885_vm12, %v7419_v46, %v7418_v47  ;;  %v7423_v34 = vrot.slane %v7399_v9, 1 }
0x11c5   :  { %v7376_v27 = vpop.f32.mrf.mxu3 }
0x11c6   :  { %v7421_v0 = vrot.slane %v7376_v27, 2 }
0x11c7   :  { %v7460_v62 = vpop.f32.mrf.mxu2 }
0x11c8   :  { %v7422_v58 = vsel %vm16887_vm0, %v7421_v0, %v7420_v17  ;;  %v7603_v46 = vadd.f32 %v7460_v62, %v16783_v31  ;;  %v7560_v17 = vpop.f32.mrf.mxu0 }
0x11c9   :  { %v7424_v15 = vsel %vm16888_vm7, %v7423_v34, %v7422_v58  ;;  %v7500_v10 = vpop.f32.mrf.mxu1  ;;  %v7608_v0 = vadd.f32 %v7560_v17, %v16784_v33 }
0x11ca   :  { %v7426_v38 = vadd.f32 %v7424_v15, %v7402_v32  ;;  %v7605_v9 = vadd.f32 %v7500_v10, %v16780_v57 }
0x11cc   :  { %7427 = vst [vmem:[%s16889_s27] sm:$0xff] %v7426_v38  ;;  %v7623_v28 = vrot.slane %v7605_v9, 6 }
0x11cd   :  { %v7480_v60 = vpop.f32.mrf.mxu3 }
0x11ce   :  { %v7604_v27 = vadd.f32 %v7480_v60, %v16779_v8 }
0x11cf   :  { %v7520_v26 = vpop.f32.mrf.mxu2 }
0x11d0   :  { %v7621_v7 = vrot.slane %v7604_v27, 7  ;;  %v7606_v47 = vadd.f32 %v7520_v26, %v16781_v45  ;;  %v7629_v26 = vrot.slane %v7608_v0, 3 }
0x11d1   :  { %v7580_v59 = vpop.f32.mrf.mxu1 }
0x11d2   :  { %v7622_v34 = vsel %vm16890_vm1, %v7621_v7, %v7603_v46  ;;  %v7625_v32 = vrot.slane %v7606_v47, 5  ;;  %v7609_v38 = vadd.f32 %v7580_v59, %v16785_v25  ;;  %vm16894_vm1 = vcmask 130048  }
0x11d3   :  { %v7624_v15 = vsel %vm16891_vm2, %v7623_v28, %v7622_v34  ;;  %v15046_v28 = vadd.f32 %v14588_v1, %v15002_v52  ;;  %vm16896_vm2 = vcmask 1041409  }
0x11d4   :  { %v7626_v53 = vsel %vm16892_vm4, %v7625_v32, %v7624_v15  ;;  %v7631_v7 = vrot.slane %v7609_v38, 2  ;;  %v7612_v32 = vpop.xlane.xlu2 %7611  ;;  %vm16897_vm4 = vcmask 1042434  }
0x11d5   :  { %v7540_v58 = vpop.f32.mrf.mxu3  ;;  %16895 = vst [vmem:[#allocation81_spill] sm:$0xff] %v15046_v28 }
0x11d6   :  { %v7607_v10 = vadd.f32 %v7540_v58, %v16782_v36 }
0x11d7   :  { %v7600_v60 = vpop.f32.mrf.mxu2 }
0x11d8   :  { %v7627_v49 = vrot.slane %v7607_v10, 4  ;;  %v7610_v62 = vadd.f32 %v7600_v60, %v16786_v37 }
0x11da   :  { %v7628_v12 = vsel %vm16893_vm6, %v7627_v49, %v7626_v53  ;;  %v7633_v57 = vrot.slane %v7610_v62, 1  ;;  %vm16898_vm6 = vcmask 1043459  }
0x11db   :  { %v7630_v17 = vsel %vm16885_vm12, %v7629_v26, %v7628_v12  ;;  %vm16899_vm12 = vcmask 1044484  }
0x11dc   :  { %v7632_v33 = vsel %vm16887_vm0, %v7631_v7, %v7630_v17  ;;  %vm16900_vm0 = vcmask 1045509  }
0x11dd   :  { %v7634_v34 = vsel %vm16888_vm7, %v7633_v57, %v7632_v33  ;;  %vm16901_vm7 = vcmask 1046534  }
0x11de   :  { %v7636_v59 = vsel %vm16894_vm1, %v7634_v34, -inf  ;;  %vm16902_vm1 = vcmask 1047559  }
0x11df   :  { %7637 = vmax.xlane.f32.xlu1 %v7636_v59 }
0x11e7   :  { %8135 = vmax.xlane.f32.xlu1 %v15046_v28 }
0x1252   :  { %v7638_v58 = vpop.xlane.xlu1 %7637 }
0x1253   :  { %v7639_v15 = vmax.f32 %v7612_v32, %v7638_v58 }
0x1255   :  { %v7640_v53 = vsub.f32 %v14821_v51, %v7639_v15  ;;  %v7644_v49 = vrot.slane %v7639_v15, 1  ;;  %v7645_v12 = vrot.slane %v7639_v15, 2  ;;  %v7646_v60 = vrot.slane %v7639_v15, 3 }
0x1256   :  { %v7647_v26 = vrot.slane %v7639_v15, 4  ;;  %v7648_v7 = vrot.slane %v7639_v15, 5  ;;  %v7649_v57 = vrot.slane %v7639_v15, 6  ;;  %v7650_v33 = vrot.slane %v7639_v15, 7 }
0x1257   :  { %v7641_v17 = vmul.f32 1.442695, %v7640_v53  ;;  %v7659_v34 = vsub.f32 %v7603_v46, %v7639_v15  ;;  %v7660_v59 = vsub.f32 %v7604_v27, %v7644_v49  ;;  %v7661_v37 = vsub.f32 %v7605_v9, %v7645_v12 }
0x1258   :  { %v7662_v1 = vsub.f32 %v7606_v47, %v7646_v60  ;;  %v7663_v52 = vsub.f32 %v7607_v10, %v7647_v26  ;;  %v7664_v36 = vsub.f32 %v7608_v0, %v7648_v7  ;;  %v7665_v28 = vsub.f32 %v7609_v38, %v7649_v57 }
0x1259   :  { %10617 = vpow2.f32 %v7641_v17  ;;  %v7667_v25 = vmul.f32 1.442695, %v7659_v34  ;;  %v7669_v32 = vmul.f32 1.442695, %v7660_v59  ;;  %v7666_v58 = vsub.f32 %v7610_v62, %v7650_v33 }
0x125a   :  { %v7671_v51 = vmul.f32 1.442695, %v7661_v37  ;;  %v7673_v45 = vmul.f32 1.442695, %v7662_v1  ;;  %v7675_v31 = vmul.f32 1.442695, %v7663_v52 }
0x125b   :  { %10619 = vpow2.f32 %v7667_v25  ;;  %v7677_v8 = vmul.f32 1.442695, %v7664_v36  ;;  %v7679_v54 = vmul.f32 1.442695, %v7665_v28  ;;  %v7681_v46 = vmul.f32 1.442695, %v7666_v58 }
0x125c   :  { %10621 = vpow2.f32 %v7669_v32 }
0x125d   :  { %10623 = vpow2.f32 %v7671_v51 }
0x125e   :  { %10625 = vpow2.f32 %v7673_v45 }
0x125f   :  { %v15050_v27 = vpop.eup %10617  ;;  %10627 = vpow2.f32 %v7675_v31 }
0x1260   :  { %7683 = vadd.xlane.f32.xlu0 %v15050_v27  ;;  %10629 = vpow2.f32 %v7677_v8 }
0x1261   :  { %v10620_v9 = vpop.eup %10619  ;;  %10631 = vpow2.f32 %v7679_v54 }
0x1262   :  { %v10622_v47 = vpop.eup %10621  ;;  %10633 = vpow2.f32 %v7681_v46 }
0x1263   :  { %v10624_v37 = vpop.eup %10623  ;;  %v7693_v0 = vrot.slane %v10622_v47, 7 }
0x1264   :  { %v10626_v25 = vpop.eup %10625  ;;  %v7695_v38 = vrot.slane %v10624_v37, 6 }
0x1265   :  { %v10628_v10 = vpop.eup %10627  ;;  %v7694_v36 = vsel %vm16896_vm2, %v7693_v0, %v10620_v9  ;;  %v7697_v62 = vrot.slane %v10626_v25, 5  ;;  %vm16903_vm2 = vcmask 130048  }
0x1266   :  { %v10630_v45 = vpop.eup %10629  ;;  %v7696_v28 = vsel %vm16897_vm4, %v7695_v38, %v7694_v36  ;;  %v7699_v15 = vrot.slane %v10628_v10, 4  ;;  %vm16904_vm4 = vmmov %vm16903_vm2 }
0x1267   :  { %v10632_v31 = vpop.eup %10631  ;;  %v7698_v53 = vsel %vm16898_vm6, %v7697_v62, %v7696_v28  ;;  %v7701_v8 = vrot.slane %v10630_v45, 3  ;;  %vm16905_vm6 = vmmov %vm16903_vm2 }
0x1268   :  { %v10634_v49 = vpop.eup %10633  ;;  %v7700_v54 = vsel %vm16899_vm12, %v7699_v15, %v7698_v53  ;;  %v7703_v12 = vrot.slane %v10632_v31, 2  ;;  %vm16906_vm12 = vmmov %vm16903_vm2 }
0x1269   :  { %v7702_v60 = vsel %vm16900_vm0, %v7701_v8, %v7700_v54  ;;  %v7705_v26 = vrot.slane %v10634_v49, 1  ;;  %vm16907_vm0 = vmmov %vm16903_vm2 }
0x126a   :  { %v7704_v7 = vsel %vm16901_vm7, %v7703_v12, %v7702_v60  ;;  %vm16908_vm7 = vmmov %vm16907_vm0 }
0x126b   :  { %v7706_v57 = vsel %vm16902_vm1, %v7705_v26, %v7704_v7  ;;  %vm16909_vm1 = vmmov %vm16907_vm0 }
0x126c   :  { %v7708_v33 = vsel %vm16903_vm2, %v7706_v57, 0.0  ;;  %vm16910_vm2 = vmmov %vm16907_vm0 }
0x126d   :  { %7709 = vadd.xlane.f32.xlu2 %v7708_v33 }
0x12d3   :  { %v7684_v17 = vpop.xlane.xlu0 %7683 }
0x12e0   :  { %v7710_v34 = vpop.xlane.xlu2 %7709 }
0x12e1   :  { %v7711_v59 = vadd.f32 %v7710_v34, %v7684_v17 }
0x12e3   :  { %10635 = vrcp.f32 %v7711_v59 }
0x12e9   :  { %v10636_v1 = vpop.eup %10635 }
0x12ea   :  { %v7713_v52 = vmul.f32 %v10636_v1, %v7711_v59 }
0x12ec   :  { %v7714_v32 = vsub.f32 2.0, %v7713_v52 }
0x12ee   :  { %v15061_v58 = vmul.f32 %v10636_v1, %v7714_v32 }
0x12f0   :  { %v7733_v51 = vmul.f32 %v10620_v9, %v15061_v58  ;;  %v7718_v46 = vrot.slane %v15061_v58, 1  ;;  %v7719_v0 = vrot.slane %v15061_v58, 2  ;;  %v7720_v38 = vrot.slane %v15061_v58, 3 }
0x12f1   :  { %v7721_v9 = vrot.slane %v15061_v58, 4 }
0x12f2   :  { %10234 = vmatmul.msk.f32.vlgmr.msrb.gmra.mxu3 %vm16904_vm4, %v7733_v51  ;;  %v7734_v36 = vmul.f32 %v10622_v47, %v7718_v46  ;;  %v7735_v62 = vmul.f32 %v10624_v37, %v7719_v0  ;;  %v7736_v28 = vmul.f32 %v10626_v25, %v7720_v38  ;;  %v7722_v47 = vrot.slane %v15061_v58, 5  ;;  %vm16911_vm4 = vmmov %vm16907_vm0 }
0x12f3   :  { %7981 = vmatpush.xpose.msrb.mxu3 %v14425_v2  ;;  %v7723_v37 = vrot.slane %v15061_v58, 6  ;;  %v7724_v25 = vrot.slane %v15061_v58, 7  ;;  %v7737_v15 = vmul.f32 %v10628_v10, %v7721_v9  ;;  %v16912_v10 = vld [vmem:[#allocation186_spill] sm:$0xff]  ;;  %v7716_v9 = vmul.f32 %v15050_v27, %v15061_v58  ;;  %v16937_v58 = vld [vmem:[#allocation97_spill] sm:$0xff] }
0x12f4   :  { %10237 = vmatmul.msk.f32.vlgmr.msrb.gmra.mxu0 %vm16905_vm6, %v7734_v36  ;;  %10240 = vmatmul.msk.f32.vlgmr.msrb.gmra.mxu1 %vm16906_vm12, %v7735_v62  ;;  %v7738_v53 = vmul.f32 %v10630_v45, %v7722_v47  ;;  %v16913_v45 = vld [vmem:[#allocation73_spill] sm:$0xff]  ;;  %vm16918_vm6 = vnez %v16850_v55  ;;  %vm16923_vm12 = vnez %v16842_v40 }
0x12f5   :  { %10243 = vmatmul.msk.f32.vlgmr.msra.gmra.mxu2 %vm16907_vm0, %v7736_v28  ;;  %8001 = vmatpush.xpose.msrb.mxu0 %v14438_v14  ;;  %v7739_v8 = vmul.f32 %v10632_v31, %v7723_v37  ;;  %v7740_v54 = vmul.f32 %v10634_v49, %v7724_v25  ;;  %v16914_v31 = vmov 1.0   ;;  %v16915_v49 = vrot.slane %v16913_v45, 1 }
0x12f6   :  { %8021 = vmatpush.xpose.msrb.mxu1 %v14452_v11  ;;  %8041 = vmatpush.xpose.msra.mxu2 %v14473_v18  ;;  %v16916_v12 = vrot.slane %v16913_v45, 2  ;;  %v16917_v60 = vrot.slane %v16913_v45, 3  ;;  %v16919_v26 = vrot.slane %v16913_v45, 4  ;;  %v16920_v7 = vrot.slane %v16913_v45, 5 }
0x12f7   :  { %7982 = vmatpush.xpose.msrb.mxu3 %v14432_v13  ;;  %v16921_v57 = vrot.slane %v16913_v45, 6  ;;  %v16922_v33 = vrot.slane %v16913_v45, 7  ;;  %vm16924_vm0 = vnez %v16858_v61 }
0x12f9   :  { %8002 = vmatpush.xpose.msrb.mxu0 %v14450_v48 }
0x12fa   :  { %8022 = vmatpush.xpose.msrb.mxu1 %v14463_v30  ;;  %8042 = vmatpush.xpose.msra.mxu2 %v14485_v24 }
0x12fb   :  { %10246 = vmatmul.msk.f32.vlgmr.msra.gmra.mxu3 %vm16908_vm7, %v7737_v15  ;;  %vm16925_vm7 = vnez %v16860_v20 }
0x12fc   :  { %8061 = vmatpush.xpose.msra.mxu3 %v14506_v50  ;;  %10249 = vmatmul.msk.f32.vlgmr.msra.gmra.mxu0 %vm16909_vm1, %v7738_v53  ;;  %vm16926_vm1 = vnez %v16854_v23 }
0x12fd   :  { %10252 = vmatmul.msk.f32.vlgmr.msra.gmra.mxu1 %vm16910_vm2, %v7739_v8  ;;  %10255 = vmatmul.msk.f32.vlgmr.msrb.gmra.mxu2 %vm16911_vm4, %v7740_v54  ;;  %vm16927_vm2 = vnez %v16862_v29  ;;  %vm16928_vm4 = vnez %v16865_v5 }
0x12fe   :  { %8081 = vmatpush.xpose.msra.mxu0 %v14514_v43  ;;  %8101 = vmatpush.xpose.msra.mxu1 %v14497_v56 }
0x12ff   :  { %8121 = vmatpush.xpose.msrb.mxu2 %v14528_v4 }
0x1300   :  { %8062 = vmatpush.xpose.msra.mxu3 %v14521_v44 }
0x1302   :  { %8082 = vmatpush.xpose.msra.mxu0 %v16912_v10  ;;  %8102 = vmatpush.xpose.msra.mxu1 %v14510_v6 }
0x1303   :  { %8122 = vmatpush.xpose.msrb.mxu2 %v14537_v35  ;;  %7983 = vmatmul.f32.vlgmr.msrb.gmra.mxu3 %v16913_v45 }
0x1304   :  { %10257 = vmatpush.msk.msrb.mxu3 %vm14734_vm9, %v16914_v31  ;;  %8003 = vmatmul.f32.vlgmr.msrb.gmra.mxu0 %v16915_v49 }
0x1305   :  { %8023 = vmatmul.f32.vlgmr.msrb.gmra.mxu1 %v16916_v12  ;;  %8043 = vmatmul.f32.vlgmr.msra.gmra.mxu2 %v16917_v60  ;;  %v16934_v12 = vld [vmem:[#allocation74_spill] sm:$0xff] }
0x1306   :  { %10258 = vmatpush.msk.msrb.mxu3 %vm14739_vm10, %v16914_v31  ;;  %10260 = vmatpush.msk.msrb.mxu0 %vm14825_vm15, %v16914_v31  ;;  %v7925_v60 = vadd.f32 %v7716_v9, %v16934_v12 }
0x1307   :  { %10263 = vmatpush.msk.msrb.mxu1 %vm14729_vm8, %v16914_v31  ;;  %10266 = vmatpush.msk.msra.mxu2 %vm14747_vm11, %v16914_v31 }
0x1308   :  { %10261 = vmatpush.msk.msrb.mxu0 %vm16918_vm6, %v16914_v31 }
0x1309   :  { %10264 = vmatpush.msk.msrb.mxu1 %vm14793_vm13, %v16914_v31  ;;  %10267 = vmatpush.msk.msra.mxu2 %vm14813_vm14, %v16914_v31 }
0x130b   :  { %8063 = vmatmul.f32.vlgmr.msra.gmra.mxu3 %v16919_v26 }
0x130c   :  { %10269 = vmatpush.msk.msra.mxu3 %vm14850_vm5, %v16914_v31  ;;  %8083 = vmatmul.f32.vlgmr.msra.gmra.mxu0 %v16920_v7 }
0x130d   :  { %8103 = vmatmul.f32.vlgmr.msra.gmra.mxu1 %v16921_v57  ;;  %8123 = vmatmul.f32.vlgmr.msrb.gmra.mxu2 %v16922_v33 }
0x130e   :  { %10270 = vmatpush.msk.msra.mxu3 %vm14874_vm3, %v16914_v31  ;;  %10272 = vmatpush.msk.msra.mxu0 %vm16923_vm12, %v16914_v31  ;;  %vm16951_vm12 = vcmask 1047559   ;;  %vm16952_vm3 = vcmask 130048  }
0x130f   :  { %10275 = vmatpush.msk.msra.mxu1 %vm16924_vm0, %v16914_v31  ;;  %10278 = vmatpush.msk.msrb.mxu2 %vm16925_vm7, %v16914_v31  ;;  %vm16929_vm7 = vcmask 1041409   ;;  %vm16933_vm0 = vcmask 1045509  }
0x1310   :  { %10273 = vmatpush.msk.msra.mxu0 %vm16926_vm1, %v16914_v31  ;;  %vm16930_vm1 = vcmask 1042434  }
0x1311   :  { %10276 = vmatpush.msk.msra.mxu1 %vm16927_vm2, %v16914_v31  ;;  %10279 = vmatpush.msk.msrb.mxu2 %vm16928_vm4, %v16914_v31  ;;  %vm16931_vm2 = vcmask 1043459   ;;  %vm16932_vm4 = vcmask 1044484  }
0x1371   :  { %v7784_v17 = vpop.f32.mrf.mxu0  ;;  %v7807_v34 = vpop.f32.mrf.mxu1 }
0x1372   :  { %v7934_v32 = vrot.slane %v7784_v17, 7  ;;  %v7936_v38 = vrot.slane %v7807_v34, 6  ;;  %v16938_v34 = vld [vmem:[#allocation96_spill] sm:$0xff] }
0x1375   :  { %v7761_v59 = vpop.f32.mrf.mxu3 }
0x1376   :  { %v7935_v46 = vsel %vm16929_vm7, %v7934_v32, %v7761_v59  ;;  %vm16935_vm7 = vcmask 1046534   ;;  %v16940_v32 = vld [vmem:[#allocation99_spill] sm:$0xff] }
0x1377   :  { %v7937_v62 = vsel %vm16930_vm1, %v7936_v38, %v7935_v46  ;;  %vm16936_vm1 = vcmask 1047559  }
0x1378   :  { %v7830_v1 = vpop.f32.mrf.mxu2 }
0x1379   :  { %v7876_v52 = vpop.f32.mrf.mxu0  ;;  %v7938_v0 = vrot.slane %v7830_v1, 5  ;;  %v16939_v1 = vld [vmem:[#allocation101_spill] sm:$0xff] }
0x137a   :  { %v7899_v51 = vpop.f32.mrf.mxu1  ;;  %v7942_v37 = vrot.slane %v7876_v52, 3 }
0x137b   :  { %v7939_v47 = vsel %vm16931_vm2, %v7938_v0, %v7937_v62  ;;  %v7944_v15 = vrot.slane %v7899_v51, 2  ;;  %vm16945_vm2 = vcmask 1042434  }
0x137e   :  { %v7853_v36 = vpop.f32.mrf.mxu3 }
0x137f   :  { %v7940_v28 = vrot.slane %v7853_v36, 4 }
0x1380   :  { %v7922_v25 = vpop.f32.mrf.mxu2 }
0x1381   :  { %v7941_v53 = vsel %vm16932_vm4, %v7940_v28, %v7939_v47  ;;  %v7946_v8 = vrot.slane %v7922_v25, 1  ;;  %v8004_v54 = vpop.f32.mrf.mxu0  ;;  %v16942_v28 = vld [vmem:[#allocation105_spill] sm:$0xff]  ;;  %v16943_v25 = vld [vmem:[#allocation103_spill] sm:$0xff]  ;;  %vm16947_vm4 = vcmask 1043459  }
0x1382   :  { %v7943_v45 = vsel %vm16933_vm0, %v7942_v37, %v7941_v53  ;;  %v8024_v49 = vpop.f32.mrf.mxu1  ;;  %v8128_v33 = vadd.f32 %v8004_v54, %v16937_v58  ;;  %vm16941_vm0 = vcmask 1041409   ;;  %v16944_v53 = vld [vmem:[#allocation102_spill] sm:$0xff] }
0x1383   :  { %v7945_v26 = vsel %vm16935_vm7, %v7944_v15, %v7943_v45  ;;  %v8129_v51 = vadd.f32 %v8024_v49, %v16940_v32  ;;  %vm16948_vm7 = vcmask 1044484  }
0x1384   :  { %v7947_v7 = vsel %vm16936_vm1, %v7946_v8, %v7945_v26  ;;  %v8145_v0 = vrot.slane %v8128_v33, 7  ;;  %v16946_v26 = vld [vmem:[#allocation104_spill] sm:$0xff]  ;;  %vm16949_vm1 = vcmask 1045509  }
0x1385   :  { %v7949_v57 = vadd.f32 %v7947_v7, %v7925_v60  ;;  %v8147_v37 = vrot.slane %v8129_v51, 6 }
0x1386   :  { %v7984_v27 = vpop.f32.mrf.mxu3 }
0x1387   :  { %10256 = vst [vmem:[%s16889_s27 + $0x8] sm:$0xff] %v7949_v57  ;;  %v8127_v59 = vadd.f32 %v7984_v27, %v16938_v34 }
0x1388   :  { %v8044_v17 = vpop.f32.mrf.mxu2 }
0x1389   :  { %v8130_v52 = vadd.f32 %v8044_v17, %v16939_v1  ;;  %v8084_v46 = vpop.f32.mrf.mxu0  ;;  %v8146_v36 = vsel %vm16941_vm0, %v8145_v0, %v8127_v59  ;;  %vm16950_vm0 = vcmask 1046534  }
0x138a   :  { %v8104_v38 = vpop.f32.mrf.mxu1  ;;  %v8132_v9 = vadd.f32 %v8084_v46, %v16942_v28  ;;  %v8148_v45 = vsel %vm16945_vm2, %v8147_v37, %v8146_v36  ;;  %v15190_v36 = vld [vmem:[%s15660_s14] ss:$0 sm:$0xff] }
0x138b   :  { %v8149_v62 = vrot.slane %v8130_v52, 5  ;;  %v8133_v15 = vadd.f32 %v8104_v38, %v16943_v25  ;;  %16953 = vst [vmem:[#allocation47_spill] sm:$0xff] %v15190_v36 }
0x138c   :  { %v8153_v57 = vrot.slane %v8132_v9, 3 }
0x138d   :  { %v8150_v7 = vsel %vm16947_vm4, %v8149_v62, %v8148_v45  ;;  %v8155_v27 = vrot.slane %v8133_v15, 2  ;;  %v16954_v62 = vld [vmem:[#allocation89_spill] sm:$0xff] }
0x138e   :  { %v8064_v47 = vpop.f32.mrf.mxu3  ;;  %v15194_v37 = vadd.f32 %v15190_v36, %v16954_v62 }
0x138f   :  { %v8131_v8 = vadd.f32 %v8064_v47, %v16944_v53 }
0x1390   :  { %v8124_v54 = vpop.f32.mrf.mxu2  ;;  %16955 = vst [vmem:[#allocation48_spill] sm:$0xff] %v15194_v37 }
0x1391   :  { %v8151_v60 = vrot.slane %v8131_v8, 4  ;;  %v8134_v49 = vadd.f32 %v8124_v54, %v16946_v26  ;;  %v8136_v54 = vpop.xlane.xlu1 %8135 }
0x1393   :  { %v8152_v17 = vsel %vm16948_vm7, %v8151_v60, %v8150_v7  ;;  %v8157_v0 = vrot.slane %v8134_v49, 1  ;;  %v16956_v7 = vld [vmem:[#allocation81_spill] sm:$0xff] }
0x1394   :  { %v8154_v46 = vsel %vm16949_vm1, %v8153_v57, %v8152_v17 }
0x1395   :  { %v8156_v28 = vsel %vm16950_vm0, %v8155_v27, %v8154_v46 }
0x1396   :  { %v8158_v38 = vsel %vm16951_vm12, %v8157_v0, %v8156_v28  ;;  %vm16958_vm12 = vmmov %vm16945_vm2 }
0x1397   :  { %v8160_v47 = vsel %vm16952_vm3, %v8158_v38, -inf  ;;  %vm16957_vm3 = vcmask 1041409   ;;  %vm16959_vm2 = vmmov %vm16947_vm4 }
0x1398   :  { %8161 = vmax.xlane.f32.xlu2 %v8160_v47  ;;  %vm16960_vm4 = vmmov %vm16948_vm7 }
0x1399   :  { %vm16961_vm7 = vmmov %vm16949_vm1 }
0x139a   :  { %vm16962_vm1 = vmmov %vm16950_vm0  ;;  %vm16963_vm0 = vcmask 1047559  }
0x13a0   :  { %8659 = vmax.xlane.f32.xlu2 %v15194_v37 }
0x140b   :  { %v8162_v45 = vpop.xlane.xlu2 %8161 }
0x140c   :  { %v8163_v60 = vmax.f32 %v8136_v54, %v8162_v45 }
0x140e   :  { %v8164_v57 = vsub.f32 %v16956_v7, %v8163_v60  ;;  %v8168_v28 = vrot.slane %v8163_v60, 1  ;;  %v8169_v27 = vrot.slane %v8163_v60, 2  ;;  %v8170_v17 = vrot.slane %v8163_v60, 3 }
0x140f   :  { %v8171_v0 = vrot.slane %v8163_v60, 4  ;;  %v8172_v46 = vrot.slane %v8163_v60, 5  ;;  %v8173_v38 = vrot.slane %v8163_v60, 6  ;;  %v8174_v47 = vrot.slane %v8163_v60, 7 }
0x1410   :  { %v8165_v26 = vmul.f32 1.442695, %v8164_v57  ;;  %v8183_v53 = vsub.f32 %v8127_v59, %v8163_v60  ;;  %v8184_v25 = vsub.f32 %v8128_v33, %v8168_v28  ;;  %v8185_v32 = vsub.f32 %v8129_v51, %v8169_v27 }
0x1411   :  { %v8186_v62 = vsub.f32 %v8130_v52, %v8170_v17  ;;  %v8187_v36 = vsub.f32 %v8131_v8, %v8171_v0  ;;  %v8188_v1 = vsub.f32 %v8132_v9, %v8172_v46  ;;  %v8189_v37 = vsub.f32 %v8133_v15, %v8173_v38 }
0x1412   :  { %10637 = vpow2.f32 %v8165_v26  ;;  %v8191_v34 = vmul.f32 1.442695, %v8183_v53  ;;  %v8193_v54 = vmul.f32 1.442695, %v8184_v25  ;;  %v8190_v45 = vsub.f32 %v8134_v49, %v8174_v47 }
0x1413   :  { %v8195_v7 = vmul.f32 1.442695, %v8185_v32  ;;  %v8197_v58 = vmul.f32 1.442695, %v8186_v62  ;;  %v8199_v12 = vmul.f32 1.442695, %v8187_v36 }
0x1414   :  { %10639 = vpow2.f32 %v8191_v34  ;;  %v8201_v5 = vmul.f32 1.442695, %v8188_v1  ;;  %v8203_v29 = vmul.f32 1.442695, %v8189_v37  ;;  %v8205_v59 = vmul.f32 1.442695, %v8190_v45 }
0x1415   :  { %10641 = vpow2.f32 %v8193_v54 }
0x1416   :  { %10643 = vpow2.f32 %v8195_v7 }
0x1417   :  { %10645 = vpow2.f32 %v8197_v58 }
0x1418   :  { %v15198_v33 = vpop.eup %10637  ;;  %10647 = vpow2.f32 %v8199_v12 }
0x1419   :  { %8207 = vadd.xlane.f32.xlu0 %v15198_v33  ;;  %10649 = vpow2.f32 %v8201_v5 }
0x141a   :  { %v10640_v52 = vpop.eup %10639  ;;  %10651 = vpow2.f32 %v8203_v29 }
0x141b   :  { %v10642_v51 = vpop.eup %10641  ;;  %10653 = vpow2.f32 %v8205_v59 }
0x141c   :  { %v10644_v32 = vpop.eup %10643  ;;  %v8217_v9 = vrot.slane %v10642_v51, 7 }
0x141d   :  { %v10646_v34 = vpop.eup %10645  ;;  %v8219_v25 = vrot.slane %v10644_v32, 6 }
0x141e   :  { %v10648_v15 = vpop.eup %10647  ;;  %v8218_v1 = vsel %vm16957_vm3, %v8217_v9, %v10640_v52  ;;  %v8221_v53 = vrot.slane %v10646_v34, 5  ;;  %vm16964_vm3 = vcmask 130048  }
0x141f   :  { %v10650_v58 = vpop.eup %10649  ;;  %v8220_v8 = vsel %vm16958_vm12, %v8219_v25, %v8218_v1  ;;  %v8223_v26 = vrot.slane %v10648_v15, 4  ;;  %vm16965_vm12 = vmmov %vm16964_vm3 }
0x1420   :  { %v10652_v12 = vpop.eup %10651  ;;  %v8222_v49 = vsel %vm16959_vm2, %v8221_v53, %v8220_v8  ;;  %v8225_v5 = vrot.slane %v10650_v58, 3  ;;  %vm16966_vm2 = vmmov %vm16964_vm3 }
0x1421   :  { %v10654_v36 = vpop.eup %10653  ;;  %v8224_v29 = vsel %vm16960_vm4, %v8223_v26, %v8222_v49  ;;  %v8227_v37 = vrot.slane %v10652_v12, 2  ;;  %vm16967_vm4 = vmmov %vm16966_vm2 }
0x1422   :  { %v8226_v60 = vsel %vm16961_vm7, %v8225_v5, %v8224_v29  ;;  %v8229_v57 = vrot.slane %v10654_v36, 1  ;;  %vm16968_vm7 = vmmov %vm16966_vm2 }
0x1423   :  { %v8228_v28 = vsel %vm16962_vm1, %v8227_v37, %v8226_v60  ;;  %vm16969_vm1 = vmmov %vm16966_vm2 }
0x1424   :  { %v8230_v27 = vsel %vm16963_vm0, %v8229_v57, %v8228_v28  ;;  %vm16970_vm0 = vmmov %vm16969_vm1 }
0x1425   :  { %v8232_v17 = vsel %vm16964_vm3, %v8230_v27, 0.0  ;;  %vm16971_vm3 = vmmov %vm16970_vm0  ;;  %v16986_v27 = vld [vmem:[#allocation85_spill] sm:$0xff] }
0x1426   :  { %8233 = vadd.xlane.f32.xlu1 %v8232_v17  ;;  %v16988_v17 = vld [vmem:[#allocation87_spill] sm:$0xff] }
0x148c   :  { %v8208_v0 = vpop.xlane.xlu0 %8207 }
0x1499   :  { %v8234_v46 = vpop.xlane.xlu1 %8233 }
0x149a   :  { %v8235_v38 = vadd.f32 %v8234_v46, %v8208_v0 }
0x149c   :  { %10655 = vrcp.f32 %v8235_v38 }
0x14a2   :  { %v10656_v47 = vpop.eup %10655 }
0x14a3   :  { %v8237_v62 = vmul.f32 %v10656_v47, %v8235_v38 }
0x14a5   :  { %v8238_v54 = vsub.f32 2.0, %v8237_v62 }
0x14a7   :  { %v15209_v45 = vmul.f32 %v10656_v47, %v8238_v54 }
0x14a9   :  { %v8257_v7 = vmul.f32 %v10640_v52, %v15209_v45  ;;  %v8242_v59 = vrot.slane %v15209_v45, 1  ;;  %v8243_v9 = vrot.slane %v15209_v45, 2  ;;  %v8244_v25 = vrot.slane %v15209_v45, 3 }
0x14aa   :  { %v8245_v52 = vrot.slane %v15209_v45, 4 }
0x14ab   :  { %10259 = vmatmul.msk.f32.vlgmr.msrb.gmra.mxu3 %vm16965_vm12, %v8257_v7  ;;  %v8258_v1 = vmul.f32 %v10642_v51, %v8242_v59  ;;  %v8259_v53 = vmul.f32 %v10644_v32, %v8243_v9  ;;  %v8260_v8 = vmul.f32 %v10646_v34, %v8244_v25  ;;  %v8246_v51 = vrot.slane %v15209_v45, 5  ;;  %vm16972_vm12 = vmmov %vm16970_vm0 }
0x14ac   :  { %8505 = vmatpush.xpose.msrb.mxu3 %v14425_v2  ;;  %v8247_v32 = vrot.slane %v15209_v45, 6  ;;  %v8248_v34 = vrot.slane %v15209_v45, 7  ;;  %v8261_v26 = vmul.f32 %v10648_v15, %v8245_v52  ;;  %v16973_v15 = vld [vmem:[#allocation184_spill] sm:$0xff]  ;;  %v8240_v52 = vmul.f32 %v15198_v33, %v15209_v45  ;;  %v16998_v45 = vld [vmem:[#allocation97_spill] sm:$0xff] }
0x14ad   :  { %10262 = vmatmul.msk.f32.vlgmr.msrb.gmra.mxu0 %vm16966_vm2, %v8258_v1  ;;  %10265 = vmatmul.msk.f32.vlgmr.msrb.gmra.mxu1 %vm16967_vm4, %v8259_v53  ;;  %v8262_v49 = vmul.f32 %v10650_v58, %v8246_v51  ;;  %v16974_v58 = vrot.slane %v16973_v15, 1  ;;  %v16977_v37 = vrot.slane %v16973_v15, 4  ;;  %v16978_v60 = vrot.slane %v16973_v15, 5 }
0x14ae   :  { %10268 = vmatmul.msk.f32.vlgmr.msra.gmra.mxu2 %vm16968_vm7, %v8260_v8  ;;  %8525 = vmatpush.xpose.msrb.mxu0 %v14438_v14  ;;  %v8263_v5 = vmul.f32 %v10652_v12, %v8247_v32  ;;  %v8264_v29 = vmul.f32 %v10654_v36, %v8248_v34  ;;  %v16975_v12 = vrot.slane %v16973_v15, 2  ;;  %v16976_v36 = vrot.slane %v16973_v15, 3 }
0x14af   :  { %8545 = vmatpush.xpose.msrb.mxu1 %v14452_v11  ;;  %8565 = vmatpush.xpose.msra.mxu2 %v14473_v18  ;;  %v16979_v57 = vrot.slane %v16973_v15, 6  ;;  %v16980_v28 = vrot.slane %v16973_v15, 7  ;;  %vm16981_vm2 = vnez %v16856_v22  ;;  %vm16982_vm4 = vnez %v16842_v40 }
0x14b0   :  { %8506 = vmatpush.xpose.msrb.mxu3 %v14432_v13  ;;  %vm16983_vm7 = vnez %v16858_v61 }
0x14b2   :  { %8526 = vmatpush.xpose.msrb.mxu0 %v14450_v48 }
0x14b3   :  { %8546 = vmatpush.xpose.msrb.mxu1 %v14463_v30  ;;  %8566 = vmatpush.xpose.msra.mxu2 %v14485_v24 }
0x14b4   :  { %10271 = vmatmul.msk.f32.vlgmr.msra.gmra.mxu3 %vm16969_vm1, %v8261_v26  ;;  %vm16984_vm1 = vnez %v16860_v20 }
0x14b5   :  { %8585 = vmatpush.xpose.msra.mxu3 %v14506_v50  ;;  %10274 = vmatmul.msk.f32.vlgmr.msra.gmra.mxu0 %vm16970_vm0, %v8262_v49  ;;  %vm16985_vm0 = vnez %v16854_v23 }
0x14b6   :  { %10277 = vmatmul.msk.f32.vlgmr.msra.gmra.mxu1 %vm16971_vm3, %v8263_v5  ;;  %10280 = vmatmul.msk.f32.vlgmr.msrb.gmra.mxu2 %vm16972_vm12, %v8264_v29  ;;  %vm16987_vm3 = vnez %v16986_v27  ;;  %vm16989_vm12 = vnez %v16988_v17 }
0x14b7   :  { %8605 = vmatpush.xpose.msra.mxu0 %v14514_v43  ;;  %8625 = vmatpush.xpose.msra.mxu1 %v14497_v56 }
0x14b8   :  { %8645 = vmatpush.xpose.msrb.mxu2 %v14528_v4 }
0x14b9   :  { %8586 = vmatpush.xpose.msra.mxu3 %v14521_v44 }
0x14bb   :  { %8606 = vmatpush.xpose.msra.mxu0 %v16912_v10  ;;  %8626 = vmatpush.xpose.msra.mxu1 %v14510_v6 }
0x14bc   :  { %8646 = vmatpush.xpose.msrb.mxu2 %v14537_v35  ;;  %8507 = vmatmul.f32.vlgmr.msrb.gmra.mxu3 %v16973_v15 }
0x14bd   :  { %10282 = vmatpush.msk.msrb.mxu3 %vm14734_vm9, %v16914_v31  ;;  %8527 = vmatmul.f32.vlgmr.msrb.gmra.mxu0 %v16974_v58 }
0x14be   :  { %8547 = vmatmul.f32.vlgmr.msrb.gmra.mxu1 %v16975_v12  ;;  %8567 = vmatmul.f32.vlgmr.msra.gmra.mxu2 %v16976_v36  ;;  %v16995_v12 = vld [vmem:[#allocation74_spill] sm:$0xff] }
0x14bf   :  { %10283 = vmatpush.msk.msrb.mxu3 %vm14739_vm10, %v16914_v31  ;;  %10285 = vmatpush.msk.msrb.mxu0 %vm14825_vm15, %v16914_v31  ;;  %v8449_v36 = vadd.f32 %v8240_v52, %v16995_v12 }
0x14c0   :  { %10288 = vmatpush.msk.msrb.mxu1 %vm14729_vm8, %v16914_v31  ;;  %10291 = vmatpush.msk.msra.mxu2 %vm14747_vm11, %v16914_v31 }
0x14c1   :  { %10286 = vmatpush.msk.msrb.mxu0 %vm16918_vm6, %v16914_v31 }
0x14c2   :  { %10289 = vmatpush.msk.msrb.mxu1 %vm14793_vm13, %v16914_v31  ;;  %10292 = vmatpush.msk.msra.mxu2 %vm14813_vm14, %v16914_v31 }
0x14c4   :  { %8587 = vmatmul.f32.vlgmr.msra.gmra.mxu3 %v16977_v37 }
0x14c5   :  { %10294 = vmatpush.msk.msra.mxu3 %vm14850_vm5, %v16914_v31  ;;  %8607 = vmatmul.f32.vlgmr.msra.gmra.mxu0 %v16978_v60 }
0x14c6   :  { %8627 = vmatmul.f32.vlgmr.msra.gmra.mxu1 %v16979_v57  ;;  %8647 = vmatmul.f32.vlgmr.msrb.gmra.mxu2 %v16980_v28 }
0x14c7   :  { %10295 = vmatpush.msk.msra.mxu3 %vm16981_vm2, %v16914_v31  ;;  %10297 = vmatpush.msk.msra.mxu0 %vm16982_vm4, %v16914_v31  ;;  %vm17012_vm4 = vcmask 1047559   ;;  %vm17013_vm2 = vcmask 130048  }
0x14c8   :  { %10300 = vmatpush.msk.msra.mxu1 %vm16983_vm7, %v16914_v31  ;;  %10303 = vmatpush.msk.msrb.mxu2 %vm16984_vm1, %v16914_v31  ;;  %vm16990_vm1 = vcmask 1041409   ;;  %vm16994_vm7 = vcmask 1045509  }
0x14c9   :  { %10298 = vmatpush.msk.msra.mxu0 %vm16985_vm0, %v16914_v31  ;;  %vm16991_vm0 = vcmask 1042434  }
0x14ca   :  { %10301 = vmatpush.msk.msra.mxu1 %vm16987_vm3, %v16914_v31  ;;  %10304 = vmatpush.msk.msrb.mxu2 %vm16989_vm12, %v16914_v31  ;;  %vm16992_vm3 = vcmask 1043459   ;;  %vm16993_vm12 = vcmask 1044484  }
0x152a   :  { %v8308_v0 = vpop.f32.mrf.mxu0  ;;  %v8331_v46 = vpop.f32.mrf.mxu1 }
0x152b   :  { %v8458_v54 = vrot.slane %v8308_v0, 7  ;;  %v8460_v25 = vrot.slane %v8331_v46, 6  ;;  %v16999_v46 = vld [vmem:[#allocation96_spill] sm:$0xff] }
0x152e   :  { %v8285_v38 = vpop.f32.mrf.mxu3 }
0x152f   :  { %v8459_v59 = vsel %vm16990_vm1, %v8458_v54, %v8285_v38  ;;  %vm16996_vm1 = vcmask 1046534   ;;  %v17001_v54 = vld [vmem:[#allocation99_spill] sm:$0xff] }
0x1530   :  { %v8461_v53 = vsel %vm16991_vm0, %v8460_v25, %v8459_v59  ;;  %vm16997_vm0 = vcmask 1047559  }
0x1531   :  { %v8354_v47 = vpop.f32.mrf.mxu2 }
0x1532   :  { %v8400_v62 = vpop.f32.mrf.mxu0  ;;  %v8462_v9 = vrot.slane %v8354_v47, 5  ;;  %v17000_v47 = vld [vmem:[#allocation101_spill] sm:$0xff] }
0x1533   :  { %v8423_v7 = vpop.f32.mrf.mxu1  ;;  %v8466_v32 = vrot.slane %v8400_v62, 3 }
0x1534   :  { %v8463_v51 = vsel %vm16992_vm3, %v8462_v9, %v8461_v53  ;;  %v8468_v26 = vrot.slane %v8423_v7, 2  ;;  %vm17006_vm3 = vcmask 1042434  }
0x1537   :  { %v8377_v1 = vpop.f32.mrf.mxu3 }
0x1538   :  { %v8464_v8 = vrot.slane %v8377_v1, 4 }
0x1539   :  { %v8446_v34 = vpop.f32.mrf.mxu2 }
0x153a   :  { %v8465_v49 = vsel %vm16993_vm12, %v8464_v8, %v8463_v51  ;;  %v8470_v5 = vrot.slane %v8446_v34, 1  ;;  %v8528_v29 = vpop.f32.mrf.mxu0  ;;  %v17003_v8 = vld [vmem:[#allocation105_spill] sm:$0xff]  ;;  %v17004_v34 = vld [vmem:[#allocation103_spill] sm:$0xff]  ;;  %vm17008_vm12 = vcmask 1043459  }
0x153b   :  { %v8467_v15 = vsel %vm16994_vm7, %v8466_v32, %v8465_v49  ;;  %v8548_v58 = vpop.f32.mrf.mxu1  ;;  %v8652_v28 = vadd.f32 %v8528_v29, %v16998_v45  ;;  %vm17002_vm7 = vcmask 1041409   ;;  %v17005_v49 = vld [vmem:[#allocation102_spill] sm:$0xff] }
0x153c   :  { %v8469_v37 = vsel %vm16996_vm1, %v8468_v26, %v8467_v15  ;;  %v8653_v7 = vadd.f32 %v8548_v58, %v17001_v54  ;;  %vm17009_vm1 = vcmask 1044484  }
0x153d   :  { %v8471_v60 = vsel %vm16997_vm0, %v8470_v5, %v8469_v37  ;;  %v8669_v9 = vrot.slane %v8652_v28, 7  ;;  %v17007_v37 = vld [vmem:[#allocation104_spill] sm:$0xff]  ;;  %vm17010_vm0 = vcmask 1045509  }
0x153e   :  { %v8473_v57 = vadd.f32 %v8471_v60, %v8449_v36  ;;  %v8671_v32 = vrot.slane %v8653_v7, 6 }
0x153f   :  { %v8508_v33 = vpop.f32.mrf.mxu3 }
0x1540   :  { %10281 = vst [vmem:[%s16889_s27 + $0x10] sm:$0xff] %v8473_v57  ;;  %v8651_v38 = vadd.f32 %v8508_v33, %v16999_v46 }
0x1541   :  { %v8568_v0 = vpop.f32.mrf.mxu2 }
0x1542   :  { %v8654_v62 = vadd.f32 %v8568_v0, %v17000_v47  ;;  %v8608_v59 = vpop.f32.mrf.mxu0  ;;  %v8670_v1 = vsel %vm17002_vm7, %v8669_v9, %v8651_v38  ;;  %vm17011_vm7 = vcmask 1046534  }
0x1543   :  { %v8628_v25 = vpop.f32.mrf.mxu1  ;;  %v8656_v52 = vadd.f32 %v8608_v59, %v17003_v8  ;;  %v8672_v15 = vsel %vm17006_vm3, %v8671_v32, %v8670_v1  ;;  %v17014_v1 = vld [vmem:[#allocation14_spill] sm:$0xff]  ;;  %v17015_v32 = vld [vmem:[#allocation47_spill] sm:$0xff] }
0x1544   :  { %v8673_v53 = vrot.slane %v8654_v62, 5  ;;  %v8657_v26 = vadd.f32 %v8628_v25, %v17004_v34 }
0x1545   :  { %v8677_v57 = vrot.slane %v8656_v52, 3 }
0x1546   :  { %v8674_v60 = vsel %vm17008_vm12, %v8673_v53, %v8672_v15  ;;  %v8679_v33 = vrot.slane %v8657_v26, 2  ;;  %v8660_v53 = vpop.xlane.xlu2 %8659 }
0x1547   :  { %v8588_v51 = vpop.f32.mrf.mxu3 }
0x1548   :  { %v8655_v5 = vadd.f32 %v8588_v51, %v17005_v49  ;;  %v15337_v49 = vadd.f32 %v17015_v32, %v17014_v1 }
0x1549   :  { %v8648_v29 = vpop.f32.mrf.mxu2 }
0x154a   :  { %v8675_v36 = vrot.slane %v8655_v5, 4  ;;  %v8658_v58 = vadd.f32 %v8648_v29, %v17007_v37  ;;  %17016 = vst [vmem:[#allocation56_spill] sm:$0xff] %v15337_v49 }
0x154c   :  { %v8676_v0 = vsel %vm17009_vm1, %v8675_v36, %v8674_v60  ;;  %v8681_v9 = vrot.slane %v8658_v58, 1  ;;  %v17017_v36 = vld [vmem:[#allocation48_spill] sm:$0xff] }
0x154d   :  { %v8678_v59 = vsel %vm17010_vm0, %v8677_v57, %v8676_v0 }
0x154e   :  { %v8680_v8 = vsel %vm17011_vm7, %v8679_v33, %v8678_v59 }
0x154f   :  { %v8682_v25 = vsel %vm17012_vm4, %v8681_v9, %v8680_v8  ;;  %vm17019_vm4 = vmmov %vm17006_vm3 }
0x1550   :  { %v8684_v51 = vsel %vm17013_vm2, %v8682_v25, -inf  ;;  %vm17018_vm2 = vcmask 1041409   ;;  %vm17020_vm3 = vmmov %vm17008_vm12 }
0x1551   :  { %8685 = vmax.xlane.f32.xlu0 %v8684_v51  ;;  %vm17021_vm12 = vmmov %vm17009_vm1 }
0x1552   :  { %vm17022_vm1 = vmmov %vm17010_vm0 }
0x1553   :  { %vm17023_vm0 = vmmov %vm17011_vm7  ;;  %vm17024_vm7 = vcmask 1047559  }
0x1559   :  { %9183 = vmax.xlane.f32.xlu0 %v15337_v49 }
0x15c4   :  { %v8686_v29 = vpop.xlane.xlu0 %8685 }
0x15c5   :  { %v8687_v15 = vmax.f32 %v8660_v53, %v8686_v29 }
0x15c7   :  { %v8688_v60 = vsub.f32 %v17017_v36, %v8687_v15  ;;  %v8692_v37 = vrot.slane %v8687_v15, 1  ;;  %v8693_v57 = vrot.slane %v8687_v15, 2  ;;  %v8694_v0 = vrot.slane %v8687_v15, 3 }
0x15c8   :  { %v8695_v33 = vrot.slane %v8687_v15, 4  ;;  %v8696_v59 = vrot.slane %v8687_v15, 5  ;;  %v8697_v8 = vrot.slane %v8687_v15, 6  ;;  %v8698_v9 = vrot.slane %v8687_v15, 7 }
0x15c9   :  { %v8689_v25 = vmul.f32 1.442695, %v8688_v60  ;;  %v8707_v51 = vsub.f32 %v8651_v38, %v8687_v15  ;;  %v8708_v34 = vsub.f32 %v8652_v28, %v8692_v37  ;;  %v8709_v54 = vsub.f32 %v8653_v7, %v8693_v57 }
0x15ca   :  { %v8710_v1 = vsub.f32 %v8654_v62, %v8694_v0  ;;  %v8711_v32 = vsub.f32 %v8655_v5, %v8695_v33  ;;  %v8712_v47 = vsub.f32 %v8656_v52, %v8696_v59  ;;  %v8713_v49 = vsub.f32 %v8657_v26, %v8697_v8 }
0x15cb   :  { %10657 = vpow2.f32 %v8689_v25  ;;  %v8715_v46 = vmul.f32 1.442695, %v8707_v51  ;;  %v8717_v53 = vmul.f32 1.442695, %v8708_v34  ;;  %v8714_v29 = vsub.f32 %v8658_v58, %v8698_v9 }
0x15cc   :  { %v8719_v36 = vmul.f32 1.442695, %v8709_v54  ;;  %v8721_v45 = vmul.f32 1.442695, %v8710_v1  ;;  %v8723_v12 = vmul.f32 1.442695, %v8711_v32 }
0x15cd   :  { %10659 = vpow2.f32 %v8715_v46  ;;  %v8725_v17 = vmul.f32 1.442695, %v8712_v47  ;;  %v8727_v27 = vmul.f32 1.442695, %v8713_v49  ;;  %v8729_v38 = vmul.f32 1.442695, %v8714_v29 }
0x15ce   :  { %10661 = vpow2.f32 %v8717_v53 }
0x15cf   :  { %10663 = vpow2.f32 %v8719_v36 }
0x15d0   :  { %10665 = vpow2.f32 %v8721_v45 }
0x15d1   :  { %v15341_v28 = vpop.eup %10657  ;;  %10667 = vpow2.f32 %v8723_v12 }
0x15d2   :  { %8731 = vadd.xlane.f32.xlu1 %v15341_v28  ;;  %10669 = vpow2.f32 %v8725_v17 }
0x15d3   :  { %v10660_v62 = vpop.eup %10659  ;;  %10671 = vpow2.f32 %v8727_v27 }
0x15d4   :  { %v10662_v7 = vpop.eup %10661  ;;  %10673 = vpow2.f32 %v8729_v38 }
0x15d5   :  { %v10664_v54 = vpop.eup %10663  ;;  %v8741_v52 = vrot.slane %v10662_v7, 7 }
0x15d6   :  { %v10666_v46 = vpop.eup %10665  ;;  %v8743_v34 = vrot.slane %v10664_v54, 6 }
0x15d7   :  { %v10668_v26 = vpop.eup %10667  ;;  %v8742_v47 = vsel %vm17018_vm2, %v8741_v52, %v10660_v62  ;;  %v8745_v49 = vrot.slane %v10666_v46, 5  ;;  %vm17025_vm2 = vcmask 130048  }
0x15d8   :  { %v10670_v45 = vpop.eup %10669  ;;  %v8744_v5 = vsel %vm17019_vm4, %v8743_v34, %v8742_v47  ;;  %v8747_v37 = vrot.slane %v10668_v26, 4  ;;  %vm17026_vm4 = vmmov %vm17025_vm2 }
0x15d9   :  { %v10672_v12 = vpop.eup %10671  ;;  %v8746_v58 = vsel %vm17020_vm3, %v8745_v49, %v8744_v5  ;;  %v8749_v17 = vrot.slane %v10670_v45, 3  ;;  %vm17027_vm3 = vmmov %vm17025_vm2 }
0x15da   :  { %v10674_v32 = vpop.eup %10673  ;;  %v8748_v27 = vsel %vm17021_vm12, %v8747_v37, %v8746_v58  ;;  %v8751_v15 = vrot.slane %v10672_v12, 2  ;;  %vm17028_vm12 = vmmov %vm17025_vm2 }
0x15db   :  { %v8750_v60 = vsel %vm17022_vm1, %v8749_v17, %v8748_v27  ;;  %v8753_v57 = vrot.slane %v10674_v32, 1  ;;  %vm17029_vm1 = vmmov %vm17025_vm2 }
0x15dc   :  { %v8752_v0 = vsel %vm17023_vm0, %v8751_v15, %v8750_v60  ;;  %vm17030_vm0 = vmmov %vm17029_vm1 }
0x15dd   :  { %v8754_v33 = vsel %vm17024_vm7, %v8753_v57, %v8752_v0  ;;  %vm17031_vm7 = vmmov %vm17030_vm0 }
0x15de   :  { %v8756_v59 = vsel %vm17025_vm2, %v8754_v33, 0.0  ;;  %vm17032_vm2 = vmmov %vm17030_vm0  ;;  %v17047_v33 = vld [vmem:[#allocation85_spill] sm:$0xff] }
0x15df   :  { %8757 = vadd.xlane.f32.xlu2 %v8756_v59  ;;  %v17049_v59 = vld [vmem:[#allocation87_spill] sm:$0xff] }
0x1645   :  { %v8732_v8 = vpop.xlane.xlu1 %8731 }
0x1652   :  { %v8758_v9 = vpop.xlane.xlu2 %8757 }
0x1653   :  { %v8759_v25 = vadd.f32 %v8758_v9, %v8732_v8 }
0x1655   :  { %10675 = vrcp.f32 %v8759_v25 }
0x165b   :  { %v10676_v51 = vpop.eup %10675 }
0x165c   :  { %v8761_v1 = vmul.f32 %v10676_v51, %v8759_v25 }
0x165e   :  { %v8762_v53 = vsub.f32 2.0, %v8761_v1 }
0x1660   :  { %v15352_v29 = vmul.f32 %v10676_v51, %v8762_v53 }
0x1662   :  { %v8781_v36 = vmul.f32 %v10660_v62, %v15352_v29  ;;  %v8766_v38 = vrot.slane %v15352_v29, 1  ;;  %v8767_v52 = vrot.slane %v15352_v29, 2  ;;  %v8768_v34 = vrot.slane %v15352_v29, 3 }
0x1663   :  { %v8769_v62 = vrot.slane %v15352_v29, 4 }
0x1664   :  { %10284 = vmatmul.msk.f32.vlgmr.msrb.gmra.mxu3 %vm17026_vm4, %v8781_v36  ;;  %v8782_v47 = vmul.f32 %v10662_v7, %v8766_v38  ;;  %v8783_v49 = vmul.f32 %v10664_v54, %v8767_v52  ;;  %v8784_v5 = vmul.f32 %v10666_v46, %v8768_v34  ;;  %v8770_v7 = vrot.slane %v15352_v29, 5  ;;  %vm17033_vm4 = vmmov %vm17030_vm0 }
0x1665   :  { %9029 = vmatpush.xpose.msrb.mxu3 %v14425_v2  ;;  %v8771_v54 = vrot.slane %v15352_v29, 6  ;;  %v8772_v46 = vrot.slane %v15352_v29, 7  ;;  %v8785_v37 = vmul.f32 %v10668_v26, %v8769_v62  ;;  %v17034_v26 = vld [vmem:[#allocation185_spill] sm:$0xff]  ;;  %v8764_v62 = vmul.f32 %v15341_v28, %v15352_v29 }
0x1666   :  { %10287 = vmatmul.msk.f32.vlgmr.msrb.gmra.mxu0 %vm17027_vm3, %v8782_v47  ;;  %10290 = vmatmul.msk.f32.vlgmr.msrb.gmra.mxu1 %vm17028_vm12, %v8783_v49  ;;  %v8786_v58 = vmul.f32 %v10670_v45, %v8770_v7  ;;  %v17035_v45 = vrot.slane %v17034_v26, 1  ;;  %v17038_v15 = vrot.slane %v17034_v26, 4  ;;  %v17039_v60 = vrot.slane %v17034_v26, 5  ;;  %v17059_v29 = vld [vmem:[#allocation97_spill] sm:$0xff] }
0x1667   :  { %10293 = vmatmul.msk.f32.vlgmr.msra.gmra.mxu2 %vm17029_vm1, %v8784_v5  ;;  %9049 = vmatpush.xpose.msrb.mxu0 %v14438_v14  ;;  %v8787_v17 = vmul.f32 %v10672_v12, %v8771_v54  ;;  %v8788_v27 = vmul.f32 %v10674_v32, %v8772_v46  ;;  %v17036_v12 = vrot.slane %v17034_v26, 2  ;;  %v17037_v32 = vrot.slane %v17034_v26, 3 }
0x1668   :  { %9069 = vmatpush.xpose.msrb.mxu1 %v14452_v11  ;;  %9089 = vmatpush.xpose.msra.mxu2 %v14473_v18  ;;  %v17040_v57 = vrot.slane %v17034_v26, 6  ;;  %v17041_v0 = vrot.slane %v17034_v26, 7  ;;  %vm17042_vm3 = vnez %v16856_v22  ;;  %vm17043_vm12 = vnez %v16842_v40 }
0x1669   :  { %9030 = vmatpush.xpose.msrb.mxu3 %v14432_v13  ;;  %vm17044_vm1 = vnez %v16858_v61 }
0x166b   :  { %9050 = vmatpush.xpose.msrb.mxu0 %v14450_v48 }
0x166c   :  { %9070 = vmatpush.xpose.msrb.mxu1 %v14463_v30  ;;  %9090 = vmatpush.xpose.msra.mxu2 %v14485_v24 }
0x166d   :  { %10296 = vmatmul.msk.f32.vlgmr.msra.gmra.mxu3 %vm17030_vm0, %v8785_v37  ;;  %vm17045_vm0 = vnez %v16860_v20 }
0x166e   :  { %9109 = vmatpush.xpose.msra.mxu3 %v14506_v50  ;;  %10299 = vmatmul.msk.f32.vlgmr.msra.gmra.mxu0 %vm17031_vm7, %v8786_v58  ;;  %vm17046_vm7 = vnez %v16854_v23 }
0x166f   :  { %10302 = vmatmul.msk.f32.vlgmr.msra.gmra.mxu1 %vm17032_vm2, %v8787_v17  ;;  %10305 = vmatmul.msk.f32.vlgmr.msrb.gmra.mxu2 %vm17033_vm4, %v8788_v27  ;;  %vm17048_vm2 = vnez %v17047_v33  ;;  %vm17050_vm4 = vnez %v17049_v59 }
0x1670   :  { %9129 = vmatpush.xpose.msra.mxu0 %v14514_v43  ;;  %9149 = vmatpush.xpose.msra.mxu1 %v14497_v56 }
0x1671   :  { %9169 = vmatpush.xpose.msrb.mxu2 %v14528_v4 }
0x1672   :  { %9110 = vmatpush.xpose.msra.mxu3 %v14521_v44 }
0x1674   :  { %9130 = vmatpush.xpose.msra.mxu0 %v16912_v10  ;;  %9150 = vmatpush.xpose.msra.mxu1 %v14510_v6 }
0x1675   :  { %9170 = vmatpush.xpose.msrb.mxu2 %v14537_v35  ;;  %9031 = vmatmul.f32.vlgmr.msrb.gmra.mxu3 %v17034_v26 }
0x1676   :  { %10307 = vmatpush.msk.msrb.mxu3 %vm14734_vm9, %v16914_v31  ;;  %9051 = vmatmul.f32.vlgmr.msrb.gmra.mxu0 %v17035_v45 }
0x1677   :  { %9071 = vmatmul.f32.vlgmr.msrb.gmra.mxu1 %v17036_v12  ;;  %9091 = vmatmul.f32.vlgmr.msra.gmra.mxu2 %v17037_v32  ;;  %v17056_v12 = vld [vmem:[#allocation74_spill] sm:$0xff] }
0x1678   :  { %10308 = vmatpush.msk.msrb.mxu3 %vm14739_vm10, %v16914_v31  ;;  %10310 = vmatpush.msk.msrb.mxu0 %vm14825_vm15, %v16914_v31  ;;  %v8973_v32 = vadd.f32 %v8764_v62, %v17056_v12 }
0x1679   :  { %10313 = vmatpush.msk.msrb.mxu1 %vm14729_vm8, %v16914_v31  ;;  %10316 = vmatpush.msk.msra.mxu2 %vm14747_vm11, %v16914_v31 }
0x167a   :  { %10311 = vmatpush.msk.msrb.mxu0 %vm16918_vm6, %v16914_v31 }
0x167b   :  { %10314 = vmatpush.msk.msrb.mxu1 %vm14793_vm13, %v16914_v31  ;;  %10317 = vmatpush.msk.msra.mxu2 %vm14813_vm14, %v16914_v31 }
0x167d   :  { %9111 = vmatmul.f32.vlgmr.msra.gmra.mxu3 %v17038_v15 }
0x167e   :  { %10319 = vmatpush.msk.msra.mxu3 %vm14850_vm5, %v16914_v31  ;;  %9131 = vmatmul.f32.vlgmr.msra.gmra.mxu0 %v17039_v60 }
0x167f   :  { %9151 = vmatmul.f32.vlgmr.msra.gmra.mxu1 %v17040_v57  ;;  %9171 = vmatmul.f32.vlgmr.msrb.gmra.mxu2 %v17041_v0 }
0x1680   :  { %10320 = vmatpush.msk.msra.mxu3 %vm17042_vm3, %v16914_v31  ;;  %10322 = vmatpush.msk.msra.mxu0 %vm17043_vm12, %v16914_v31  ;;  %vm17073_vm12 = vcmask 1047559   ;;  %vm17074_vm3 = vcmask 130048  }
0x1681   :  { %10325 = vmatpush.msk.msra.mxu1 %vm17044_vm1, %v16914_v31  ;;  %10328 = vmatpush.msk.msrb.mxu2 %vm17045_vm0, %v16914_v31  ;;  %vm17051_vm0 = vcmask 1041409   ;;  %vm17055_vm1 = vcmask 1045509  }
0x1682   :  { %10323 = vmatpush.msk.msra.mxu0 %vm17046_vm7, %v16914_v31  ;;  %vm17052_vm7 = vcmask 1042434  }
0x1683   :  { %10326 = vmatpush.msk.msra.mxu1 %vm17048_vm2, %v16914_v31  ;;  %10329 = vmatpush.msk.msrb.mxu2 %vm17050_vm4, %v16914_v31  ;;  %vm17053_vm2 = vcmask 1043459   ;;  %vm17054_vm4 = vcmask 1044484  }
0x16e3   :  { %v8832_v8 = vpop.f32.mrf.mxu0  ;;  %v8855_v9 = vpop.f32.mrf.mxu1 }
0x16e4   :  { %v8982_v53 = vrot.slane %v8832_v8, 7  ;;  %v8984_v34 = vrot.slane %v8855_v9, 6  ;;  %v17060_v9 = vld [vmem:[#allocation96_spill] sm:$0xff] }
0x16e7   :  { %v8809_v25 = vpop.f32.mrf.mxu3 }
0x16e8   :  { %v8983_v38 = vsel %vm17051_vm0, %v8982_v53, %v8809_v25  ;;  %vm17057_vm0 = vcmask 1046534   ;;  %v17062_v53 = vld [vmem:[#allocation99_spill] sm:$0xff] }
0x16e9   :  { %v8985_v49 = vsel %vm17052_vm7, %v8984_v34, %v8983_v38  ;;  %vm17058_vm7 = vcmask 1047559  }
0x16ea   :  { %v8878_v51 = vpop.f32.mrf.mxu2 }
0x16eb   :  { %v8924_v1 = vpop.f32.mrf.mxu0  ;;  %v8986_v52 = vrot.slane %v8878_v51, 5  ;;  %v17061_v51 = vld [vmem:[#allocation101_spill] sm:$0xff] }
0x16ec   :  { %v8947_v36 = vpop.f32.mrf.mxu1  ;;  %v8990_v54 = vrot.slane %v8924_v1, 3 }
0x16ed   :  { %v8987_v7 = vsel %vm17053_vm2, %v8986_v52, %v8985_v49  ;;  %v8992_v37 = vrot.slane %v8947_v36, 2  ;;  %vm17067_vm2 = vcmask 1042434  }
0x16f0   :  { %v8901_v47 = vpop.f32.mrf.mxu3 }
0x16f1   :  { %v8988_v5 = vrot.slane %v8901_v47, 4 }
0x16f2   :  { %v8970_v46 = vpop.f32.mrf.mxu2 }
0x16f3   :  { %v8989_v58 = vsel %vm17054_vm4, %v8988_v5, %v8987_v7  ;;  %v8994_v17 = vrot.slane %v8970_v46, 1  ;;  %v9052_v27 = vpop.f32.mrf.mxu0  ;;  %v17064_v5 = vld [vmem:[#allocation105_spill] sm:$0xff]  ;;  %v17065_v46 = vld [vmem:[#allocation103_spill] sm:$0xff]  ;;  %vm17069_vm4 = vcmask 1043459  }
0x16f4   :  { %v8991_v26 = vsel %vm17055_vm1, %v8990_v54, %v8989_v58  ;;  %v9072_v45 = vpop.f32.mrf.mxu1  ;;  %v9176_v0 = vadd.f32 %v9052_v27, %v17059_v29  ;;  %vm17063_vm1 = vcmask 1041409   ;;  %v17066_v58 = vld [vmem:[#allocation102_spill] sm:$0xff] }
0x16f5   :  { %v8993_v15 = vsel %vm17057_vm0, %v8992_v37, %v8991_v26  ;;  %v9177_v36 = vadd.f32 %v9072_v45, %v17062_v53  ;;  %vm17070_vm0 = vcmask 1044484  }
0x16f6   :  { %v8995_v60 = vsel %vm17058_vm7, %v8994_v17, %v8993_v15  ;;  %v9193_v52 = vrot.slane %v9176_v0, 7  ;;  %v17068_v15 = vld [vmem:[#allocation104_spill] sm:$0xff]  ;;  %vm17071_vm7 = vcmask 1045509  }
0x16f7   :  { %v8997_v57 = vadd.f32 %v8995_v60, %v8973_v32  ;;  %v9195_v54 = vrot.slane %v9177_v36, 6 }
0x16f8   :  { %v9032_v28 = vpop.f32.mrf.mxu3 }
0x16f9   :  { %10306 = vst [vmem:[%s16889_s27 + $0x18] sm:$0xff] %v8997_v57  ;;  %v9175_v25 = vadd.f32 %v9032_v28, %v17060_v9 }
0x16fa   :  { %v9092_v8 = vpop.f32.mrf.mxu2 }
0x16fb   :  { %v9178_v1 = vadd.f32 %v9092_v8, %v17061_v51  ;;  %v9132_v38 = vpop.f32.mrf.mxu0  ;;  %v9194_v47 = vsel %vm17063_vm1, %v9193_v52, %v9175_v25  ;;  %vm17072_vm1 = vcmask 1046534  }
0x16fc   :  { %v9152_v34 = vpop.f32.mrf.mxu1  ;;  %v9180_v62 = vadd.f32 %v9132_v38, %v17064_v5  ;;  %v9196_v26 = vsel %vm17067_vm2, %v9195_v54, %v9194_v47  ;;  %v17075_v47 = vld [vmem:[#allocation76_spill] sm:$0xff]  ;;  %v17076_v54 = vld [vmem:[#allocation47_spill] sm:$0xff] }
0x16fd   :  { %v9197_v49 = vrot.slane %v9178_v1, 5  ;;  %v9181_v37 = vadd.f32 %v9152_v34, %v17065_v46 }
0x16fe   :  { %v9201_v57 = vrot.slane %v9180_v62, 3 }
0x16ff   :  { %v9198_v60 = vsel %vm17069_vm4, %v9197_v49, %v9196_v26  ;;  %v9203_v28 = vrot.slane %v9181_v37, 2  ;;  %v9184_v49 = vpop.xlane.xlu0 %9183 }
0x1700   :  { %v9112_v7 = vpop.f32.mrf.mxu3 }
0x1701   :  { %v9179_v17 = vadd.f32 %v9112_v7, %v17066_v58  ;;  %v15480_v58 = vadd.f32 %v17076_v54, %v17075_v47 }
0x1702   :  { %v9172_v27 = vpop.f32.mrf.mxu2 }
0x1703   :  { %v9199_v32 = vrot.slane %v9179_v17, 4  ;;  %v9182_v45 = vadd.f32 %v9172_v27, %v17068_v15  ;;  %17077 = vst [vmem:[#allocation77_spill] sm:$0xff] %v15480_v58 }
0x1705   :  { %v9200_v8 = vsel %vm17070_vm0, %v9199_v32, %v9198_v60  ;;  %v9205_v52 = vrot.slane %v9182_v45, 1  ;;  %v17078_v32 = vld [vmem:[#allocation56_spill] sm:$0xff] }
0x1706   :  { %v9202_v38 = vsel %vm17071_vm7, %v9201_v57, %v9200_v8 }
0x1707   :  { %v9204_v5 = vsel %vm17072_vm1, %v9203_v28, %v9202_v38 }
0x1708   :  { %v9206_v34 = vsel %vm17073_vm12, %v9205_v52, %v9204_v5  ;;  %vm17080_vm12 = vmmov %vm17067_vm2 }
0x1709   :  { %v9208_v7 = vsel %vm17074_vm3, %v9206_v34, -inf  ;;  %vm17079_vm3 = vcmask 1041409   ;;  %vm17081_vm2 = vmmov %vm17069_vm4 }
0x170a   :  { %9209 = vmax.xlane.f32.xlu1 %v9208_v7  ;;  %vm17082_vm4 = vmmov %vm17070_vm0 }
0x170b   :  { %vm17083_vm0 = vmmov %vm17071_vm7 }
0x170c   :  { %vm17084_vm7 = vmmov %vm17072_vm1  ;;  %vm17085_vm1 = vcmask 1047559  }
0x1712   :  { %9707 = vmax.xlane.f32.xlu1 %v15480_v58 }
0x177d   :  { %v9210_v27 = vpop.xlane.xlu1 %9209 }
0x177e   :  { %v9211_v26 = vmax.f32 %v9184_v49, %v9210_v27 }
0x1780   :  { %v9212_v60 = vsub.f32 %v17078_v32, %v9211_v26  ;;  %v9216_v15 = vrot.slane %v9211_v26, 1  ;;  %v9217_v57 = vrot.slane %v9211_v26, 2  ;;  %v9218_v8 = vrot.slane %v9211_v26, 3 }
0x1781   :  { %v9219_v28 = vrot.slane %v9211_v26, 4  ;;  %v9220_v38 = vrot.slane %v9211_v26, 5  ;;  %v9221_v5 = vrot.slane %v9211_v26, 6  ;;  %v9222_v52 = vrot.slane %v9211_v26, 7 }
0x1782   :  { %v9213_v34 = vmul.f32 1.442695, %v9212_v60  ;;  %v9231_v7 = vsub.f32 %v9175_v25, %v9211_v26  ;;  %v9232_v46 = vsub.f32 %v9176_v0, %v9216_v15  ;;  %v9233_v53 = vsub.f32 %v9177_v36, %v9217_v57 }
0x1783   :  { %v9234_v47 = vsub.f32 %v9178_v1, %v9218_v8  ;;  %v9235_v54 = vsub.f32 %v9179_v17, %v9219_v28  ;;  %v9236_v51 = vsub.f32 %v9180_v62, %v9220_v38  ;;  %v9237_v58 = vsub.f32 %v9181_v37, %v9221_v5 }
0x1784   :  { %10677 = vpow2.f32 %v9213_v34  ;;  %v9239_v9 = vmul.f32 1.442695, %v9231_v7  ;;  %v9241_v49 = vmul.f32 1.442695, %v9232_v46  ;;  %v9238_v27 = vsub.f32 %v9182_v45, %v9222_v52 }
0x1785   :  { %v9243_v32 = vmul.f32 1.442695, %v9233_v53  ;;  %v9245_v29 = vmul.f32 1.442695, %v9234_v47  ;;  %v9247_v12 = vmul.f32 1.442695, %v9235_v54 }
0x1786   :  { %10679 = vpow2.f32 %v9239_v9  ;;  %v9249_v59 = vmul.f32 1.442695, %v9236_v51  ;;  %v9251_v33 = vmul.f32 1.442695, %v9237_v58  ;;  %v9253_v25 = vmul.f32 1.442695, %v9238_v27 }
0x1787   :  { %10681 = vpow2.f32 %v9241_v49 }
0x1788   :  { %10683 = vpow2.f32 %v9243_v32 }
0x1789   :  { %10685 = vpow2.f32 %v9245_v29 }
0x178a   :  { %v15484_v0 = vpop.eup %10677  ;;  %10687 = vpow2.f32 %v9247_v12 }
0x178b   :  { %9255 = vadd.xlane.f32.xlu2 %v15484_v0  ;;  %10689 = vpow2.f32 %v9249_v59 }
0x178c   :  { %v10680_v1 = vpop.eup %10679  ;;  %10691 = vpow2.f32 %v9251_v33 }
0x178d   :  { %v10682_v36 = vpop.eup %10681  ;;  %10693 = vpow2.f32 %v9253_v25 }
0x178e   :  { %v10684_v53 = vpop.eup %10683  ;;  %v9265_v62 = vrot.slane %v10682_v36, 7 }
0x178f   :  { %v10686_v9 = vpop.eup %10685  ;;  %v9267_v46 = vrot.slane %v10684_v53, 6 }
0x1790   :  { %v10688_v37 = vpop.eup %10687  ;;  %v9266_v51 = vsel %vm17079_vm3, %v9265_v62, %v10680_v1  ;;  %v9269_v58 = vrot.slane %v10686_v9, 5  ;;  %vm17086_vm3 = vcmask 130048  }
0x1791   :  { %v10690_v29 = vpop.eup %10689  ;;  %v9268_v17 = vsel %vm17080_vm12, %v9267_v46, %v9266_v51  ;;  %v9271_v15 = vrot.slane %v10688_v37, 4  ;;  %vm17087_vm12 = vmmov %vm17086_vm3 }
0x1792   :  { %v10692_v12 = vpop.eup %10691  ;;  %v9270_v45 = vsel %vm17081_vm2, %v9269_v58, %v9268_v17  ;;  %v9273_v59 = vrot.slane %v10690_v29, 3  ;;  %vm17088_vm2 = vmmov %vm17086_vm3 }
0x1793   :  { %v10694_v26 = vpop.eup %10693  ;;  %v9272_v33 = vsel %vm17082_vm4, %v9271_v15, %v9270_v45  ;;  %v9275_v60 = vrot.slane %v10692_v12, 2  ;;  %vm17089_vm4 = vmmov %vm17088_vm2 }
0x1794   :  { %v9274_v57 = vsel %vm17083_vm0, %v9273_v59, %v9272_v33  ;;  %v9277_v8 = vrot.slane %v10694_v26, 1  ;;  %vm17090_vm0 = vmmov %vm17088_vm2 }
0x1795   :  { %v9276_v28 = vsel %vm17084_vm7, %v9275_v60, %v9274_v57  ;;  %vm17091_vm7 = vmmov %vm17090_vm0 }
0x1796   :  { %v9278_v38 = vsel %vm17085_vm1, %v9277_v8, %v9276_v28  ;;  %vm17092_vm1 = vmmov %vm17090_vm0  ;;  %v17113_v28 = vld [vmem:[#allocation97_spill] sm:$0xff] }
0x1797   :  { %v9280_v5 = vsel %vm17086_vm3, %v9278_v38, 0.0  ;;  %vm17093_vm3 = vmmov %vm17090_vm0 }
0x1798   :  { %9281 = vadd.xlane.f32.xlu0 %v9280_v5 }
0x17fe   :  { %v9256_v52 = vpop.xlane.xlu2 %9255 }
0x180b   :  { %v9282_v34 = vpop.xlane.xlu0 %9281 }
0x180c   :  { %v9283_v7 = vadd.f32 %v9282_v34, %v9256_v52  ;;  %v17114_v52 = vld [vmem:[#allocation96_spill] sm:$0xff] }
0x180e   :  { %10695 = vrcp.f32 %v9283_v7 }
0x1814   :  { %v10696_v47 = vpop.eup %10695 }
0x1815   :  { %v9285_v54 = vmul.f32 %v10696_v47, %v9283_v7  ;;  %v17115_v7 = vld [vmem:[#allocation101_spill] sm:$0xff] }
0x1817   :  { %v9286_v49 = vsub.f32 2.0, %v9285_v54  ;;  %v17116_v54 = vld [vmem:[#allocation99_spill] sm:$0xff] }
0x1819   :  { %v15495_v27 = vmul.f32 %v10696_v47, %v9286_v49 }
0x181b   :  { %v9305_v32 = vmul.f32 %v10680_v1, %v15495_v27  ;;  %v9290_v25 = vrot.slane %v15495_v27, 1  ;;  %v9291_v62 = vrot.slane %v15495_v27, 2  ;;  %v9292_v46 = vrot.slane %v15495_v27, 3 }
0x181c   :  { %v9293_v1 = vrot.slane %v15495_v27, 4 }
0x181d   :  { %10309 = vmatmul.msk.f32.vlgmr.msrb.gmra.mxu3 %vm17087_vm12, %v9305_v32  ;;  %v9306_v51 = vmul.f32 %v10682_v36, %v9290_v25  ;;  %v9307_v58 = vmul.f32 %v10684_v53, %v9291_v62  ;;  %v9308_v17 = vmul.f32 %v10686_v9, %v9292_v46  ;;  %v9294_v36 = vrot.slane %v15495_v27, 5  ;;  %vm17094_vm12 = vmmov %vm17090_vm0 }
0x181e   :  { %9553 = vmatpush.xpose.msrb.mxu3 %v14425_v2  ;;  %v9295_v2 = vrot.slane %v15495_v27, 6  ;;  %v9296_v53 = vrot.slane %v15495_v27, 7  ;;  %v9309_v9 = vmul.f32 %v10688_v37, %v9293_v1 }
0x181f   :  { %10312 = vmatmul.msk.f32.vlgmr.msrb.gmra.mxu0 %vm17088_vm2, %v9306_v51  ;;  %10315 = vmatmul.msk.f32.vlgmr.msrb.gmra.mxu1 %vm17089_vm4, %v9307_v58  ;;  %vm17107_vm2 = vcmask 1043459   ;;  %vm17108_vm4 = vcmask 1044484   ;;  %v17118_v51 = vld [vmem:[#allocation105_spill] sm:$0xff] }
0x1820   :  { %10318 = vmatmul.msk.f32.vlgmr.msra.gmra.mxu2 %vm17090_vm0, %v9308_v17  ;;  %9573 = vmatpush.xpose.msrb.mxu0 %v14438_v14  ;;  %v9310_v14 = vmul.f32 %v10690_v29, %v9294_v36  ;;  %vm17109_vm0 = vcmask 1045509   ;;  %v17119_v36 = vld [vmem:[#allocation103_spill] sm:$0xff] }
0x1821   :  { %9593 = vmatpush.xpose.msrb.mxu1 %v14452_v11  ;;  %9613 = vmatpush.xpose.msra.mxu2 %v14473_v18  ;;  %v9311_v11 = vmul.f32 %v10692_v12, %v9295_v2  ;;  %v9312_v18 = vmul.f32 %v10694_v26, %v9296_v53  ;;  %v17110_v26 = vld [vmem:[#allocation74_spill] sm:$0xff] }
0x1822   :  { %9554 = vmatpush.xpose.msrb.mxu3 %v14432_v13  ;;  %v17095_v13 = vld [vmem:[#allocation84_spill] sm:$0xff]  ;;  %v17120_v53 = vld [vmem:[#allocation102_spill] sm:$0xff] }
0x1824   :  { %9574 = vmatpush.xpose.msrb.mxu0 %v14450_v48  ;;  %v9525_v48 = vrot.slane %v17095_v13, 1 }
0x1825   :  { %9594 = vmatpush.xpose.msrb.mxu1 %v14463_v30  ;;  %9614 = vmatpush.xpose.msra.mxu2 %v14485_v24  ;;  %v9526_v30 = vrot.slane %v17095_v13, 2  ;;  %v9527_v24 = vrot.slane %v17095_v13, 3 }
0x1826   :  { %10321 = vmatmul.msk.f32.vlgmr.msra.gmra.mxu3 %vm17091_vm7, %v9309_v9  ;;  %vm17111_vm7 = vcmask 1046534  }
0x1827   :  { %9633 = vmatpush.xpose.msra.mxu3 %v14506_v50  ;;  %10324 = vmatmul.msk.f32.vlgmr.msra.gmra.mxu0 %vm17092_vm1, %v9310_v14  ;;  %v9529_v50 = vrot.slane %v17095_v13, 5  ;;  %vm17112_vm1 = vcmask 1047559  }
0x1828   :  { %10327 = vmatmul.msk.f32.vlgmr.msra.gmra.mxu1 %vm17093_vm3, %v9311_v11  ;;  %10330 = vmatmul.msk.f32.vlgmr.msrb.gmra.mxu2 %vm17094_vm12, %v9312_v18 }
0x1829   :  { %9653 = vmatpush.xpose.msra.mxu0 %v14514_v43  ;;  %9673 = vmatpush.xpose.msra.mxu1 %v14497_v56  ;;  %v9528_v56 = vrot.slane %v17095_v13, 4  ;;  %v9531_v43 = vrot.slane %v17095_v13, 7 }
0x182a   :  { %9693 = vmatpush.xpose.msrb.mxu2 %v14528_v4  ;;  %v17103_v4 = vld [vmem:[#allocation87_spill] sm:$0xff] }
0x182b   :  { %9634 = vmatpush.xpose.msra.mxu3 %v14521_v44  ;;  %v17101_v44 = vld [vmem:[#allocation85_spill] sm:$0xff] }
0x182d   :  { %9654 = vmatpush.xpose.msra.mxu0 %v16912_v10  ;;  %9674 = vmatpush.xpose.msra.mxu1 %v14510_v6  ;;  %v9530_v6 = vrot.slane %v17095_v13, 6 }
0x182e   :  { %9694 = vmatpush.xpose.msrb.mxu2 %v14537_v35  ;;  %9555 = vmatmul.f32.vlgmr.msrb.gmra.mxu3 %v17095_v13  ;;  %v17122_v13 = vld [vmem:[#allocation104_spill] sm:$0xff] }
0x182f   :  { %10332 = vmatpush.msk.msrb.mxu3 %vm14734_vm9, %v16914_v31  ;;  %9575 = vmatmul.f32.vlgmr.msrb.gmra.mxu0 %v9525_v48  ;;  %vm17097_vm9 = vnez %v16842_v40 }
0x1830   :  { %9595 = vmatmul.f32.vlgmr.msrb.gmra.mxu1 %v9526_v30  ;;  %9615 = vmatmul.f32.vlgmr.msra.gmra.mxu2 %v9527_v24 }
0x1831   :  { %10333 = vmatpush.msk.msrb.mxu3 %vm14739_vm10, %v16914_v31  ;;  %10335 = vmatpush.msk.msrb.mxu0 %vm14825_vm15, %v16914_v31  ;;  %vm17098_vm10 = vnez %v16858_v61  ;;  %vm17105_vm15 = vcmask 1041409   ;;  %v9288_v61 = vmul.f32 %v15484_v0, %v15495_v27 }
0x1832   :  { %10338 = vmatpush.msk.msrb.mxu1 %vm14729_vm8, %v16914_v31  ;;  %10341 = vmatpush.msk.msra.mxu2 %vm14747_vm11, %v16914_v31  ;;  %vm17096_vm8 = vnez %v16856_v22  ;;  %vm17099_vm11 = vnez %v16860_v20  ;;  %vm17117_vm3 = vmmov %vm17105_vm15 }
0x1833   :  { %10336 = vmatpush.msk.msrb.mxu0 %vm16918_vm6, %v16914_v31  ;;  %vm17106_vm6 = vcmask 1042434   ;;  %v9497_v33 = vadd.f32 %v9288_v61, %v17110_v26 }
0x1834   :  { %10339 = vmatpush.msk.msrb.mxu1 %vm14793_vm13, %v16914_v31  ;;  %10342 = vmatpush.msk.msra.mxu2 %vm14813_vm14, %v16914_v31  ;;  %vm17102_vm13 = vnez %v17101_v44  ;;  %vm17104_vm14 = vnez %v17103_v4  ;;  %vm17121_vm12 = vmmov %vm17106_vm6 }
0x1836   :  { %9635 = vmatmul.f32.vlgmr.msra.gmra.mxu3 %v9528_v56 }
0x1837   :  { %10344 = vmatpush.msk.msra.mxu3 %vm14850_vm5, %v16914_v31  ;;  %9655 = vmatmul.f32.vlgmr.msra.gmra.mxu0 %v9529_v50  ;;  %vm17100_vm5 = vnez %v16854_v23 }
0x1838   :  { %9675 = vmatmul.f32.vlgmr.msra.gmra.mxu1 %v9530_v6  ;;  %9695 = vmatmul.f32.vlgmr.msrb.gmra.mxu2 %v9531_v43 }
0x1839   :  { %10345 = vmatpush.msk.msra.mxu3 %vm17096_vm8, %v16914_v31  ;;  %10347 = vmatpush.msk.msra.mxu0 %vm17097_vm9, %v16914_v31  ;;  %vm17123_vm8 = vmmov %vm17107_vm2 }
0x183a   :  { %10350 = vmatpush.msk.msra.mxu1 %vm17098_vm10, %v16914_v31  ;;  %10353 = vmatpush.msk.msrb.mxu2 %vm17099_vm11, %v16914_v31  ;;  %vm17124_vm9 = vmmov %vm17108_vm4 }
0x183b   :  { %10348 = vmatpush.msk.msra.mxu0 %vm17100_vm5, %v16914_v31  ;;  %vm17125_vm10 = vmmov %vm17109_vm0 }
0x183c   :  { %10351 = vmatpush.msk.msra.mxu1 %vm17102_vm13, %v16914_v31  ;;  %10354 = vmatpush.msk.msrb.mxu2 %vm17104_vm14, %v16914_v31  ;;  %vm17126_vm11 = vmmov %vm17111_vm7  ;;  %vm17128_vm13 = vcmask 130048  }
0x183d   :  { %vm17127_vm5 = vmmov %vm17112_vm1 }
0x183e   :  { %vm17130_vm14 = vmmov %vm17117_vm3 }
0x189c   :  { %v9356_v35 = vpop.f32.mrf.mxu0  ;;  %v9379_v41 = vpop.f32.mrf.mxu1 }
0x189d   :  { %v9506_v40 = vrot.slane %v9356_v35, 7  ;;  %v9508_v55 = vrot.slane %v9379_v41, 6  ;;  %v9708_v41 = vpop.xlane.xlu1 %9707 }
0x18a0   :  { %v9333_v39 = vpop.f32.mrf.mxu3 }
0x18a1   :  { %v9507_v19 = vsel %vm17105_vm15, %v9506_v40, %v9333_v39  ;;  %vm17131_vm15 = vmmov %vm17106_vm6 }
0x18a2   :  { %v9509_v23 = vsel %vm17106_vm6, %v9508_v55, %v9507_v19  ;;  %vm17132_vm6 = vmmov %vm17107_vm2 }
0x18a3   :  { %v9402_v63 = vpop.f32.mrf.mxu2 }
0x18a4   :  { %v9448_v21 = vpop.f32.mrf.mxu0  ;;  %v9510_v16 = vrot.slane %v9402_v63, 5 }
0x18a5   :  { %v9471_v42 = vpop.f32.mrf.mxu1  ;;  %v9514_v10 = vrot.slane %v9448_v21, 3  ;;  %v17129_v21 = vld [vmem:[#allocation77_spill] sm:$0xff] }
0x18a6   :  { %v9511_v20 = vsel %vm17107_vm2, %v9510_v16, %v9509_v23  ;;  %v9516_v37 = vrot.slane %v9471_v42, 2  ;;  %vm17133_vm2 = vmmov %vm17108_vm4 }
0x18a9   :  { %v9425_v3 = vpop.f32.mrf.mxu3 }
0x18aa   :  { %v9512_v22 = vrot.slane %v9425_v3, 4 }
0x18ab   :  { %v9494_v31 = vpop.f32.mrf.mxu2 }
0x18ac   :  { %v9513_v29 = vsel %vm17108_vm4, %v9512_v22, %v9511_v20  ;;  %v9518_v15 = vrot.slane %v9494_v31, 1  ;;  %v9576_v12 = vpop.f32.mrf.mxu0  ;;  %vm17134_vm4 = vmmov %vm17109_vm0 }
0x18ad   :  { %v9515_v45 = vsel %vm17109_vm0, %v9514_v10, %v9513_v29  ;;  %v9596_v59 = vpop.f32.mrf.mxu1  ;;  %v9700_v38 = vadd.f32 %v9576_v12, %v17113_v28  ;;  %vm17135_vm0 = vmmov %vm17111_vm7 }
0x18ae   :  { %v9517_v60 = vsel %vm17111_vm7, %v9516_v37, %v9515_v45  ;;  %v9701_v49 = vadd.f32 %v9596_v59, %v17116_v54  ;;  %vm17136_vm7 = vmmov %vm17112_vm1 }
0x18af   :  { %v9519_v57 = vsel %vm17112_vm1, %v9518_v15, %v9517_v60  ;;  %v9717_v32 = vrot.slane %v9700_v38, 7  ;;  %vm17137_vm1 = vmmov %vm17128_vm13 }
0x18b0   :  { %v9521_v8 = vadd.f32 %v9519_v57, %v9497_v33  ;;  %v9719_v1 = vrot.slane %v9701_v49, 6 }
0x18b1   :  { %v9556_v0 = vpop.f32.mrf.mxu3 }
0x18b2   :  { %10331 = vst [vmem:[%s16889_s27 + $0x20] sm:$0xff] %v9521_v8  ;;  %v9699_v34 = vadd.f32 %v9556_v0, %v17114_v52 }
0x18b3   :  { %v9616_v5 = vpop.f32.mrf.mxu2 }
0x18b4   :  { %v9702_v47 = vadd.f32 %v9616_v5, %v17115_v7  ;;  %v9656_v27 = vpop.f32.mrf.mxu0  ;;  %v9718_v62 = vsel %vm17117_vm3, %v9717_v32, %v9699_v34  ;;  %vm17138_vm3 = vmmov %vm17137_vm1 }
0x18b5   :  { %v9676_v25 = vpop.f32.mrf.mxu1  ;;  %v9704_v58 = vadd.f32 %v9656_v27, %v17118_v51  ;;  %v9720_v11 = vsel %vm17121_vm12, %v9719_v1, %v9718_v62  ;;  %vm17139_vm12 = vmmov %vm17137_vm1 }
0x18b6   :  { %v9721_v46 = vrot.slane %v9702_v47, 5  ;;  %v9705_v2 = vadd.f32 %v9676_v25, %v17119_v36 }
0x18b7   :  { %v9725_v24 = vrot.slane %v9704_v58, 3 }
0x18b8   :  { %v9722_v30 = vsel %vm17123_vm8, %v9721_v46, %v9720_v11  ;;  %v9727_v56 = vrot.slane %v9705_v2, 2  ;;  %vm17140_vm8 = vmmov %vm17137_vm1 }
0x18b9   :  { %v9636_v17 = vpop.f32.mrf.mxu3 }
0x18ba   :  { %v9703_v9 = vadd.f32 %v9636_v17, %v17120_v53 }
0x18bb   :  { %v9696_v14 = vpop.f32.mrf.mxu2 }
0x18bc   :  { %v9723_v18 = vrot.slane %v9703_v9, 4  ;;  %v9706_v48 = vadd.f32 %v9696_v14, %v17122_v13 }
0x18be   :  { %v9724_v50 = vsel %vm17124_vm9, %v9723_v18, %v9722_v30  ;;  %v9729_v6 = vrot.slane %v9706_v48, 1  ;;  %vm17141_vm9 = vmmov %vm17137_vm1 }
0x18bf   :  { %v9726_v43 = vsel %vm17125_vm10, %v9725_v24, %v9724_v50  ;;  %vm17142_vm10 = vmmov %vm17137_vm1 }
0x18c0   :  { %v9728_v44 = vsel %vm17126_vm11, %v9727_v56, %v9726_v43  ;;  %vm17143_vm11 = vmmov %vm17137_vm1 }
0x18c1   :  { %v9730_v4 = vsel %vm17127_vm5, %v9729_v6, %v9728_v44  ;;  %vm17144_vm5 = vmmov %vm17137_vm1 }
0x18c2   :  { %v9732_v35 = vsel %vm17128_vm13, %v9730_v4, -inf  ;;  %vm17145_vm13 = vmmov %vm17137_vm1 }
0x18c3   :  { %9733 = vmax.xlane.f32.xlu2 %v9732_v35 }
0x1936   :  { %v9734_v39 = vpop.xlane.xlu2 %9733 }
0x1937   :  { %v9735_v63 = vmax.f32 %v9708_v41, %v9734_v39 }
0x1939   :  { %v9736_v40 = vsub.f32 %v17129_v21, %v9735_v63  ;;  %v9740_v42 = vrot.slane %v9735_v63, 1  ;;  %v9741_v19 = vrot.slane %v9735_v63, 2  ;;  %v9742_v16 = vrot.slane %v9735_v63, 3 }
0x193a   :  { %v9743_v55 = vrot.slane %v9735_v63, 4  ;;  %v9744_v3 = vrot.slane %v9735_v63, 5  ;;  %v9745_v23 = vrot.slane %v9735_v63, 6  ;;  %v9746_v22 = vrot.slane %v9735_v63, 7 }
0x193b   :  { %v9737_v61 = vmul.f32 1.442695, %v9736_v40  ;;  %v9755_v20 = vsub.f32 %v9699_v34, %v9735_v63  ;;  %v9756_v10 = vsub.f32 %v9700_v38, %v9740_v42  ;;  %v9757_v31 = vsub.f32 %v9701_v49, %v9741_v19 }
0x193c   :  { %v9758_v37 = vsub.f32 %v9702_v47, %v9742_v16  ;;  %v9759_v29 = vsub.f32 %v9703_v9, %v9743_v55  ;;  %v9760_v15 = vsub.f32 %v9704_v58, %v9744_v3  ;;  %v9761_v12 = vsub.f32 %v9705_v2, %v9745_v23 }
0x193d   :  { %10697 = vpow2.f32 %v9737_v61  ;;  %v9763_v45 = vmul.f32 1.442695, %v9755_v20  ;;  %v9765_v59 = vmul.f32 1.442695, %v9756_v10  ;;  %v9762_v33 = vsub.f32 %v9706_v48, %v9746_v22 }
0x193e   :  { %v9767_v60 = vmul.f32 1.442695, %v9757_v31  ;;  %v9769_v57 = vmul.f32 1.442695, %v9758_v37  ;;  %v9771_v8 = vmul.f32 1.442695, %v9759_v29 }
0x193f   :  { %10699 = vpow2.f32 %v9763_v45  ;;  %v9773_v0 = vmul.f32 1.442695, %v9760_v15  ;;  %v9775_v28 = vmul.f32 1.442695, %v9761_v12  ;;  %v9777_v5 = vmul.f32 1.442695, %v9762_v33 }
0x1940   :  { %10701 = vpow2.f32 %v9765_v59 }
0x1941   :  { %10703 = vpow2.f32 %v9767_v60 }
0x1942   :  { %10705 = vpow2.f32 %v9769_v57 }
0x1943   :  { %v15615_v38 = vpop.eup %10697  ;;  %10707 = vpow2.f32 %v9771_v8 }
0x1944   :  { %9779 = vadd.xlane.f32.xlu0 %v15615_v38  ;;  %10709 = vpow2.f32 %v9773_v0 }
0x1945   :  { %v10700_v52 = vpop.eup %10699  ;;  %10711 = vpow2.f32 %v9775_v28 }
0x1946   :  { %v10702_v34 = vpop.eup %10701  ;;  %10713 = vpow2.f32 %v9777_v5 }
0x1947   :  { %v10704_v7 = vpop.eup %10703  ;;  %v9789_v47 = vrot.slane %v10702_v34, 7 }
0x1948   :  { %v10706_v54 = vpop.eup %10705  ;;  %v9791_v49 = vrot.slane %v10704_v7, 6 }
0x1949   :  { %v10708_v27 = vpop.eup %10707  ;;  %v9790_v32 = vsel %vm17130_vm14, %v9789_v47, %v10700_v52  ;;  %v9793_v25 = vrot.slane %v10706_v54, 5 }
0x194a   :  { %v10710_v62 = vpop.eup %10709  ;;  %v9792_v46 = vsel %vm17131_vm15, %v9791_v49, %v9790_v32  ;;  %v9795_v51 = vrot.slane %v10708_v27, 4 }
0x194b   :  { %v10712_v58 = vpop.eup %10711  ;;  %v9794_v17 = vsel %vm17132_vm6, %v9793_v25, %v9792_v46  ;;  %v9797_v1 = vrot.slane %v10710_v62, 3 }
0x194c   :  { %v10714_v36 = vpop.eup %10713  ;;  %v9796_v2 = vsel %vm17133_vm2, %v9795_v51, %v9794_v17  ;;  %v9799_v53 = vrot.slane %v10712_v58, 2 }
0x194d   :  { %v9798_v9 = vsel %vm17134_vm4, %v9797_v1, %v9796_v2  ;;  %v9801_v14 = vrot.slane %v10714_v36, 1 }
0x194e   :  { %v9800_v11 = vsel %vm17135_vm0, %v9799_v53, %v9798_v9 }
0x194f   :  { %v9802_v18 = vsel %vm17136_vm7, %v9801_v14, %v9800_v11 }
0x1950   :  { %v9804_v13 = vsel %vm17137_vm1, %v9802_v18, 0.0 }
0x1951   :  { %9805 = vadd.xlane.f32.xlu1 %v9804_v13 }
0x19b7   :  { %v9780_v48 = vpop.xlane.xlu0 %9779 }
0x19c4   :  { %v9806_v30 = vpop.xlane.xlu1 %9805 }
0x19c5   :  { %v9807_v24 = vadd.f32 %v9806_v30, %v9780_v48 }
0x19c7   :  { %10715 = vrcp.f32 %v9807_v24 }
0x19cd   :  { %v10716_v56 = vpop.eup %10715 }
0x19ce   :  { %v9809_v50 = vmul.f32 %v10716_v56, %v9807_v24 }
0x19d0   :  { %v9810_v6 = vsub.f32 2.0, %v9809_v50 }
0x19d2   :  { %v9811_v43 = vmul.f32 %v10716_v56, %v9810_v6 }
0x19d4   :  { %v9829_v44 = vmul.f32 %v10700_v52, %v9811_v43  ;;  %v9814_v4 = vrot.slane %v9811_v43, 1  ;;  %v9815_v35 = vrot.slane %v9811_v43, 2  ;;  %v9816_v41 = vrot.slane %v9811_v43, 3 }
0x19d5   :  { %v9817_v40 = vrot.slane %v9811_v43, 4  ;;  %v9818_v42 = vrot.slane %v9811_v43, 5  ;;  %v9819_v19 = vrot.slane %v9811_v43, 6  ;;  %v9820_v16 = vrot.slane %v9811_v43, 7 }
0x19d6   :  { %10334 = vmatmul.msk.f32.vlgmr.msrb.gmra.mxu3 %vm17138_vm3, %v9829_v44  ;;  %v9830_v39 = vmul.f32 %v10702_v34, %v9814_v4  ;;  %v9831_v63 = vmul.f32 %v10704_v7, %v9815_v35  ;;  %v9832_v21 = vmul.f32 %v10706_v54, %v9816_v41  ;;  %v9812_v8 = vmul.f32 %v15615_v38, %v9811_v43 }
0x19d7   :  { %v9833_v55 = vmul.f32 %v10708_v27, %v9817_v40  ;;  %v9834_v3 = vmul.f32 %v10710_v62, %v9818_v42  ;;  %v9835_v23 = vmul.f32 %v10712_v58, %v9819_v19  ;;  %v9836_v22 = vmul.f32 %v10714_v36, %v9820_v16 }
0x19d8   :  { %10337 = vmatmul.msk.f32.vlgmr.msrb.gmra.mxu0 %vm17139_vm12, %v9830_v39  ;;  %10340 = vmatmul.msk.f32.vlgmr.msrb.gmra.mxu1 %vm17140_vm8, %v9831_v63  ;;  %v10021_v54 = vadd.f32 %v9812_v8, %v17110_v26 }
0x19d9   :  { %10343 = vmatmul.msk.f32.vlgmr.msra.gmra.mxu2 %vm17141_vm9, %v9832_v21 }
0x19de   :  { %10346 = vmatmul.msk.f32.vlgmr.msra.gmra.mxu3 %vm17142_vm10, %v9833_v55 }
0x19e0   :  { %10349 = vmatmul.msk.f32.vlgmr.msra.gmra.mxu0 %vm17143_vm11, %v9834_v3  ;;  %10352 = vmatmul.msk.f32.vlgmr.msra.gmra.mxu1 %vm17144_vm5, %v9835_v23 }
0x19e1   :  { %10355 = vmatmul.msk.f32.vlgmr.msrb.gmra.mxu2 %vm17145_vm13, %v9836_v22 }
0x1a55   :  { %v9880_v61 = vpop.f32.mrf.mxu0  ;;  %v9903_v20 = vpop.f32.mrf.mxu1 }
0x1a56   :  { %v10030_v37 = vrot.slane %v9880_v61, 7  ;;  %v10032_v12 = vrot.slane %v9903_v20, 6 }
0x1a59   :  { %v9857_v10 = vpop.f32.mrf.mxu3 }
0x1a5a   :  { %v10031_v29 = vsel %vm17130_vm14, %v10030_v37, %v9857_v10 }
0x1a5b   :  { %v10033_v60 = vsel %vm17131_vm15, %v10032_v12, %v10031_v29 }
0x1a5c   :  { %v9926_v31 = vpop.f32.mrf.mxu2 }
0x1a5d   :  { %v10034_v15 = vrot.slane %v9926_v31, 5  ;;  %v9972_v45 = vpop.f32.mrf.mxu0  ;;  %v9995_v59 = vpop.f32.mrf.mxu1 }
0x1a5e   :  { %v10038_v28 = vrot.slane %v9972_v45, 3  ;;  %v10040_v5 = vrot.slane %v9995_v59, 2 }
0x1a5f   :  { %v10035_v0 = vsel %vm17132_vm6, %v10034_v15, %v10033_v60 }
0x1a61   :  { %v9949_v33 = vpop.f32.mrf.mxu3 }
0x1a62   :  { %v10036_v57 = vrot.slane %v9949_v33, 4 }
0x1a64   :  { %v10037_v52 = vsel %vm17133_vm2, %v10036_v57, %v10035_v0  ;;  %v10018_v34 = vpop.f32.mrf.mxu2 }
0x1a65   :  { %v10039_v7 = vsel %vm17134_vm4, %v10038_v28, %v10037_v52  ;;  %v10042_v47 = vrot.slane %v10018_v34, 1 }
0x1a66   :  { %v10041_v49 = vsel %vm17135_vm0, %v10040_v5, %v10039_v7 }
0x1a67   :  { %v10043_v27 = vsel %vm17136_vm7, %v10042_v47, %v10041_v49 }
0x1a68   :  { %v10045_v32 = vadd.f32 %v10043_v27, %v10021_v54 }
0x1a6a   :  { %10356 = vst [vmem:[%s16889_s27 + $0x28] sm:$0xff] %v10045_v32 }
0x1a6b   :  { %10052 = vsyncpa [#allocation4], 1 }
0x1a6c   :  { %10053 = vsyncpa [#allocation6], 1 }
0x1a6d   :  { %10054 = vsyncpa [#allocation9], 1 }

</bundles_post_ra>
